<compile_context>
chip_gen: v5e
topology: v5e:2x2
jax: 0.10.0
libtpu: 0.0.40
codegen_flags: <defaults>
</compile_context>

<pallas_src>
import math

import jax
import jax.numpy as jnp
from jax.experimental import pallas as pl
from jax.experimental.pallas import tpu as pltpu

D_MODEL = 384                     # module default d_model (384 = 3 * 128 lanes)
NUM_HEADS = 4
HEAD_DIM = D_MODEL // NUM_HEADS   # 96 (not lane aligned)
HEAD_PAD = 128                    # padded per-head lane slab
D_PAD = NUM_HEADS * HEAD_PAD      # 512


def _mhca_kernel(q_ref, kv_ref, wq_ref, wk_ref, wv_ref, bin_ref, wo_ref,
                 bout_ref, out_ref):
    """One grid step = one (Bt, Lq, D) query block vs its (Bt, Lkv, D) kv block.

    q_ref/kv_ref: bf16 activations.  wq/wk/wv: bf16 (D, D_PAD) head-padded fused
    projection weights (softmax scale already folded into wq).  bin_ref: f32
    (3, D_PAD) padded q/k/v biases.  wo_ref: bf16 (D_PAD, D) head-padded
    out-projection weight.  bout_ref: f32 (1, D) out-projection bias.
    """
    Bt, Lq, D = q_ref.shape
    Lkv = kv_ref.shape[1]
    DP = wq_ref.shape[1]                       # NUM_HEADS * HEAD_PAD

    # Flatten batch into matmul rows (pure leading-dim merge; Lq/Lkv are
    # multiples of the bf16 sublane tile, guaranteed by the wrapper for Lq).
    q2 = q_ref[...].reshape(Bt * Lq, D)        # bf16 (rows_q, D)
    kv2 = kv_ref[...].reshape(Bt * Lkv, D)     # bf16 (rows_kv, D)
    b_in = bin_ref[...]                        # f32 (3, DP)

    # Fused input projections into head-padded space: bf16 operands, f32 acc.
    qp = jnp.dot(q2, wq_ref[...], preferred_element_type=jnp.float32) + b_in[0:1]
    kp = jnp.dot(kv2, wk_ref[...], preferred_element_type=jnp.float32) + b_in[1:2]
    vp = jnp.dot(kv2, wv_ref[...], preferred_element_type=jnp.float32) + b_in[2:3]

    # bf16 MXU operands for the attention matmuls (f32 accumulation below).
    qp3 = qp.reshape(Bt, Lq, DP).astype(jnp.bfloat16)
    kp3 = kp.reshape(Bt, Lkv, DP).astype(jnp.bfloat16)
    vp3 = vp.reshape(Bt, Lkv, DP).astype(jnp.bfloat16)

    # Per-head attention.  Slices are 128-lane aligned (no XLU relayout); the
    # 32 zero-padded lanes per head contribute exactly 0 to scores and outputs.
    head_outs = []
    for h in range(NUM_HEADS):                 # static, unrolled
        sl = slice(h * HEAD_PAD, (h + 1) * HEAD_PAD)
        qh = qp3[:, :, sl]                     # (Bt, Lq, 128), pre-scaled
        kh = kp3[:, :, sl]                     # (Bt, Lkv, 128)
        vh = vp3[:, :, sl]                     # (Bt, Lkv, 128)

        s = jnp.einsum("bqd,bkd->bqk", qh, kh,
                       preferred_element_type=jnp.float32)      # (Bt, Lq, Lkv)
        s = s - jnp.max(s, axis=-1, keepdims=True)
        p = jnp.exp(s)
        denom = jnp.sum(p, axis=-1, keepdims=True)
        p = p * pl.reciprocal(denom, approx=True)   # EUP reciprocal, not a divide
        # TODO(synk): attention-probability dropout skipped (eval-mode semantics).

        head_outs.append(jnp.einsum("bqk,bkd->bqd", p.astype(jnp.bfloat16), vh,
                                    preferred_element_type=jnp.float32))

    # Lane-aligned concat of the (Bt, Lq, 128) head outputs -> one out-proj matmul.
    heads = jnp.concatenate(head_outs, axis=-1)          # (Bt, Lq, DP)
    heads2 = heads.reshape(Bt * Lq, DP).astype(jnp.bfloat16)
    out = jnp.dot(heads2, wo_ref[...],
                  preferred_element_type=jnp.float32) + bout_ref[...]
    out_ref[...] = out.reshape(Bt, Lq, D).astype(out_ref.dtype)


def multi_head_cross_attention(q_tensors, kv_tensors, params, *, block_b=None):
    """q_tensors: (B, Lq, D), kv_tensors: (B, Lkv, D). Returns (B, Lq, D)."""
    B, Lq_in, D = q_tensors.shape
    _, Lkv, _ = kv_tensors.shape
    assert D == D_MODEL
    out_dtype = q_tensors.dtype

    # Batch blocking.  Default: the whole batch in ONE grid step (fewest grid
    # steps; best on the single-TensorCore v5e/v6e).  On v7x (2 TensorCores)
    # pass block_b = B // 2 so both cores get work under "parallel" semantics.
    if block_b is None:
        block_b = B
    assert B % block_b == 0

    # Pad Lq up to a multiple of 16 (bf16 sublane tile) so the in-kernel
    # reshapes are pure leading-dim merges; padded query rows are discarded.
    pad_q = (-Lq_in) % 16
    if pad_q:
        q_tensors = jnp.pad(q_tensors, ((0, 0), (0, pad_q), (0, 0)))
    Lq = Lq_in + pad_q
    # TODO(synk): Lkv is not padded (would need an additive key mask); pass Lkv
    # as a multiple of 16 to avoid in-kernel relayout copies.

    W_q, W_k, W_v = params["W_q"], params["W_k"], params["W_v"]
    in_w, in_b = params["in_proj_weight"], params["in_proj_bias"]
    Wq_in, Wk_in, Wv_in = in_w[:D], in_w[D:2 * D], in_w[2 * D:]
    bq, bk, bv = in_b[:D], in_b[D:2 * D], in_b[2 * D:]
    W_out, b_out = params["out_proj_weight"], params["out_proj_bias"]

    scale = 1.0 / math.sqrt(HEAD_DIM)
    # Fuse the outer Linear with the MHA in_proj:
    #   (x @ W_q.T) @ Wq_in.T + bq == x @ (Wq_in @ W_q).T + bq
    # and fold the 1/sqrt(head_dim) softmax scale into the q weight + bias.
    wq_comb = (Wq_in @ W_q).T * scale      # (D, D), right-multiply form
    wk_comb = (Wk_in @ W_k).T
    wv_comb = (Wv_in @ W_v).T

    pad_w = HEAD_PAD - HEAD_DIM            # 32 zero lanes per head

    def pad_head_cols(w):                  # (D, NH*96) -> (D, NH*128), zero pad
        w3 = w.reshape(D, NUM_HEADS, HEAD_DIM)
        w3 = jnp.pad(w3, ((0, 0), (0, 0), (0, pad_w)))
        return w3.reshape(D, D_PAD)

    def pad_head_rows(w):                  # (NH*96, D) -> (NH*128, D), zero pad
        w3 = w.reshape(NUM_HEADS, HEAD_DIM, D)
        w3 = jnp.pad(w3, ((0, 0), (0, pad_w), (0, 0)))
        return w3.reshape(D_PAD, D)

    def pad_head_vec(b):                   # (NH*96,) -> (NH*128,), zero pad
        b2 = b.reshape(NUM_HEADS, HEAD_DIM)
        b2 = jnp.pad(b2, ((0, 0), (0, pad_w)))
        return b2.reshape(D_PAD)

    # bf16 MXU operands; biases stay f32 (added to f32 accumulators).
    wq_p = pad_head_cols(wq_comb).astype(jnp.bfloat16)          # (384, 512)
    wk_p = pad_head_cols(wk_comb).astype(jnp.bfloat16)
    wv_p = pad_head_cols(wv_comb).astype(jnp.bfloat16)
    wo_p = pad_head_rows(W_out.T).astype(jnp.bfloat16)          # (512, 384)
    b_in = jnp.stack([pad_head_vec(bq * scale), pad_head_vec(bk),
                      pad_head_vec(bv)], axis=0).astype(jnp.float32)   # (3, 512)
    b_out2 = b_out.reshape(1, D).astype(jnp.float32)            # (1, 384)

    q_bf = q_tensors.astype(jnp.bfloat16)
    kv_bf = kv_tensors.astype(jnp.bfloat16)

    grid = (B // block_b,)

    # Advisory cost estimate (helps XLA overlap this weight-DMA-latency-bound
    # call with surrounding ops on v5e/v6e).
    rows_q, rows_kv = B * Lq, B * Lkv
    flops = int(
        2 * rows_q * D * D_PAD                       # q projection
        + 2 * 2 * rows_kv * D * D_PAD                # k, v projections
        + NUM_HEADS * 4 * B * Lq * Lkv * HEAD_PAD    # QK^T + PV
        + 2 * rows_q * D_PAD * D)                    # out projection
    transcendentals = int(NUM_HEADS * B * Lq * Lkv)  # exp
    bytes_accessed = int(
        (rows_q + rows_kv) * D * 2                   # bf16 activations in
        + (3 * D * D_PAD + D_PAD * D) * 2            # bf16 weights
        + (3 * D_PAD + D) * 4                        # f32 biases
        + rows_q * D * jnp.dtype(out_dtype).itemsize)  # output

    full2d = lambda shape: pl.BlockSpec(shape, lambda i: (0, 0))

    out = pl.pallas_call(
        _mhca_kernel,
        out_shape=jax.ShapeDtypeStruct((B, Lq, D), out_dtype),
        grid_spec=pltpu.PrefetchScalarGridSpec(
            num_scalar_prefetch=0,
            grid=grid,
            in_specs=[
                pl.BlockSpec((block_b, Lq, D), lambda i: (i, 0, 0)),
                pl.BlockSpec((block_b, Lkv, D), lambda i: (i, 0, 0)),
                full2d((D, D_PAD)),       # wq (fused, scaled, head-padded)
                full2d((D, D_PAD)),       # wk
                full2d((D, D_PAD)),       # wv
                full2d((3, D_PAD)),       # q/k/v biases
                full2d((D_PAD, D)),       # wo (head-padded rows)
                full2d((1, D)),           # out bias
            ],
            out_specs=pl.BlockSpec((block_b, Lq, D), lambda i: (i, 0, 0)),
        ),
        compiler_params=pltpu.CompilerParams(
            dimension_semantics=("parallel",),
            vmem_limit_bytes=32 * 1024 * 1024),
        cost_estimate=pl.CostEstimate(flops=flops,
                                      transcendentals=transcendentals,
                                      bytes_accessed=bytes_accessed),
    )(q_bf, kv_bf, wq_p, wk_p, wv_p, b_in, wo_p, b_out2)

    if pad_q:
        out = out[:, :Lq_in, :]
    return out


def _reference(q, kv, params):
    """Pure-JAX f32 reference mirroring the PyTorch eval-mode forward."""
    D = D_MODEL
    W_q, W_k, W_v = params["W_q"], params["W_k"], params["W_v"]
    in_w, in_b = params["in_proj_weight"], params["in_proj_bias"]
    W_out, b_out = params["out_proj_weight"], params["out_proj_bias"]

    Q = q @ W_q.T
    K = kv @ W_k.T
    V = kv @ W_v.T
    qp = Q @ in_w[:D].T + in_b[:D]
    kp = K @ in_w[D:2 * D].T + in_b[D:2 * D]
    vp = V @ in_w[2 * D:].T + in_b[2 * D:]

    B, Lq, _ = qp.shape
    Lkv = kp.shape[1]
    qh = qp.reshape(B, Lq, NUM_HEADS, HEAD_DIM).transpose(0, 2, 1, 3)
    kh = kp.reshape(B, Lkv, NUM_HEADS, HEAD_DIM).transpose(0, 2, 1, 3)
    vh = vp.reshape(B, Lkv, NUM_HEADS, HEAD_DIM).transpose(0, 2, 1, 3)
    s = jnp.einsum("bhqd,bhkd->bhqk", qh, kh) / math.sqrt(HEAD_DIM)
    p = jax.nn.softmax(s, axis=-1)
    o = jnp.einsum("bhqk,bhkd->bhqd", p, vh)
    o = o.transpose(0, 2, 1, 3).reshape(B, Lq, D)
    return o @ W_out.T + b_out


def _init_params(key):
    keys = jax.random.split(key, 6)
    scale = 0.02
    return {
        "W_q": scale * jax.random.normal(keys[0], (D_MODEL, D_MODEL), jnp.float32),
        "W_k": scale * jax.random.normal(keys[1], (D_MODEL, D_MODEL), jnp.float32),
        "W_v": scale * jax.random.normal(keys[2], (D_MODEL, D_MODEL), jnp.float32),
        "in_proj_weight": scale * jax.random.normal(keys[3], (3 * D_MODEL, D_MODEL), jnp.float32),
        "in_proj_bias": jnp.zeros((3 * D_MODEL,), jnp.float32) + 0.01,
        "out_proj_weight": scale * jax.random.normal(keys[4], (D_MODEL, D_MODEL), jnp.float32),
        "out_proj_bias": jnp.zeros((D_MODEL,), jnp.float32) + 0.02,
    }


if __name__ == "__main__":
    key = jax.random.PRNGKey(0)
    k_par, k_q, k_kv = jax.random.split(key, 3)
    params = _init_params(k_par)

    # Small but MXU-row-filling demo: B*Lq = 128 query rows, B*Lkv = 256 kv rows.
    B, Lq, Lkv = 8, 16, 32
    q_tensors = jax.random.normal(k_q, (B, Lq, D_MODEL), jnp.float32)
    kv_tensors = jax.random.normal(k_kv, (B, Lkv, D_MODEL), jnp.float32)

    out = multi_head_cross_attention(q_tensors, kv_tensors, params)
    out = jax.block_until_ready(out)

    ref = _reference(q_tensors, kv_tensors, params)
    assert out.shape == (B, Lq, D_MODEL)
    max_err = float(jnp.max(jnp.abs(out - ref)))
    # bf16 MXU operands with f32 accumulation -> allow ~1e-3-level deviation
    # from the all-f32 reference.
    assert jnp.allclose(out, ref, atol=5e-3, rtol=5e-3), (
        "mismatch vs reference, max abs err = %g" % max_err)

    print("KERNEL_OK")
</pallas_src>

<mosaic_0001>
module attributes {stable_mosaic.version = 11 : i64} {
  func.func @_mhca_kernel(%arg0: i32, %arg1: memref<8x16x384xbf16, #tpu.memory_space<vmem>>, %arg2: memref<8x32x384xbf16, #tpu.memory_space<vmem>>, %arg3: memref<384x512xbf16, #tpu.memory_space<vmem>>, %arg4: memref<384x512xbf16, #tpu.memory_space<vmem>>, %arg5: memref<384x512xbf16, #tpu.memory_space<vmem>>, %arg6: memref<3x512xf32, #tpu.memory_space<vmem>>, %arg7: memref<512x384xbf16, #tpu.memory_space<vmem>>, %arg8: memref<1x384xf32, #tpu.memory_space<vmem>>, %arg9: memref<8x16x384xf32, #tpu.memory_space<vmem>>) attributes {dimension_semantics = [#tpu.dimension_semantics<parallel>], iteration_bounds = array<i64: 1>, scalar_prefetch = 0 : i64, scratch_operands = 0 : i64, tpu.core_type = #tpu.core_type<tc>, window_params = [{transform_indices = @transform_0, window_bounds = array<i64: 8, 16, 384>}, {transform_indices = @transform_1, window_bounds = array<i64: 8, 32, 384>}, {pipeline_mode = #tpu.pipeline_mode<synchronous>, transform_indices = @transform_2, window_bounds = array<i64: 384, 512>}, {pipeline_mode = #tpu.pipeline_mode<synchronous>, transform_indices = @transform_3, window_bounds = array<i64: 384, 512>}, {pipeline_mode = #tpu.pipeline_mode<synchronous>, transform_indices = @transform_4, window_bounds = array<i64: 384, 512>}, {pipeline_mode = #tpu.pipeline_mode<synchronous>, transform_indices = @transform_5, window_bounds = array<i64: 3, 512>}, {pipeline_mode = #tpu.pipeline_mode<synchronous>, transform_indices = @transform_6, window_bounds = array<i64: 512, 384>}, {pipeline_mode = #tpu.pipeline_mode<synchronous>, transform_indices = @transform_7, window_bounds = array<i64: 1, 384>}, {transform_indices = @transform_8, window_bounds = array<i64: 8, 16, 384>}]} {
    %c0 = arith.constant 0 : index
    %c0_0 = arith.constant 0 : index
    %c0_1 = arith.constant 0 : index
    %0 = vector.load %arg1[%c0, %c0_0, %c0_1] : memref<8x16x384xbf16, #tpu.memory_space<vmem>>, vector<8x16x384xbf16>
    %1 = vector.shape_cast %0 : vector<8x16x384xbf16> to vector<128x384xbf16>
    %c0_2 = arith.constant 0 : index
    %c0_3 = arith.constant 0 : index
    %c0_4 = arith.constant 0 : index
    %2 = vector.load %arg2[%c0_2, %c0_3, %c0_4] : memref<8x32x384xbf16, #tpu.memory_space<vmem>>, vector<8x32x384xbf16>
    %3 = vector.shape_cast %2 : vector<8x32x384xbf16> to vector<256x384xbf16>
    %c0_5 = arith.constant 0 : index
    %c0_6 = arith.constant 0 : index
    %4 = vector.load %arg6[%c0_5, %c0_6] : memref<3x512xf32, #tpu.memory_space<vmem>>, vector<3x512xf32>
    %c0_7 = arith.constant 0 : index
    %c0_8 = arith.constant 0 : index
    %5 = vector.load %arg3[%c0_7, %c0_8] : memref<384x512xbf16, #tpu.memory_space<vmem>>, vector<384x512xbf16>
    %cst = arith.constant dense<0.000000e+00> : vector<128x512xf32>
    %6 = tpu.matmul %1, %5, %cst {dimension_numbers = #tpu.dot_dimension_numbers<[1], [0], [0], [1], [0, 0, 1, 1], [], []>} : vector<128x384xbf16>, vector<384x512xbf16>, vector<128x512xf32> -> vector<128x512xf32>
    %7 = vector.extract_strided_slice %4 {offsets = [0, 0], sizes = [1, 512], strides = [1, 1]} : vector<3x512xf32> to vector<1x512xf32>
    %8 = vector.broadcast %7 : vector<1x512xf32> to vector<128x512xf32>
    %9 = arith.addf %6, %8 : vector<128x512xf32>
    %c0_9 = arith.constant 0 : index
    %c0_10 = arith.constant 0 : index
    %10 = vector.load %arg4[%c0_9, %c0_10] : memref<384x512xbf16, #tpu.memory_space<vmem>>, vector<384x512xbf16>
    %cst_11 = arith.constant dense<0.000000e+00> : vector<256x512xf32>
    %11 = tpu.matmul %3, %10, %cst_11 {dimension_numbers = #tpu.dot_dimension_numbers<[1], [0], [0], [1], [0, 0, 1, 1], [], []>} : vector<256x384xbf16>, vector<384x512xbf16>, vector<256x512xf32> -> vector<256x512xf32>
    %12 = vector.extract_strided_slice %4 {offsets = [1, 0], sizes = [1, 512], strides = [1, 1]} : vector<3x512xf32> to vector<1x512xf32>
    %13 = vector.broadcast %12 : vector<1x512xf32> to vector<256x512xf32>
    %14 = arith.addf %11, %13 : vector<256x512xf32>
    %c0_12 = arith.constant 0 : index
    %c0_13 = arith.constant 0 : index
    %15 = vector.load %arg5[%c0_12, %c0_13] : memref<384x512xbf16, #tpu.memory_space<vmem>>, vector<384x512xbf16>
    %cst_14 = arith.constant dense<0.000000e+00> : vector<256x512xf32>
    %16 = tpu.matmul %3, %15, %cst_14 {dimension_numbers = #tpu.dot_dimension_numbers<[1], [0], [0], [1], [0, 0, 1, 1], [], []>} : vector<256x384xbf16>, vector<384x512xbf16>, vector<256x512xf32> -> vector<256x512xf32>
    %17 = vector.extract_strided_slice %4 {offsets = [2, 0], sizes = [1, 512], strides = [1, 1]} : vector<3x512xf32> to vector<1x512xf32>
    %18 = vector.broadcast %17 : vector<1x512xf32> to vector<256x512xf32>
    %19 = arith.addf %16, %18 : vector<256x512xf32>
    %20 = vector.shape_cast %9 : vector<128x512xf32> to vector<8x16x512xf32>
    %21 = arith.truncf %20 : vector<8x16x512xf32> to vector<8x16x512xbf16>
    %22 = vector.shape_cast %14 : vector<256x512xf32> to vector<8x32x512xf32>
    %23 = arith.truncf %22 : vector<8x32x512xf32> to vector<8x32x512xbf16>
    %24 = vector.shape_cast %19 : vector<256x512xf32> to vector<8x32x512xf32>
    %25 = arith.truncf %24 : vector<8x32x512xf32> to vector<8x32x512xbf16>
    %26 = vector.extract_strided_slice %21 {offsets = [0, 0, 0], sizes = [8, 16, 128], strides = [1, 1, 1]} : vector<8x16x512xbf16> to vector<8x16x128xbf16>
    %27 = vector.extract_strided_slice %23 {offsets = [0, 0, 0], sizes = [8, 32, 128], strides = [1, 1, 1]} : vector<8x32x512xbf16> to vector<8x32x128xbf16>
    %28 = vector.extract_strided_slice %25 {offsets = [0, 0, 0], sizes = [8, 32, 128], strides = [1, 1, 1]} : vector<8x32x512xbf16> to vector<8x32x128xbf16>
    "tpu.trace_start"() <{level = 10 : i32, message = "bqd,bkd->bqk"}> : () -> ()
    %cst_15 = arith.constant dense<0.000000e+00> : vector<8x16x32xf32>
    %29 = tpu.matmul %26, %27, %cst_15 {dimension_numbers = #tpu.dot_dimension_numbers<[2], [2], [1], [1], [0, 0, 0, 1, 1, 1], [0], [0]>} : vector<8x16x128xbf16>, vector<8x32x128xbf16>, vector<8x16x32xf32> -> vector<8x16x32xf32>
    "tpu.trace_stop"() : () -> ()
    %cst_16 = arith.constant dense<0xFF800000> : vector<8x16xf32>
    %30 = vector.multi_reduction <maximumf>, %29, %cst_16 [2] : vector<8x16x32xf32> to vector<8x16xf32>
    %31 = vector.shape_cast %30 : vector<8x16xf32> to vector<8x16x1xf32>
    %32 = vector.broadcast %31 : vector<8x16x1xf32> to vector<8x16x32xf32>
    %33 = arith.subf %29, %32 : vector<8x16x32xf32>
    %34 = math.exp %33 : vector<8x16x32xf32>
    %cst_17 = arith.constant dense<0.000000e+00> : vector<8x16xf32>
    %35 = vector.multi_reduction <add>, %34, %cst_17 [2] : vector<8x16x32xf32> to vector<8x16xf32>
    %36 = vector.shape_cast %35 : vector<8x16xf32> to vector<8x16x1xf32>
    %37 = tpu.reciprocal %36 {approx = true} : vector<8x16x1xf32> -> vector<8x16x1xf32>
    %38 = vector.broadcast %37 : vector<8x16x1xf32> to vector<8x16x32xf32>
    %39 = arith.mulf %34, %38 : vector<8x16x32xf32>
    %40 = arith.truncf %39 : vector<8x16x32xf32> to vector<8x16x32xbf16>
    "tpu.trace_start"() <{level = 10 : i32, message = "bqk,bkd->bqd"}> : () -> ()
    %cst_18 = arith.constant dense<0.000000e+00> : vector<8x16x128xf32>
    %41 = tpu.matmul %40, %28, %cst_18 {dimension_numbers = #tpu.dot_dimension_numbers<[2], [1], [1], [2], [0, 0, 0, 1, 1, 2], [0], [0]>} : vector<8x16x32xbf16>, vector<8x32x128xbf16>, vector<8x16x128xf32> -> vector<8x16x128xf32>
    "tpu.trace_stop"() : () -> ()
    %42 = vector.extract_strided_slice %21 {offsets = [0, 0, 128], sizes = [8, 16, 128], strides = [1, 1, 1]} : vector<8x16x512xbf16> to vector<8x16x128xbf16>
    %43 = vector.extract_strided_slice %23 {offsets = [0, 0, 128], sizes = [8, 32, 128], strides = [1, 1, 1]} : vector<8x32x512xbf16> to vector<8x32x128xbf16>
    %44 = vector.extract_strided_slice %25 {offsets = [0, 0, 128], sizes = [8, 32, 128], strides = [1, 1, 1]} : vector<8x32x512xbf16> to vector<8x32x128xbf16>
    "tpu.trace_start"() <{level = 10 : i32, message = "bqd,bkd->bqk"}> : () -> ()
    %cst_19 = arith.constant dense<0.000000e+00> : vector<8x16x32xf32>
    %45 = tpu.matmul %42, %43, %cst_19 {dimension_numbers = #tpu.dot_dimension_numbers<[2], [2], [1], [1], [0, 0, 0, 1, 1, 1], [0], [0]>} : vector<8x16x128xbf16>, vector<8x32x128xbf16>, vector<8x16x32xf32> -> vector<8x16x32xf32>
    "tpu.trace_stop"() : () -> ()
    %cst_20 = arith.constant dense<0xFF800000> : vector<8x16xf32>
    %46 = vector.multi_reduction <maximumf>, %45, %cst_20 [2] : vector<8x16x32xf32> to vector<8x16xf32>
    %47 = vector.shape_cast %46 : vector<8x16xf32> to vector<8x16x1xf32>
    %48 = vector.broadcast %47 : vector<8x16x1xf32> to vector<8x16x32xf32>
    %49 = arith.subf %45, %48 : vector<8x16x32xf32>
    %50 = math.exp %49 : vector<8x16x32xf32>
    %cst_21 = arith.constant dense<0.000000e+00> : vector<8x16xf32>
    %51 = vector.multi_reduction <add>, %50, %cst_21 [2] : vector<8x16x32xf32> to vector<8x16xf32>
    %52 = vector.shape_cast %51 : vector<8x16xf32> to vector<8x16x1xf32>
    %53 = tpu.reciprocal %52 {approx = true} : vector<8x16x1xf32> -> vector<8x16x1xf32>
    %54 = vector.broadcast %53 : vector<8x16x1xf32> to vector<8x16x32xf32>
    %55 = arith.mulf %50, %54 : vector<8x16x32xf32>
    %56 = arith.truncf %55 : vector<8x16x32xf32> to vector<8x16x32xbf16>
    "tpu.trace_start"() <{level = 10 : i32, message = "bqk,bkd->bqd"}> : () -> ()
    %cst_22 = arith.constant dense<0.000000e+00> : vector<8x16x128xf32>
    %57 = tpu.matmul %56, %44, %cst_22 {dimension_numbers = #tpu.dot_dimension_numbers<[2], [1], [1], [2], [0, 0, 0, 1, 1, 2], [0], [0]>} : vector<8x16x32xbf16>, vector<8x32x128xbf16>, vector<8x16x128xf32> -> vector<8x16x128xf32>
    "tpu.trace_stop"() : () -> ()
    %58 = vector.extract_strided_slice %21 {offsets = [0, 0, 256], sizes = [8, 16, 128], strides = [1, 1, 1]} : vector<8x16x512xbf16> to vector<8x16x128xbf16>
    %59 = vector.extract_strided_slice %23 {offsets = [0, 0, 256], sizes = [8, 32, 128], strides = [1, 1, 1]} : vector<8x32x512xbf16> to vector<8x32x128xbf16>
    %60 = vector.extract_strided_slice %25 {offsets = [0, 0, 256], sizes = [8, 32, 128], strides = [1, 1, 1]} : vector<8x32x512xbf16> to vector<8x32x128xbf16>
    "tpu.trace_start"() <{level = 10 : i32, message = "bqd,bkd->bqk"}> : () -> ()
    %cst_23 = arith.constant dense<0.000000e+00> : vector<8x16x32xf32>
    %61 = tpu.matmul %58, %59, %cst_23 {dimension_numbers = #tpu.dot_dimension_numbers<[2], [2], [1], [1], [0, 0, 0, 1, 1, 1], [0], [0]>} : vector<8x16x128xbf16>, vector<8x32x128xbf16>, vector<8x16x32xf32> -> vector<8x16x32xf32>
    "tpu.trace_stop"() : () -> ()
    %cst_24 = arith.constant dense<0xFF800000> : vector<8x16xf32>
    %62 = vector.multi_reduction <maximumf>, %61, %cst_24 [2] : vector<8x16x32xf32> to vector<8x16xf32>
    %63 = vector.shape_cast %62 : vector<8x16xf32> to vector<8x16x1xf32>
    %64 = vector.broadcast %63 : vector<8x16x1xf32> to vector<8x16x32xf32>
    %65 = arith.subf %61, %64 : vector<8x16x32xf32>
    %66 = math.exp %65 : vector<8x16x32xf32>
    %cst_25 = arith.constant dense<0.000000e+00> : vector<8x16xf32>
    %67 = vector.multi_reduction <add>, %66, %cst_25 [2] : vector<8x16x32xf32> to vector<8x16xf32>
    %68 = vector.shape_cast %67 : vector<8x16xf32> to vector<8x16x1xf32>
    %69 = tpu.reciprocal %68 {approx = true} : vector<8x16x1xf32> -> vector<8x16x1xf32>
    %70 = vector.broadcast %69 : vector<8x16x1xf32> to vector<8x16x32xf32>
    %71 = arith.mulf %66, %70 : vector<8x16x32xf32>
    %72 = arith.truncf %71 : vector<8x16x32xf32> to vector<8x16x32xbf16>
    "tpu.trace_start"() <{level = 10 : i32, message = "bqk,bkd->bqd"}> : () -> ()
    %cst_26 = arith.constant dense<0.000000e+00> : vector<8x16x128xf32>
    %73 = tpu.matmul %72, %60, %cst_26 {dimension_numbers = #tpu.dot_dimension_numbers<[2], [1], [1], [2], [0, 0, 0, 1, 1, 2], [0], [0]>} : vector<8x16x32xbf16>, vector<8x32x128xbf16>, vector<8x16x128xf32> -> vector<8x16x128xf32>
    "tpu.trace_stop"() : () -> ()
    %74 = vector.extract_strided_slice %21 {offsets = [0, 0, 384], sizes = [8, 16, 128], strides = [1, 1, 1]} : vector<8x16x512xbf16> to vector<8x16x128xbf16>
    %75 = vector.extract_strided_slice %23 {offsets = [0, 0, 384], sizes = [8, 32, 128], strides = [1, 1, 1]} : vector<8x32x512xbf16> to vector<8x32x128xbf16>
    %76 = vector.extract_strided_slice %25 {offsets = [0, 0, 384], sizes = [8, 32, 128], strides = [1, 1, 1]} : vector<8x32x512xbf16> to vector<8x32x128xbf16>
    "tpu.trace_start"() <{level = 10 : i32, message = "bqd,bkd->bqk"}> : () -> ()
    %cst_27 = arith.constant dense<0.000000e+00> : vector<8x16x32xf32>
    %77 = tpu.matmul %74, %75, %cst_27 {dimension_numbers = #tpu.dot_dimension_numbers<[2], [2], [1], [1], [0, 0, 0, 1, 1, 1], [0], [0]>} : vector<8x16x128xbf16>, vector<8x32x128xbf16>, vector<8x16x32xf32> -> vector<8x16x32xf32>
    "tpu.trace_stop"() : () -> ()
    %cst_28 = arith.constant dense<0xFF800000> : vector<8x16xf32>
    %78 = vector.multi_reduction <maximumf>, %77, %cst_28 [2] : vector<8x16x32xf32> to vector<8x16xf32>
    %79 = vector.shape_cast %78 : vector<8x16xf32> to vector<8x16x1xf32>
    %80 = vector.broadcast %79 : vector<8x16x1xf32> to vector<8x16x32xf32>
    %81 = arith.subf %77, %80 : vector<8x16x32xf32>
    %82 = math.exp %81 : vector<8x16x32xf32>
    %cst_29 = arith.constant dense<0.000000e+00> : vector<8x16xf32>
    %83 = vector.multi_reduction <add>, %82, %cst_29 [2] : vector<8x16x32xf32> to vector<8x16xf32>
    %84 = vector.shape_cast %83 : vector<8x16xf32> to vector<8x16x1xf32>
    %85 = tpu.reciprocal %84 {approx = true} : vector<8x16x1xf32> -> vector<8x16x1xf32>
    %86 = vector.broadcast %85 : vector<8x16x1xf32> to vector<8x16x32xf32>
    %87 = arith.mulf %82, %86 : vector<8x16x32xf32>
    %88 = arith.truncf %87 : vector<8x16x32xf32> to vector<8x16x32xbf16>
    "tpu.trace_start"() <{level = 10 : i32, message = "bqk,bkd->bqd"}> : () -> ()
    %cst_30 = arith.constant dense<0.000000e+00> : vector<8x16x128xf32>
    %89 = tpu.matmul %88, %76, %cst_30 {dimension_numbers = #tpu.dot_dimension_numbers<[2], [1], [1], [2], [0, 0, 0, 1, 1, 2], [0], [0]>} : vector<8x16x32xbf16>, vector<8x32x128xbf16>, vector<8x16x128xf32> -> vector<8x16x128xf32>
    "tpu.trace_stop"() : () -> ()
    %90 = tpu.concatenate %41, %57, %73, %89 in 2 : vector<8x16x128xf32>, vector<8x16x128xf32>, vector<8x16x128xf32>, vector<8x16x128xf32> -> vector<8x16x512xf32>
    %91 = vector.shape_cast %90 : vector<8x16x512xf32> to vector<128x512xf32>
    %92 = arith.truncf %91 : vector<128x512xf32> to vector<128x512xbf16>
    %c0_31 = arith.constant 0 : index
    %c0_32 = arith.constant 0 : index
    %93 = vector.load %arg7[%c0_31, %c0_32] : memref<512x384xbf16, #tpu.memory_space<vmem>>, vector<512x384xbf16>
    %cst_33 = arith.constant dense<0.000000e+00> : vector<128x384xf32>
    %94 = tpu.matmul %92, %93, %cst_33 {dimension_numbers = #tpu.dot_dimension_numbers<[1], [0], [0], [1], [0, 0, 1, 1], [], []>} : vector<128x512xbf16>, vector<512x384xbf16>, vector<128x384xf32> -> vector<128x384xf32>
    %c0_34 = arith.constant 0 : index
    %c0_35 = arith.constant 0 : index
    %95 = vector.load %arg8[%c0_34, %c0_35] : memref<1x384xf32, #tpu.memory_space<vmem>>, vector<1x384xf32>
    %96 = vector.broadcast %95 : vector<1x384xf32> to vector<128x384xf32>
    %97 = arith.addf %94, %96 : vector<128x384xf32>
    %98 = vector.shape_cast %97 : vector<128x384xf32> to vector<8x16x384xf32>
    %c0_36 = arith.constant 0 : index
    %c0_37 = arith.constant 0 : index
    %c0_38 = arith.constant 0 : index
    %99 = vector.load %arg9[%c0_36, %c0_37, %c0_38] : memref<8x16x384xf32, #tpu.memory_space<vmem>>, vector<8x16x384xf32>
    tpu.vector_store %arg9[%c0_36, %c0_37, %c0_38], %98 {strides = array<i32>} : memref<8x16x384xf32, #tpu.memory_space<vmem>>, vector<8x16x384xf32>,
    return
  }
  func.func @transform_0(%arg0: i32) -> (i32, i32, i32) {
    %c0_i32 = arith.constant 0 : i32
    %c0_i32_0 = arith.constant 0 : i32
    %c0_i32_1 = arith.constant 0 : i32
    return %arg0, %c0_i32, %c0_i32_0 : i32, i32, i32
  }
  func.func @transform_1(%arg0: i32) -> (i32, i32, i32) {
    %c0_i32 = arith.constant 0 : i32
    %c0_i32_0 = arith.constant 0 : i32
    %c0_i32_1 = arith.constant 0 : i32
    return %arg0, %c0_i32, %c0_i32_0 : i32, i32, i32
  }
  func.func @transform_2(%arg0: i32) -> (i32, i32) {
    %c0_i32 = arith.constant 0 : i32
    %c0_i32_0 = arith.constant 0 : i32
    %c0_i32_1 = arith.constant 0 : i32
    return %c0_i32, %c0_i32_0 : i32, i32
  }
  func.func @transform_3(%arg0: i32) -> (i32, i32) {
    %c0_i32 = arith.constant 0 : i32
    %c0_i32_0 = arith.constant 0 : i32
    %c0_i32_1 = arith.constant 0 : i32
    return %c0_i32, %c0_i32_0 : i32, i32
  }
  func.func @transform_4(%arg0: i32) -> (i32, i32) {
    %c0_i32 = arith.constant 0 : i32
    %c0_i32_0 = arith.constant 0 : i32
    %c0_i32_1 = arith.constant 0 : i32
    return %c0_i32, %c0_i32_0 : i32, i32
  }
  func.func @transform_5(%arg0: i32) -> (i32, i32) {
    %c0_i32 = arith.constant 0 : i32
    %c0_i32_0 = arith.constant 0 : i32
    %c0_i32_1 = arith.constant 0 : i32
    return %c0_i32, %c0_i32_0 : i32, i32
  }
  func.func @transform_6(%arg0: i32) -> (i32, i32) {
    %c0_i32 = arith.constant 0 : i32
    %c0_i32_0 = arith.constant 0 : i32
    %c0_i32_1 = arith.constant 0 : i32
    return %c0_i32, %c0_i32_0 : i32, i32
  }
  func.func @transform_7(%arg0: i32) -> (i32, i32) {
    %c0_i32 = arith.constant 0 : i32
    %c0_i32_0 = arith.constant 0 : i32
    %c0_i32_1 = arith.constant 0 : i32
    return %c0_i32, %c0_i32_0 : i32, i32
  }
  func.func @transform_8(%arg0: i32) -> (i32, i32, i32) {
    %c0_i32 = arith.constant 0 : i32
    %c0_i32_0 = arith.constant 0 : i32
    %c0_i32_1 = arith.constant 0 : i32
    return %arg0, %c0_i32, %c0_i32_0 : i32, i32, i32
  }
}

</mosaic_0001>

<bundles_post_ra>
// kernel: tpu_custom_call.1
= control target key start
LH: loop header
LB: loop body
LE: loop exit
PB: predicated region body
PF: predicated region fallthrough
CT: control target
= control target key end

     0   :  { %13 = vsyncpa [#allocation3], 0  ;;  %s16066_s0 = inlined_call_operand.hbm [shape: bf16[8,16,384], index: 0, kind: input, shape index: {}]   ;;  %s16067_s1 = inlined_call_operand.hbm [shape: bf16[8,32,384], index: 1, kind: input, shape index: {}]   ;;  %s16068_s2 = inlined_call_operand.hbm [shape: bf16[384,512], index: 2, kind: input, shape index: {}]   ;;  %s16069_s3 = inlined_call_operand.hbm [shape: bf16[384,512], index: 3, kind: input, shape index: {}]   ;;  %s16070_s4 = inlined_call_operand.hbm [shape: bf16[384,512], index: 4, kind: input, shape index: {}]   ;;  %s16071_s5 = inlined_call_operand.hbm [shape: f32[3,512], index: 5, kind: input, shape index: {}]   ;;  %s16072_s6 = inlined_call_operand.hbm [shape: bf16[512,384], index: 6, kind: input, shape index: {}]   ;;  %s16073_s7 = inlined_call_operand.vmem [shape: f32[1,384], index: 7, kind: input, shape index: {}]   ;;  %s16074_s8 = inlined_call_operand.hbm [shape: f32[8,16,384], index: 8, kind: output, shape index: {}]  }
   0x1   :  { %14 = vsyncpa [#allocation6], 0 }
   0x2   :  { %15 = vsyncpa [#allocation9], 0 }
   0x3   :  { %16 = vsyncpa [#allocation12], 0 }
   0x4   :  { %17 = vsyncpa [#allocation4], 0  ;;  %s35_s29 = sshll.u32 %s16067_s1, 4  ;;  %s12278_s30 = smov [#allocation5]   ;;  %s36_s29 = int_to_ptr.hbm [resolvable:$true] %s35_s29 }
   0x5   :  { %s37_s9 = sshll.u32 %s12278_s30, 4  ;;  %s12279_s10 = smov 192   ;;  %s38_s9 = int_to_ptr.vmem [resolvable:$true] %s37_s9 }
   0x6   :  { %s12280_s11 = smov 12   ;;  %s61_s14 = sshll.u32 %s16069_s3, 4  ;;  %s62_s14 = int_to_ptr.hbm [resolvable:$true] %s61_s14 }
   0x7   :  { %43 = dma.hbm_to_vmem [thread:$0]  %s36_s29, 6144, %s38_s9, [#allocation6], %s12279_s10, %s12279_s10, %s12280_s11  }
   0x8   :  { %s12281_s15 = smov [#allocation8]   ;;  %s88_s1 = sshll.u32 %s16071_s5, 4  ;;  %s89_s1 = int_to_ptr.hbm [resolvable:$true] %s88_s1 }
   0x9   :  { %s63_s16 = sshll.u32 %s12281_s15, 4  ;;  %s12282_s19 = smov 256   ;;  %s64_s16 = int_to_ptr.vmem [resolvable:$true] %s63_s16 }
   0xa   :  { %s12283_s20 = smov 16   ;;  %s22_s23 = sshll.u32 %s16066_s0, 4  ;;  %s23_s23 = int_to_ptr.hbm [resolvable:$true] %s22_s23 }
   0xb   :  { %69 = dma.hbm_to_vmem [thread:$0]  %s62_s14, 12288, %s64_s16, [#allocation9], %s12282_s19, %s12282_s19, %s12283_s20  }
   0xc   :  { %s12284_s24 = smov [#allocation11]   ;;  %s12285_s3 = smov [#allocation2]  }
   0xd   :  { %s90_s25 = sshll.u32 %s12284_s24, 4  ;;  %s24_s26 = sshll.u32 %s12285_s3, 4  ;;  %s91_s25 = int_to_ptr.vmem [resolvable:$true] %s90_s25  ;;  %s25_s26 = int_to_ptr.vmem [resolvable:$true] %s24_s26 }
   0xe   :  { %93 = dma.hbm_to_vmem [thread:$0]  %s89_s1, 256, %s91_s25, [#allocation12]  }
   0xf   :  { %s48_s5 = sshll.u32 %s16068_s2, 4  ;;  %s74_s0 = sshll.u32 %s16070_s4, 4  ;;  %s49_s5 = int_to_ptr.hbm [resolvable:$true] %s48_s5  ;;  %s75_s0 = int_to_ptr.hbm [resolvable:$true] %s74_s0 }
  0x10   :  { %30 = dma.hbm_to_vmem [thread:$0]  %s23_s23, 3072, %s25_s26, [#allocation3], %s12279_s10, %s12279_s10, %s12280_s11  }
  0x11   :  { %s12286_s9 = smov [#allocation7]   ;;  %s12287_s13 = smov [#allocation10]  }
  0x12   :  { %s50_s12 = sshll.u32 %s12286_s9, 4  ;;  %s76_s14 = sshll.u32 %s12287_s13, 4  ;;  %s51_s12 = int_to_ptr.vmem [resolvable:$true] %s50_s12  ;;  %s77_s14 = int_to_ptr.vmem [resolvable:$true] %s76_s14 }
  0x13   :  { %56 = dma.hbm_to_vmem [thread:$0]  %s49_s5, 12288, %s51_s12, [#allocation6], %s12282_s19, %s12282_s19, %s12283_s20  }
  0x14   :  { %s98_s2 = sshll.u32 %s16072_s6, 4  ;;  %s12288_s17 = smov [#allocation13]   ;;  %s99_s2 = int_to_ptr.hbm [resolvable:$true] %s98_s2 }
  0x15   :  { %82 = dma.hbm_to_vmem [thread:$0]  %s75_s0, 12288, %s77_s14, [#allocation9], %s12282_s19, %s12282_s19, %s12283_s20  }
  0x16   :  { %s100_s18 = sshll.u32 %s12288_s17, 4  ;;  %s101_s18 = int_to_ptr.vmem [resolvable:$true] %s100_s18 }
  0x17   :  { %106 = dma.hbm_to_vmem [thread:$0]  %s99_s2, 12288, %s101_s18, [#allocation12], %s12279_s10, %s12279_s10, %s12280_s11  }
  0x18   :  { %12268 = dma.done.wait [#allocation3], 3072  }
  0x19   :  { %12269 = vsyncadd [#allocation3], 4294964224 }
  0x1a   :  { %12270 = dma.done.wait [#allocation6], 18432  }
  0x1b   :  { %12271 = vsyncadd [#allocation6], 4294948864 }
  0x1c   :  { %12272 = dma.done.wait [#allocation9], 24576  }
  0x1d   :  { %12273 = vsyncadd [#allocation9], 4294942720 }
  0x1e   :  { %12274 = dma.done.wait [#allocation12], 12544  }
  0x1f   :  { %12275 = vsyncadd [#allocation12], 4294954752  ;;  %v9699_v0 = vld [vmem:[#allocation7 + $0xe0] sm:$0xf]  ;;  %v11447_v1 = vld [vmem:[#allocation7 + $0xec] sm:$0xf0] }
  0x20   :  { %v9827_v2 = vld [vmem:[#allocation7 + $0x1e0] sm:$0xf]  ;;  %v9700_v3 = vor.u32 %v11447_v1, %v9699_v0  ;;  %v11479_v4 = vld [vmem:[#allocation7 + $0x1ec] sm:$0xf0]  ;;  %v11445_v9 = vld [vmem:[#allocation7 + $0xe4] sm:$0xf] }
  0x21   :  { %v9955_v5 = vld [vmem:[#allocation7 + $0x2e0] sm:$0xf]  ;;  %v11511_v6 = vld [vmem:[#allocation7 + $0x2ec] sm:$0xf0]  ;;  %v9828_v7 = vor.u32 %v11479_v4, %v9827_v2  ;;  %v9701_v10 = vld [vmem:[#allocation7 + $0xf0] sm:$0xf0] }
  0x22   :  { %v9956_v8 = vor.u32 %v11511_v6, %v9955_v5  ;;  %v9683_v11 = vld [vmem:[#allocation7 + $0xc0] sm:$0xf]  ;;  %954 = vmatpush.bf16.msra.mxu0 %v9700_v3  ;;  %v9704_v12 = vor.u32 %v11445_v9, %v9701_v10  ;;  %v11443_v13 = vld [vmem:[#allocation7 + $0xcc] sm:$0xf0]  ;;  %v11441_v20 = vld [vmem:[#allocation7 + $0xc4] sm:$0xf] }
  0x23   :  { %v9811_v14 = vld [vmem:[#allocation7 + $0x1c0] sm:$0xf]  ;;  %v11475_v15 = vld [vmem:[#allocation7 + $0x1cc] sm:$0xf0]  ;;  %1003 = vmatpush.bf16.msra.mxu1 %v9828_v7  ;;  %v9684_v16 = vor.u32 %v11443_v13, %v9683_v11  ;;  %v9685_v22 = vld [vmem:[#allocation7 + $0xd0] sm:$0xf0] }
  0x24   :  { %1052 = vmatpush.bf16.msra.mxu2 %v9956_v8  ;;  %v9812_v17 = vor.u32 %v11475_v15, %v9811_v14  ;;  %v9939_v18 = vld [vmem:[#allocation7 + $0x2c0] sm:$0xf]  ;;  %v11507_v19 = vld [vmem:[#allocation7 + $0x2cc] sm:$0xf0]  ;;  %1101 = vmatpush.bf16.msra.mxu3 %v9704_v12  ;;  %v9688_v25 = vor.u32 %v11441_v20, %v9685_v22  ;;  %v11437_v31 = vld [vmem:[#allocation7 + $0xa4] sm:$0xf] }
  0x25   :  { %v9940_v21 = vor.u32 %v11507_v19, %v9939_v18  ;;  %v9667_v23 = vld [vmem:[#allocation7 + $0xa0] sm:$0xf]  ;;  %v11439_v24 = vld [vmem:[#allocation7 + $0xac] sm:$0xf0]  ;;  %v9669_v32 = vld [vmem:[#allocation7 + $0xb0] sm:$0xf0] }
  0x26   :  { %v9795_v26 = vld [vmem:[#allocation7 + $0x1a0] sm:$0xf]  ;;  %v11471_v27 = vld [vmem:[#allocation7 + $0x1ac] sm:$0xf0]  ;;  %955 = vmatpush.bf16.msra.mxu0 %v9684_v16  ;;  %v9668_v29 = vor.u32 %v11439_v24, %v9667_v23  ;;  %v9672_v38 = vor.u32 %v11437_v31, %v9669_v32  ;;  %v11433_v42 = vld [vmem:[#allocation7 + $0x84] sm:$0xf] }
  0x27   :  { %v9923_v28 = vld [vmem:[#allocation7 + $0x2a0] sm:$0xf]  ;;  %v11503_v30 = vld [vmem:[#allocation7 + $0x2ac] sm:$0xf0]  ;;  %1004 = vmatpush.bf16.msra.mxu1 %v9812_v17  ;;  %v9796_v33 = vor.u32 %v11471_v27, %v9795_v26  ;;  %v9653_v43 = vld [vmem:[#allocation7 + $0x90] sm:$0xf0] }
  0x28   :  { %1053 = vmatpush.bf16.msra.mxu2 %v9940_v21  ;;  %v9924_v34 = vor.u32 %v11503_v30, %v9923_v28  ;;  %v9651_v35 = vld [vmem:[#allocation7 + $0x80] sm:$0xf]  ;;  %v11435_v36 = vld [vmem:[#allocation7 + $0x8c] sm:$0xf0]  ;;  %1102 = vmatpush.bf16.msra.mxu3 %v9688_v25  ;;  %v9656_v50 = vor.u32 %v11433_v42, %v9653_v43  ;;  %v11429_v54 = vld [vmem:[#allocation7 + $0x64] sm:$0xf] }
  0x29   :  { %v9779_v37 = vld [vmem:[#allocation7 + $0x180] sm:$0xf]  ;;  %v11467_v39 = vld [vmem:[#allocation7 + $0x18c] sm:$0xf0]  ;;  %v9652_v44 = vor.u32 %v11435_v36, %v9651_v35  ;;  %v9637_v55 = vld [vmem:[#allocation7 + $0x70] sm:$0xf0] }
  0x2a   :  { %v9907_v40 = vld [vmem:[#allocation7 + $0x280] sm:$0xf]  ;;  %v11499_v41 = vld [vmem:[#allocation7 + $0x28c] sm:$0xf0]  ;;  %956 = vmatpush.bf16.msra.mxu0 %v9668_v29  ;;  %v9780_v45 = vor.u32 %v11467_v39, %v9779_v37  ;;  %v9640_v62 = vor.u32 %v11429_v54, %v9637_v55  ;;  %v11425_v2 = vld [vmem:[#allocation7 + $0x44] sm:$0xf] }
  0x2b   :  { %1005 = vmatpush.bf16.msra.mxu1 %v9796_v33  ;;  %v9908_v46 = vor.u32 %v11499_v41, %v9907_v40  ;;  %v9635_v47 = vld [vmem:[#allocation7 + $0x60] sm:$0xf]  ;;  %v11431_v48 = vld [vmem:[#allocation7 + $0x6c] sm:$0xf0]  ;;  %v9621_v3 = vld [vmem:[#allocation7 + $0x50] sm:$0xf0] }
  0x2c   :  { %1054 = vmatpush.bf16.msra.mxu2 %v9924_v34  ;;  %v9763_v49 = vld [vmem:[#allocation7 + $0x160] sm:$0xf]  ;;  %1103 = vmatpush.bf16.msra.mxu3 %v9672_v38  ;;  %v11463_v51 = vld [vmem:[#allocation7 + $0x16c] sm:$0xf0]  ;;  %v9636_v56 = vor.u32 %v11431_v48, %v9635_v47  ;;  %v9624_v10 = vor.u32 %v11425_v2, %v9621_v3  ;;  %v11421_v14 = vld [vmem:[#allocation7 + $0x24] sm:$0xf] }
  0x2d   :  { %v9891_v52 = vld [vmem:[#allocation7 + $0x260] sm:$0xf]  ;;  %v11495_v53 = vld [vmem:[#allocation7 + $0x26c] sm:$0xf0]  ;;  %v9764_v57 = vor.u32 %v11463_v51, %v9763_v49  ;;  %v9605_v15 = vld [vmem:[#allocation7 + $0x30] sm:$0xf0] }
  0x2e   :  { %957 = vmatpush.bf16.msra.mxu0 %v9652_v44  ;;  %v9892_v58 = vor.u32 %v11495_v53, %v9891_v52  ;;  %v9619_v59 = vld [vmem:[#allocation7 + $0x40] sm:$0xf]  ;;  %v11427_v60 = vld [vmem:[#allocation7 + $0x4c] sm:$0xf0]  ;;  %v9608_v25 = vor.u32 %v11421_v14, %v9605_v15  ;;  %v11417_v26 = vld [vmem:[#allocation7 + $0x4] sm:$0xf] }
  0x2f   :  { %1006 = vmatpush.bf16.msra.mxu1 %v9780_v45  ;;  %v9747_v61 = vld [vmem:[#allocation7 + $0x140] sm:$0xf]  ;;  %v11459_v63 = vld [vmem:[#allocation7 + $0x14c] sm:$0xf0]  ;;  %v9620_v4 = vor.u32 %v11427_v60, %v9619_v59  ;;  %v9589_v27 = vld [vmem:[#allocation7 + $0x10] sm:$0xf0] }
  0x30   :  { %1055 = vmatpush.bf16.msra.mxu2 %v9908_v46  ;;  %1104 = vmatpush.bf16.msra.mxu3 %v9656_v50  ;;  %v9875_v0 = vld [vmem:[#allocation7 + $0x240] sm:$0xf]  ;;  %v11491_v1 = vld [vmem:[#allocation7 + $0x24c] sm:$0xf0]  ;;  %v9748_v5 = vor.u32 %v11459_v63, %v9747_v61  ;;  %v11346_v29 = vld [vmem:[#allocation2 + $0x8] sm:$0xf0]  ;;  %v9592_v41 = vor.u32 %v11417_v26, %v9589_v27 }
  0x31   :  { %v9876_v6 = vor.u32 %v11491_v1, %v9875_v0  ;;  %v9603_v7 = vld [vmem:[#allocation7 + $0x20] sm:$0xf]  ;;  %v11423_v8 = vld [vmem:[#allocation7 + $0x2c] sm:$0xf0]  ;;  %v11477_v30 = vld [vmem:[#allocation7 + $0x1e4] sm:$0xf] }
  0x32   :  { %958 = vmatpush.bf16.msra.mxu0 %v9636_v56  ;;  %v9731_v9 = vld [vmem:[#allocation7 + $0x120] sm:$0xf]  ;;  %v11455_v11 = vld [vmem:[#allocation7 + $0x12c] sm:$0xf0]  ;;  %v9604_v16 = vor.u32 %v11423_v8, %v9603_v7  ;;  %v9829_v31 = vld [vmem:[#allocation7 + $0x1f0] sm:$0xf0] }
  0x33   :  { %1007 = vmatpush.bf16.msra.mxu1 %v9764_v57  ;;  %v9859_v12 = vld [vmem:[#allocation7 + $0x220] sm:$0xf]  ;;  %v11487_v13 = vld [vmem:[#allocation7 + $0x22c] sm:$0xf0]  ;;  %v9732_v20 = vor.u32 %v11455_v11, %v9731_v9  ;;  %v11345_v33 = vld [vmem:[#allocation2 + $0x4] sm:$0xf]  ;;  %v9832_v42 = vor.u32 %v11477_v30, %v9829_v31 }
  0x34   :  { %1056 = vmatpush.bf16.msra.mxu2 %v9892_v58  ;;  %1105 = vmatpush.bf16.msra.mxu3 %v9640_v62  ;;  %v9587_v17 = vld [vmem:[#allocation7] sm:$0xf]  ;;  %v11419_v18 = vld [vmem:[#allocation7 + $0xc] sm:$0xf0]  ;;  %v9860_v21 = vor.u32 %v11487_v13, %v9859_v12  ;;  %v9707_v34 = vld [vmem:[#allocation7 + $0xe8] sm:$0xf] }
  0x35   :  { %v9715_v19 = vld [vmem:[#allocation7 + $0x100] sm:$0xf]  ;;  %v11451_v22 = vld [vmem:[#allocation7 + $0x10c] sm:$0xf0]  ;;  %v9588_v32 = vor.u32 %v11419_v18, %v9587_v17  ;;  %v11448_v35 = vld [vmem:[#allocation7 + $0xf4] sm:$0xf0] }
  0x36   :  { %959 = vmatpush.bf16.msra.mxu0 %v9620_v4  ;;  %v9843_v23 = vld [vmem:[#allocation7 + $0x200] sm:$0xf]  ;;  %v11483_v24 = vld [vmem:[#allocation7 + $0x20c] sm:$0xf0]  ;;  %v9716_v36 = vor.u32 %v11451_v22, %v9715_v19  ;;  %v9499_v39 = vld [vmem:[#allocation2 + $0x8] sm:$0xf]  ;;  %v9708_v47 = vor.u32 %v11448_v35, %v9707_v34 }
  0x37   :  { %1008 = vmatpush.bf16.msra.mxu1 %v9748_v5  ;;  %v9491_v28 = vld [vmem:[#allocation2] sm:$0xf]  ;;  %v9844_v37 = vor.u32 %v11483_v24, %v9843_v23  ;;  %v9493_v38 = vld [vmem:[#allocation2 + $0xc] sm:$0xf0]  ;;  %v11347_v40 = vld [vmem:[#allocation2 + $0x10] sm:$0xf0] }
  0x38   :  { %1057 = vmatpush.bf16.msra.mxu2 %v9876_v6  ;;  %1106 = vmatpush.bf16.msra.mxu3 %v9624_v10  ;;  %v11509_v43 = vld [vmem:[#allocation7 + $0x2e4] sm:$0xf]  ;;  %v9957_v44 = vld [vmem:[#allocation7 + $0x2f0] sm:$0xf0]  ;;  %v9835_v45 = vld [vmem:[#allocation7 + $0x1e8] sm:$0xf]  ;;  %v12367_v46 = vor.u32 %v11346_v29, %v9491_v28  ;;  %v12369_v51 = vor.u32 %v11345_v33, %v9493_v38  ;;  %v12371_v52 = vor.u32 %v11347_v40, %v9499_v39 }
  0x39   :  { %v11480_v48 = vld [vmem:[#allocation7 + $0x1f4] sm:$0xf0]  ;;  %v11473_v49 = vld [vmem:[#allocation7 + $0x1c4] sm:$0xf]  ;;  %v9813_v50 = vld [vmem:[#allocation7 + $0x1d0] sm:$0xf0]  ;;  %v9960_v55 = vor.u32 %v11509_v43, %v9957_v44 }
  0x3a   :  { %960 = vmatpush.bf16.msra.mxu0 %v9604_v16  ;;  %v9691_v53 = vld [vmem:[#allocation7 + $0xc8] sm:$0xf]  ;;  %v11444_v54 = vld [vmem:[#allocation7 + $0xd4] sm:$0xf0]  ;;  %v9836_v56 = vor.u32 %v11480_v48, %v9835_v45  ;;  %v9816_v57 = vor.u32 %v11473_v49, %v9813_v50  ;;  %v11505_v58 = vld [vmem:[#allocation7 + $0x2c4] sm:$0xf] }
  0x3b   :  { %1009 = vmatpush.bf16.msra.mxu1 %v9732_v20  ;;  %v9941_v59 = vld [vmem:[#allocation7 + $0x2d0] sm:$0xf0]  ;;  %v9692_v60 = vor.u32 %v11444_v54, %v9691_v53  ;;  %v9819_v61 = vld [vmem:[#allocation7 + $0x1c8] sm:$0xf]  ;;  %v11476_v62 = vld [vmem:[#allocation7 + $0x1d4] sm:$0xf0] }
  0x3c   :  { %1058 = vmatpush.bf16.msra.mxu2 %v9860_v21  ;;  %1107 = vmatpush.bf16.msra.mxu3 %v9608_v25  ;;  %v9944_v63 = vor.u32 %v11505_v58, %v9941_v59  ;;  %v11469_v0 = vld [vmem:[#allocation7 + $0x1a4] sm:$0xf]  ;;  %v9797_v1 = vld [vmem:[#allocation7 + $0x1b0] sm:$0xf0]  ;;  %v9675_v2 = vld [vmem:[#allocation7 + $0xa8] sm:$0xf]  ;;  %v9820_v3 = vor.u32 %v11476_v62, %v9819_v61 }
  0x3d   :  { %v9800_v4 = vor.u32 %v11469_v0, %v9797_v1  ;;  %v11440_v5 = vld [vmem:[#allocation7 + $0xb4] sm:$0xf0]  ;;  %v11501_v6 = vld [vmem:[#allocation7 + $0x2a4] sm:$0xf]  ;;  %v9925_v7 = vld [vmem:[#allocation7 + $0x2b0] sm:$0xf0] }
  0x3e   :  { %961 = vmatpush.bf16.msra.mxu0 %v9588_v32  ;;  %v9676_v8 = vor.u32 %v11440_v5, %v9675_v2  ;;  %v9803_v9 = vld [vmem:[#allocation7 + $0x1a8] sm:$0xf]  ;;  %v11472_v10 = vld [vmem:[#allocation7 + $0x1b4] sm:$0xf0]  ;;  %v9928_v11 = vor.u32 %v11501_v6, %v9925_v7  ;;  %v11349_v14 = vld [vmem:[#allocation2 + $0x20] sm:$0xf0] }
  0x3f   :  { %1010 = vmatpush.bf16.msra.mxu1 %v9716_v36  ;;  %v9804_v12 = vor.u32 %v11472_v10, %v9803_v9  ;;  %v9503_v13 = vld [vmem:[#allocation2 + $0x18] sm:$0xf]  ;;  %v11348_v15 = vld [vmem:[#allocation2 + $0x1c] sm:$0xf]  ;;  %v9505_v16 = vld [vmem:[#allocation2 + $0x24] sm:$0xf0] }
  0x40   :  { %1059 = vmatpush.bf16.msra.mxu2 %v9844_v37  ;;  %1108 = vmatpush.bf16.msra.mxu3 %v9592_v41  ;;  %v9511_v17 = vld [vmem:[#allocation2 + $0x20] sm:$0xf]  ;;  %v11350_v18 = vld [vmem:[#allocation2 + $0x28] sm:$0xf0]  ;;  %v12377_v19 = vor.u32 %v11349_v14, %v9503_v13  ;;  %v12379_v20 = vor.u32 %v11348_v15, %v9505_v16  ;;  %v11465_v22 = vld [vmem:[#allocation7 + $0x184] sm:$0xf] }
  0x41   :  { %962 = vmatmul.bf16.vlgmr.msra.gmra.mxu0 %v12367_v46  ;;  %v12381_v21 = vor.u32 %v11350_v18, %v9511_v17  ;;  %v9781_v23 = vld [vmem:[#allocation7 + $0x190] sm:$0xf0]  ;;  %v9659_v24 = vld [vmem:[#allocation7 + $0x88] sm:$0xf]  ;;  %v11436_v26 = vld [vmem:[#allocation7 + $0x94] sm:$0xf0] }
  0x42   :  { %1150 = vmatpush.bf16.msrb.mxu0 %v9832_v42  ;;  %1011 = vmatmul.bf16.vlgmr.msra.gmra.mxu1 %v12369_v51  ;;  %v9784_v25 = vor.u32 %v11465_v22, %v9781_v23  ;;  %v11497_v27 = vld [vmem:[#allocation7 + $0x284] sm:$0xf]  ;;  %v9909_v28 = vld [vmem:[#allocation7 + $0x290] sm:$0xf0]  ;;  %v9660_v29 = vor.u32 %v11436_v26, %v9659_v24  ;;  %v9787_v31 = vld [vmem:[#allocation7 + $0x188] sm:$0xf] }
  0x43   :  { %1060 = vmatmul.bf16.vlgmr.msra.gmra.mxu2 %v12371_v52  ;;  %1109 = vmatmul.bf16.vlgmr.msra.gmra.mxu3 %v12367_v46  ;;  %v9912_v30 = vor.u32 %v11497_v27, %v9909_v28  ;;  %v11468_v32 = vld [vmem:[#allocation7 + $0x194] sm:$0xf0]  ;;  %v9515_v34 = vld [vmem:[#allocation2 + $0x30] sm:$0xf]  ;;  %v11352_v35 = vld [vmem:[#allocation2 + $0x38] sm:$0xf0] }
  0x44   :  { %1248 = vmatpush.bf16.msrb.mxu2 %v9708_v47  ;;  %1199 = vmatpush.bf16.msrb.mxu1 %v9960_v55  ;;  %v9788_v33 = vor.u32 %v11468_v32, %v9787_v31  ;;  %v11351_v36 = vld [vmem:[#allocation2 + $0x34] sm:$0xf]  ;;  %v9517_v37 = vld [vmem:[#allocation2 + $0x3c] sm:$0xf0]  ;;  %v9523_v38 = vld [vmem:[#allocation2 + $0x38] sm:$0xf]  ;;  %v12387_v40 = vor.u32 %v11352_v35, %v9515_v34 }
  0x45   :  { %1297 = vmatpush.bf16.msrb.mxu3 %v9836_v56  ;;  %v11353_v39 = vld [vmem:[#allocation2 + $0x40] sm:$0xf0]  ;;  %v12389_v41 = vor.u32 %v11351_v36, %v9517_v37  ;;  %v9765_v44 = vld [vmem:[#allocation7 + $0x170] sm:$0xf0]  ;;  %v9643_v45 = vld [vmem:[#allocation7 + $0x68] sm:$0xf] }
  0x46   :  { %1151 = vmatpush.bf16.msrb.mxu0 %v9816_v57  ;;  %v12391_v42 = vor.u32 %v11353_v39, %v9523_v38  ;;  %v11461_v43 = vld [vmem:[#allocation7 + $0x164] sm:$0xf]  ;;  %v11432_v48 = vld [vmem:[#allocation7 + $0x74] sm:$0xf0]  ;;  %v9893_v50 = vld [vmem:[#allocation7 + $0x270] sm:$0xf0] }
  0x47   :  { %v9768_v47 = vor.u32 %v11461_v43, %v9765_v44  ;;  %v11493_v49 = vld [vmem:[#allocation7 + $0x264] sm:$0xf]  ;;  %v9644_v53 = vor.u32 %v11432_v48, %v9643_v45  ;;  %v9771_v55 = vld [vmem:[#allocation7 + $0x168] sm:$0xf]  ;;  %v11464_v56 = vld [vmem:[#allocation7 + $0x174] sm:$0xf0] }
  0x48   :  { %1249 = vmatpush.bf16.msrb.mxu2 %v9692_v60  ;;  %1200 = vmatpush.bf16.msrb.mxu1 %v9944_v63  ;;  %v9896_v54 = vor.u32 %v11493_v49, %v9893_v50  ;;  %v9772_v57 = vor.u32 %v11464_v56, %v9771_v55  ;;  %v9527_v58 = vld [vmem:[#allocation2 + $0x48] sm:$0xf]  ;;  %v11355_v59 = vld [vmem:[#allocation2 + $0x50] sm:$0xf0]  ;;  %v11354_v60 = vld [vmem:[#allocation2 + $0x4c] sm:$0xf] }
  0x49   :  { %1298 = vmatpush.bf16.msrb.mxu3 %v9820_v3  ;;  %v9529_v61 = vld [vmem:[#allocation2 + $0x54] sm:$0xf0]  ;;  %v9535_v62 = vld [vmem:[#allocation2 + $0x50] sm:$0xf]  ;;  %v11356_v63 = vld [vmem:[#allocation2 + $0x58] sm:$0xf0]  ;;  %v12397_v0 = vor.u32 %v11355_v59, %v9527_v58 }
  0x4a   :  { %1152 = vmatpush.bf16.msrb.mxu0 %v9800_v4  ;;  %v12399_v1 = vor.u32 %v11354_v60, %v9529_v61  ;;  %v12401_v2 = vor.u32 %v11356_v63, %v9535_v62  ;;  %v11457_v3 = vld [vmem:[#allocation7 + $0x144] sm:$0xf]  ;;  %v9749_v4 = vld [vmem:[#allocation7 + $0x150] sm:$0xf0]  ;;  %v9627_v5 = vld [vmem:[#allocation7 + $0x48] sm:$0xf] }
  0x4b   :  { %v9752_v6 = vor.u32 %v11457_v3, %v9749_v4  ;;  %v11428_v7 = vld [vmem:[#allocation7 + $0x54] sm:$0xf0]  ;;  %v9877_v9 = vld [vmem:[#allocation7 + $0x250] sm:$0xf0]  ;;  %v9539_v15 = vld [vmem:[#allocation2 + $0x60] sm:$0xf] }
  0x4c   :  { %1250 = vmatpush.bf16.msrb.mxu2 %v9676_v8  ;;  %1201 = vmatpush.bf16.msrb.mxu1 %v9928_v11  ;;  %v11489_v8 = vld [vmem:[#allocation7 + $0x244] sm:$0xf]  ;;  %v9628_v10 = vor.u32 %v11428_v7, %v9627_v5  ;;  %v11460_v13 = vld [vmem:[#allocation7 + $0x154] sm:$0xf0]  ;;  %v11358_v16 = vld [vmem:[#allocation2 + $0x68] sm:$0xf0] }
  0x4d   :  { %1299 = vmatpush.bf16.msrb.mxu3 %v9804_v12  ;;  %v9880_v11 = vor.u32 %v11489_v8, %v9877_v9  ;;  %v9755_v12 = vld [vmem:[#allocation7 + $0x148] sm:$0xf]  ;;  %v11357_v17 = vld [vmem:[#allocation2 + $0x64] sm:$0xf]  ;;  %v9541_v18 = vld [vmem:[#allocation2 + $0x6c] sm:$0xf0]  ;;  %v12407_v24 = vor.u32 %v11358_v16, %v9539_v15 }
  0x4e   :  { %1153 = vmatpush.bf16.msrb.mxu0 %v9784_v25  ;;  %v9756_v14 = vor.u32 %v11460_v13, %v9755_v12  ;;  %v9547_v22 = vld [vmem:[#allocation2 + $0x68] sm:$0xf]  ;;  %v11359_v23 = vld [vmem:[#allocation2 + $0x70] sm:$0xf0]  ;;  %v12409_v25 = vor.u32 %v11357_v17, %v9541_v18  ;;  %v11453_v27 = vld [vmem:[#allocation7 + $0x124] sm:$0xf] }
  0x4f   :  { %v12411_v26 = vor.u32 %v11359_v23, %v9547_v22  ;;  %v9733_v28 = vld [vmem:[#allocation7 + $0x130] sm:$0xf0]  ;;  %v11424_v31 = vld [vmem:[#allocation7 + $0x34] sm:$0xf0]  ;;  %v11485_v32 = vld [vmem:[#allocation7 + $0x224] sm:$0xf] }
  0x50   :  { %1251 = vmatpush.bf16.msrb.mxu2 %v9660_v29  ;;  %1202 = vmatpush.bf16.msrb.mxu1 %v9912_v30  ;;  %v9611_v29 = vld [vmem:[#allocation7 + $0x28] sm:$0xf]  ;;  %v9736_v30 = vor.u32 %v11453_v27, %v9733_v28  ;;  %v11456_v37 = vld [vmem:[#allocation7 + $0x134] sm:$0xf0]  ;;  %v11361_v43 = vld [vmem:[#allocation2 + $0x80] sm:$0xf0] }
  0x51   :  { %967 = vmatmul.bf16.gmra.mxu0 %v12377_v19  ;;  %1300 = vmatpush.bf16.msrb.mxu3 %v9788_v33  ;;  %v9861_v33 = vld [vmem:[#allocation7 + $0x230] sm:$0xf0]  ;;  %v9612_v34 = vor.u32 %v11424_v31, %v9611_v29  ;;  %v9739_v36 = vld [vmem:[#allocation7 + $0x128] sm:$0xf]  ;;  %v9551_v39 = vld [vmem:[#allocation2 + $0x78] sm:$0xf] }
  0x52   :  { %1016 = vmatmul.bf16.gmra.mxu1 %v12379_v20  ;;  %1154 = vmatpush.bf16.msrb.mxu0 %v9768_v47  ;;  %v9864_v35 = vor.u32 %v11485_v32, %v9861_v33  ;;  %v9740_v38 = vor.u32 %v11456_v37, %v9739_v36  ;;  %v11360_v44 = vld [vmem:[#allocation2 + $0x7c] sm:$0xf]  ;;  %v9553_v45 = vld [vmem:[#allocation2 + $0x84] sm:$0xf0]  ;;  %v9559_v47 = vld [vmem:[#allocation2 + $0x80] sm:$0xf]  ;;  %v12417_v49 = vor.u32 %v11361_v43, %v9551_v39 }
  0x53   :  { %1065 = vmatmul.bf16.gmra.mxu2 %v12381_v21  ;;  %1114 = vmatmul.bf16.gmra.mxu3 %v12377_v19  ;;  %v11362_v48 = vld [vmem:[#allocation2 + $0x88] sm:$0xf0]  ;;  %v12419_v50 = vor.u32 %v11360_v44, %v9553_v45  ;;  %v9717_v55 = vld [vmem:[#allocation7 + $0x110] sm:$0xf0]  ;;  %v9595_v56 = vld [vmem:[#allocation7 + $0x8] sm:$0xf] }
  0x54   :  { %1252 = vmatpush.bf16.msrb.mxu2 %v9644_v53  ;;  %1203 = vmatpush.bf16.msrb.mxu1 %v9896_v54  ;;  %v12421_v53 = vor.u32 %v11362_v48, %v9559_v47  ;;  %v11449_v54 = vld [vmem:[#allocation7 + $0x104] sm:$0xf]  ;;  %v11420_v58 = vld [vmem:[#allocation7 + $0x14] sm:$0xf0]  ;;  %v9845_v60 = vld [vmem:[#allocation7 + $0x210] sm:$0xf0] }
  0x55   :  { %1301 = vmatpush.bf16.msrb.mxu3 %v9772_v57  ;;  %16364 = vst [vmem:[#allocation20_spill] sm:$0xff] %v12419_v50  ;;  %v9720_v57 = vor.u32 %v11449_v54, %v9717_v55  ;;  %v11481_v59 = vld [vmem:[#allocation7 + $0x204] sm:$0xf]  ;;  %v9596_v61 = vor.u32 %v11420_v58, %v9595_v56  ;;  %v9723_v63 = vld [vmem:[#allocation7 + $0x108] sm:$0xf]  ;;  %vm5526_vm0 = vcmask 261120  }
  0x56   :  { %1155 = vmatpush.bf16.msrb.mxu0 %v9752_v6  ;;  %v9848_v62 = vor.u32 %v11481_v59, %v9845_v60  ;;  %v11452_v3 = vld [vmem:[#allocation7 + $0x114] sm:$0xf0]  ;;  %v9563_v5 = vld [vmem:[#allocation2 + $0x90] sm:$0xf]  ;;  %v11364_v6 = vld [vmem:[#allocation2 + $0x98] sm:$0xf0] }
  0x57   :  { %v9724_v4 = vor.u32 %v11452_v3, %v9723_v63  ;;  %v11363_v7 = vld [vmem:[#allocation2 + $0x94] sm:$0xf]  ;;  %v9565_v8 = vld [vmem:[#allocation2 + $0x9c] sm:$0xf0]  ;;  %v9571_v9 = vld [vmem:[#allocation2 + $0x98] sm:$0xf] }
  0x58   :  { %1253 = vmatpush.bf16.msrb.mxu2 %v9628_v10  ;;  %1204 = vmatpush.bf16.msrb.mxu1 %v9880_v11  ;;  %v11365_v10 = vld [vmem:[#allocation2 + $0xa0] sm:$0xf0]  ;;  %v12427_v11 = vor.u32 %v11364_v6, %v9563_v5  ;;  %v12429_v12 = vor.u32 %v11363_v7, %v9565_v8  ;;  %v11512_v15 = vld [vmem:[#allocation7 + $0x2f4] sm:$0xf0]  ;;  %v11478_v16 = vld [vmem:[#allocation7 + $0x1ec] sm:$0xf] }
  0x59   :  { %1302 = vmatpush.bf16.msrb.mxu3 %v9756_v14  ;;  %v12431_v13 = vor.u32 %v11365_v10, %v9571_v9  ;;  %v9963_v14 = vld [vmem:[#allocation7 + $0x2e8] sm:$0xf]  ;;  %v9837_v18 = vld [vmem:[#allocation7 + $0x1f8] sm:$0xf0]  ;;  %v11367_v27 = vld [vmem:[#allocation2 + $0xb0] sm:$0xf0] }
  0x5a   :  { %1156 = vmatpush.bf16.msrb.mxu0 %v9736_v30  ;;  %16365 = vst [vmem:[#allocation21_spill] sm:$0xff] %v12427_v11  ;;  %v9964_v17 = vor.u32 %v11512_v15, %v9963_v14  ;;  %v9840_v22 = vor.u32 %v11478_v16, %v9837_v18  ;;  %v9575_v23 = vld [vmem:[#allocation2 + $0xa8] sm:$0xf]  ;;  %v11446_v28 = vld [vmem:[#allocation7 + $0xec] sm:$0xf]  ;;  %s9473_s19 = sshll.u32 %s16074_s8, 4  ;;  %s9474_s19 = int_to_ptr.hbm [resolvable:$true] %s9473_s19 }
  0x5b   :  { %16366 = vst [vmem:[#allocation22_spill] sm:$0xff] %v12429_v12  ;;  %v9709_v29 = vld [vmem:[#allocation7 + $0xf8] sm:$0xf0]  ;;  %v11366_v30 = vld [vmem:[#allocation2 + $0xac] sm:$0xf]  ;;  %s12290_s20 = smov 384  }
  0x5c   :  { %1254 = vmatpush.bf16.msrb.mxu2 %v9612_v34  ;;  %1205 = vmatpush.bf16.msrb.mxu1 %v9864_v35  ;;  %16367 = vst [vmem:[#allocation23_spill] sm:$0xff] %v12431_v13  ;;  %v9712_v31 = vor.u32 %v11446_v28, %v9709_v29  ;;  %v11510_v32 = vld [vmem:[#allocation7 + $0x2ec] sm:$0xf]  ;;  %v9965_v33 = vld [vmem:[#allocation7 + $0x2f8] sm:$0xf0]  ;;  %s12291_s21 = smov 24  }
  0x5d   :  { %1303 = vmatpush.bf16.msrb.mxu3 %v9740_v38  ;;  %v9577_v34 = vld [vmem:[#allocation2 + $0xb4] sm:$0xf0]  ;;  %v9583_v35 = vld [vmem:[#allocation2 + $0xb0] sm:$0xf]  ;;  %v11368_v36 = vld [vmem:[#allocation2 + $0xb8] sm:$0xf0]  ;;  %v9968_v37 = vor.u32 %v11510_v32, %v9965_v33  ;;  %v12437_v38 = vor.u32 %v11367_v27, %v9575_v23 }
  0x5e   :  { %1157 = vmatpush.bf16.msrb.mxu0 %v9720_v57  ;;  %v12439_v39 = vor.u32 %v11366_v30, %v9577_v34  ;;  %v12441_v43 = vor.u32 %v11368_v36, %v9583_v35  ;;  %v9947_v44 = vld [vmem:[#allocation7 + $0x2c8] sm:$0xf]  ;;  %v11508_v45 = vld [vmem:[#allocation7 + $0x2d4] sm:$0xf0]  ;;  %v11474_v47 = vld [vmem:[#allocation7 + $0x1cc] sm:$0xf] }
  0x5f   :  { %16368 = vst [vmem:[#allocation24_spill] sm:$0xff] %v12437_v38  ;;  %v234_v48 = vld [vmem:[#allocation11] sm:$0x77]  ;;  %v9948_v54 = vor.u32 %v11508_v45, %v9947_v44  ;;  %v9821_v55 = vld [vmem:[#allocation7 + $0x1d8] sm:$0xf0] }
  0x60   :  { %1255 = vmatpush.bf16.msrb.mxu2 %v9596_v61  ;;  %1206 = vmatpush.bf16.msrb.mxu1 %v9848_v62  ;;  %16369 = vst [vmem:[#allocation25_spill] sm:$0xff] %v12439_v39  ;;  %v9824_v56 = vor.u32 %v11474_v47, %v9821_v55  ;;  %v334_v57 = vperm.slane %v234_v48, 0  ;;  %v11442_v58 = vld [vmem:[#allocation7 + $0xcc] sm:$0xf]  ;;  %v9693_v59 = vld [vmem:[#allocation7 + $0xd8] sm:$0xf0] }
  0x61   :  { %972 = vmatmul.bf16.gmra.mxu0 %v12387_v40  ;;  %1304 = vmatpush.bf16.msrb.mxu3 %v9724_v4  ;;  %16370 = vst [vmem:[#allocation26_spill] sm:$0xff] %v12441_v43  ;;  %v11506_v60 = vld [vmem:[#allocation7 + $0x2cc] sm:$0xf]  ;;  %v9696_v61 = vor.u32 %v11442_v58, %v9693_v59  ;;  %v9949_v62 = vld [vmem:[#allocation7 + $0x2d8] sm:$0xf0]  ;;  %v335_v5 = vperm.slane %v234_v48, 4 }
  0x62   :  { %1021 = vmatmul.bf16.gmra.mxu1 %v12389_v41  ;;  %1346 = vmatpush.bf16.msra.mxu0 %v9964_v17  ;;  %v12447_v63 = vperm.slane %v334_v57, 0  ;;  %v9952_v3 = vor.u32 %v11506_v60, %v9949_v62  ;;  %v9931_v10 = vld [vmem:[#allocation7 + $0x2a8] sm:$0xf]  ;;  %v11504_v14 = vld [vmem:[#allocation7 + $0x2b4] sm:$0xf0] }
  0x63   :  { %1070 = vmatmul.bf16.gmra.mxu2 %v12391_v42  ;;  %1119 = vmatmul.bf16.gmra.mxu3 %v12387_v40  ;;  %v12453_v9 = vperm.slane %v335_v5, 0  ;;  %v11470_v15 = vld [vmem:[#allocation7 + $0x1ac] sm:$0xf]  ;;  %v9932_v16 = vor.u32 %v11504_v14, %v9931_v10  ;;  %v9805_v17 = vld [vmem:[#allocation7 + $0x1b8] sm:$0xf0] }
  0x64   :  { %1444 = vmatpush.bf16.msra.mxu2 %v9840_v22  ;;  %1395 = vmatpush.bf16.msra.mxu1 %v9712_v31  ;;  %v9808_v22 = vor.u32 %v11470_v15, %v9805_v17  ;;  %v11438_v33 = vld [vmem:[#allocation7 + $0xac] sm:$0xf]  ;;  %v9677_v34 = vld [vmem:[#allocation7 + $0xb8] sm:$0xf0]  ;;  %v9915_v59 = vld [vmem:[#allocation7 + $0x288] sm:$0xf] }
  0x65   :  { %1493 = vmatpush.bf16.msra.mxu3 %v9968_v37  ;;  %v11502_v35 = vld [vmem:[#allocation7 + $0x2ac] sm:$0xf]  ;;  %v9680_v36 = vor.u32 %v11438_v33, %v9677_v34  ;;  %v9933_v37 = vld [vmem:[#allocation7 + $0x2b8] sm:$0xf0]  ;;  %v11500_v60 = vld [vmem:[#allocation7 + $0x294] sm:$0xf0] }
  0x66   :  { %1347 = vmatpush.bf16.msra.mxu0 %v9948_v54  ;;  %v9936_v44 = vor.u32 %v11502_v35, %v9933_v37  ;;  %v9916_v62 = vor.u32 %v11500_v60, %v9915_v59  ;;  %v11434_v17 = vld [vmem:[#allocation7 + $0x8c] sm:$0xf] }
  0x68   :  { %1445 = vmatpush.bf16.msra.mxu2 %v9824_v56  ;;  %1396 = vmatpush.bf16.msra.mxu1 %v9696_v61  ;;  %v11466_v61 = vld [vmem:[#allocation7 + $0x18c] sm:$0xf] }
  0x69   :  { %1494 = vmatpush.bf16.msra.mxu3 %v9952_v3  ;;  %v9789_v3 = vld [vmem:[#allocation7 + $0x198] sm:$0xf0] }
  0x6a   :  { %1348 = vmatpush.bf16.msra.mxu0 %v9932_v16  ;;  %v9792_v5 = vor.u32 %v11466_v61, %v9789_v3 }
  0x6c   :  { %1446 = vmatpush.bf16.msra.mxu2 %v9808_v22  ;;  %1397 = vmatpush.bf16.msra.mxu1 %v9680_v36  ;;  %v11498_v22 = vld [vmem:[#allocation7 + $0x28c] sm:$0xf] }
  0x6d   :  { %1495 = vmatpush.bf16.msra.mxu3 %v9936_v44 }
  0x6e   :  { %1349 = vmatpush.bf16.msra.mxu0 %v9916_v62 }
  0x70   :  { %1447 = vmatpush.bf16.msra.mxu2 %v9792_v5 }
  0x71   :  { %977 = vmatmul.bf16.gmra.mxu0 %v12397_v0 }
  0x72   :  { %1026 = vmatmul.bf16.gmra.mxu1 %v12399_v1 }
  0x73   :  { %1075 = vmatmul.bf16.gmra.mxu2 %v12401_v2  ;;  %1124 = vmatmul.bf16.gmra.mxu3 %v12397_v0 }
  0x81   :  { %982 = vmatmul.bf16.gmra.mxu0 %v12407_v24 }
  0x82   :  { %1031 = vmatmul.bf16.gmra.mxu1 %v12409_v25 }
  0x83   :  { %1080 = vmatmul.bf16.gmra.mxu2 %v12411_v26  ;;  %1129 = vmatmul.bf16.gmra.mxu3 %v12407_v24 }
  0x91   :  { %987 = vmatmul.bf16.gmra.mxu0 %v12417_v49 }
  0x92   :  { %1036 = vmatmul.bf16.gmra.mxu1 %v12419_v50 }
  0x93   :  { %1085 = vmatmul.bf16.gmra.mxu2 %v12421_v53  ;;  %1134 = vmatmul.bf16.gmra.mxu3 %v12417_v49 }
  0xa1   :  { %992 = vmatmul.bf16.gmra.mxu0 %v12427_v11 }
  0xa2   :  { %1041 = vmatmul.bf16.gmra.mxu1 %v12429_v12 }
  0xa3   :  { %1090 = vmatmul.bf16.gmra.mxu2 %v12431_v13  ;;  %1139 = vmatmul.bf16.gmra.mxu3 %v12427_v11 }
  0xb1   :  { %997 = vmatmul.bf16.gmra.mxu0 %v12437_v38 }
  0xb2   :  { %1046 = vmatmul.bf16.gmra.mxu1 %v12439_v39 }
  0xb3   :  { %1095 = vmatmul.bf16.gmra.mxu2 %v12441_v43  ;;  %1144 = vmatmul.bf16.gmra.mxu3 %v12437_v38 }
  0xbe   :  { %v963_v4 = vpop.f32.mrf.mxu0 }
  0xbf   :  { %v964_v6 = vadd.f32 %v963_v4, %v12447_v63  ;;  %v1012_v7 = vpop.f32.mrf.mxu1 }
  0xc1   :  { %v1013_v8 = vadd.f32 %v1012_v7, %v964_v6  ;;  %1158 = vmatmul.bf16.vlgmr.msrb.gmra.mxu0 %v12369_v51 }
  0xc2   :  { %1207 = vmatmul.bf16.vlgmr.msrb.gmra.mxu1 %v12371_v52 }
  0xc3   :  { %1256 = vmatmul.bf16.vlgmr.msrb.gmra.mxu2 %v12367_v46  ;;  %1305 = vmatmul.bf16.vlgmr.msrb.gmra.mxu3 %v12369_v51 }
  0xc6   :  { %v1061_v18 = vpop.f32.mrf.mxu2  ;;  %v1110_v27 = vpop.f32.mrf.mxu3 }
  0xc7   :  { %v12456_v23 = vadd.f32 %v1061_v18, %v1013_v8  ;;  %v965_v28 = vpop.f32.mrf.mxu0  ;;  %v12459_v29 = vadd.f32 %v1110_v27, %v12453_v9  ;;  %v1014_v31 = vpop.f32.mrf.mxu1  ;;  %v9661_v18 = vld [vmem:[#allocation7 + $0x98] sm:$0xf0] }
  0xc8   :  { %v966_v30 = vadd.f32 %v965_v28, %v12447_v63  ;;  %v9664_v27 = vor.u32 %v11434_v17, %v9661_v18  ;;  %v9917_v28 = vld [vmem:[#allocation7 + $0x298] sm:$0xf0] }
  0xc9   :  { %v9901_v17 = vld [vmem:[#allocation7 + $0x278] sm:$0xf0] }
  0xca   :  { %v1015_v32 = vadd.f32 %v1014_v31, %v966_v30  ;;  %v9920_v30 = vor.u32 %v11498_v22, %v9917_v28  ;;  %1398 = vmatpush.bf16.msra.mxu1 %v9664_v27 }
  0xcc   :  { %1496 = vmatpush.bf16.msra.mxu3 %v9920_v30 }
  0xce   :  { %v1063_v45 = vpop.f32.mrf.mxu2  ;;  %v1112_v48 = vpop.f32.mrf.mxu3 }
  0xcf   :  { %v12462_v47 = vadd.f32 %v1063_v45, %v1015_v32  ;;  %v968_v54 = vpop.f32.mrf.mxu0  ;;  %v12465_v55 = vadd.f32 %v1112_v48, %v12453_v9  ;;  %v1017_v57 = vpop.f32.mrf.mxu1  ;;  %v9899_v45 = vld [vmem:[#allocation7 + $0x268] sm:$0xf]  ;;  %v11496_v48 = vld [vmem:[#allocation7 + $0x274] sm:$0xf0] }
  0xd0   :  { %v969_v56 = vadd.f32 %v968_v54, %v12447_v63  ;;  %v11462_v54 = vld [vmem:[#allocation7 + $0x16c] sm:$0xf] }
  0xd1   :  { %1163 = vmatmul.bf16.gmra.mxu0 %v12379_v20 }
  0xd2   :  { %v1018_v58 = vadd.f32 %v1017_v57, %v969_v56  ;;  %1212 = vmatmul.bf16.gmra.mxu1 %v12381_v21  ;;  %v9900_v56 = vor.u32 %v11496_v48, %v9899_v45  ;;  %v9773_v57 = vld [vmem:[#allocation7 + $0x178] sm:$0xf0]  ;;  %v11458_v45 = vld [vmem:[#allocation7 + $0x14c] sm:$0xf] }
  0xd3   :  { %1261 = vmatmul.bf16.gmra.mxu2 %v12377_v19  ;;  %1310 = vmatmul.bf16.gmra.mxu3 %v12379_v20  ;;  %v9776_v59 = vor.u32 %v11462_v54, %v9773_v57  ;;  %v9757_v54 = vld [vmem:[#allocation7 + $0x158] sm:$0xf0] }
  0xd4   :  { %1350 = vmatpush.bf16.msra.mxu0 %v9900_v56  ;;  %v9760_v57 = vor.u32 %v11458_v45, %v9757_v54  ;;  %v9867_v45 = vld [vmem:[#allocation7 + $0x228] sm:$0xf]  ;;  %v11454_v54 = vld [vmem:[#allocation7 + $0x12c] sm:$0xf] }
  0xd5   :  { %1448 = vmatpush.bf16.msra.mxu2 %v9776_v59 }
  0xd6   :  { %v1066_v4 = vpop.f32.mrf.mxu2  ;;  %v1115_v7 = vpop.f32.mrf.mxu3 }
  0xd7   :  { %v12472_v6 = vadd.f32 %v1066_v4, %v1018_v58  ;;  %v970_v8 = vpop.f32.mrf.mxu0  ;;  %v12475_v10 = vadd.f32 %v1115_v7, %v12453_v9  ;;  %v1019_v15 = vpop.f32.mrf.mxu1 }
  0xd8   :  { %v971_v14 = vadd.f32 %v970_v8, %v12447_v63  ;;  %v11430_v8 = vld [vmem:[#allocation7 + $0x6c] sm:$0xf] }
  0xd9   :  { %1449 = vmatpush.bf16.msra.mxu2 %v9760_v57  ;;  %v9741_v57 = vld [vmem:[#allocation7 + $0x138] sm:$0xf0] }
  0xda   :  { %v1020_v16 = vadd.f32 %v1019_v15, %v971_v14  ;;  %v9645_v14 = vld [vmem:[#allocation7 + $0x78] sm:$0xf0]  ;;  %v11494_v15 = vld [vmem:[#allocation7 + $0x26c] sm:$0xf] }
  0xdb   :  { %v9904_v18 = vor.u32 %v11494_v15, %v9901_v17  ;;  %v11490_v15 = vld [vmem:[#allocation7 + $0x24c] sm:$0xf]  ;;  %v9885_v17 = vld [vmem:[#allocation7 + $0x258] sm:$0xf0] }
  0xdd   :  { %1497 = vmatpush.bf16.msra.mxu3 %v9904_v18  ;;  %v9888_v18 = vor.u32 %v11490_v15, %v9885_v17  ;;  %v11422_v17 = vld [vmem:[#allocation7 + $0x2c] sm:$0xf] }
  0xde   :  { %v1068_v31 = vpop.f32.mrf.mxu2  ;;  %v1117_v33 = vpop.f32.mrf.mxu3 }
  0xdf   :  { %v12478_v32 = vadd.f32 %v1068_v31, %v1020_v16  ;;  %v973_v34 = vpop.f32.mrf.mxu0  ;;  %v12481_v35 = vadd.f32 %v1117_v33, %v12453_v9  ;;  %v1022_v37 = vpop.f32.mrf.mxu1  ;;  %v9648_v16 = vor.u32 %v11430_v8, %v9645_v14  ;;  %v11426_v8 = vld [vmem:[#allocation7 + $0x4c] sm:$0xf]  ;;  %v9629_v14 = vld [vmem:[#allocation7 + $0x58] sm:$0xf0] }
  0xe0   :  { %v974_v36 = vadd.f32 %v973_v34, %v12447_v63 }
  0xe1   :  { %1168 = vmatmul.bf16.gmra.mxu0 %v12389_v41  ;;  %1399 = vmatpush.bf16.msra.mxu1 %v9648_v16  ;;  %v9632_v16 = vor.u32 %v11426_v8, %v9629_v14 }
  0xe2   :  { %v1023_v44 = vadd.f32 %v1022_v37, %v974_v36  ;;  %1217 = vmatmul.bf16.gmra.mxu1 %v12391_v42  ;;  %v9883_v37 = vld [vmem:[#allocation7 + $0x248] sm:$0xf]  ;;  %1498 = vmatpush.bf16.msra.mxu3 %v9888_v18  ;;  %v9613_v18 = vld [vmem:[#allocation7 + $0x38] sm:$0xf0] }
  0xe3   :  { %1266 = vmatmul.bf16.gmra.mxu2 %v12387_v40  ;;  %1315 = vmatmul.bf16.gmra.mxu3 %v12389_v41 }
  0xe5   :  { %1400 = vmatpush.bf16.msra.mxu1 %v9632_v16 }
  0xe6   :  { %v1071_v58 = vpop.f32.mrf.mxu2  ;;  %v1120_v61 = vpop.f32.mrf.mxu3 }
  0xe7   :  { %v12488_v60 = vadd.f32 %v1071_v58, %v1023_v44  ;;  %v975_v62 = vpop.f32.mrf.mxu0  ;;  %v12491_v3 = vadd.f32 %v1120_v61, %v12453_v9  ;;  %v1024_v5 = vpop.f32.mrf.mxu1  ;;  %v11492_v44 = vld [vmem:[#allocation7 + $0x254] sm:$0xf0] }
  0xe8   :  { %v976_v4 = vadd.f32 %v975_v62, %v12447_v63  ;;  %v9884_v48 = vor.u32 %v11492_v44, %v9883_v37 }
  0xea   :  { %v1025_v7 = vadd.f32 %v1024_v5, %v976_v4  ;;  %1351 = vmatpush.bf16.msra.mxu0 %v9884_v48  ;;  %v11488_v48 = vld [vmem:[#allocation7 + $0x234] sm:$0xf0] }
  0xee   :  { %v1073_v22 = vpop.f32.mrf.mxu2  ;;  %v1122_v28 = vpop.f32.mrf.mxu3 }
  0xef   :  { %v12494_v27 = vadd.f32 %v1073_v22, %v1025_v7  ;;  %v978_v30 = vpop.f32.mrf.mxu0  ;;  %v12497_v31 = vadd.f32 %v1122_v28, %v12453_v9  ;;  %v1027_v34 = vpop.f32.mrf.mxu1 }
  0xf0   :  { %v979_v33 = vadd.f32 %v978_v30, %v12447_v63 }
  0xf1   :  { %1173 = vmatmul.bf16.gmra.mxu0 %v12399_v1 }
  0xf2   :  { %v1028_v36 = vadd.f32 %v1027_v34, %v979_v33  ;;  %1222 = vmatmul.bf16.gmra.mxu1 %v12401_v2 }
  0xf3   :  { %1271 = vmatmul.bf16.gmra.mxu2 %v12397_v0  ;;  %1320 = vmatmul.bf16.gmra.mxu3 %v12399_v1 }
  0xf6   :  { %v1076_v56 = vpop.f32.mrf.mxu2  ;;  %v1125_v59 = vpop.f32.mrf.mxu3 }
  0xf7   :  { %v12504_v58 = vadd.f32 %v1076_v56, %v1028_v36  ;;  %v980_v61 = vpop.f32.mrf.mxu0  ;;  %v12507_v62 = vadd.f32 %v1125_v59, %v12453_v9  ;;  %v1029_v5 = vpop.f32.mrf.mxu1  ;;  %v9868_v56 = vor.u32 %v11488_v48, %v9867_v45 }
  0xf8   :  { %v981_v4 = vadd.f32 %v980_v61, %v12447_v63  ;;  %v9744_v61 = vor.u32 %v11454_v54, %v9741_v57 }
  0xf9   :  { %1352 = vmatpush.bf16.msra.mxu0 %v9868_v56 }
  0xfa   :  { %v1030_v7 = vadd.f32 %v1029_v5, %v981_v4  ;;  %1450 = vmatpush.bf16.msra.mxu2 %v9744_v61  ;;  %v9851_v61 = vld [vmem:[#allocation7 + $0x208] sm:$0xf] }
  0xfe   :  { %v1078_v22 = vpop.f32.mrf.mxu2  ;;  %v1127_v30 = vpop.f32.mrf.mxu3 }
  0xff   :  { %v12510_v28 = vadd.f32 %v1078_v22, %v1030_v7  ;;  %v983_v33 = vpop.f32.mrf.mxu0  ;;  %v12513_v34 = vadd.f32 %v1127_v30, %v12453_v9  ;;  %v1032_v37 = vpop.f32.mrf.mxu1  ;;  %v11486_v22 = vld [vmem:[#allocation7 + $0x22c] sm:$0xf]  ;;  %v9616_v30 = vor.u32 %v11422_v17, %v9613_v18 }
 0x100   :  { %v984_v36 = vadd.f32 %v983_v33, %v12447_v63  ;;  %v9869_v33 = vld [vmem:[#allocation7 + $0x238] sm:$0xf0] }
 0x101   :  { %1178 = vmatmul.bf16.gmra.mxu0 %v12409_v25  ;;  %1401 = vmatpush.bf16.msra.mxu1 %v9616_v30 }
 0x102   :  { %v1033_v44 = vadd.f32 %v1032_v37, %v984_v36  ;;  %1227 = vmatmul.bf16.gmra.mxu1 %v12411_v26  ;;  %v9872_v36 = vor.u32 %v11486_v22, %v9869_v33 }
 0x103   :  { %1276 = vmatmul.bf16.gmra.mxu2 %v12407_v24  ;;  %1325 = vmatmul.bf16.gmra.mxu3 %v12409_v25 }
 0x104   :  { %1499 = vmatpush.bf16.msra.mxu3 %v9872_v36 }
 0x106   :  { %v1081_v59 = vpop.f32.mrf.mxu2  ;;  %v1130_v5 = vpop.f32.mrf.mxu3 }
 0x107   :  { %v12520_v4 = vadd.f32 %v1081_v59, %v1033_v44  ;;  %v985_v7 = vpop.f32.mrf.mxu0  ;;  %v12523_v8 = vadd.f32 %v1130_v5, %v12453_v9  ;;  %v1034_v15 = vpop.f32.mrf.mxu1  ;;  %v11484_v5 = vld [vmem:[#allocation7 + $0x214] sm:$0xf0] }
 0x108   :  { %v986_v14 = vadd.f32 %v985_v7, %v12447_v63  ;;  %v11450_v7 = vld [vmem:[#allocation7 + $0x10c] sm:$0xf] }
 0x10a   :  { %v1035_v16 = vadd.f32 %v1034_v15, %v986_v14  ;;  %v9852_v14 = vor.u32 %v11484_v5, %v9851_v61  ;;  %v9725_v15 = vld [vmem:[#allocation7 + $0x118] sm:$0xf0] }
 0x10b   :  { %v9728_v17 = vor.u32 %v11450_v7, %v9725_v15  ;;  %v9853_v5 = vld [vmem:[#allocation7 + $0x218] sm:$0xf0] }
 0x10c   :  { %1353 = vmatpush.bf16.msra.mxu0 %v9852_v14 }
 0x10d   :  { %1451 = vmatpush.bf16.msra.mxu2 %v9728_v17 }
 0x10e   :  { %v1083_v37 = vpop.f32.mrf.mxu2  ;;  %v1132_v45 = vpop.f32.mrf.mxu3 }
 0x10f   :  { %v12526_v44 = vadd.f32 %v1083_v37, %v1035_v16  ;;  %v988_v48 = vpop.f32.mrf.mxu0  ;;  %v12529_v54 = vadd.f32 %v1132_v45, %v12453_v9  ;;  %v1037_v57 = vpop.f32.mrf.mxu1 }
 0x110   :  { %v989_v56 = vadd.f32 %v988_v48, %v12447_v63  ;;  %v11418_v48 = vld [vmem:[#allocation7 + $0xc] sm:$0xf] }
 0x111   :  { %1183 = vmatmul.bf16.gmra.mxu0 %v12419_v50 }
 0x112   :  { %v1038_v59 = vadd.f32 %v1037_v57, %v989_v56  ;;  %1232 = vmatmul.bf16.gmra.mxu1 %v12421_v53  ;;  %v9597_v56 = vld [vmem:[#allocation7 + $0x18] sm:$0xf0]  ;;  %v11482_v57 = vld [vmem:[#allocation7 + $0x20c] sm:$0xf] }
 0x113   :  { %1281 = vmatmul.bf16.gmra.mxu2 %v12417_v49  ;;  %1330 = vmatmul.bf16.gmra.mxu3 %v12419_v50  ;;  %v9600_v61 = vor.u32 %v11418_v48, %v9597_v56  ;;  %v9856_v50 = vor.u32 %v11482_v57, %v9853_v5  ;;  %v11543_v5 = vld [vmem:[#allocation8 + $0xec] sm:$0xf0] }
 0x115   :  { %1402 = vmatpush.bf16.msra.mxu1 %v9600_v61  ;;  %1500 = vmatpush.bf16.msra.mxu3 %v9856_v50  ;;  %v10275_v61 = vld [vmem:[#allocation8 + $0xe0] sm:$0xf] }
 0x116   :  { %v1086_v16 = vpop.f32.mrf.mxu2  ;;  %v1135_v22 = vpop.f32.mrf.mxu3 }
 0x117   :  { %v12536_v18 = vadd.f32 %v1086_v16, %v1038_v59  ;;  %v990_v30 = vpop.f32.mrf.mxu0  ;;  %v12539_v33 = vadd.f32 %v1135_v22, %v12453_v9  ;;  %v1039_v37 = vpop.f32.mrf.mxu1 }
 0x118   :  { %v991_v36 = vadd.f32 %v990_v30, %v12447_v63 }
 0x11a   :  { %v1040_v45 = vadd.f32 %v1039_v37, %v991_v36 }
 0x11e   :  { %v1088_v59 = vpop.f32.mrf.mxu2  ;;  %v1137_v14 = vpop.f32.mrf.mxu3 }
 0x11f   :  { %v12542_v7 = vadd.f32 %v1088_v59, %v1040_v45  ;;  %v993_v15 = vpop.f32.mrf.mxu0  ;;  %v12545_v16 = vadd.f32 %v1137_v14, %v12453_v9  ;;  %v1042_v17 = vpop.f32.mrf.mxu1  ;;  %v10531_v59 = vld [vmem:[#allocation8 + $0x2e0] sm:$0xf]  ;;  %v10276_v14 = vor.u32 %v11543_v5, %v10275_v61  ;;  %v11575_v5 = vld [vmem:[#allocation8 + $0x1ec] sm:$0xf0] }
 0x120   :  { %v994_v22 = vadd.f32 %v993_v15, %v12447_v63  ;;  %v11607_v15 = vld [vmem:[#allocation8 + $0x2ec] sm:$0xf0]  ;;  %v10403_v61 = vld [vmem:[#allocation8 + $0x1e0] sm:$0xf] }
 0x121   :  { %1188 = vmatmul.bf16.gmra.mxu0 %v12429_v12 }
 0x122   :  { %v1043_v30 = vadd.f32 %v1042_v17, %v994_v22  ;;  %1237 = vmatmul.bf16.gmra.mxu1 %v12431_v13  ;;  %v10532_v17 = vor.u32 %v11607_v15, %v10531_v59  ;;  %2386 = vmatpush.bf16.msrb.mxu0 %v10276_v14 }
 0x123   :  { %1286 = vmatmul.bf16.gmra.mxu2 %v12427_v11  ;;  %1335 = vmatmul.bf16.gmra.mxu3 %v12429_v12 }
 0x124   :  { %2564 = vmatpush.bf16.msrb.mxu2 %v10532_v17 }
 0x126   :  { %v1091_v50 = vpop.f32.mrf.mxu2  ;;  %v1140_v37 = vpop.f32.mrf.mxu3 }
 0x127   :  { %v12552_v36 = vadd.f32 %v1091_v50, %v1043_v30  ;;  %v995_v45 = vpop.f32.mrf.mxu0  ;;  %v12555_v48 = vadd.f32 %v1140_v37, %v12453_v9  ;;  %v1044_v57 = vpop.f32.mrf.mxu1 }
 0x128   :  { %v996_v56 = vadd.f32 %v995_v45, %v12447_v63 }
 0x129   :  { %16371 = vst [vmem:[#allocation27_spill] sm:$0xff] %v12552_v36 }
 0x12a   :  { %v1045_v22 = vadd.f32 %v1044_v57, %v996_v56  ;;  %v11541_v56 = vld [vmem:[#allocation8 + $0xe4] sm:$0xf]  ;;  %v10277_v57 = vld [vmem:[#allocation8 + $0xf0] sm:$0xf0] }
 0x12b   :  { %v10280_v59 = vor.u32 %v11541_v56, %v10277_v57 }
 0x12d   :  { %2653 = vmatpush.bf16.msrb.mxu3 %v10280_v59 }
 0x12e   :  { %v1093_v12 = vpop.f32.mrf.mxu2  ;;  %v1142_v50 = vpop.f32.mrf.mxu3 }
 0x12f   :  { %v12558_v30 = vadd.f32 %v1093_v12, %v1045_v22  ;;  %v998_v36 = vpop.f32.mrf.mxu0  ;;  %v12561_v37 = vadd.f32 %v1142_v50, %v12453_v9  ;;  %v1047_v11 = vpop.f32.mrf.mxu1  ;;  %v10404_v12 = vor.u32 %v11575_v5, %v10403_v61  ;;  %v10515_v61 = vld [vmem:[#allocation8 + $0x2c0] sm:$0xf] }
 0x130   :  { %v999_v45 = vadd.f32 %v998_v36, %v12447_v63 }
 0x131   :  { %1193 = vmatmul.bf16.gmra.mxu0 %v12439_v39  ;;  %2475 = vmatpush.bf16.msrb.mxu1 %v10404_v12  ;;  %v12574_v12 = vld [vmem:[#allocation11 + $0x8] sm:$0x77] }
 0x132   :  { %v1048_v13 = vadd.f32 %v1047_v11, %v999_v45  ;;  %1242 = vmatmul.bf16.gmra.mxu1 %v12441_v43  ;;  %v10259_v45 = vld [vmem:[#allocation8 + $0xc0] sm:$0xf]  ;;  %v11603_v43 = vld [vmem:[#allocation8 + $0x2cc] sm:$0xf0]  ;;  %16372 = vst [vmem:[#allocation28_spill] sm:$0xff] %v12574_v12 }
 0x133   :  { %1291 = vmatmul.bf16.gmra.mxu2 %v12437_v38  ;;  %1340 = vmatmul.bf16.gmra.mxu3 %v12439_v39  ;;  %v11539_v38 = vld [vmem:[#allocation8 + $0xcc] sm:$0xf0]  ;;  %v10516_v56 = vor.u32 %v11603_v43, %v10515_v61  ;;  %v10387_v43 = vld [vmem:[#allocation8 + $0x1c0] sm:$0xf] }
 0x134   :  { %v10260_v5 = vor.u32 %v11539_v38, %v10259_v45 }
 0x135   :  { %2565 = vmatpush.bf16.msrb.mxu2 %v10516_v56 }
 0x136   :  { %v1096_v14 = vpop.f32.mrf.mxu2  ;;  %v1145_v11 = vpop.f32.mrf.mxu3  ;;  %2387 = vmatpush.bf16.msrb.mxu0 %v10260_v5  ;;  %v10261_v5 = vld [vmem:[#allocation8 + $0xd0] sm:$0xf0] }
 0x137   :  { %v12568_v36 = vadd.f32 %v1096_v14, %v1048_v13  ;;  %v1000_v15 = vpop.f32.mrf.mxu0  ;;  %v12571_v22 = vadd.f32 %v1145_v11, %v12453_v9  ;;  %v1049_v50 = vpop.f32.mrf.mxu1  ;;  %v336_v11 = vperm.slane %v12574_v12, 0 }
 0x138   :  { %v1001_v17 = vadd.f32 %v1000_v15, %v12447_v63 }
 0x13a   :  { %v1050_v39 = vadd.f32 %v1049_v50, %v1001_v17  ;;  %v11571_v17 = vld [vmem:[#allocation8 + $0x1cc] sm:$0xf0]  ;;  %v11537_v50 = vld [vmem:[#allocation8 + $0xc4] sm:$0xf] }
 0x13b   :  { %v10388_v61 = vor.u32 %v11571_v17, %v10387_v43 }
 0x13d   :  { %2476 = vmatpush.bf16.msrb.mxu1 %v10388_v61 }
 0x13e   :  { %v1098_v13 = vpop.f32.mrf.mxu2  ;;  %v1147_v59 = vpop.f32.mrf.mxu3 }
 0x13f   :  { %v12576_v57 = vadd.f32 %v1098_v13, %v1050_v39  ;;  %v1159_v14 = vpop.f32.mrf.mxu0  ;;  %v12580_v63 = vadd.f32 %v1147_v59, %v12453_v9  ;;  %v1208_v38 = vpop.f32.mrf.mxu1  ;;  %v12586_v39 = vperm.slane %v336_v11, 0  ;;  %v11535_v11 = vld [vmem:[#allocation8 + $0xac] sm:$0xf0] }
 0x140   :  { %v1160_v15 = vadd.f32 %v1159_v14, %v12459_v29  ;;  %v10264_v29 = vor.u32 %v11537_v50, %v10261_v5 }
 0x141   :  { %16373 = vst [vmem:[#allocation29_spill] sm:$0xff] %v12576_v57  ;;  %1354 = vmatmul.bf16.vlgmr.msra.gmra.mxu0 %v12371_v52 }
 0x142   :  { %16374 = vst [vmem:[#allocation30_spill] sm:$0xff] %v12580_v63  ;;  %v1209_v45 = vadd.f32 %v1208_v38, %v1160_v15  ;;  %1403 = vmatmul.bf16.vlgmr.msra.gmra.mxu1 %v12367_v46  ;;  %2654 = vmatpush.bf16.msrb.mxu3 %v10264_v29  ;;  %v10499_v38 = vld [vmem:[#allocation8 + $0x2a0] sm:$0xf] }
 0x143   :  { %1452 = vmatmul.bf16.vlgmr.msra.gmra.mxu2 %v12369_v51  ;;  %1501 = vmatmul.bf16.vlgmr.msra.gmra.mxu3 %v12371_v52  ;;  %v10243_v51 = vld [vmem:[#allocation8 + $0xa0] sm:$0xf] }
 0x144   :  { %v5110_v9 = vpack.c.bf16 %v1209_v45, %v12456_v23  ;;  %v10244_v17 = vor.u32 %v11535_v11, %v10243_v51  ;;  %v11599_v23 = vld [vmem:[#allocation8 + $0x2ac] sm:$0xf0] }
 0x145   :  { %v10500_v52 = vor.u32 %v11599_v23, %v10499_v38  ;;  %v11567_v11 = vld [vmem:[#allocation8 + $0x1ac] sm:$0xf0]  ;;  %v11533_v38 = vld [vmem:[#allocation8 + $0xa4] sm:$0xf]  ;;  %v10245_v23 = vld [vmem:[#allocation8 + $0xb0] sm:$0xf0] }
 0x146   :  { %v1257_v56 = vpop.f32.mrf.mxu2  ;;  %v1306_v59 = vpop.f32.mrf.mxu3  ;;  %2388 = vmatpush.bf16.msrb.mxu0 %v10244_v17  ;;  %v5991_v50 = vrot.slane %v5110_v9, 4  ;;  %v5272_v5 = vunpack.c.l.b16 %v5110_v9 }
 0x147   :  { %v1258_v13 = vadd.f32 %v1257_v56, %v12586_v39  ;;  %v1161_v14 = vpop.f32.mrf.mxu0  ;;  %v1210_v15 = vpop.f32.mrf.mxu1  ;;  %2566 = vmatpush.bf16.msrb.mxu2 %v10500_v52 }
 0x148   :  { %v1162_v46 = vadd.f32 %v1161_v14, %v12465_v55  ;;  %v12596_v63 = vunpack.c.l.b16 %v5991_v50 }
 0x149   :  { %v12592_v43 = vadd.f32 %v1306_v59, %v1258_v13 }
 0x14a   :  { %v1211_v45 = vadd.f32 %v1210_v15, %v1162_v46  ;;  %16375 = vst [vmem:[#allocation31_spill] sm:$0xff] %v12596_v63 }
 0x14c   :  { %v5112_v61 = vpack.c.bf16 %v1211_v45, %v12462_v47  ;;  %v9991_v47 = vld [vmem:[#allocation5 + $0x20] sm:$0xf] }
 0x14e   :  { %v5273_v29 = vunpack.c.l.b16 %v5112_v61  ;;  %v5992_v56 = vrot.slane %v5112_v61, 4  ;;  %v1259_v57 = vpop.f32.mrf.mxu2  ;;  %v1308_v14 = vpop.f32.mrf.mxu3 }
 0x14f   :  { %v1260_v55 = vadd.f32 %v1259_v57, %v12586_v39  ;;  %v1164_v12 = vpop.f32.mrf.mxu0  ;;  %v1213_v15 = vpop.f32.mrf.mxu1  ;;  %v10371_v57 = vld [vmem:[#allocation8 + $0x1a0] sm:$0xf] }
 0x150   :  { %v12598_v13 = vpack.c.b16 %v5273_v29, %v5272_v5  ;;  %v12600_v59 = vunpack.c.l.b16 %v5992_v56  ;;  %v1165_v46 = vadd.f32 %v1164_v12, %v12475_v10  ;;  %v10372_v17 = vor.u32 %v11567_v11, %v10371_v57  ;;  %v11531_v56 = vld [vmem:[#allocation8 + $0x8c] sm:$0xf0] }
 0x151   :  { %v12603_v51 = vadd.f32 %v1308_v14, %v1260_v55  ;;  %1359 = vmatmul.bf16.gmra.mxu0 %v12381_v21  ;;  %v10248_v12 = vor.u32 %v11533_v38, %v10245_v23 }
 0x152   :  { %16376 = vst [vmem:[#allocation32_spill] sm:$0xff] %v12598_v13  ;;  %v1214_v9 = vadd.f32 %v1213_v15, %v1165_v46  ;;  %1408 = vmatmul.bf16.gmra.mxu1 %v12377_v19  ;;  %v10227_v19 = vld [vmem:[#allocation8 + $0x80] sm:$0xf] }
 0x153   :  { %16377 = vst [vmem:[#allocation33_spill] sm:$0xff] %v12600_v59  ;;  %1457 = vmatmul.bf16.gmra.mxu2 %v12379_v20  ;;  %1506 = vmatmul.bf16.gmra.mxu3 %v12381_v21  ;;  %v10483_v20 = vld [vmem:[#allocation8 + $0x280] sm:$0xf]  ;;  %v10228_v14 = vor.u32 %v11531_v56, %v10227_v19  ;;  %v11563_v56 = vld [vmem:[#allocation8 + $0x18c] sm:$0xf0] }
 0x154   :  { %v5114_v10 = vpack.c.bf16 %v1214_v9, %v12472_v6  ;;  %2477 = vmatpush.bf16.msrb.mxu1 %v10372_v17  ;;  %2655 = vmatpush.bf16.msrb.mxu3 %v10248_v12  ;;  %v11595_v6 = vld [vmem:[#allocation8 + $0x28c] sm:$0xf0]  ;;  %v10355_v19 = vld [vmem:[#allocation8 + $0x180] sm:$0xf] }
 0x155   :  { %v10484_v21 = vor.u32 %v11595_v6, %v10483_v20  ;;  %2389 = vmatpush.bf16.msrb.mxu0 %v10228_v14  ;;  %v11529_v20 = vld [vmem:[#allocation8 + $0x84] sm:$0xf]  ;;  %v10356_v14 = vor.u32 %v11563_v56, %v10355_v19  ;;  %v10229_v6 = vld [vmem:[#allocation8 + $0x90] sm:$0xf0] }
 0x156   :  { %v1262_v45 = vpop.f32.mrf.mxu2  ;;  %v1311_v50 = vpop.f32.mrf.mxu3  ;;  %v6023_v15 = vrot.slane %v5114_v10, 4  ;;  %v5304_v57 = vunpack.c.l.b16 %v5114_v10 }
 0x157   :  { %v1263_v52 = vadd.f32 %v1262_v45, %v12586_v39  ;;  %v1166_v61 = vpop.f32.mrf.mxu0  ;;  %v1215_v29 = vpop.f32.mrf.mxu1  ;;  %2567 = vmatpush.bf16.msrb.mxu2 %v10484_v21 }
 0x158   :  { %v1167_v5 = vadd.f32 %v1166_v61, %v12481_v35  ;;  %v12618_v45 = vunpack.c.l.b16 %v6023_v15  ;;  %2478 = vmatpush.bf16.msrb.mxu1 %v10356_v14 }
 0x159   :  { %v12614_v55 = vadd.f32 %v1311_v50, %v1263_v52 }
 0x15a   :  { %v1216_v46 = vadd.f32 %v1215_v29, %v1167_v5  ;;  %16378 = vst [vmem:[#allocation34_spill] sm:$0xff] %v12618_v45  ;;  %v11392_v45 = vld [vmem:[#allocation5 + $0xb8] sm:$0xf0] }
 0x15c   :  { %v5116_v9 = vpack.c.bf16 %v1216_v46, %v12478_v32  ;;  %v10232_v46 = vor.u32 %v11529_v20, %v10229_v6 }
 0x15e   :  { %v5305_v11 = vunpack.c.l.b16 %v5116_v9  ;;  %v6024_v38 = vrot.slane %v5116_v9, 4  ;;  %v1264_v17 = vpop.f32.mrf.mxu2  ;;  %v1313_v23 = vpop.f32.mrf.mxu3  ;;  %2656 = vmatpush.bf16.msrb.mxu3 %v10232_v46 }
 0x15f   :  { %v1265_v35 = vadd.f32 %v1264_v17, %v12586_v39  ;;  %v1169_v12 = vpop.f32.mrf.mxu0  ;;  %v1218_v5 = vpop.f32.mrf.mxu1  ;;  %v11527_v17 = vld [vmem:[#allocation8 + $0x6c] sm:$0xf0] }
 0x160   :  { %v12620_v52 = vpack.c.b16 %v5305_v11, %v5304_v57  ;;  %v12622_v50 = vunpack.c.l.b16 %v6024_v38  ;;  %v1170_v61 = vadd.f32 %v1169_v12, %v12491_v3 }
 0x161   :  { %v12625_v29 = vadd.f32 %v1313_v23, %v1265_v35  ;;  %1364 = vmatmul.bf16.gmra.mxu0 %v12391_v42 }
 0x162   :  { %16379 = vst [vmem:[#allocation35_spill] sm:$0xff] %v12620_v52  ;;  %v1219_v10 = vadd.f32 %v1218_v5, %v1170_v61  ;;  %1413 = vmatmul.bf16.gmra.mxu1 %v12387_v40  ;;  %v10211_v40 = vld [vmem:[#allocation8 + $0x60] sm:$0xf]  ;;  %v11552_v52 = vld [vmem:[#allocation8 + $0x134] sm:$0xf0] }
 0x163   :  { %16380 = vst [vmem:[#allocation36_spill] sm:$0xff] %v12622_v50  ;;  %1462 = vmatmul.bf16.gmra.mxu2 %v12389_v41  ;;  %1511 = vmatmul.bf16.gmra.mxu3 %v12391_v42  ;;  %v10467_v41 = vld [vmem:[#allocation8 + $0x260] sm:$0xf]  ;;  %v10212_v23 = vor.u32 %v11527_v17, %v10211_v40  ;;  %v11559_v40 = vld [vmem:[#allocation8 + $0x16c] sm:$0xf0] }
 0x164   :  { %v5118_v3 = vpack.c.bf16 %v1219_v10, %v12488_v60  ;;  %v11591_v60 = vld [vmem:[#allocation8 + $0x26c] sm:$0xf0]  ;;  %v11525_v17 = vld [vmem:[#allocation8 + $0x64] sm:$0xf] }
 0x165   :  { %v10468_v42 = vor.u32 %v11591_v60, %v10467_v41  ;;  %2390 = vmatpush.bf16.msrb.mxu0 %v10212_v23  ;;  %v10213_v23 = vld [vmem:[#allocation8 + $0x70] sm:$0xf0] }
 0x166   :  { %v1267_v21 = vpop.f32.mrf.mxu2  ;;  %v1316_v9 = vpop.f32.mrf.mxu3  ;;  %v6055_v61 = vrot.slane %v5118_v3, 4  ;;  %v5336_v10 = vunpack.c.l.b16 %v5118_v3  ;;  %v10216_v60 = vor.u32 %v11525_v17, %v10213_v23 }
 0x167   :  { %v1268_v15 = vadd.f32 %v1267_v21, %v12586_v39  ;;  %v1171_v57 = vpop.f32.mrf.mxu0  ;;  %v1220_v38 = vpop.f32.mrf.mxu1  ;;  %2568 = vmatpush.bf16.msrb.mxu2 %v10468_v42 }
 0x168   :  { %v1172_v11 = vadd.f32 %v1171_v57, %v12497_v31  ;;  %v12640_v46 = vunpack.c.l.b16 %v6055_v61  ;;  %2657 = vmatpush.bf16.msrb.mxu3 %v10216_v60 }
 0x169   :  { %v12636_v35 = vadd.f32 %v1316_v9, %v1268_v15 }
 0x16a   :  { %v1221_v12 = vadd.f32 %v1220_v38, %v1172_v11  ;;  %16381 = vst [vmem:[#allocation37_spill] sm:$0xff] %v12640_v46  ;;  %v10339_v38 = vld [vmem:[#allocation8 + $0x160] sm:$0xf] }
 0x16b   :  { %v10340_v41 = vor.u32 %v11559_v40, %v10339_v38 }
 0x16c   :  { %v5120_v5 = vpack.c.bf16 %v1221_v12, %v12494_v27  ;;  %v9985_v27 = vld [vmem:[#allocation5 + $0x24] sm:$0xf0] }
 0x16d   :  { %2479 = vmatpush.bf16.msrb.mxu1 %v10340_v41 }
 0x16e   :  { %v5337_v19 = vunpack.c.l.b16 %v5120_v5  ;;  %v6056_v56 = vrot.slane %v5120_v5, 4  ;;  %v1269_v20 = vpop.f32.mrf.mxu2  ;;  %v1318_v14 = vpop.f32.mrf.mxu3 }
 0x16f   :  { %v1270_v31 = vadd.f32 %v1269_v20, %v12586_v39  ;;  %v1174_v6 = vpop.f32.mrf.mxu0  ;;  %v1223_v57 = vpop.f32.mrf.mxu1 }
 0x170   :  { %v12642_v21 = vpack.c.b16 %v5337_v19, %v5336_v10  ;;  %v12644_v15 = vunpack.c.l.b16 %v6056_v56  ;;  %v1175_v9 = vadd.f32 %v1174_v6, %v12507_v62  ;;  %v11523_v56 = vld [vmem:[#allocation8 + $0x4c] sm:$0xf0] }
 0x171   :  { %v12647_v11 = vadd.f32 %v1318_v14, %v1270_v31  ;;  %1369 = vmatmul.bf16.gmra.mxu0 %v12401_v2 }
 0x172   :  { %16382 = vst [vmem:[#allocation38_spill] sm:$0xff] %v12642_v21  ;;  %v1224_v3 = vadd.f32 %v1223_v57, %v1175_v9  ;;  %1418 = vmatmul.bf16.gmra.mxu1 %v12397_v0  ;;  %v10195_v0 = vld [vmem:[#allocation8 + $0x40] sm:$0xf]  ;;  %v11403_v21 = vld [vmem:[#allocation5 + $0x110] sm:$0xf0] }
 0x173   :  { %16383 = vst [vmem:[#allocation39_spill] sm:$0xff] %v12644_v15  ;;  %1467 = vmatmul.bf16.gmra.mxu2 %v12399_v1  ;;  %1516 = vmatmul.bf16.gmra.mxu3 %v12401_v2  ;;  %v10451_v1 = vld [vmem:[#allocation8 + $0x240] sm:$0xf]  ;;  %v10196_v31 = vor.u32 %v11523_v56, %v10195_v0  ;;  %v11521_v0 = vld [vmem:[#allocation8 + $0x44] sm:$0xf] }
 0x174   :  { %v5122_v62 = vpack.c.bf16 %v1224_v3, %v12504_v58  ;;  %v11587_v58 = vld [vmem:[#allocation8 + $0x24c] sm:$0xf0] }
 0x175   :  { %v10452_v2 = vor.u32 %v11587_v58, %v10451_v1  ;;  %2391 = vmatpush.bf16.msrb.mxu0 %v10196_v31  ;;  %v10197_v1 = vld [vmem:[#allocation8 + $0x50] sm:$0xf0] }
 0x176   :  { %v1272_v12 = vpop.f32.mrf.mxu2  ;;  %v1321_v61 = vpop.f32.mrf.mxu3  ;;  %v6087_v6 = vrot.slane %v5122_v62, 4  ;;  %v5368_v57 = vunpack.c.l.b16 %v5122_v62  ;;  %v10200_v31 = vor.u32 %v11521_v0, %v10197_v1 }
 0x177   :  { %v1273_v42 = vadd.f32 %v1272_v12, %v12586_v39  ;;  %v1176_v5 = vpop.f32.mrf.mxu0  ;;  %v1225_v19 = vpop.f32.mrf.mxu1  ;;  %2569 = vmatpush.bf16.msrb.mxu2 %v10452_v2 }
 0x178   :  { %v1177_v10 = vadd.f32 %v1176_v5, %v12513_v34  ;;  %v12662_v23 = vunpack.c.l.b16 %v6087_v6  ;;  %2658 = vmatpush.bf16.msrb.mxu3 %v10200_v31 }
 0x179   :  { %v12658_v20 = vadd.f32 %v1321_v61, %v1273_v42 }
 0x17a   :  { %v1226_v14 = vadd.f32 %v1225_v19, %v1177_v10  ;;  %16384 = vst [vmem:[#allocation40_spill] sm:$0xff] %v12662_v23  ;;  %v10323_v10 = vld [vmem:[#allocation8 + $0x140] sm:$0xf]  ;;  %v11555_v19 = vld [vmem:[#allocation8 + $0x14c] sm:$0xf0] }
 0x17b   :  { %v10324_v56 = vor.u32 %v11555_v19, %v10323_v10  ;;  %v11564_v23 = vld [vmem:[#allocation8 + $0x194] sm:$0xf0] }
 0x17c   :  { %v5124_v9 = vpack.c.bf16 %v1226_v14, %v12510_v28 }
 0x17d   :  { %2480 = vmatpush.bf16.msrb.mxu1 %v10324_v56 }
 0x17e   :  { %v5369_v3 = vunpack.c.l.b16 %v5124_v9  ;;  %v6088_v38 = vrot.slane %v5124_v9, 4  ;;  %v1274_v40 = vpop.f32.mrf.mxu2  ;;  %v1323_v17 = vpop.f32.mrf.mxu3 }
 0x17f   :  { %v1275_v34 = vadd.f32 %v1274_v40, %v12586_v39  ;;  %v1179_v41 = vpop.f32.mrf.mxu0  ;;  %v1228_v61 = vpop.f32.mrf.mxu1 }
 0x180   :  { %v12664_v60 = vpack.c.b16 %v5369_v3, %v5368_v57  ;;  %v12666_v12 = vunpack.c.l.b16 %v6088_v38  ;;  %v1180_v42 = vadd.f32 %v1179_v41, %v12523_v8  ;;  %v11519_v3 = vld [vmem:[#allocation8 + $0x2c] sm:$0xf0] }
 0x181   :  { %v12669_v5 = vadd.f32 %v1323_v17, %v1275_v34  ;;  %1374 = vmatmul.bf16.gmra.mxu0 %v12411_v26 }
 0x182   :  { %16385 = vst [vmem:[#allocation41_spill] sm:$0xff] %v12664_v60  ;;  %v1229_v62 = vadd.f32 %v1228_v61, %v1180_v42  ;;  %1423 = vmatmul.bf16.gmra.mxu1 %v12407_v24  ;;  %v10179_v24 = vld [vmem:[#allocation8 + $0x20] sm:$0xf]  ;;  %v10315_v60 = vld [vmem:[#allocation8 + $0x128] sm:$0xf] }
 0x183   :  { %16386 = vst [vmem:[#allocation42_spill] sm:$0xff] %v12666_v12  ;;  %1472 = vmatmul.bf16.gmra.mxu2 %v12409_v25  ;;  %1521 = vmatmul.bf16.gmra.mxu3 %v12411_v26  ;;  %v10435_v25 = vld [vmem:[#allocation8 + $0x220] sm:$0xf]  ;;  %v10180_v40 = vor.u32 %v11519_v3, %v10179_v24  ;;  %v16390_v24 = vld [vmem:[#allocation20_spill] sm:$0xff] }
 0x184   :  { %v5126_v8 = vpack.c.bf16 %v1229_v62, %v12520_v4  ;;  %v11583_v4 = vld [vmem:[#allocation8 + $0x22c] sm:$0xf0] }
 0x185   :  { %v10436_v26 = vor.u32 %v11583_v4, %v10435_v25  ;;  %2392 = vmatpush.bf16.msrb.mxu0 %v10180_v40  ;;  %v10181_v25 = vld [vmem:[#allocation8 + $0x30] sm:$0xf0] }
 0x186   :  { %v1277_v58 = vpop.f32.mrf.mxu2  ;;  %v1326_v2 = vpop.f32.mrf.mxu3  ;;  %v6119_v17 = vrot.slane %v5126_v8, 4  ;;  %v5400_v42 = vunpack.c.l.b16 %v5126_v8 }
 0x187   :  { %v1278_v14 = vadd.f32 %v1277_v58, %v12586_v39  ;;  %v1181_v6 = vpop.f32.mrf.mxu0  ;;  %v1230_v57 = vpop.f32.mrf.mxu1  ;;  %2570 = vmatpush.bf16.msrb.mxu2 %v10436_v26 }
 0x188   :  { %v1182_v9 = vadd.f32 %v1181_v6, %v12529_v54  ;;  %v12684_v56 = vunpack.c.l.b16 %v6119_v17  ;;  %v10307_v6 = vld [vmem:[#allocation8 + $0x120] sm:$0xf] }
 0x189   :  { %v12680_v38 = vadd.f32 %v1326_v2, %v1278_v14 }
 0x18a   :  { %v1231_v34 = vadd.f32 %v1230_v57, %v1182_v9  ;;  %16387 = vst [vmem:[#allocation43_spill] sm:$0xff] %v12684_v56  ;;  %v11551_v9 = vld [vmem:[#allocation8 + $0x12c] sm:$0xf0]  ;;  %v11517_v57 = vld [vmem:[#allocation8 + $0x24] sm:$0xf] }
 0x18b   :  { %v10308_v3 = vor.u32 %v11551_v9, %v10307_v6  ;;  %v10184_v40 = vor.u32 %v11517_v57, %v10181_v25  ;;  %v11547_v57 = vld [vmem:[#allocation8 + $0x10c] sm:$0xf0]  ;;  %v10347_v56 = vld [vmem:[#allocation8 + $0x168] sm:$0xf] }
 0x18c   :  { %v5128_v41 = vpack.c.bf16 %v1231_v34, %v12526_v44 }
 0x18d   :  { %2481 = vmatpush.bf16.msrb.mxu1 %v10308_v3  ;;  %2659 = vmatpush.bf16.msrb.mxu3 %v10184_v40 }
 0x18e   :  { %v5401_v61 = vunpack.c.l.b16 %v5128_v41  ;;  %v6120_v62 = vrot.slane %v5128_v41, 4  ;;  %v1279_v10 = vpop.f32.mrf.mxu2  ;;  %v1328_v19 = vpop.f32.mrf.mxu3 }
 0x18f   :  { %v1280_v54 = vadd.f32 %v1279_v10, %v12586_v39  ;;  %v1184_v0 = vpop.f32.mrf.mxu0  ;;  %v1233_v14 = vpop.f32.mrf.mxu1 }
 0x190   :  { %v12686_v1 = vpack.c.b16 %v5401_v61, %v5400_v42  ;;  %v12688_v31 = vunpack.c.l.b16 %v6120_v62  ;;  %v1185_v58 = vadd.f32 %v1184_v0, %v12539_v33  ;;  %v11515_v61 = vld [vmem:[#allocation8 + $0xc] sm:$0xf0]  ;;  %v10419_v62 = vld [vmem:[#allocation8 + $0x200] sm:$0xf] }
 0x191   :  { %v12691_v2 = vadd.f32 %v1328_v19, %v1280_v54  ;;  %1379 = vmatmul.bf16.gmra.mxu0 %v12421_v53 }
 0x192   :  { %16388 = vst [vmem:[#allocation44_spill] sm:$0xff] %v12686_v1  ;;  %v1234_v8 = vadd.f32 %v1233_v14, %v1185_v58  ;;  %1428 = vmatmul.bf16.gmra.mxu1 %v12417_v49  ;;  %v10163_v49 = vld [vmem:[#allocation8] sm:$0xf]  ;;  %v10437_v1 = vld [vmem:[#allocation8 + $0x230] sm:$0xf0] }
 0x193   :  { %16389 = vst [vmem:[#allocation45_spill] sm:$0xff] %v12688_v31  ;;  %1477 = vmatmul.bf16.gmra.mxu2 %v16390_v24  ;;  %1526 = vmatmul.bf16.gmra.mxu3 %v12421_v53  ;;  %v10164_v54 = vor.u32 %v11515_v61, %v10163_v49  ;;  %v10063_v31 = vld [vmem:[#allocation5 + $0xb0] sm:$0xf] }
 0x194   :  { %v5130_v33 = vpack.c.bf16 %v1234_v8, %v12536_v18  ;;  %v11579_v18 = vld [vmem:[#allocation8 + $0x20c] sm:$0xf0] }
 0x195   :  { %v10420_v53 = vor.u32 %v11579_v18, %v10419_v62  ;;  %2393 = vmatpush.bf16.msrb.mxu0 %v10164_v54  ;;  %v16394_v54 = vld [vmem:[#allocation23_spill] sm:$0xff]  ;;  %v16395_v18 = vld [vmem:[#allocation21_spill] sm:$0xff] }
 0x196   :  { %v1282_v4 = vpop.f32.mrf.mxu2  ;;  %v1331_v26 = vpop.f32.mrf.mxu3  ;;  %v6151_v0 = vrot.slane %v5130_v33, 4  ;;  %v5432_v14 = vunpack.c.l.b16 %v5130_v33 }
 0x197   :  { %v1283_v34 = vadd.f32 %v1282_v4, %v12586_v39  ;;  %v1186_v17 = vpop.f32.mrf.mxu0  ;;  %v1235_v42 = vpop.f32.mrf.mxu1  ;;  %2571 = vmatpush.bf16.msrb.mxu2 %v10420_v53  ;;  %v16397_v53 = vld [vmem:[#allocation27_spill] sm:$0xff] }
 0x198   :  { %v1187_v41 = vadd.f32 %v1186_v17, %v12545_v16  ;;  %v10291_v16 = vld [vmem:[#allocation8 + $0x100] sm:$0xf]  ;;  %v12705_v24 = vunpack.c.l.b16 %v6151_v0 }
 0x199   :  { %v12702_v10 = vadd.f32 %v1331_v26, %v1283_v34  ;;  %v10292_v4 = vor.u32 %v11547_v57, %v10291_v16  ;;  %v11513_v34 = vld [vmem:[#allocation8 + $0x4] sm:$0xf]  ;;  %v10165_v26 = vld [vmem:[#allocation8 + $0x10] sm:$0xf0] }
 0x19a   :  { %v1236_v19 = vadd.f32 %v1235_v42, %v1187_v41  ;;  %16391 = vst [vmem:[#allocation20_spill] sm:$0xff] %v12705_v24  ;;  %v10168_v42 = vor.u32 %v11513_v34, %v10165_v26  ;;  %v11572_v24 = vld [vmem:[#allocation8 + $0x1d4] sm:$0xf0] }
 0x19b   :  { %2482 = vmatpush.bf16.msrb.mxu1 %v10292_v4 }
 0x19c   :  { %v5132_v58 = vpack.c.bf16 %v1236_v19, %v12542_v7  ;;  %2660 = vmatpush.bf16.msrb.mxu3 %v10168_v42  ;;  %v16396_v19 = vld [vmem:[#allocation22_spill] sm:$0xff] }
 0x19e   :  { %v5433_v8 = vunpack.c.l.b16 %v5132_v58  ;;  %v6152_v6 = vrot.slane %v5132_v58, 4  ;;  %v1284_v9 = vpop.f32.mrf.mxu2  ;;  %v1333_v25 = vpop.f32.mrf.mxu3  ;;  %v10405_v58 = vld [vmem:[#allocation8 + $0x1f0] sm:$0xf0] }
 0x19f   :  { %v1285_v3 = vadd.f32 %v1284_v9, %v12586_v39  ;;  %v1189_v40 = vpop.f32.mrf.mxu0  ;;  %v1238_v33 = vpop.f32.mrf.mxu1 }
 0x1a0   :  { %v12708_v17 = vpack.c.b16 %v5433_v8, %v5432_v14  ;;  %v12710_v41 = vunpack.c.l.b16 %v6152_v6  ;;  %v1190_v7 = vadd.f32 %v1189_v40, %v12555_v48  ;;  %v11573_v48 = vld [vmem:[#allocation8 + $0x1e4] sm:$0xf]  ;;  %v10283_v8 = vld [vmem:[#allocation8 + $0xe8] sm:$0xf]  ;;  %v11544_v6 = vld [vmem:[#allocation8 + $0xf4] sm:$0xf0] }
 0x1a1   :  { %v12713_v49 = vadd.f32 %v1333_v25, %v1285_v3  ;;  %1384 = vmatmul.bf16.gmra.mxu0 %v16394_v54  ;;  %v10408_v14 = vor.u32 %v11573_v48, %v10405_v58  ;;  %v10284_v16 = vor.u32 %v11544_v6, %v10283_v8  ;;  %v10411_v8 = vld [vmem:[#allocation8 + $0x1e8] sm:$0xf] }
 0x1a2   :  { %16392 = vst [vmem:[#allocation46_spill] sm:$0xff] %v12708_v17  ;;  %v1239_v62 = vadd.f32 %v1238_v33, %v1190_v7  ;;  %1433 = vmatmul.bf16.gmra.mxu1 %v16395_v18  ;;  %v11581_v17 = vld [vmem:[#allocation8 + $0x224] sm:$0xf] }
 0x1a3   :  { %16393 = vst [vmem:[#allocation47_spill] sm:$0xff] %v12710_v41  ;;  %1482 = vmatmul.bf16.gmra.mxu2 %v16396_v19  ;;  %1531 = vmatmul.bf16.gmra.mxu3 %v16394_v54  ;;  %v11380_v41 = vld [vmem:[#allocation5 + $0x58] sm:$0xf0] }
 0x1a4   :  { %v5134_v0 = vpack.c.bf16 %v1239_v62, %v16397_v53  ;;  %2742 = vmatpush.bf16.msra.mxu0 %v10408_v14  ;;  %2920 = vmatpush.bf16.msra.mxu2 %v10284_v16  ;;  %v11605_v14 = vld [vmem:[#allocation8 + $0x2e4] sm:$0xf] }
 0x1a6   :  { %v1287_v9 = vpop.f32.mrf.mxu2  ;;  %v1336_v3 = vpop.f32.mrf.mxu3  ;;  %v6183_v7 = vrot.slane %v5134_v0, 4  ;;  %v5464_v42 = vunpack.c.l.b16 %v5134_v0 }
 0x1a7   :  { %v1288_v57 = vadd.f32 %v1287_v9, %v12586_v39  ;;  %v1191_v25 = vpop.f32.mrf.mxu0  ;;  %v1240_v4 = vpop.f32.mrf.mxu1 }
 0x1a8   :  { %v1192_v40 = vadd.f32 %v1191_v25, %v12561_v37  ;;  %v12727_v19 = vunpack.c.l.b16 %v6183_v7  ;;  %v10533_v37 = vld [vmem:[#allocation8 + $0x2f0] sm:$0xf0] }
 0x1a9   :  { %v12724_v34 = vadd.f32 %v1336_v3, %v1288_v57  ;;  %v10536_v0 = vor.u32 %v11605_v14, %v10533_v37  ;;  %v11576_v57 = vld [vmem:[#allocation8 + $0x1f4] sm:$0xf0]  ;;  %v16402_v7 = vld [vmem:[#allocation24_spill] sm:$0xff] }
 0x1aa   :  { %v1241_v26 = vadd.f32 %v1240_v4, %v1192_v40  ;;  %16398 = vst [vmem:[#allocation23_spill] sm:$0xff] %v12727_v19  ;;  %v10412_v25 = vor.u32 %v11576_v57, %v10411_v8  ;;  %v9971_v8 = vld [vmem:[#allocation5] sm:$0xf]  ;;  %v11369_v57 = vld [vmem:[#allocation5 + $0x4] sm:$0xf] }
 0x1ab   :  { %2831 = vmatpush.bf16.msra.mxu1 %v10536_v0  ;;  %v11568_v19 = vld [vmem:[#allocation8 + $0x1b4] sm:$0xf0] }
 0x1ac   :  { %v5136_v33 = vpack.c.bf16 %v1241_v26, %v12558_v30  ;;  %v16401_v26 = vld [vmem:[#allocation26_spill] sm:$0xff]  ;;  %3009 = vmatpush.bf16.msra.mxu3 %v10412_v25 }
 0x1ae   :  { %v5465_v62 = vunpack.c.l.b16 %v5136_v33  ;;  %v6184_v54 = vrot.slane %v5136_v33, 4  ;;  %v1289_v18 = vpop.f32.mrf.mxu2  ;;  %v1338_v48 = vpop.f32.mrf.mxu3  ;;  %v16403_v33 = vld [vmem:[#allocation25_spill] sm:$0xff] }
 0x1af   :  { %v1290_v53 = vadd.f32 %v1289_v18, %v12586_v39  ;;  %v1194_v58 = vpop.f32.mrf.mxu0  ;;  %v1243_v30 = vpop.f32.mrf.mxu1 }
 0x1b0   :  { %v12730_v6 = vpack.c.b16 %v5465_v62, %v5464_v42  ;;  %v12732_v9 = vunpack.c.l.b16 %v6184_v54  ;;  %v1195_v16 = vadd.f32 %v1194_v58, %v12571_v22 }
 0x1b1   :  { %v12735_v3 = vadd.f32 %v1338_v48, %v1290_v53  ;;  %1389 = vmatmul.bf16.gmra.mxu0 %v16401_v26  ;;  %v16404_v53 = vld [vmem:[#allocation30_spill] sm:$0xff] }
 0x1b2   :  { %16399 = vst [vmem:[#allocation21_spill] sm:$0xff] %v12730_v6  ;;  %v1244_v4 = vadd.f32 %v1243_v30, %v1195_v16  ;;  %1438 = vmatmul.bf16.gmra.mxu1 %v16402_v7  ;;  %v11370_v16 = vld [vmem:[#allocation5 + $0x8] sm:$0xf0]  ;;  %v16405_v30 = vld [vmem:[#allocation28_spill] sm:$0xff]  ;;  %v9979_v7 = vld [vmem:[#allocation5 + $0x8] sm:$0xf] }
 0x1b3   :  { %16400 = vst [vmem:[#allocation22_spill] sm:$0xff] %v12732_v9  ;;  %1487 = vmatmul.bf16.gmra.mxu2 %v16403_v33  ;;  %1536 = vmatmul.bf16.gmra.mxu3 %v16401_v26  ;;  %v337_v0 = vperm.slane %v16405_v30, 4  ;;  %v16406_v26 = vld [vmem:[#allocation29_spill] sm:$0xff]  ;;  %v11371_v33 = vld [vmem:[#allocation5 + $0x10] sm:$0xf0] }
 0x1b4   :  { %v5138_v42 = vpack.c.bf16 %v1244_v4, %v12568_v36  ;;  %v9973_v36 = vld [vmem:[#allocation5 + $0xc] sm:$0xf0]  ;;  %v12757_v30 = vor.u32 %v11371_v33, %v9979_v7  ;;  %v10389_v7 = vld [vmem:[#allocation8 + $0x1d0] sm:$0xf0]  ;;  %v10267_v33 = vld [vmem:[#allocation8 + $0xc8] sm:$0xf] }
 0x1b5   :  { %v11386_v9 = vld [vmem:[#allocation5 + $0x88] sm:$0xf0] }
 0x1b6   :  { %v1292_v22 = vpop.f32.mrf.mxu2  ;;  %v1341_v54 = vpop.f32.mrf.mxu3  ;;  %v6215_v4 = vrot.slane %v5138_v42, 4  ;;  %16409 = vst [vmem:[#allocation24_spill] sm:$0xff] %v12757_v30 }
 0x1b7   :  { %v1293_v62 = vadd.f32 %v1292_v22, %v12586_v39  ;;  %v1196_v18 = vpop.f32.mrf.mxu0  ;;  %v1245_v58 = vpop.f32.mrf.mxu1  ;;  %v5496_v22 = vunpack.c.l.b16 %v5138_v42 }
 0x1b8   :  { %v1197_v48 = vadd.f32 %v1196_v18, %v16404_v53  ;;  %v12750_v18 = vor.u32 %v11370_v16, %v9971_v8  ;;  %v12759_v44 = vunpack.c.l.b16 %v6215_v4 }
 0x1b9   :  { %v12746_v14 = vadd.f32 %v1341_v54, %v1293_v62 }
 0x1ba   :  { %v1246_v37 = vadd.f32 %v1245_v58, %v1197_v48  ;;  %16407 = vst [vmem:[#allocation27_spill] sm:$0xff] %v12750_v18  ;;  %v12753_v48 = vperm.slane %v337_v0, 0  ;;  %v12755_v58 = vor.u32 %v11369_v57, %v9973_v36 }
 0x1bb   :  { %16410 = vst [vmem:[#allocation25_spill] sm:$0xff] %v12759_v44  ;;  %v11374_v44 = vld [vmem:[#allocation5 + $0x28] sm:$0xf0] }
 0x1bc   :  { %v5140_v25 = vpack.c.bf16 %v1246_v37, %v16406_v26  ;;  %16408 = vst [vmem:[#allocation26_spill] sm:$0xff] %v12755_v58 }
 0x1be   :  { %v5497_v61 = vunpack.c.l.b16 %v5140_v25  ;;  %v6216_v40 = vrot.slane %v5140_v25, 4  ;;  %v1294_v28 = vpop.f32.mrf.mxu2  ;;  %v1343_v54 = vpop.f32.mrf.mxu3  ;;  %v11569_v25 = vld [vmem:[#allocation8 + $0x1c4] sm:$0xf] }
 0x1bf   :  { %v1295_v62 = vadd.f32 %v1294_v28, %v12586_v39  ;;  %v1355_v53 = vpop.f32.mrf.mxu0  ;;  %v1404_v8 = vpop.f32.mrf.mxu1  ;;  %v11372_v39 = vld [vmem:[#allocation5 + $0x1c] sm:$0xf] }
 0x1c0   :  { %v12761_v37 = vpack.c.b16 %v5497_v61, %v5496_v22  ;;  %v12763_v42 = vunpack.c.l.b16 %v6216_v40  ;;  %v1356_v26 = vadd.f32 %v1355_v53, %v12592_v43  ;;  %v1405_v28 = vadd.f32 %v1404_v8, %v12753_v48  ;;  %v9983_v53 = vld [vmem:[#allocation5 + $0x18] sm:$0xf]  ;;  %v11373_v8 = vld [vmem:[#allocation5 + $0x20] sm:$0xf0] }
 0x1c1   :  { %v12766_v16 = vadd.f32 %v1343_v54, %v1295_v62  ;;  %2394 = vmatmul.bf16.vlgmr.msrb.gmra.mxu0 %v12750_v18  ;;  %v10392_v22 = vor.u32 %v11569_v25, %v10389_v7  ;;  %v11540_v62 = vld [vmem:[#allocation8 + $0xd4] sm:$0xf0]  ;;  %v12779_v25 = vor.u32 %v11372_v39, %v9985_v27  ;;  %v10517_v7 = vld [vmem:[#allocation8 + $0x2d0] sm:$0xf0] }
 0x1c2   :  { %16411 = vst [vmem:[#allocation30_spill] sm:$0xff] %v12761_v37  ;;  %2483 = vmatmul.bf16.vlgmr.msrb.gmra.mxu1 %v12755_v58  ;;  %v10268_v32 = vor.u32 %v11540_v62, %v10267_v33  ;;  %v10395_v33 = vld [vmem:[#allocation8 + $0x1c8] sm:$0xf] }
 0x1c3   :  { %16412 = vst [vmem:[#allocation28_spill] sm:$0xff] %v12763_v42  ;;  %2572 = vmatmul.bf16.vlgmr.msrb.gmra.mxu2 %v12757_v30  ;;  %2661 = vmatmul.bf16.vlgmr.msrb.gmra.mxu3 %v12750_v18  ;;  %v10103_v37 = vld [vmem:[#allocation5 + $0x108] sm:$0xf] }
 0x1c4   :  { %2743 = vmatpush.bf16.msra.mxu0 %v10392_v22  ;;  %2921 = vmatpush.bf16.msra.mxu2 %v10268_v32  ;;  %16414 = vst [vmem:[#allocation48_spill] sm:$0xff] %v12779_v25  ;;  %v10396_v32 = vor.u32 %v11572_v24, %v10395_v33  ;;  %v9995_v33 = vld [vmem:[#allocation5 + $0x30] sm:$0xf] }
 0x1c6   :  { %v1453_v61 = vpop.f32.mrf.mxu2  ;;  %v1502_v0 = vpop.f32.mrf.mxu3  ;;  %3010 = vmatpush.bf16.msra.mxu3 %v10396_v32  ;;  %v9997_v32 = vld [vmem:[#allocation5 + $0x3c] sm:$0xf0] }
 0x1c7   :  { %v1454_v40 = vadd.f32 %v1453_v61, %v1405_v28  ;;  %v1357_v43 = vpop.f32.mrf.mxu0  ;;  %v1406_v36 = vpop.f32.mrf.mxu1  ;;  %v12777_v61 = vor.u32 %v11373_v8, %v9983_v53 }
 0x1c8   :  { %v1358_v57 = vadd.f32 %v1357_v43, %v12603_v51  ;;  %v1407_v28 = vadd.f32 %v1406_v36, %v12753_v48 }
 0x1c9   :  { %v1503_v4 = vadd.f32 %v1502_v0, %v1454_v40  ;;  %16413 = vst [vmem:[#allocation29_spill] sm:$0xff] %v12777_v61 }
 0x1cb   :  { %v5111_v54 = vpack.c.bf16 %v1503_v4, %v1356_v26  ;;  %v12781_v26 = vor.u32 %v11374_v44, %v9991_v47  ;;  %v11601_v4 = vld [vmem:[#allocation8 + $0x2c4] sm:$0xf] }
 0x1cc   :  { %v10520_v22 = vor.u32 %v11601_v4, %v10517_v7 }
 0x1cd   :  { %16415 = vst [vmem:[#allocation49_spill] sm:$0xff] %v12781_v26  ;;  %v7431_v53 = vrot.slane %v5111_v54, 4  ;;  %v6713_v47 = vunpack.c.l.b16 %v5111_v54 }
 0x1ce   :  { %v1455_v51 = vpop.f32.mrf.mxu2  ;;  %v1504_v0 = vpop.f32.mrf.mxu3  ;;  %2832 = vmatpush.bf16.msra.mxu1 %v10520_v22  ;;  %v11376_v22 = vld [vmem:[#allocation5 + $0x38] sm:$0xf0] }
 0x1cf   :  { %v1456_v40 = vadd.f32 %v1455_v51, %v1407_v28  ;;  %v1360_v43 = vpop.f32.mrf.mxu0  ;;  %v1409_v42 = vpop.f32.mrf.mxu1  ;;  %v12789_v28 = vunpack.c.l.b16 %v7431_v53  ;;  %v10003_v53 = vld [vmem:[#allocation5 + $0x38] sm:$0xf] }
 0x1d0   :  { %v1361_v62 = vadd.f32 %v1360_v43, %v12614_v55  ;;  %v1410_v27 = vadd.f32 %v1409_v42, %v12753_v48 }
 0x1d1   :  { %v1505_v36 = vadd.f32 %v1504_v0, %v1456_v40  ;;  %2399 = vmatmul.bf16.gmra.mxu0 %v12777_v61  ;;  %16416 = vst [vmem:[#allocation50_spill] sm:$0xff] %v12789_v28 }
 0x1d2   :  { %2488 = vmatmul.bf16.gmra.mxu1 %v12779_v25 }
 0x1d3   :  { %v5113_v8 = vpack.c.bf16 %v1505_v36, %v1358_v57  ;;  %2577 = vmatmul.bf16.gmra.mxu2 %v12781_v26  ;;  %2666 = vmatmul.bf16.gmra.mxu3 %v12777_v61  ;;  %v11375_v36 = vld [vmem:[#allocation5 + $0x34] sm:$0xf] }
 0x1d5   :  { %v6714_v55 = vunpack.c.l.b16 %v5113_v8  ;;  %v7432_v44 = vrot.slane %v5113_v8, 4  ;;  %v11377_v8 = vld [vmem:[#allocation5 + $0x40] sm:$0xf0] }
 0x1d6   :  { %v1458_v39 = vpop.f32.mrf.mxu2  ;;  %v1507_v40 = vpop.f32.mrf.mxu3 }
 0x1d7   :  { %v12791_v24 = vpack.c.b16 %v6714_v55, %v6713_v47  ;;  %v12793_v51 = vunpack.c.l.b16 %v7432_v44  ;;  %v1459_v57 = vadd.f32 %v1458_v39, %v1410_v27  ;;  %v1362_v42 = vpop.f32.mrf.mxu0  ;;  %v1411_v43 = vpop.f32.mrf.mxu1  ;;  %v12799_v27 = vor.u32 %v11376_v22, %v9995_v33 }
 0x1d8   :  { %v1363_v0 = vadd.f32 %v1362_v42, %v12625_v29  ;;  %v1412_v47 = vadd.f32 %v1411_v43, %v12753_v48  ;;  %v12801_v42 = vor.u32 %v11375_v36, %v9997_v32 }
 0x1d9   :  { %16417 = vst [vmem:[#allocation51_spill] sm:$0xff] %v12791_v24  ;;  %v1508_v54 = vadd.f32 %v1507_v40, %v1459_v57  ;;  %v12803_v24 = vor.u32 %v11377_v8, %v10003_v53 }
 0x1da   :  { %16418 = vst [vmem:[#allocation52_spill] sm:$0xff] %v12793_v51 }
 0x1db   :  { %v5115_v7 = vpack.c.bf16 %v1508_v54, %v1361_v62  ;;  %16419 = vst [vmem:[#allocation53_spill] sm:$0xff] %v12799_v27 }
 0x1dc   :  { %16420 = vst [vmem:[#allocation54_spill] sm:$0xff] %v12801_v42 }
 0x1dd   :  { %16421 = vst [vmem:[#allocation55_spill] sm:$0xff] %v12803_v24  ;;  %v7463_v54 = vrot.slane %v5115_v7, 4  ;;  %v6745_v33 = vunpack.c.l.b16 %v5115_v7  ;;  %v11565_v7 = vld [vmem:[#allocation8 + $0x1a4] sm:$0xf] }
 0x1de   :  { %v1460_v55 = vpop.f32.mrf.mxu2  ;;  %v1509_v39 = vpop.f32.mrf.mxu3 }
 0x1df   :  { %v1461_v44 = vadd.f32 %v1460_v55, %v1412_v47  ;;  %v1365_v29 = vpop.f32.mrf.mxu0  ;;  %v1414_v57 = vpop.f32.mrf.mxu1  ;;  %v12811_v53 = vunpack.c.l.b16 %v7463_v54  ;;  %v11536_v54 = vld [vmem:[#allocation8 + $0xb4] sm:$0xf0] }
 0x1e0   :  { %v1366_v62 = vadd.f32 %v1365_v29, %v12636_v35  ;;  %v1415_v43 = vadd.f32 %v1414_v57, %v12753_v48 }
 0x1e1   :  { %v1510_v40 = vadd.f32 %v1509_v39, %v1461_v44  ;;  %2404 = vmatmul.bf16.gmra.mxu0 %v12799_v27  ;;  %16422 = vst [vmem:[#allocation56_spill] sm:$0xff] %v12811_v53 }
 0x1e2   :  { %2493 = vmatmul.bf16.gmra.mxu1 %v12801_v42 }
 0x1e3   :  { %v5117_v4 = vpack.c.bf16 %v1510_v40, %v1363_v0  ;;  %2582 = vmatmul.bf16.gmra.mxu2 %v12803_v24  ;;  %2671 = vmatmul.bf16.gmra.mxu3 %v12799_v27  ;;  %v10373_v40 = vld [vmem:[#allocation8 + $0x1b0] sm:$0xf0] }
 0x1e4   :  { %v10376_v28 = vor.u32 %v11565_v7, %v10373_v40  ;;  %v10501_v40 = vld [vmem:[#allocation8 + $0x2b0] sm:$0xf0] }
 0x1e5   :  { %v6746_v22 = vunpack.c.l.b16 %v5117_v4  ;;  %v7464_v36 = vrot.slane %v5117_v4, 4  ;;  %v10251_v4 = vld [vmem:[#allocation8 + $0xa8] sm:$0xf] }
 0x1e6   :  { %v1463_v32 = vpop.f32.mrf.mxu2  ;;  %v1512_v0 = vpop.f32.mrf.mxu3  ;;  %2744 = vmatpush.bf16.msra.mxu0 %v10376_v28 }
 0x1e7   :  { %v12813_v35 = vpack.c.b16 %v6746_v22, %v6745_v33  ;;  %v12815_v8 = vunpack.c.l.b16 %v7464_v36  ;;  %v1464_v47 = vadd.f32 %v1463_v32, %v1415_v43  ;;  %v1367_v55 = vpop.f32.mrf.mxu0  ;;  %v1416_v39 = vpop.f32.mrf.mxu1  ;;  %v10007_v33 = vld [vmem:[#allocation5 + $0x48] sm:$0xf]  ;;  %v11379_v22 = vld [vmem:[#allocation5 + $0x50] sm:$0xf0]  ;;  %v11378_v36 = vld [vmem:[#allocation5 + $0x4c] sm:$0xf] }
 0x1e8   :  { %v1368_v44 = vadd.f32 %v1367_v55, %v12647_v11  ;;  %v10009_v43 = vld [vmem:[#allocation5 + $0x54] sm:$0xf0]  ;;  %v10015_v32 = vld [vmem:[#allocation5 + $0x50] sm:$0xf]  ;;  %v1417_v11 = vadd.f32 %v1416_v39, %v12753_v48  ;;  %v12821_v29 = vor.u32 %v11379_v22, %v10007_v33 }
 0x1e9   :  { %16423 = vst [vmem:[#allocation57_spill] sm:$0xff] %v12813_v35  ;;  %v1513_v57 = vadd.f32 %v1512_v0, %v1464_v47  ;;  %v10252_v35 = vor.u32 %v11536_v54, %v10251_v4  ;;  %v12823_v7 = vor.u32 %v11378_v36, %v10009_v43  ;;  %v10379_v4 = vld [vmem:[#allocation8 + $0x1a8] sm:$0xf] }
 0x1ea   :  { %16424 = vst [vmem:[#allocation58_spill] sm:$0xff] %v12815_v8 }
 0x1eb   :  { %v5119_v51 = vpack.c.bf16 %v1513_v57, %v1366_v62  ;;  %2922 = vmatpush.bf16.msra.mxu2 %v10252_v35  ;;  %16425 = vst [vmem:[#allocation59_spill] sm:$0xff] %v12821_v29  ;;  %v12825_v62 = vor.u32 %v11380_v41, %v10015_v32  ;;  %v11597_v57 = vld [vmem:[#allocation8 + $0x2a4] sm:$0xf]  ;;  %v10380_v35 = vor.u32 %v11568_v19, %v10379_v4  ;;  %v10019_v4 = vld [vmem:[#allocation5 + $0x60] sm:$0xf] }
 0x1ec   :  { %16426 = vst [vmem:[#allocation60_spill] sm:$0xff] %v12823_v7  ;;  %v10504_v28 = vor.u32 %v11597_v57, %v10501_v40 }
 0x1ed   :  { %16427 = vst [vmem:[#allocation61_spill] sm:$0xff] %v12825_v62  ;;  %v7495_v33 = vrot.slane %v5119_v51, 4  ;;  %v6777_v41 = vunpack.c.l.b16 %v5119_v51  ;;  %3011 = vmatpush.bf16.msra.mxu3 %v10380_v35  ;;  %v10021_v35 = vld [vmem:[#allocation5 + $0x6c] sm:$0xf0] }
 0x1ee   :  { %v1465_v55 = vpop.f32.mrf.mxu2  ;;  %v1514_v0 = vpop.f32.mrf.mxu3  ;;  %2833 = vmatpush.bf16.msra.mxu1 %v10504_v28  ;;  %v11382_v28 = vld [vmem:[#allocation5 + $0x68] sm:$0xf0] }
 0x1ef   :  { %v1466_v47 = vadd.f32 %v1465_v55, %v1417_v11  ;;  %v1370_v53 = vpop.f32.mrf.mxu0  ;;  %v1419_v8 = vpop.f32.mrf.mxu1  ;;  %v12833_v32 = vunpack.c.l.b16 %v7495_v33  ;;  %v10027_v33 = vld [vmem:[#allocation5 + $0x68] sm:$0xf] }
 0x1f0   :  { %v1371_v54 = vadd.f32 %v1370_v53, %v12658_v20  ;;  %v1420_v36 = vadd.f32 %v1419_v8, %v12753_v48 }
 0x1f1   :  { %v1515_v39 = vadd.f32 %v1514_v0, %v1466_v47  ;;  %2409 = vmatmul.bf16.gmra.mxu0 %v12821_v29  ;;  %16428 = vst [vmem:[#allocation62_spill] sm:$0xff] %v12833_v32 }
 0x1f2   :  { %2498 = vmatmul.bf16.gmra.mxu1 %v12823_v7 }
 0x1f3   :  { %v5121_v22 = vpack.c.bf16 %v1515_v39, %v1368_v44  ;;  %2587 = vmatmul.bf16.gmra.mxu2 %v12825_v62  ;;  %2676 = vmatmul.bf16.gmra.mxu3 %v12821_v29  ;;  %v11381_v39 = vld [vmem:[#allocation5 + $0x64] sm:$0xf] }
 0x1f5   :  { %v6778_v20 = vunpack.c.l.b16 %v5121_v22  ;;  %v7496_v53 = vrot.slane %v5121_v22, 4  ;;  %v11383_v22 = vld [vmem:[#allocation5 + $0x70] sm:$0xf0] }
 0x1f6   :  { %v1468_v43 = vpop.f32.mrf.mxu2  ;;  %v1517_v55 = vpop.f32.mrf.mxu3 }
 0x1f7   :  { %v12835_v19 = vpack.c.b16 %v6778_v20, %v6777_v41  ;;  %v12837_v11 = vunpack.c.l.b16 %v7496_v53  ;;  %v1469_v44 = vadd.f32 %v1468_v43, %v1420_v36  ;;  %v1372_v8 = vpop.f32.mrf.mxu0  ;;  %v1421_v0 = vpop.f32.mrf.mxu1  ;;  %v12843_v36 = vor.u32 %v11382_v28, %v10019_v4 }
 0x1f8   :  { %v1373_v47 = vadd.f32 %v1372_v8, %v12669_v5  ;;  %v1422_v41 = vadd.f32 %v1421_v0, %v12753_v48  ;;  %v12845_v8 = vor.u32 %v11381_v39, %v10021_v35 }
 0x1f9   :  { %16429 = vst [vmem:[#allocation63_spill] sm:$0xff] %v12835_v19  ;;  %v1518_v51 = vadd.f32 %v1517_v55, %v1469_v44  ;;  %v12847_v19 = vor.u32 %v11383_v22, %v10027_v33 }
 0x1fa   :  { %16430 = vst [vmem:[#allocation64_spill] sm:$0xff] %v12837_v11 }
 0x1fb   :  { %v5123_v40 = vpack.c.bf16 %v1518_v51, %v1371_v54  ;;  %16431 = vst [vmem:[#allocation65_spill] sm:$0xff] %v12843_v36 }
 0x1fc   :  { %16432 = vst [vmem:[#allocation66_spill] sm:$0xff] %v12845_v8 }
 0x1fd   :  { %16433 = vst [vmem:[#allocation67_spill] sm:$0xff] %v12847_v19  ;;  %v7527_v51 = vrot.slane %v5123_v40, 4  ;;  %v6809_v4 = vunpack.c.l.b16 %v5123_v40  ;;  %v11561_v40 = vld [vmem:[#allocation8 + $0x184] sm:$0xf] }
 0x1fe   :  { %v1470_v20 = vpop.f32.mrf.mxu2  ;;  %v1519_v43 = vpop.f32.mrf.mxu3 }
 0x1ff   :  { %v1471_v53 = vadd.f32 %v1470_v20, %v1422_v41  ;;  %v1375_v5 = vpop.f32.mrf.mxu0  ;;  %v1424_v44 = vpop.f32.mrf.mxu1  ;;  %v12855_v33 = vunpack.c.l.b16 %v7527_v51  ;;  %v11532_v51 = vld [vmem:[#allocation8 + $0x94] sm:$0xf0] }
 0x200   :  { %v1376_v54 = vadd.f32 %v1375_v5, %v12680_v38  ;;  %v1425_v0 = vadd.f32 %v1424_v44, %v12753_v48 }
 0x201   :  { %v1520_v55 = vadd.f32 %v1519_v43, %v1471_v53  ;;  %2414 = vmatmul.bf16.gmra.mxu0 %v12843_v36  ;;  %16434 = vst [vmem:[#allocation68_spill] sm:$0xff] %v12855_v33 }
 0x202   :  { %2503 = vmatmul.bf16.gmra.mxu1 %v12845_v8 }
 0x203   :  { %v5125_v57 = vpack.c.bf16 %v1520_v55, %v1373_v47  ;;  %2592 = vmatmul.bf16.gmra.mxu2 %v12847_v19  ;;  %2681 = vmatmul.bf16.gmra.mxu3 %v12843_v36  ;;  %v10357_v55 = vld [vmem:[#allocation8 + $0x190] sm:$0xf0] }
 0x204   :  { %v10360_v32 = vor.u32 %v11561_v40, %v10357_v55  ;;  %v10485_v55 = vld [vmem:[#allocation8 + $0x290] sm:$0xf0] }
 0x205   :  { %v6810_v28 = vunpack.c.l.b16 %v5125_v57  ;;  %v7528_v39 = vrot.slane %v5125_v57, 4  ;;  %v10235_v57 = vld [vmem:[#allocation8 + $0x88] sm:$0xf] }
 0x206   :  { %v1473_v35 = vpop.f32.mrf.mxu2  ;;  %v1522_v47 = vpop.f32.mrf.mxu3  ;;  %2745 = vmatpush.bf16.msra.mxu0 %v10360_v32 }
 0x207   :  { %v12857_v38 = vpack.c.b16 %v6810_v28, %v6809_v4  ;;  %v12859_v22 = vunpack.c.l.b16 %v7528_v39  ;;  %v1474_v41 = vadd.f32 %v1473_v35, %v1425_v0  ;;  %v1377_v20 = vpop.f32.mrf.mxu0  ;;  %v1426_v43 = vpop.f32.mrf.mxu1  ;;  %v10031_v4 = vld [vmem:[#allocation5 + $0x78] sm:$0xf]  ;;  %v11385_v28 = vld [vmem:[#allocation5 + $0x80] sm:$0xf0]  ;;  %v11384_v39 = vld [vmem:[#allocation5 + $0x7c] sm:$0xf] }
 0x208   :  { %v1378_v53 = vadd.f32 %v1377_v20, %v12691_v2  ;;  %v10033_v0 = vld [vmem:[#allocation5 + $0x84] sm:$0xf0]  ;;  %v10039_v35 = vld [vmem:[#allocation5 + $0x80] sm:$0xf]  ;;  %v1427_v2 = vadd.f32 %v1426_v43, %v12753_v48  ;;  %v12865_v5 = vor.u32 %v11385_v28, %v10031_v4 }
 0x209   :  { %16435 = vst [vmem:[#allocation69_spill] sm:$0xff] %v12857_v38  ;;  %v1523_v44 = vadd.f32 %v1522_v47, %v1474_v41  ;;  %v10236_v38 = vor.u32 %v11532_v51, %v10235_v57  ;;  %v12867_v40 = vor.u32 %v11384_v39, %v10033_v0  ;;  %v10363_v57 = vld [vmem:[#allocation8 + $0x188] sm:$0xf] }
 0x20a   :  { %16436 = vst [vmem:[#allocation70_spill] sm:$0xff] %v12859_v22 }
 0x20b   :  { %v5127_v11 = vpack.c.bf16 %v1523_v44, %v1376_v54  ;;  %2923 = vmatpush.bf16.msra.mxu2 %v10236_v38  ;;  %16437 = vst [vmem:[#allocation71_spill] sm:$0xff] %v12865_v5  ;;  %v12869_v54 = vor.u32 %v11386_v9, %v10039_v35  ;;  %v11593_v44 = vld [vmem:[#allocation8 + $0x284] sm:$0xf]  ;;  %v10364_v38 = vor.u32 %v11564_v23, %v10363_v57  ;;  %v10043_v57 = vld [vmem:[#allocation5 + $0x90] sm:$0xf] }
 0x20c   :  { %16438 = vst [vmem:[#allocation72_spill] sm:$0xff] %v12867_v40  ;;  %v10488_v32 = vor.u32 %v11593_v44, %v10485_v55 }
 0x20d   :  { %16439 = vst [vmem:[#allocation73_spill] sm:$0xff] %v12869_v54  ;;  %v7559_v4 = vrot.slane %v5127_v11, 4  ;;  %v6841_v9 = vunpack.c.l.b16 %v5127_v11  ;;  %3012 = vmatpush.bf16.msra.mxu3 %v10364_v38  ;;  %v10045_v38 = vld [vmem:[#allocation5 + $0x9c] sm:$0xf0] }
 0x20e   :  { %v1475_v20 = vpop.f32.mrf.mxu2  ;;  %v1524_v47 = vpop.f32.mrf.mxu3  ;;  %2834 = vmatpush.bf16.msra.mxu1 %v10488_v32  ;;  %v11388_v32 = vld [vmem:[#allocation5 + $0x98] sm:$0xf0] }
 0x20f   :  { %v1476_v41 = vadd.f32 %v1475_v20, %v1427_v2  ;;  %v1380_v33 = vpop.f32.mrf.mxu0  ;;  %v1429_v22 = vpop.f32.mrf.mxu1  ;;  %v12877_v35 = vunpack.c.l.b16 %v7559_v4  ;;  %v10051_v4 = vld [vmem:[#allocation5 + $0x98] sm:$0xf] }
 0x210   :  { %v1381_v51 = vadd.f32 %v1380_v33, %v12702_v10  ;;  %v1430_v39 = vadd.f32 %v1429_v22, %v12753_v48 }
 0x211   :  { %v1525_v43 = vadd.f32 %v1524_v47, %v1476_v41  ;;  %2419 = vmatmul.bf16.gmra.mxu0 %v12865_v5  ;;  %16440 = vst [vmem:[#allocation74_spill] sm:$0xff] %v12877_v35  ;;  %v10341_v35 = vld [vmem:[#allocation8 + $0x170] sm:$0xf0] }
 0x212   :  { %2508 = vmatmul.bf16.gmra.mxu1 %v12867_v40 }
 0x213   :  { %v5129_v28 = vpack.c.bf16 %v1525_v43, %v1378_v53  ;;  %2597 = vmatmul.bf16.gmra.mxu2 %v12869_v54  ;;  %2686 = vmatmul.bf16.gmra.mxu3 %v12865_v5  ;;  %v11387_v43 = vld [vmem:[#allocation5 + $0x94] sm:$0xf] }
 0x215   :  { %v6842_v10 = vunpack.c.l.b16 %v5129_v28  ;;  %v7560_v33 = vrot.slane %v5129_v28, 4  ;;  %v11389_v28 = vld [vmem:[#allocation5 + $0xa0] sm:$0xf0] }
 0x216   :  { %v1478_v0 = vpop.f32.mrf.mxu2  ;;  %v1527_v20 = vpop.f32.mrf.mxu3 }
 0x217   :  { %v12879_v23 = vpack.c.b16 %v6842_v10, %v6841_v9  ;;  %v12881_v2 = vunpack.c.l.b16 %v7560_v33  ;;  %v1479_v53 = vadd.f32 %v1478_v0, %v1430_v39  ;;  %v1382_v22 = vpop.f32.mrf.mxu0  ;;  %v1431_v47 = vpop.f32.mrf.mxu1  ;;  %v12887_v39 = vor.u32 %v11388_v32, %v10043_v57 }
 0x218   :  { %v1383_v41 = vadd.f32 %v1382_v22, %v12713_v49  ;;  %v1432_v9 = vadd.f32 %v1431_v47, %v12753_v48  ;;  %v12889_v22 = vor.u32 %v11387_v43, %v10045_v38 }
 0x219   :  { %16441 = vst [vmem:[#allocation75_spill] sm:$0xff] %v12879_v23  ;;  %v1528_v11 = vadd.f32 %v1527_v20, %v1479_v53  ;;  %v12891_v23 = vor.u32 %v11389_v28, %v10051_v4 }
 0x21a   :  { %16442 = vst [vmem:[#allocation76_spill] sm:$0xff] %v12881_v2 }
 0x21b   :  { %v5131_v55 = vpack.c.bf16 %v1528_v11, %v1381_v51  ;;  %16443 = vst [vmem:[#allocation77_spill] sm:$0xff] %v12887_v39 }
 0x21c   :  { %16444 = vst [vmem:[#allocation78_spill] sm:$0xff] %v12889_v22 }
 0x21d   :  { %16445 = vst [vmem:[#allocation79_spill] sm:$0xff] %v12891_v23  ;;  %v7591_v11 = vrot.slane %v5131_v55, 4  ;;  %v6873_v57 = vunpack.c.l.b16 %v5131_v55  ;;  %v10055_v55 = vld [vmem:[#allocation5 + $0xa8] sm:$0xf] }
 0x21e   :  { %v1480_v10 = vpop.f32.mrf.mxu2  ;;  %v1529_v0 = vpop.f32.mrf.mxu3 }
 0x21f   :  { %v1481_v33 = vadd.f32 %v1480_v10, %v1432_v9  ;;  %v1385_v49 = vpop.f32.mrf.mxu0  ;;  %v1434_v53 = vpop.f32.mrf.mxu1  ;;  %v12899_v4 = vunpack.c.l.b16 %v7591_v11  ;;  %v10219_v11 = vld [vmem:[#allocation8 + $0x68] sm:$0xf] }
 0x220   :  { %v1386_v51 = vadd.f32 %v1385_v49, %v12724_v34  ;;  %v1435_v47 = vadd.f32 %v1434_v53, %v12753_v48 }
 0x221   :  { %v1530_v20 = vadd.f32 %v1529_v0, %v1481_v33  ;;  %2424 = vmatmul.bf16.gmra.mxu0 %v12887_v39  ;;  %16446 = vst [vmem:[#allocation80_spill] sm:$0xff] %v12899_v4 }
 0x222   :  { %2513 = vmatmul.bf16.gmra.mxu1 %v12889_v22 }
 0x223   :  { %v5133_v44 = vpack.c.bf16 %v1530_v20, %v1383_v41  ;;  %2602 = vmatmul.bf16.gmra.mxu2 %v12891_v23  ;;  %2691 = vmatmul.bf16.gmra.mxu3 %v12887_v39  ;;  %v11391_v20 = vld [vmem:[#allocation5 + $0xb0] sm:$0xf0] }
 0x225   :  { %v6874_v32 = vunpack.c.l.b16 %v5133_v44  ;;  %v7592_v43 = vrot.slane %v5133_v44, 4  ;;  %v11557_v44 = vld [vmem:[#allocation8 + $0x164] sm:$0xf] }
 0x226   :  { %v1483_v38 = vpop.f32.mrf.mxu2  ;;  %v1532_v41 = vpop.f32.mrf.mxu3  ;;  %v10344_v2 = vor.u32 %v11557_v44, %v10341_v35  ;;  %v12909_v35 = vor.u32 %v11391_v20, %v10055_v55 }
 0x227   :  { %v12901_v34 = vpack.c.b16 %v6874_v32, %v6873_v57  ;;  %v12903_v28 = vunpack.c.l.b16 %v7592_v43  ;;  %v1484_v9 = vadd.f32 %v1483_v38, %v1435_v47  ;;  %v1387_v10 = vpop.f32.mrf.mxu0  ;;  %v1436_v0 = vpop.f32.mrf.mxu1  ;;  %v11528_v57 = vld [vmem:[#allocation8 + $0x74] sm:$0xf0]  ;;  %v11589_v32 = vld [vmem:[#allocation8 + $0x264] sm:$0xf]  ;;  %v10469_v43 = vld [vmem:[#allocation8 + $0x270] sm:$0xf0] }
 0x228   :  { %v1388_v33 = vadd.f32 %v1387_v10, %v12735_v3  ;;  %v11390_v47 = vld [vmem:[#allocation5 + $0xac] sm:$0xf]  ;;  %v10220_v38 = vor.u32 %v11528_v57, %v10219_v11  ;;  %v10472_v12 = vor.u32 %v11589_v32, %v10469_v43  ;;  %v11560_v3 = vld [vmem:[#allocation8 + $0x174] sm:$0xf0]  ;;  %2746 = vmatpush.bf16.msra.mxu0 %v10344_v2  ;;  %16449 = vst [vmem:[#allocation83_spill] sm:$0xff] %v12909_v35 }
 0x229   :  { %16447 = vst [vmem:[#allocation81_spill] sm:$0xff] %v12901_v34  ;;  %v1533_v53 = vadd.f32 %v1532_v41, %v1484_v9  ;;  %v10057_v10 = vld [vmem:[#allocation5 + $0xb4] sm:$0xf0]  ;;  %v10348_v9 = vor.u32 %v11560_v3, %v10347_v56  ;;  %v1437_v41 = vadd.f32 %v1436_v0, %v12753_v48  ;;  %v12913_v57 = vor.u32 %v11392_v45, %v10063_v31  ;;  %v12921_v31 = vld [vmem:[#allocation11] sm:$0x77] }
 0x22a   :  { %16448 = vst [vmem:[#allocation82_spill] sm:$0xff] %v12903_v28  ;;  %2924 = vmatpush.bf16.msra.mxu2 %v10220_v38  ;;  %2835 = vmatpush.bf16.msra.mxu1 %v10472_v12  ;;  %v12911_v11 = vor.u32 %v11390_v47, %v10057_v10 }
 0x22b   :  { %v5135_v34 = vpack.c.bf16 %v1533_v53, %v1386_v51  ;;  %3013 = vmatpush.bf16.msra.mxu3 %v10348_v9  ;;  %16451 = vst [vmem:[#allocation85_spill] sm:$0xff] %v12913_v57 }
 0x22c   :  { %16450 = vst [vmem:[#allocation84_spill] sm:$0xff] %v12911_v11 }
 0x22d   :  { %v7623_v56 = vrot.slane %v5135_v34, 4 }
 0x22e   :  { %v1485_v49 = vpop.f32.mrf.mxu2  ;;  %v1534_v51 = vpop.f32.mrf.mxu3 }
 0x22f   :  { %v1486_v44 = vadd.f32 %v1485_v49, %v1437_v41  ;;  %v1390_v53 = vpop.f32.mrf.mxu0  ;;  %v1439_v43 = vpop.f32.mrf.mxu1  ;;  %v6905_v49 = vunpack.c.l.b16 %v5135_v34  ;;  %v12924_v47 = vunpack.c.l.b16 %v7623_v56  ;;  %v11394_v56 = vld [vmem:[#allocation5 + $0xc8] sm:$0xf0] }
 0x230   :  { %v1391_v32 = vadd.f32 %v1390_v53, %v12746_v14  ;;  %v1440_v12 = vadd.f32 %v1439_v43, %v12753_v48  ;;  %v1638_v14 = vperm.slane %v12921_v31, 1 }
 0x231   :  { %v1535_v2 = vadd.f32 %v1534_v51, %v1486_v44  ;;  %2429 = vmatmul.bf16.gmra.mxu0 %v12909_v35  ;;  %16452 = vst [vmem:[#allocation86_spill] sm:$0xff] %v12924_v47 }
 0x232   :  { %2518 = vmatmul.bf16.gmra.mxu1 %v12911_v11  ;;  %v12933_v53 = vperm.slane %v1638_v14, 1 }
 0x233   :  { %v5137_v0 = vpack.c.bf16 %v1535_v2, %v1388_v33  ;;  %2607 = vmatmul.bf16.gmra.mxu2 %v12913_v57  ;;  %2696 = vmatmul.bf16.gmra.mxu3 %v12909_v35  ;;  %v10067_v2 = vld [vmem:[#allocation5 + $0xc0] sm:$0xf] }
 0x234   :  { %v12936_v4 = vor.u32 %v11394_v56, %v10067_v2  ;;  %v10203_v2 = vld [vmem:[#allocation8 + $0x48] sm:$0xf] }
 0x235   :  { %v6906_v55 = vunpack.c.l.b16 %v5137_v0  ;;  %v7624_v45 = vrot.slane %v5137_v0, 4  ;;  %v11393_v0 = vld [vmem:[#allocation5 + $0xc4] sm:$0xf] }
 0x236   :  { %v1488_v20 = vpop.f32.mrf.mxu2  ;;  %v1537_v10 = vpop.f32.mrf.mxu3  ;;  %16455 = vst [vmem:[#allocation89_spill] sm:$0xff] %v12936_v4 }
 0x237   :  { %v12926_v38 = vpack.c.b16 %v6906_v55, %v6905_v49  ;;  %v12928_v33 = vunpack.c.l.b16 %v7624_v45  ;;  %v1489_v3 = vadd.f32 %v1488_v20, %v1440_v12  ;;  %v1392_v9 = vpop.f32.mrf.mxu0  ;;  %v1441_v44 = vpop.f32.mrf.mxu1  ;;  %v10069_v49 = vld [vmem:[#allocation5 + $0xcc] sm:$0xf0]  ;;  %v10075_v55 = vld [vmem:[#allocation5 + $0xc8] sm:$0xf]  ;;  %v11395_v45 = vld [vmem:[#allocation5 + $0xd0] sm:$0xf0] }
 0x238   :  { %v1393_v41 = vadd.f32 %v1392_v9, %v12766_v16  ;;  %v1442_v12 = vadd.f32 %v1441_v44, %v12753_v48  ;;  %v11553_v48 = vld [vmem:[#allocation8 + $0x144] sm:$0xf]  ;;  %v10325_v44 = vld [vmem:[#allocation8 + $0x150] sm:$0xf0] }
 0x239   :  { %16453 = vst [vmem:[#allocation87_spill] sm:$0xff] %v12926_v38  ;;  %v1538_v51 = vadd.f32 %v1537_v10, %v1489_v3  ;;  %v12938_v38 = vor.u32 %v11393_v0, %v10069_v49  ;;  %v12940_v3 = vor.u32 %v11395_v45, %v10075_v55  ;;  %v11524_v55 = vld [vmem:[#allocation8 + $0x54] sm:$0xf0] }
 0x23a   :  { %16454 = vst [vmem:[#allocation88_spill] sm:$0xff] %v12928_v33  ;;  %v10087_v33 = vld [vmem:[#allocation5 + $0xe0] sm:$0xf] }
 0x23b   :  { %v5139_v43 = vpack.c.bf16 %v1538_v51, %v1391_v32  ;;  %16456 = vst [vmem:[#allocation90_spill] sm:$0xff] %v12938_v38 }
 0x23c   :  { %16457 = vst [vmem:[#allocation91_spill] sm:$0xff] %v12940_v3 }
 0x23d   :  { %v7655_v34 = vrot.slane %v5139_v43, 4  ;;  %v6937_v56 = vunpack.c.l.b16 %v5139_v43 }
 0x23e   :  { %v1490_v20 = vpop.f32.mrf.mxu2  ;;  %v1539_v9 = vpop.f32.mrf.mxu3 }
 0x23f   :  { %v1491_v16 = vadd.f32 %v1490_v20, %v1442_v12  ;;  %v2395_v28 = vpop.f32.mrf.mxu0  ;;  %v2484_v14 = vpop.f32.mrf.mxu1  ;;  %v10204_v12 = vor.u32 %v11524_v55, %v10203_v2  ;;  %v12947_v20 = vunpack.c.l.b16 %v7655_v34  ;;  %v10453_v2 = vld [vmem:[#allocation8 + $0x250] sm:$0xf0]  ;;  %v11556_v55 = vld [vmem:[#allocation8 + $0x154] sm:$0xf0] }
 0x240   :  { %v2396_v32 = vadd.f32 %v2395_v28, %v12933_v53  ;;  %v10328_v28 = vor.u32 %v11553_v48, %v10325_v44  ;;  %v10079_v48 = vld [vmem:[#allocation5 + $0xd8] sm:$0xf]  ;;  %v11585_v44 = vld [vmem:[#allocation8 + $0x244] sm:$0xf] }
 0x241   :  { %v1540_v10 = vadd.f32 %v1539_v9, %v1491_v16  ;;  %2434 = vmatmul.bf16.gmra.mxu0 %v12936_v4  ;;  %16458 = vst [vmem:[#allocation92_spill] sm:$0xff] %v12947_v20  ;;  %2925 = vmatpush.bf16.msra.mxu2 %v10204_v12 }
 0x242   :  { %v2485_v51 = vadd.f32 %v2484_v14, %v2396_v32  ;;  %2523 = vmatmul.bf16.gmra.mxu1 %v12938_v38  ;;  %2747 = vmatpush.bf16.msra.mxu0 %v10328_v28 }
 0x243   :  { %v5141_v47 = vpack.c.bf16 %v1540_v10, %v1393_v41  ;;  %2612 = vmatmul.bf16.gmra.mxu2 %v12940_v3  ;;  %2701 = vmatmul.bf16.gmra.mxu3 %v12936_v4 }
 0x245   :  { %v6938_v0 = vunpack.c.l.b16 %v5141_v47  ;;  %v7656_v49 = vrot.slane %v5141_v47, 4 }
 0x246   :  { %v2573_v45 = vpop.f32.mrf.mxu2  ;;  %v12955_v32 = vpop.f32.mrf.mxu3 }
 0x247   :  { %v12949_v16 = vpack.c.b16 %v6938_v0, %v6937_v56  ;;  %v12951_v41 = vunpack.c.l.b16 %v7656_v49  ;;  %v12953_v9 = vadd.f32 %v2573_v45, %v2485_v51  ;;  %v2397_v14 = vpop.f32.mrf.mxu0  ;;  %v2486_v10 = vpop.f32.mrf.mxu1  ;;  %v10331_v56 = vld [vmem:[#allocation8 + $0x148] sm:$0xf]  ;;  %v11397_v0 = vld [vmem:[#allocation5 + $0xe0] sm:$0xf0]  ;;  %v11396_v49 = vld [vmem:[#allocation5 + $0xdc] sm:$0xf]  ;;  %v10456_v51 = vor.u32 %v11585_v44, %v10453_v2 }
 0x248   :  { %v2398_v43 = vadd.f32 %v2397_v14, %v12933_v53  ;;  %v10081_v45 = vld [vmem:[#allocation5 + $0xe4] sm:$0xf0]  ;;  %v10332_v28 = vor.u32 %v11556_v55, %v10331_v56  ;;  %v12960_v50 = vor.u32 %v11397_v0, %v10079_v48  ;;  %v11400_v55 = vld [vmem:[#allocation5 + $0xf8] sm:$0xf0] }
 0x249   :  { %16459 = vst [vmem:[#allocation93_spill] sm:$0xff] %v12949_v16  ;;  %v11398_v16 = vld [vmem:[#allocation5 + $0xe8] sm:$0xf0]  ;;  %2836 = vmatpush.bf16.msra.mxu1 %v10456_v51  ;;  %v10091_v51 = vld [vmem:[#allocation5 + $0xf0] sm:$0xf] }
 0x24a   :  { %16460 = vst [vmem:[#allocation94_spill] sm:$0xff] %v12951_v41  ;;  %v2487_v34 = vadd.f32 %v2486_v10, %v2398_v43  ;;  %3014 = vmatpush.bf16.msra.mxu3 %v10332_v28  ;;  %v12966_v10 = vor.u32 %v11396_v49, %v10081_v45  ;;  %v12968_v20 = vor.u32 %v11398_v16, %v10087_v33  ;;  %v11399_v45 = vld [vmem:[#allocation5 + $0xf4] sm:$0xf]  ;;  %v10093_v28 = vld [vmem:[#allocation5 + $0xfc] sm:$0xf0] }
 0x24b   :  { %16461 = vst [vmem:[#allocation95_spill] sm:$0xff] %v12960_v50  ;;  %v12986_v15 = vor.u32 %v11399_v45, %v10093_v28  ;;  %v11520_v45 = vld [vmem:[#allocation8 + $0x34] sm:$0xf0] }
 0x24c   :  { %16462 = vst [vmem:[#allocation96_spill] sm:$0xff] %v12966_v10 }
 0x24d   :  { %16463 = vst [vmem:[#allocation97_spill] sm:$0xff] %v12968_v20 }
 0x24e   :  { %v2575_v14 = vpop.f32.mrf.mxu2  ;;  %v12964_v47 = vpop.f32.mrf.mxu3  ;;  %16465 = vst [vmem:[#allocation99_spill] sm:$0xff] %v12986_v15 }
 0x24f   :  { %v12962_v12 = vadd.f32 %v2575_v14, %v2487_v34  ;;  %v2400_v43 = vpop.f32.mrf.mxu0  ;;  %v2489_v2 = vpop.f32.mrf.mxu1  ;;  %v10099_v14 = vld [vmem:[#allocation5 + $0xf8] sm:$0xf] }
 0x250   :  { %v2401_v44 = vadd.f32 %v2400_v43, %v12933_v53  ;;  %v11401_v43 = vld [vmem:[#allocation5 + $0x100] sm:$0xf0] }
 0x251   :  { %2439 = vmatmul.bf16.gmra.mxu0 %v12960_v50  ;;  %v12988_v63 = vor.u32 %v11401_v43, %v10099_v14 }
 0x252   :  { %v2490_v41 = vadd.f32 %v2489_v2, %v2401_v44  ;;  %2528 = vmatmul.bf16.gmra.mxu1 %v12966_v10  ;;  %v12980_v2 = vor.u32 %v11400_v55, %v10091_v51  ;;  %v10309_v51 = vld [vmem:[#allocation8 + $0x130] sm:$0xf0]  ;;  %v10187_v55 = vld [vmem:[#allocation8 + $0x28] sm:$0xf] }
 0x253   :  { %2617 = vmatmul.bf16.gmra.mxu2 %v12968_v20  ;;  %2706 = vmatmul.bf16.gmra.mxu3 %v12960_v50  ;;  %16466 = vst [vmem:[#allocation100_spill] sm:$0xff] %v12988_v63  ;;  %v10188_v14 = vor.u32 %v11520_v45, %v10187_v55  ;;  %v10105_v55 = vld [vmem:[#allocation5 + $0x114] sm:$0xf0]  ;;  %v11404_v45 = vld [vmem:[#allocation5 + $0x118] sm:$0xf0] }
 0x254   :  { %16464 = vst [vmem:[#allocation98_spill] sm:$0xff] %v12980_v2 }
 0x255   :  { %2926 = vmatpush.bf16.msra.mxu2 %v10188_v14 }
 0x256   :  { %v2578_v48 = vpop.f32.mrf.mxu2  ;;  %v12977_v56 = vpop.f32.mrf.mxu3 }
 0x257   :  { %v12975_v34 = vadd.f32 %v2578_v48, %v2490_v41  ;;  %v2402_v0 = vpop.f32.mrf.mxu0  ;;  %v2491_v16 = vpop.f32.mrf.mxu1 }
 0x258   :  { %v2403_v33 = vadd.f32 %v2402_v0, %v12933_v53 }
 0x25a   :  { %v2492_v49 = vadd.f32 %v2491_v16, %v2403_v33 }
 0x25e   :  { %v2580_v44 = vpop.f32.mrf.mxu2  ;;  %v12984_v41 = vpop.f32.mrf.mxu3 }
 0x25f   :  { %v12982_v46 = vadd.f32 %v2580_v44, %v2492_v49  ;;  %v2405_v48 = vpop.f32.mrf.mxu0  ;;  %v2494_v33 = vpop.f32.mrf.mxu1  ;;  %v11549_v49 = vld [vmem:[#allocation8 + $0x124] sm:$0xf] }
 0x260   :  { %v2406_v0 = vadd.f32 %v2405_v48, %v12933_v53  ;;  %v10312_v44 = vor.u32 %v11549_v49, %v10309_v51  ;;  %v11402_v49 = vld [vmem:[#allocation5 + $0x10c] sm:$0xf]  ;;  %v10440_v51 = vor.u32 %v11581_v17, %v10437_v1 }
 0x261   :  { %2444 = vmatmul.bf16.gmra.mxu0 %v12980_v2 }
 0x262   :  { %v2495_v16 = vadd.f32 %v2494_v33, %v2406_v0  ;;  %2533 = vmatmul.bf16.gmra.mxu1 %v12986_v15  ;;  %2748 = vmatpush.bf16.msra.mxu0 %v10312_v44  ;;  %v13000_v44 = vor.u32 %v11403_v21, %v10103_v37 }
 0x263   :  { %2622 = vmatmul.bf16.gmra.mxu2 %v12988_v63  ;;  %2711 = vmatmul.bf16.gmra.mxu3 %v12980_v2 }
 0x264   :  { %2837 = vmatpush.bf16.msra.mxu1 %v10440_v51  ;;  %16468 = vst [vmem:[#allocation102_spill] sm:$0xff] %v13000_v44  ;;  %v10115_v51 = vld [vmem:[#allocation5 + $0x120] sm:$0xf] }
 0x266   :  { %v2583_v28 = vpop.f32.mrf.mxu2  ;;  %v12997_v48 = vpop.f32.mrf.mxu3 }
 0x267   :  { %v12995_v43 = vadd.f32 %v2583_v28, %v2495_v16  ;;  %v2407_v0 = vpop.f32.mrf.mxu0  ;;  %v2496_v59 = vpop.f32.mrf.mxu1  ;;  %v10111_v16 = vld [vmem:[#allocation5 + $0x110] sm:$0xf]  ;;  %v10316_v28 = vor.u32 %v11552_v52, %v10315_v60 }
 0x268   :  { %v2408_v33 = vadd.f32 %v2407_v0, %v12933_v53 }
 0x269   :  { %16467 = vst [vmem:[#allocation101_spill] sm:$0xff] %v12995_v43  ;;  %3015 = vmatpush.bf16.msra.mxu3 %v10316_v28  ;;  %v13008_v43 = vor.u32 %v11404_v45, %v10111_v16  ;;  %v11405_v16 = vld [vmem:[#allocation5 + $0x124] sm:$0xf]  ;;  %v10117_v45 = vld [vmem:[#allocation5 + $0x12c] sm:$0xf0] }
 0x26a   :  { %v2497_v6 = vadd.f32 %v2496_v59, %v2408_v33  ;;  %v13006_v33 = vor.u32 %v11402_v49, %v10105_v55  ;;  %v11406_v55 = vld [vmem:[#allocation5 + $0x128] sm:$0xf0]  ;;  %v10123_v28 = vld [vmem:[#allocation5 + $0x128] sm:$0xf] }
 0x26b   :  { %16472 = vst [vmem:[#allocation106_spill] sm:$0xff] %v13008_v43 }
 0x26c   :  { %16471 = vst [vmem:[#allocation105_spill] sm:$0xff] %v13006_v33 }
 0x26e   :  { %v2585_v13 = vpop.f32.mrf.mxu2  ;;  %v13004_v14 = vpop.f32.mrf.mxu3 }
 0x26f   :  { %v13002_v0 = vadd.f32 %v2585_v13, %v2497_v6  ;;  %16470 = vst [vmem:[#allocation104_spill] sm:$0xff] %v13004_v14  ;;  %v2410_v59 = vpop.f32.mrf.mxu0  ;;  %v2499_v17 = vpop.f32.mrf.mxu1 }
 0x270   :  { %v2411_v1 = vadd.f32 %v2410_v59, %v12933_v53  ;;  %v11407_v59 = vld [vmem:[#allocation5 + $0x130] sm:$0xf0] }
 0x271   :  { %16469 = vst [vmem:[#allocation103_spill] sm:$0xff] %v13002_v0  ;;  %2449 = vmatmul.bf16.gmra.mxu0 %v13000_v44  ;;  %v11548_v0 = vld [vmem:[#allocation8 + $0x114] sm:$0xf0] }
 0x272   :  { %v2500_v2 = vadd.f32 %v2499_v17, %v2411_v1  ;;  %2538 = vmatmul.bf16.gmra.mxu1 %v13006_v33  ;;  %v13020_v17 = vor.u32 %v11406_v55, %v10115_v51  ;;  %v10293_v51 = vld [vmem:[#allocation8 + $0x110] sm:$0xf0]  ;;  %v10171_v55 = vld [vmem:[#allocation8 + $0x8] sm:$0xf] }
 0x273   :  { %2627 = vmatmul.bf16.gmra.mxu2 %v13008_v43  ;;  %2716 = vmatmul.bf16.gmra.mxu3 %v13000_v44  ;;  %v13028_v43 = vor.u32 %v11407_v59, %v10123_v28  ;;  %v10299_v33 = vld [vmem:[#allocation8 + $0x108] sm:$0xf] }
 0x274   :  { %16475 = vst [vmem:[#allocation109_spill] sm:$0xff] %v13020_v17 }
 0x275   :  { %16479 = vst [vmem:[#allocation113_spill] sm:$0xff] %v13028_v43 }
 0x276   :  { %v2588_v13 = vpop.f32.mrf.mxu2  ;;  %v13017_v21 = vpop.f32.mrf.mxu3 }
 0x277   :  { %v13015_v52 = vadd.f32 %v2588_v13, %v2500_v2  ;;  %16474 = vst [vmem:[#allocation108_spill] sm:$0xff] %v13017_v21  ;;  %v2412_v60 = vpop.f32.mrf.mxu0  ;;  %v2501_v37 = vpop.f32.mrf.mxu1  ;;  %v11409_v21 = vld [vmem:[#allocation5 + $0x140] sm:$0xf0] }
 0x278   :  { %v2413_v6 = vadd.f32 %v2412_v60, %v12933_v53 }
 0x279   :  { %16473 = vst [vmem:[#allocation107_spill] sm:$0xff] %v13015_v52  ;;  %v13026_v52 = vor.u32 %v11405_v16, %v10117_v45  ;;  %v11516_v16 = vld [vmem:[#allocation8 + $0x14] sm:$0xf0] }
 0x27a   :  { %v2502_v49 = vadd.f32 %v2501_v37, %v2413_v6  ;;  %v10172_v28 = vor.u32 %v11516_v16, %v10171_v55  ;;  %v10129_v55 = vld [vmem:[#allocation5 + $0x144] sm:$0xf0]  ;;  %v11410_v16 = vld [vmem:[#allocation5 + $0x148] sm:$0xf0] }
 0x27b   :  { %16478 = vst [vmem:[#allocation112_spill] sm:$0xff] %v13026_v52 }
 0x27c   :  { %2927 = vmatpush.bf16.msra.mxu2 %v10172_v28 }
 0x27e   :  { %v2590_v1 = vpop.f32.mrf.mxu2  ;;  %v13024_v2 = vpop.f32.mrf.mxu3 }
 0x27f   :  { %v13022_v44 = vadd.f32 %v2590_v1, %v2502_v49  ;;  %16477 = vst [vmem:[#allocation111_spill] sm:$0xff] %v13024_v2  ;;  %v2415_v13 = vpop.f32.mrf.mxu0  ;;  %v2504_v6 = vpop.f32.mrf.mxu1  ;;  %v11545_v49 = vld [vmem:[#allocation8 + $0x104] sm:$0xf]  ;;  %v10421_v2 = vld [vmem:[#allocation8 + $0x210] sm:$0xf0] }
 0x280   :  { %v2416_v60 = vadd.f32 %v2415_v13, %v12933_v53  ;;  %v10296_v1 = vor.u32 %v11545_v49, %v10293_v51  ;;  %v11408_v49 = vld [vmem:[#allocation5 + $0x13c] sm:$0xf] }
 0x281   :  { %16476 = vst [vmem:[#allocation110_spill] sm:$0xff] %v13022_v44  ;;  %2454 = vmatmul.bf16.gmra.mxu0 %v13020_v17 }
 0x282   :  { %v2505_v37 = vadd.f32 %v2504_v6, %v2416_v60  ;;  %2543 = vmatmul.bf16.gmra.mxu1 %v13026_v52  ;;  %2749 = vmatpush.bf16.msra.mxu0 %v10296_v1 }
 0x283   :  { %2632 = vmatmul.bf16.gmra.mxu2 %v13028_v43  ;;  %2721 = vmatmul.bf16.gmra.mxu3 %v13020_v17  ;;  %v10127_v43 = vld [vmem:[#allocation5 + $0x138] sm:$0xf]  ;;  %v11577_v17 = vld [vmem:[#allocation8 + $0x204] sm:$0xf] }
 0x284   :  { %v10424_v51 = vor.u32 %v11577_v17, %v10421_v2  ;;  %v13040_v1 = vor.u32 %v11409_v21, %v10127_v43 }
 0x286   :  { %v2593_v45 = vpop.f32.mrf.mxu2  ;;  %v13037_v13 = vpop.f32.mrf.mxu3  ;;  %2838 = vmatpush.bf16.msra.mxu1 %v10424_v51  ;;  %16482 = vst [vmem:[#allocation116_spill] sm:$0xff] %v13040_v1  ;;  %v10139_v51 = vld [vmem:[#allocation5 + $0x150] sm:$0xf] }
 0x287   :  { %v13035_v59 = vadd.f32 %v2593_v45, %v2505_v37  ;;  %16481 = vst [vmem:[#allocation115_spill] sm:$0xff] %v13037_v13  ;;  %v2417_v60 = vpop.f32.mrf.mxu0  ;;  %v2506_v52 = vpop.f32.mrf.mxu1  ;;  %v10135_v37 = vld [vmem:[#allocation5 + $0x140] sm:$0xf]  ;;  %v10300_v45 = vor.u32 %v11548_v0, %v10299_v33 }
 0x288   :  { %v2418_v6 = vadd.f32 %v2417_v60, %v12933_v53  ;;  %v13048_v13 = vor.u32 %v11410_v16, %v10135_v37  ;;  %v11411_v37 = vld [vmem:[#allocation5 + $0x154] sm:$0xf]  ;;  %v10141_v16 = vld [vmem:[#allocation5 + $0x15c] sm:$0xf0] }
 0x289   :  { %16480 = vst [vmem:[#allocation114_spill] sm:$0xff] %v13035_v59  ;;  %3016 = vmatpush.bf16.msra.mxu3 %v10300_v45  ;;  %v10147_v45 = vld [vmem:[#allocation5 + $0x158] sm:$0xf] }
 0x28a   :  { %v2507_v44 = vadd.f32 %v2506_v52, %v2418_v6  ;;  %v13046_v6 = vor.u32 %v11408_v49, %v10129_v55  ;;  %16486 = vst [vmem:[#allocation120_spill] sm:$0xff] %v13048_v13  ;;  %v11412_v55 = vld [vmem:[#allocation5 + $0x158] sm:$0xf0] }
 0x28c   :  { %16485 = vst [vmem:[#allocation119_spill] sm:$0xff] %v13046_v6 }
 0x28e   :  { %v2595_v59 = vpop.f32.mrf.mxu2  ;;  %v13044_v28 = vpop.f32.mrf.mxu3 }
 0x28f   :  { %v13042_v60 = vadd.f32 %v2595_v59, %v2507_v44  ;;  %16484 = vst [vmem:[#allocation118_spill] sm:$0xff] %v13044_v28  ;;  %v2420_v52 = vpop.f32.mrf.mxu0  ;;  %v2509_v2 = vpop.f32.mrf.mxu1 }
 0x290   :  { %v2421_v17 = vadd.f32 %v2420_v52, %v12933_v53  ;;  %v11413_v52 = vld [vmem:[#allocation5 + $0x160] sm:$0xf0] }
 0x291   :  { %16483 = vst [vmem:[#allocation117_spill] sm:$0xff] %v13042_v60  ;;  %2459 = vmatmul.bf16.gmra.mxu0 %v13040_v1  ;;  %v10541_v60 = vld [vmem:[#allocation8 + $0x2f8] sm:$0xf0] }
 0x292   :  { %v2510_v14 = vadd.f32 %v2509_v2, %v2421_v17  ;;  %2548 = vmatmul.bf16.gmra.mxu1 %v13046_v6  ;;  %v13060_v2 = vor.u32 %v11412_v55, %v10139_v51  ;;  %v11608_v51 = vld [vmem:[#allocation8 + $0x2f4] sm:$0xf0]  ;;  %v11574_v55 = vld [vmem:[#allocation8 + $0x1ec] sm:$0xf] }
 0x293   :  { %2637 = vmatmul.bf16.gmra.mxu2 %v13048_v13  ;;  %2726 = vmatmul.bf16.gmra.mxu3 %v13040_v1  ;;  %v13068_v13 = vor.u32 %v11413_v52, %v10147_v45  ;;  %v11606_v6 = vld [vmem:[#allocation8 + $0x2ec] sm:$0xf] }
 0x294   :  { %16489 = vst [vmem:[#allocation123_spill] sm:$0xff] %v13060_v2 }
 0x295   :  { %16493 = vst [vmem:[#allocation127_spill] sm:$0xff] %v13068_v13 }
 0x296   :  { %v2598_v43 = vpop.f32.mrf.mxu2  ;;  %v13057_v0 = vpop.f32.mrf.mxu3 }
 0x297   :  { %v13055_v44 = vadd.f32 %v2598_v43, %v2510_v14  ;;  %16488 = vst [vmem:[#allocation122_spill] sm:$0xff] %v13057_v0  ;;  %v2422_v33 = vpop.f32.mrf.mxu0  ;;  %v2511_v59 = vpop.f32.mrf.mxu1  ;;  %v11415_v0 = vld [vmem:[#allocation5 + $0x170] sm:$0xf0] }
 0x298   :  { %v2423_v21 = vadd.f32 %v2422_v33, %v12933_v53 }
 0x299   :  { %16487 = vst [vmem:[#allocation121_spill] sm:$0xff] %v13055_v44  ;;  %v13066_v44 = vor.u32 %v11411_v37, %v10141_v16  ;;  %v10413_v37 = vld [vmem:[#allocation8 + $0x1f8] sm:$0xf0] }
 0x29a   :  { %v2512_v49 = vadd.f32 %v2511_v59, %v2423_v21  ;;  %v10416_v45 = vor.u32 %v11574_v55, %v10413_v37  ;;  %v10153_v55 = vld [vmem:[#allocation5 + $0x174] sm:$0xf0]  ;;  %v11416_v37 = vld [vmem:[#allocation5 + $0x178] sm:$0xf0] }
 0x29b   :  { %16492 = vst [vmem:[#allocation126_spill] sm:$0xff] %v13066_v44 }
 0x29c   :  { %3276 = vmatpush.bf16.msrb.mxu2 %v10416_v45 }
 0x29e   :  { %v2600_v17 = vpop.f32.mrf.mxu2  ;;  %v13064_v14 = vpop.f32.mrf.mxu3 }
 0x29f   :  { %v13062_v1 = vadd.f32 %v2600_v17, %v2512_v49  ;;  %16491 = vst [vmem:[#allocation125_spill] sm:$0xff] %v13064_v14  ;;  %v2425_v43 = vpop.f32.mrf.mxu0  ;;  %v2514_v21 = vpop.f32.mrf.mxu1  ;;  %v10539_v49 = vld [vmem:[#allocation8 + $0x2e8] sm:$0xf]  ;;  %v10285_v14 = vld [vmem:[#allocation8 + $0xf8] sm:$0xf0] }
 0x2a0   :  { %v2426_v33 = vadd.f32 %v2425_v43, %v12933_v53  ;;  %v10540_v17 = vor.u32 %v11608_v51, %v10539_v49  ;;  %v11414_v49 = vld [vmem:[#allocation5 + $0x16c] sm:$0xf] }
 0x2a1   :  { %16490 = vst [vmem:[#allocation124_spill] sm:$0xff] %v13062_v1  ;;  %2464 = vmatmul.bf16.gmra.mxu0 %v13060_v2 }
 0x2a2   :  { %v2515_v59 = vadd.f32 %v2514_v21, %v2426_v33  ;;  %2553 = vmatmul.bf16.gmra.mxu1 %v13066_v44  ;;  %3098 = vmatpush.bf16.msrb.mxu0 %v10540_v17 }
 0x2a3   :  { %2642 = vmatmul.bf16.gmra.mxu2 %v13068_v13  ;;  %2731 = vmatmul.bf16.gmra.mxu3 %v13060_v2  ;;  %v10151_v13 = vld [vmem:[#allocation5 + $0x168] sm:$0xf]  ;;  %v11542_v2 = vld [vmem:[#allocation8 + $0xec] sm:$0xf] }
 0x2a4   :  { %v10288_v51 = vor.u32 %v11542_v2, %v10285_v14  ;;  %v13080_v17 = vor.u32 %v11415_v0, %v10151_v13 }
 0x2a6   :  { %v2603_v16 = vpop.f32.mrf.mxu2  ;;  %v13077_v43 = vpop.f32.mrf.mxu3  ;;  %3187 = vmatpush.bf16.msrb.mxu1 %v10288_v51  ;;  %16496 = vst [vmem:[#allocation130_spill] sm:$0xff] %v13080_v17 }
 0x2a7   :  { %v13075_v52 = vadd.f32 %v2603_v16, %v2515_v59  ;;  %16495 = vst [vmem:[#allocation129_spill] sm:$0xff] %v13077_v43  ;;  %v2427_v33 = vpop.f32.mrf.mxu0  ;;  %v2516_v44 = vpop.f32.mrf.mxu1  ;;  %v10159_v59 = vld [vmem:[#allocation5 + $0x170] sm:$0xf]  ;;  %v10544_v16 = vor.u32 %v11606_v6, %v10541_v60 }
 0x2a8   :  { %v2428_v21 = vadd.f32 %v2427_v33, %v12933_v53  ;;  %v13088_v43 = vor.u32 %v11416_v37, %v10159_v59 }
 0x2a9   :  { %16494 = vst [vmem:[#allocation128_spill] sm:$0xff] %v13075_v52  ;;  %3365 = vmatpush.bf16.msrb.mxu3 %v10544_v16 }
 0x2aa   :  { %v2517_v1 = vadd.f32 %v2516_v44, %v2428_v21  ;;  %v13086_v21 = vor.u32 %v11414_v49, %v10153_v55 }
 0x2ae   :  { %v2605_v52 = vpop.f32.mrf.mxu2  ;;  %v13084_v45 = vpop.f32.mrf.mxu3 }
 0x2af   :  { %v13082_v33 = vadd.f32 %v2605_v52, %v2517_v1  ;;  %v2430_v44 = vpop.f32.mrf.mxu0  ;;  %v2519_v14 = vpop.f32.mrf.mxu1 }
 0x2b0   :  { %v2431_v2 = vadd.f32 %v2430_v44, %v12933_v53 }
 0x2b1   :  { %2469 = vmatmul.bf16.gmra.mxu0 %v13080_v17 }
 0x2b2   :  { %v2520_v28 = vadd.f32 %v2519_v14, %v2431_v2  ;;  %2558 = vmatmul.bf16.gmra.mxu1 %v13086_v21  ;;  %v11604_v14 = vld [vmem:[#allocation8 + $0x2d4] sm:$0xf0] }
 0x2b3   :  { %2647 = vmatmul.bf16.gmra.mxu2 %v13088_v43  ;;  %2736 = vmatmul.bf16.gmra.mxu3 %v13080_v17  ;;  %v10525_v17 = vld [vmem:[#allocation8 + $0x2d8] sm:$0xf0] }
 0x2b6   :  { %v2608_v13 = vpop.f32.mrf.mxu2  ;;  %v13097_v60 = vpop.f32.mrf.mxu3 }
 0x2b7   :  { %v13095_v1 = vadd.f32 %v2608_v13, %v2520_v28  ;;  %v2432_v6 = vpop.f32.mrf.mxu0  ;;  %v2521_v52 = vpop.f32.mrf.mxu1  ;;  %v10523_v28 = vld [vmem:[#allocation8 + $0x2c8] sm:$0xf]  ;;  %v11570_v13 = vld [vmem:[#allocation8 + $0x1cc] sm:$0xf] }
 0x2b8   :  { %v2433_v0 = vadd.f32 %v2432_v6, %v12933_v53  ;;  %v10524_v6 = vor.u32 %v11604_v14, %v10523_v28 }
 0x2b9   :  { %16497 = vst [vmem:[#allocation131_spill] sm:$0xff] %v13095_v1 }
 0x2ba   :  { %v2522_v49 = vadd.f32 %v2521_v52, %v2433_v0  ;;  %v10397_v0 = vld [vmem:[#allocation8 + $0x1d8] sm:$0xf0]  ;;  %3099 = vmatpush.bf16.msrb.mxu0 %v10524_v6 }
 0x2be   :  { %v2610_v51 = vpop.f32.mrf.mxu2  ;;  %v13102_v59 = vpop.f32.mrf.mxu3 }
 0x2bf   :  { %v13100_v55 = vadd.f32 %v2610_v51, %v2522_v49  ;;  %16499 = vst [vmem:[#allocation133_spill] sm:$0xff] %v13102_v59  ;;  %v2435_v37 = vpop.f32.mrf.mxu0  ;;  %v2524_v44 = vpop.f32.mrf.mxu1  ;;  %v10400_v49 = vor.u32 %v11570_v13, %v10397_v0  ;;  %v11602_v59 = vld [vmem:[#allocation8 + $0x2cc] sm:$0xf] }
 0x2c0   :  { %v2436_v16 = vadd.f32 %v2435_v37, %v12933_v53  ;;  %v10528_v28 = vor.u32 %v11602_v59, %v10525_v17 }
 0x2c1   :  { %16498 = vst [vmem:[#allocation132_spill] sm:$0xff] %v13100_v55  ;;  %2750 = vmatmul.bf16.vlgmr.msra.gmra.mxu0 %v12755_v58  ;;  %3277 = vmatpush.bf16.msrb.mxu2 %v10400_v49  ;;  %v11538_v55 = vld [vmem:[#allocation8 + $0xcc] sm:$0xf] }
 0x2c2   :  { %v2525_v2 = vadd.f32 %v2524_v44, %v2436_v16  ;;  %2839 = vmatmul.bf16.vlgmr.msra.gmra.mxu1 %v12757_v30  ;;  %3366 = vmatpush.bf16.msrb.mxu3 %v10528_v28 }
 0x2c3   :  { %2928 = vmatmul.bf16.vlgmr.msra.gmra.mxu2 %v12750_v18  ;;  %3017 = vmatmul.bf16.vlgmr.msra.gmra.mxu3 %v12755_v58  ;;  %v10269_v58 = vld [vmem:[#allocation8 + $0xd8] sm:$0xf0] }
 0x2c4   :  { %v10272_v1 = vor.u32 %v11538_v55, %v10269_v58 }
 0x2c6   :  { %v2613_v52 = vpop.f32.mrf.mxu2  ;;  %v13111_v37 = vpop.f32.mrf.mxu3  ;;  %3188 = vmatpush.bf16.msrb.mxu1 %v10272_v1 }
 0x2c7   :  { %v13109_v51 = vadd.f32 %v2613_v52, %v2525_v2  ;;  %v2437_v16 = vpop.f32.mrf.mxu0  ;;  %v2526_v30 = vpop.f32.mrf.mxu1 }
 0x2c8   :  { %v2438_v44 = vadd.f32 %v2437_v16, %v12933_v53 }
 0x2ca   :  { %v2527_v18 = vadd.f32 %v2526_v30, %v2438_v44 }
 0x2ce   :  { %v2615_v14 = vpop.f32.mrf.mxu2  ;;  %v13116_v13 = vpop.f32.mrf.mxu3 }
 0x2cf   :  { %v13114_v2 = vadd.f32 %v2615_v14, %v2527_v18  ;;  %v2440_v0 = vpop.f32.mrf.mxu0  ;;  %v2529_v52 = vpop.f32.mrf.mxu1 }
 0x2d0   :  { %v2441_v6 = vadd.f32 %v2440_v0, %v12933_v53 }
 0x2d1   :  { %2755 = vmatmul.bf16.gmra.mxu0 %v12779_v25 }
 0x2d2   :  { %v2530_v16 = vadd.f32 %v2529_v52, %v2441_v6  ;;  %2844 = vmatmul.bf16.gmra.mxu1 %v12781_v26 }
 0x2d3   :  { %2933 = vmatmul.bf16.gmra.mxu2 %v12777_v61  ;;  %3022 = vmatmul.bf16.gmra.mxu3 %v12779_v25  ;;  %v10509_v61 = vld [vmem:[#allocation8 + $0x2b8] sm:$0xf0] }
 0x2d6   :  { %v2618_v58 = vpop.f32.mrf.mxu2  ;;  %v13125_v18 = vpop.f32.mrf.mxu3 }
 0x2d7   :  { %v13123_v30 = vadd.f32 %v2618_v58, %v2530_v16  ;;  %v2442_v17 = vpop.f32.mrf.mxu0  ;;  %v2531_v55 = vpop.f32.mrf.mxu1  ;;  %v10507_v16 = vld [vmem:[#allocation8 + $0x2a8] sm:$0xf]  ;;  %v11600_v58 = vld [vmem:[#allocation8 + $0x2b4] sm:$0xf0] }
 0x2d8   :  { %v2443_v1 = vadd.f32 %v2442_v17, %v12933_v53  ;;  %v11566_v17 = vld [vmem:[#allocation8 + $0x1ac] sm:$0xf] }
 0x2d9   :  { %16500 = vst [vmem:[#allocation134_spill] sm:$0xff] %v13123_v30  ;;  %v11598_v30 = vld [vmem:[#allocation8 + $0x2ac] sm:$0xf] }
 0x2da   :  { %v2532_v59 = vadd.f32 %v2531_v55, %v2443_v1  ;;  %v10508_v1 = vor.u32 %v11600_v58, %v10507_v16  ;;  %v10381_v55 = vld [vmem:[#allocation8 + $0x1b8] sm:$0xf0]  ;;  %v10512_v16 = vor.u32 %v11598_v30, %v10509_v61 }
 0x2dc   :  { %3100 = vmatpush.bf16.msrb.mxu0 %v10508_v1  ;;  %3367 = vmatpush.bf16.msrb.mxu3 %v10512_v16 }
 0x2de   :  { %v2620_v49 = vpop.f32.mrf.mxu2  ;;  %v13130_v28 = vpop.f32.mrf.mxu3 }
 0x2df   :  { %v13128_v44 = vadd.f32 %v2620_v49, %v2532_v59  ;;  %16502 = vst [vmem:[#allocation136_spill] sm:$0xff] %v13130_v28  ;;  %v2445_v14 = vpop.f32.mrf.mxu0  ;;  %v2534_v6 = vpop.f32.mrf.mxu1  ;;  %v10384_v49 = vor.u32 %v11566_v17, %v10381_v55  ;;  %v11534_v28 = vld [vmem:[#allocation8 + $0xac] sm:$0xf] }
 0x2e0   :  { %v2446_v0 = vadd.f32 %v2445_v14, %v12933_v53 }
 0x2e1   :  { %16501 = vst [vmem:[#allocation135_spill] sm:$0xff] %v13128_v44  ;;  %2760 = vmatmul.bf16.gmra.mxu0 %v12801_v42  ;;  %3278 = vmatpush.bf16.msrb.mxu2 %v10384_v49 }
 0x2e2   :  { %v2535_v52 = vadd.f32 %v2534_v6, %v2446_v0  ;;  %2849 = vmatmul.bf16.gmra.mxu1 %v12803_v24 }
 0x2e3   :  { %2938 = vmatmul.bf16.gmra.mxu2 %v12799_v27  ;;  %3027 = vmatmul.bf16.gmra.mxu3 %v12801_v42  ;;  %v10253_v42 = vld [vmem:[#allocation8 + $0xb8] sm:$0xf0] }
 0x2e4   :  { %v10256_v25 = vor.u32 %v11534_v28, %v10253_v42 }
 0x2e6   :  { %v2623_v59 = vpop.f32.mrf.mxu2  ;;  %v13139_v14 = vpop.f32.mrf.mxu3  ;;  %3189 = vmatpush.bf16.msrb.mxu1 %v10256_v25 }
 0x2e7   :  { %v13137_v44 = vadd.f32 %v2623_v59, %v2535_v52  ;;  %v2447_v0 = vpop.f32.mrf.mxu0  ;;  %v2536_v24 = vpop.f32.mrf.mxu1 }
 0x2e8   :  { %v2448_v6 = vadd.f32 %v2447_v0, %v12933_v53 }
 0x2ea   :  { %v2537_v27 = vadd.f32 %v2536_v24, %v2448_v6 }
 0x2ee   :  { %v2625_v58 = vpop.f32.mrf.mxu2  ;;  %v13144_v17 = vpop.f32.mrf.mxu3 }
 0x2ef   :  { %v13142_v52 = vadd.f32 %v2625_v58, %v2537_v27  ;;  %v2450_v55 = vpop.f32.mrf.mxu0  ;;  %v2539_v59 = vpop.f32.mrf.mxu1 }
 0x2f0   :  { %v2451_v1 = vadd.f32 %v2450_v55, %v12933_v53 }
 0x2f1   :  { %2765 = vmatmul.bf16.gmra.mxu0 %v12823_v7 }
 0x2f2   :  { %v2540_v0 = vadd.f32 %v2539_v59, %v2451_v1  ;;  %2854 = vmatmul.bf16.gmra.mxu1 %v12825_v62 }
 0x2f3   :  { %2943 = vmatmul.bf16.gmra.mxu2 %v12821_v29  ;;  %3032 = vmatmul.bf16.gmra.mxu3 %v12823_v7  ;;  %v10493_v29 = vld [vmem:[#allocation8 + $0x298] sm:$0xf0] }
 0x2f6   :  { %v2628_v61 = vpop.f32.mrf.mxu2  ;;  %v13153_v24 = vpop.f32.mrf.mxu3 }
 0x2f7   :  { %v13151_v25 = vadd.f32 %v2628_v61, %v2540_v0  ;;  %v2452_v27 = vpop.f32.mrf.mxu0  ;;  %v2541_v30 = vpop.f32.mrf.mxu1  ;;  %v10491_v0 = vld [vmem:[#allocation8 + $0x288] sm:$0xf]  ;;  %v11596_v61 = vld [vmem:[#allocation8 + $0x294] sm:$0xf0] }
 0x2f8   :  { %v2453_v42 = vadd.f32 %v2452_v27, %v12933_v53  ;;  %v11562_v27 = vld [vmem:[#allocation8 + $0x18c] sm:$0xf] }
 0x2f9   :  { %16503 = vst [vmem:[#allocation137_spill] sm:$0xff] %v13151_v25  ;;  %v11594_v25 = vld [vmem:[#allocation8 + $0x28c] sm:$0xf] }
 0x2fa   :  { %v2542_v28 = vadd.f32 %v2541_v30, %v2453_v42  ;;  %v10492_v42 = vor.u32 %v11596_v61, %v10491_v0  ;;  %v10365_v30 = vld [vmem:[#allocation8 + $0x198] sm:$0xf0]  ;;  %v10496_v0 = vor.u32 %v11594_v25, %v10493_v29 }
 0x2fc   :  { %3101 = vmatpush.bf16.msrb.mxu0 %v10492_v42  ;;  %3368 = vmatpush.bf16.msrb.mxu3 %v10496_v0 }
 0x2fe   :  { %v2630_v49 = vpop.f32.mrf.mxu2  ;;  %v13158_v16 = vpop.f32.mrf.mxu3 }
 0x2ff   :  { %v13156_v6 = vadd.f32 %v2630_v49, %v2542_v28  ;;  %16505 = vst [vmem:[#allocation139_spill] sm:$0xff] %v13158_v16  ;;  %v2455_v58 = vpop.f32.mrf.mxu0  ;;  %v2544_v1 = vpop.f32.mrf.mxu1  ;;  %v10368_v49 = vor.u32 %v11562_v27, %v10365_v30  ;;  %v11530_v16 = vld [vmem:[#allocation8 + $0x8c] sm:$0xf] }
 0x300   :  { %v2456_v55 = vadd.f32 %v2455_v58, %v12933_v53 }
 0x301   :  { %16504 = vst [vmem:[#allocation138_spill] sm:$0xff] %v13156_v6  ;;  %2770 = vmatmul.bf16.gmra.mxu0 %v12845_v8  ;;  %3279 = vmatpush.bf16.msrb.mxu2 %v10368_v49 }
 0x302   :  { %v2545_v59 = vadd.f32 %v2544_v1, %v2456_v55  ;;  %2859 = vmatmul.bf16.gmra.mxu1 %v12847_v19 }
 0x303   :  { %2948 = vmatmul.bf16.gmra.mxu2 %v12843_v36  ;;  %3037 = vmatmul.bf16.gmra.mxu3 %v12845_v8  ;;  %v10237_v8 = vld [vmem:[#allocation8 + $0x98] sm:$0xf0] }
 0x304   :  { %v10240_v7 = vor.u32 %v11530_v16, %v10237_v8 }
 0x306   :  { %v2633_v28 = vpop.f32.mrf.mxu2  ;;  %v13167_v58 = vpop.f32.mrf.mxu3  ;;  %3190 = vmatpush.bf16.msrb.mxu1 %v10240_v7 }
 0x307   :  { %v13165_v6 = vadd.f32 %v2633_v28, %v2545_v59  ;;  %v2457_v55 = vpop.f32.mrf.mxu0  ;;  %v2546_v19 = vpop.f32.mrf.mxu1 }
 0x308   :  { %v2458_v1 = vadd.f32 %v2457_v55, %v12933_v53 }
 0x30a   :  { %v2547_v36 = vadd.f32 %v2546_v19, %v2458_v1 }
 0x30e   :  { %v2635_v61 = vpop.f32.mrf.mxu2  ;;  %v13172_v27 = vpop.f32.mrf.mxu3 }
 0x30f   :  { %v13170_v59 = vadd.f32 %v2635_v61, %v2547_v36  ;;  %v2460_v30 = vpop.f32.mrf.mxu0  ;;  %v2549_v28 = vpop.f32.mrf.mxu1 }
 0x310   :  { %v2461_v42 = vadd.f32 %v2460_v30, %v12933_v53 }
 0x311   :  { %2775 = vmatmul.bf16.gmra.mxu0 %v12867_v40 }
 0x312   :  { %v2550_v55 = vadd.f32 %v2549_v28, %v2461_v42  ;;  %2864 = vmatmul.bf16.gmra.mxu1 %v12869_v54 }
 0x313   :  { %2953 = vmatmul.bf16.gmra.mxu2 %v12865_v5  ;;  %3042 = vmatmul.bf16.gmra.mxu3 %v12867_v40  ;;  %v10477_v40 = vld [vmem:[#allocation8 + $0x278] sm:$0xf0] }
 0x316   :  { %v2638_v29 = vpop.f32.mrf.mxu2  ;;  %v13181_v19 = vpop.f32.mrf.mxu3 }
 0x317   :  { %v13179_v7 = vadd.f32 %v2638_v29, %v2550_v55  ;;  %v2462_v36 = vpop.f32.mrf.mxu0  ;;  %v2551_v25 = vpop.f32.mrf.mxu1 }
 0x318   :  { %v2463_v8 = vadd.f32 %v2462_v36, %v12933_v53 }
 0x319   :  { %16506 = vst [vmem:[#allocation140_spill] sm:$0xff] %v13179_v7  ;;  %v10221_v7 = vld [vmem:[#allocation8 + $0x78] sm:$0xf0] }
 0x31a   :  { %v2552_v16 = vadd.f32 %v2551_v25, %v2463_v8 }
 0x31e   :  { %v2640_v49 = vpop.f32.mrf.mxu2  ;;  %v13186_v0 = vpop.f32.mrf.mxu3 }
 0x31f   :  { %v13184_v1 = vadd.f32 %v2640_v49, %v2552_v16  ;;  %16508 = vst [vmem:[#allocation142_spill] sm:$0xff] %v13186_v0  ;;  %v2465_v61 = vpop.f32.mrf.mxu0  ;;  %v2554_v42 = vpop.f32.mrf.mxu1  ;;  %v10475_v49 = vld [vmem:[#allocation8 + $0x268] sm:$0xf] }
 0x320   :  { %v2466_v30 = vadd.f32 %v2465_v61, %v12933_v53  ;;  %v11592_v61 = vld [vmem:[#allocation8 + $0x274] sm:$0xf0] }
 0x321   :  { %16507 = vst [vmem:[#allocation141_spill] sm:$0xff] %v13184_v1  ;;  %2780 = vmatmul.bf16.gmra.mxu0 %v12889_v22  ;;  %v10349_v1 = vld [vmem:[#allocation8 + $0x178] sm:$0xf0] }
 0x322   :  { %v2555_v28 = vadd.f32 %v2554_v42, %v2466_v30  ;;  %2869 = vmatmul.bf16.gmra.mxu1 %v12891_v23  ;;  %v11558_v30 = vld [vmem:[#allocation8 + $0x16c] sm:$0xf]  ;;  %v10476_v42 = vor.u32 %v11592_v61, %v10475_v49 }
 0x323   :  { %2958 = vmatmul.bf16.gmra.mxu2 %v12887_v39  ;;  %3047 = vmatmul.bf16.gmra.mxu3 %v12889_v22  ;;  %v10352_v23 = vor.u32 %v11558_v30, %v10349_v1  ;;  %v11526_v22 = vld [vmem:[#allocation8 + $0x6c] sm:$0xf] }
 0x324   :  { %3102 = vmatpush.bf16.msrb.mxu0 %v10476_v42  ;;  %v12072_v61 = vld [vmem:[#allocation11 + $0x8] sm:$0x77] }
 0x325   :  { %3280 = vmatpush.bf16.msrb.mxu2 %v10352_v23  ;;  %v1639_v23 = vperm.slane %v12921_v31, 5  ;;  %v1640_v30 = vperm.slane %v12072_v61, 1  ;;  %v11588_v61 = vld [vmem:[#allocation8 + $0x254] sm:$0xf0] }
 0x326   :  { %v2643_v55 = vpop.f32.mrf.mxu2  ;;  %v13195_v36 = vpop.f32.mrf.mxu3 }
 0x327   :  { %v13193_v29 = vadd.f32 %v2643_v55, %v2555_v28  ;;  %16510 = vst [vmem:[#allocation144_spill] sm:$0xff] %v13195_v36  ;;  %v2467_v8 = vpop.f32.mrf.mxu0  ;;  %v2556_v16 = vpop.f32.mrf.mxu1  ;;  %v11590_v28 = vld [vmem:[#allocation8 + $0x26c] sm:$0xf] }
 0x328   :  { %v2468_v25 = vadd.f32 %v2467_v8, %v12933_v53  ;;  %v10224_v8 = vor.u32 %v11526_v22, %v10221_v7  ;;  %v10480_v49 = vor.u32 %v11590_v28, %v10477_v40 }
 0x329   :  { %16509 = vst [vmem:[#allocation143_spill] sm:$0xff] %v13193_v29 }
 0x32a   :  { %v2557_v0 = vadd.f32 %v2556_v16, %v2468_v25  ;;  %3191 = vmatpush.bf16.msrb.mxu1 %v10224_v8  ;;  %3369 = vmatpush.bf16.msrb.mxu3 %v10480_v49 }
 0x32e   :  { %v2645_v39 = vpop.f32.mrf.mxu2  ;;  %v13200_v29 = vpop.f32.mrf.mxu3 }
 0x32f   :  { %v13198_v55 = vadd.f32 %v2645_v39, %v2557_v0  ;;  %v2470_v36 = vpop.f32.mrf.mxu0  ;;  %v2559_v54 = vpop.f32.mrf.mxu1 }
 0x330   :  { %v2471_v5 = vadd.f32 %v2470_v36, %v12933_v53 }
 0x331   :  { %2785 = vmatmul.bf16.gmra.mxu0 %v12911_v11 }
 0x332   :  { %v2560_v25 = vadd.f32 %v2559_v54, %v2471_v5  ;;  %2874 = vmatmul.bf16.gmra.mxu1 %v12913_v57  ;;  %v13213_v54 = vperm.slane %v1639_v23, 1 }
 0x333   :  { %2963 = vmatmul.bf16.gmra.mxu2 %v12909_v35  ;;  %3052 = vmatmul.bf16.gmra.mxu3 %v12911_v11 }
 0x334   :  { %v2663_v36 = vadd.f32 %v12955_v32, %v13213_v54  ;;  %v2665_v23 = vadd.f32 %v12964_v47, %v13213_v54 }
 0x336   :  { %v2648_v39 = vpop.f32.mrf.mxu2  ;;  %v13210_v7 = vpop.f32.mrf.mxu3 }
 0x337   :  { %v13208_v22 = vadd.f32 %v2648_v39, %v2560_v25  ;;  %v2472_v1 = vpop.f32.mrf.mxu0  ;;  %v2561_v5 = vpop.f32.mrf.mxu1 }
 0x338   :  { %v2473_v40 = vadd.f32 %v2472_v1, %v12933_v53  ;;  %v13222_v53 = vperm.slane %v1640_v30, 1  ;;  %v11554_v30 = vld [vmem:[#allocation8 + $0x14c] sm:$0xf] }
 0x33a   :  { %v2562_v0 = vadd.f32 %v2561_v5, %v2473_v40 }
 0x33e   :  { %v2650_v16 = vpop.f32.mrf.mxu2  ;;  %v13219_v31 = vpop.f32.mrf.mxu3 }
 0x33f   :  { %v13217_v42 = vadd.f32 %v2650_v16, %v2562_v0  ;;  %16512 = vst [vmem:[#allocation146_spill] sm:$0xff] %v13219_v31  ;;  %v2751_v28 = vpop.f32.mrf.mxu0  ;;  %v2840_v49 = vpop.f32.mrf.mxu1  ;;  %v10459_v16 = vld [vmem:[#allocation8 + $0x248] sm:$0xf]  ;;  %v10205_v31 = vld [vmem:[#allocation8 + $0x58] sm:$0xf0] }
 0x340   :  { %v2752_v8 = vadd.f32 %v2751_v28, %v2663_v36 }
 0x341   :  { %16511 = vst [vmem:[#allocation145_spill] sm:$0xff] %v13217_v42  ;;  %2790 = vmatmul.bf16.gmra.mxu0 %v12938_v38  ;;  %v11522_v42 = vld [vmem:[#allocation8 + $0x4c] sm:$0xf] }
 0x342   :  { %v2841_v25 = vadd.f32 %v2840_v49, %v2752_v8  ;;  %2879 = vmatmul.bf16.gmra.mxu1 %v12940_v3  ;;  %v10460_v8 = vor.u32 %v11588_v61, %v10459_v16  ;;  %v10333_v49 = vld [vmem:[#allocation8 + $0x158] sm:$0xf0]  ;;  %v10208_v16 = vor.u32 %v11522_v42, %v10205_v31  ;;  %v11586_v61 = vld [vmem:[#allocation8 + $0x24c] sm:$0xf] }
 0x343   :  { %2968 = vmatmul.bf16.gmra.mxu2 %v12936_v4  ;;  %3057 = vmatmul.bf16.gmra.mxu3 %v12938_v38 }
 0x344   :  { %v5142_v32 = vpack.c.bf16 %v2841_v25, %v12953_v9  ;;  %v10336_v25 = vor.u32 %v11554_v30, %v10333_v49  ;;  %3103 = vmatpush.bf16.msrb.mxu0 %v10460_v8  ;;  %v10461_v30 = vld [vmem:[#allocation8 + $0x258] sm:$0xf0]  ;;  %3192 = vmatpush.bf16.msrb.mxu1 %v10208_v16 }
 0x345   :  { %v10464_v49 = vor.u32 %v11586_v61, %v10461_v30 }
 0x346   :  { %v2929_v39 = vpop.f32.mrf.mxu2  ;;  %v3018_v40 = vpop.f32.mrf.mxu3  ;;  %v5993_v38 = vrot.slane %v5142_v32, 4  ;;  %3281 = vmatpush.bf16.msrb.mxu2 %v10336_v25  ;;  %v5280_v4 = vunpack.c.l.b16 %v5142_v32 }
 0x347   :  { %v2930_v1 = vadd.f32 %v2929_v39, %v13222_v53  ;;  %v2753_v5 = vpop.f32.mrf.mxu0  ;;  %v2842_v36 = vpop.f32.mrf.mxu1  ;;  %v2668_v39 = vadd.f32 %v12977_v56, %v13213_v54  ;;  %3370 = vmatpush.bf16.msrb.mxu3 %v10464_v49 }
 0x348   :  { %v2754_v0 = vadd.f32 %v2753_v5, %v2665_v23 }
 0x349   :  { %v13231_v28 = vadd.f32 %v3018_v40, %v2930_v1  ;;  %v13236_v1 = vunpack.c.l.b16 %v5993_v38 }
 0x34a   :  { %v2843_v9 = vadd.f32 %v2842_v36, %v2754_v0 }
 0x34b   :  { %16513 = vst [vmem:[#allocation147_spill] sm:$0xff] %v13236_v1 }
 0x34c   :  { %v5144_v47 = vpack.c.bf16 %v2843_v9, %v12962_v12 }
 0x34e   :  { %v5281_v23 = vunpack.c.l.b16 %v5144_v47  ;;  %v5994_v5 = vrot.slane %v5144_v47, 4  ;;  %v2931_v3 = vpop.f32.mrf.mxu2  ;;  %v3020_v0 = vpop.f32.mrf.mxu3 }
 0x34f   :  { %v2932_v40 = vadd.f32 %v2931_v3, %v13222_v53  ;;  %v2756_v36 = vpop.f32.mrf.mxu0  ;;  %v2845_v8 = vpop.f32.mrf.mxu1 }
 0x350   :  { %v2757_v12 = vadd.f32 %v2756_v36, %v2668_v39  ;;  %v13239_v9 = vpack.c.b16 %v5281_v23, %v5280_v4  ;;  %v13241_v56 = vunpack.c.l.b16 %v5994_v5  ;;  %v2670_v4 = vadd.f32 %v12984_v41, %v13213_v54 }
 0x351   :  { %v13243_v32 = vadd.f32 %v3020_v0, %v2932_v40  ;;  %2795 = vmatmul.bf16.gmra.mxu0 %v12966_v10 }
 0x352   :  { %16514 = vst [vmem:[#allocation148_spill] sm:$0xff] %v13239_v9  ;;  %v2846_v25 = vadd.f32 %v2845_v8, %v2757_v12  ;;  %2884 = vmatmul.bf16.gmra.mxu1 %v12968_v20 }
 0x353   :  { %16515 = vst [vmem:[#allocation149_spill] sm:$0xff] %v13241_v56  ;;  %2973 = vmatmul.bf16.gmra.mxu2 %v12960_v50  ;;  %3062 = vmatmul.bf16.gmra.mxu3 %v12966_v10  ;;  %v16522_v56 = vld [vmem:[#allocation103_spill] sm:$0xff] }
 0x354   :  { %v5146_v3 = vpack.c.bf16 %v2846_v25, %v12975_v34  ;;  %v2673_v34 = vadd.f32 %v12997_v48, %v13213_v54  ;;  %v10317_v48 = vld [vmem:[#allocation8 + $0x138] sm:$0xf0] }
 0x356   :  { %v2934_v42 = vpop.f32.mrf.mxu2  ;;  %v3023_v47 = vpop.f32.mrf.mxu3  ;;  %v5995_v36 = vrot.slane %v5146_v3, 4  ;;  %v5282_v61 = vunpack.c.l.b16 %v5146_v3  ;;  %v16519_v3 = vld [vmem:[#allocation98_spill] sm:$0xff] }
 0x357   :  { %v2935_v31 = vadd.f32 %v2934_v42, %v13222_v53  ;;  %v2758_v39 = vpop.f32.mrf.mxu0  ;;  %v2847_v5 = vpop.f32.mrf.mxu1 }
 0x358   :  { %v2759_v23 = vadd.f32 %v2758_v39, %v2670_v4  ;;  %v13261_v42 = vunpack.c.l.b16 %v5995_v36  ;;  %v16521_v36 = vld [vmem:[#allocation104_spill] sm:$0xff] }
 0x359   :  { %v13255_v40 = vadd.f32 %v3023_v47, %v2935_v31 }
 0x35a   :  { %v2848_v0 = vadd.f32 %v2847_v5, %v2759_v23  ;;  %16516 = vst [vmem:[#allocation150_spill] sm:$0xff] %v13261_v42  ;;  %v16520_v5 = vld [vmem:[#allocation101_spill] sm:$0xff] }
 0x35c   :  { %v5148_v16 = vpack.c.bf16 %v2848_v0, %v12982_v46 }
 0x35e   :  { %v5283_v30 = vunpack.c.l.b16 %v5148_v16  ;;  %v5996_v12 = vrot.slane %v5148_v16, 4  ;;  %v2936_v41 = vpop.f32.mrf.mxu2  ;;  %v3025_v49 = vpop.f32.mrf.mxu3  ;;  %v2675_v16 = vadd.f32 %v16521_v36, %v13213_v54 }
 0x35f   :  { %v2937_v8 = vadd.f32 %v2936_v41, %v13222_v53  ;;  %v2761_v25 = vpop.f32.mrf.mxu0  ;;  %v2850_v47 = vpop.f32.mrf.mxu1 }
 0x360   :  { %v13263_v4 = vunpack.c.l.b16 %v5996_v12  ;;  %v2762_v31 = vadd.f32 %v2761_v25, %v2673_v34  ;;  %v13265_v39 = vpack.c.b16 %v5283_v30, %v5282_v61  ;;  %v11584_v25 = vld [vmem:[#allocation8 + $0x234] sm:$0xf0] }
 0x361   :  { %v13267_v46 = vadd.f32 %v3025_v49, %v2937_v8  ;;  %2800 = vmatmul.bf16.gmra.mxu0 %v12986_v15  ;;  %v10443_v49 = vld [vmem:[#allocation8 + $0x228] sm:$0xf] }
 0x362   :  { %16517 = vst [vmem:[#allocation151_spill] sm:$0xff] %v13263_v4  ;;  %v2851_v23 = vadd.f32 %v2850_v47, %v2762_v31  ;;  %2889 = vmatmul.bf16.gmra.mxu1 %v12988_v63  ;;  %v11550_v31 = vld [vmem:[#allocation8 + $0x12c] sm:$0xf]  ;;  %v10444_v38 = vor.u32 %v11584_v25, %v10443_v49  ;;  %v10445_v49 = vld [vmem:[#allocation8 + $0x238] sm:$0xf0] }
 0x363   :  { %16518 = vst [vmem:[#allocation152_spill] sm:$0xff] %v13265_v39  ;;  %2978 = vmatmul.bf16.gmra.mxu2 %v16519_v3  ;;  %3067 = vmatmul.bf16.gmra.mxu3 %v12986_v15  ;;  %v11518_v39 = vld [vmem:[#allocation8 + $0x2c] sm:$0xf]  ;;  %v10189_v15 = vld [vmem:[#allocation8 + $0x38] sm:$0xf0] }
 0x364   :  { %v5150_v0 = vpack.c.bf16 %v2851_v23, %v16520_v5  ;;  %v10320_v5 = vor.u32 %v11550_v31, %v10317_v48  ;;  %3104 = vmatpush.bf16.msrb.mxu0 %v10444_v38  ;;  %v11582_v38 = vld [vmem:[#allocation8 + $0x22c] sm:$0xf]  ;;  %v10173_v3 = vld [vmem:[#allocation8 + $0x18] sm:$0xf0] }
 0x365   :  { %v10448_v31 = vor.u32 %v11582_v38, %v10445_v49 }
 0x366   :  { %v2939_v34 = vpop.f32.mrf.mxu2  ;;  %v3028_v30 = vpop.f32.mrf.mxu3  ;;  %v6025_v1 = vrot.slane %v5150_v0, 4  ;;  %3282 = vmatpush.bf16.msrb.mxu2 %v10320_v5  ;;  %v5312_v4 = vunpack.c.l.b16 %v5150_v0 }
 0x367   :  { %v2940_v61 = vadd.f32 %v2939_v34, %v13222_v53  ;;  %v2763_v12 = vpop.f32.mrf.mxu0  ;;  %v2852_v8 = vpop.f32.mrf.mxu1  ;;  %v16523_v34 = vld [vmem:[#allocation108_spill] sm:$0xff]  ;;  %3371 = vmatpush.bf16.msrb.mxu3 %v10448_v31  ;;  %v16534_v31 = vld [vmem:[#allocation110_spill] sm:$0xff] }
 0x368   :  { %v2764_v41 = vadd.f32 %v2763_v12, %v2675_v16  ;;  %v2678_v42 = vadd.f32 %v16523_v34, %v13213_v54 }
 0x369   :  { %v13279_v47 = vadd.f32 %v3028_v30, %v2940_v61  ;;  %v13284_v61 = vunpack.c.l.b16 %v6025_v1  ;;  %v16528_v1 = vld [vmem:[#allocation105_spill] sm:$0xff] }
 0x36a   :  { %v2853_v23 = vadd.f32 %v2852_v8, %v2764_v41  ;;  %v10192_v8 = vor.u32 %v11518_v39, %v10189_v15  ;;  %v16529_v15 = vld [vmem:[#allocation106_spill] sm:$0xff] }
 0x36b   :  { %16524 = vst [vmem:[#allocation101_spill] sm:$0xff] %v13284_v61  ;;  %v16530_v39 = vld [vmem:[#allocation102_spill] sm:$0xff] }
 0x36c   :  { %v5152_v36 = vpack.c.bf16 %v2853_v23, %v16522_v56  ;;  %3193 = vmatpush.bf16.msrb.mxu1 %v10192_v8 }
 0x36e   :  { %v5313_v16 = vunpack.c.l.b16 %v5152_v36  ;;  %v6026_v12 = vrot.slane %v5152_v36, 4  ;;  %v2941_v9 = vpop.f32.mrf.mxu2  ;;  %v3030_v41 = vpop.f32.mrf.mxu3 }
 0x36f   :  { %v2942_v30 = vadd.f32 %v2941_v9, %v13222_v53  ;;  %v2766_v48 = vpop.f32.mrf.mxu0  ;;  %v2855_v25 = vpop.f32.mrf.mxu1 }
 0x370   :  { %v2767_v56 = vadd.f32 %v2766_v48, %v2678_v42  ;;  %v13287_v23 = vpack.c.b16 %v5313_v16, %v5312_v4  ;;  %v13289_v0 = vunpack.c.l.b16 %v6026_v12  ;;  %v16531_v42 = vld [vmem:[#allocation107_spill] sm:$0xff] }
 0x371   :  { %v13291_v5 = vadd.f32 %v3030_v41, %v2942_v30  ;;  %2805 = vmatmul.bf16.gmra.mxu0 %v16528_v1  ;;  %v16532_v4 = vld [vmem:[#allocation111_spill] sm:$0xff] }
 0x372   :  { %16525 = vst [vmem:[#allocation104_spill] sm:$0xff] %v13287_v23  ;;  %v2856_v36 = vadd.f32 %v2855_v25, %v2767_v56  ;;  %2894 = vmatmul.bf16.gmra.mxu1 %v16529_v15  ;;  %v2680_v16 = vadd.f32 %v16532_v4, %v13213_v54 }
 0x373   :  { %16526 = vst [vmem:[#allocation103_spill] sm:$0xff] %v13289_v0  ;;  %2983 = vmatmul.bf16.gmra.mxu2 %v16530_v39  ;;  %3072 = vmatmul.bf16.gmra.mxu3 %v16528_v1 }
 0x374   :  { %16527 = vst [vmem:[#allocation108_spill] sm:$0xff] %v13291_v5  ;;  %v5154_v34 = vpack.c.bf16 %v2856_v36, %v16531_v42  ;;  %v16535_v36 = vld [vmem:[#allocation115_spill] sm:$0xff] }
 0x375   :  { %v2683_v42 = vadd.f32 %v16535_v36, %v13213_v54  ;;  %v11514_v5 = vld [vmem:[#allocation8 + $0xc] sm:$0xf] }
 0x376   :  { %v2944_v12 = vpop.f32.mrf.mxu2  ;;  %v3033_v41 = vpop.f32.mrf.mxu3  ;;  %v6027_v25 = vrot.slane %v5154_v34, 4  ;;  %v5314_v61 = vunpack.c.l.b16 %v5154_v34  ;;  %v16541_v34 = vld [vmem:[#allocation113_spill] sm:$0xff] }
 0x377   :  { %v2945_v30 = vadd.f32 %v2944_v12, %v13222_v53  ;;  %v2768_v48 = vpop.f32.mrf.mxu0  ;;  %v2857_v38 = vpop.f32.mrf.mxu1 }
 0x378   :  { %v2769_v8 = vadd.f32 %v2768_v48, %v2680_v16  ;;  %v13309_v15 = vunpack.c.l.b16 %v6027_v25  ;;  %v16543_v25 = vld [vmem:[#allocation114_spill] sm:$0xff] }
 0x379   :  { %v13303_v49 = vadd.f32 %v3033_v41, %v2945_v30 }
 0x37a   :  { %v2858_v56 = vadd.f32 %v2857_v38, %v2769_v8  ;;  %16536 = vst [vmem:[#allocation111_spill] sm:$0xff] %v13309_v15 }
 0x37b   :  { %16533 = vst [vmem:[#allocation107_spill] sm:$0xff] %v13303_v49 }
 0x37c   :  { %v5156_v9 = vpack.c.bf16 %v2858_v56, %v16534_v31  ;;  %v16540_v56 = vld [vmem:[#allocation112_spill] sm:$0xff]  ;;  %v16542_v31 = vld [vmem:[#allocation109_spill] sm:$0xff] }
 0x37e   :  { %v5315_v0 = vunpack.c.l.b16 %v5156_v9  ;;  %v6028_v23 = vrot.slane %v5156_v9, 4  ;;  %v2946_v4 = vpop.f32.mrf.mxu2  ;;  %v3035_v12 = vpop.f32.mrf.mxu3  ;;  %v11546_v9 = vld [vmem:[#allocation8 + $0x10c] sm:$0xf] }
 0x37f   :  { %v2947_v1 = vadd.f32 %v2946_v4, %v13222_v53  ;;  %v2771_v39 = vpop.f32.mrf.mxu0  ;;  %v2860_v41 = vpop.f32.mrf.mxu1 }
 0x380   :  { %v13311_v16 = vunpack.c.l.b16 %v6028_v23  ;;  %v2772_v30 = vadd.f32 %v2771_v39, %v2683_v42  ;;  %v13313_v48 = vpack.c.b16 %v5315_v0, %v5314_v61  ;;  %v16544_v23 = vld [vmem:[#allocation118_spill] sm:$0xff] }
 0x381   :  { %v13315_v8 = vadd.f32 %v3035_v12, %v2947_v1  ;;  %2810 = vmatmul.bf16.gmra.mxu0 %v16540_v56  ;;  %v2685_v61 = vadd.f32 %v16544_v23, %v13213_v54 }
 0x382   :  { %16537 = vst [vmem:[#allocation110_spill] sm:$0xff] %v13311_v16  ;;  %v2861_v38 = vadd.f32 %v2860_v41, %v2772_v30  ;;  %2899 = vmatmul.bf16.gmra.mxu1 %v16541_v34  ;;  %v10427_v30 = vld [vmem:[#allocation8 + $0x208] sm:$0xf]  ;;  %v11580_v41 = vld [vmem:[#allocation8 + $0x214] sm:$0xf0] }
 0x383   :  { %16538 = vst [vmem:[#allocation115_spill] sm:$0xff] %v13313_v48  ;;  %2988 = vmatmul.bf16.gmra.mxu2 %v16542_v31  ;;  %3077 = vmatmul.bf16.gmra.mxu3 %v16540_v56  ;;  %v10428_v16 = vor.u32 %v11580_v41, %v10427_v30  ;;  %v10301_v48 = vld [vmem:[#allocation8 + $0x118] sm:$0xf0] }
 0x384   :  { %16539 = vst [vmem:[#allocation153_spill] sm:$0xff] %v13315_v8  ;;  %v5158_v36 = vpack.c.bf16 %v2861_v38, %v16543_v25  ;;  %v10304_v25 = vor.u32 %v11546_v9, %v10301_v48  ;;  %v16545_v31 = vld [vmem:[#allocation117_spill] sm:$0xff]  ;;  %v10176_v9 = vor.u32 %v11514_v5, %v10173_v3  ;;  %v16551_v3 = vld [vmem:[#allocation120_spill] sm:$0xff] }
 0x385   :  { %3105 = vmatpush.bf16.msrb.mxu0 %v10428_v16  ;;  %v11578_v16 = vld [vmem:[#allocation8 + $0x20c] sm:$0xf]  ;;  %v16552_v5 = vld [vmem:[#allocation116_spill] sm:$0xff] }
 0x386   :  { %v2949_v0 = vpop.f32.mrf.mxu2  ;;  %v3038_v39 = vpop.f32.mrf.mxu3  ;;  %v6057_v56 = vrot.slane %v5158_v36, 4  ;;  %3283 = vmatpush.bf16.msrb.mxu2 %v10304_v25  ;;  %v5344_v8 = vunpack.c.l.b16 %v5158_v36  ;;  %3194 = vmatpush.bf16.msrb.mxu1 %v10176_v9 }
 0x387   :  { %v2950_v1 = vadd.f32 %v2949_v0, %v13222_v53  ;;  %v2773_v42 = vpop.f32.mrf.mxu0  ;;  %v2862_v12 = vpop.f32.mrf.mxu1  ;;  %v16546_v0 = vld [vmem:[#allocation122_spill] sm:$0xff] }
 0x388   :  { %v2774_v4 = vadd.f32 %v2773_v42, %v2685_v61  ;;  %v2688_v34 = vadd.f32 %v16546_v0, %v13213_v54 }
 0x389   :  { %v13327_v15 = vadd.f32 %v3038_v39, %v2950_v1  ;;  %v13332_v1 = vunpack.c.l.b16 %v6057_v56  ;;  %v16550_v56 = vld [vmem:[#allocation119_spill] sm:$0xff] }
 0x38a   :  { %v2863_v38 = vadd.f32 %v2862_v12, %v2774_v4  ;;  %v10429_v12 = vld [vmem:[#allocation8 + $0x218] sm:$0xf0] }
 0x38b   :  { %16547 = vst [vmem:[#allocation114_spill] sm:$0xff] %v13332_v1  ;;  %v10432_v41 = vor.u32 %v11578_v16, %v10429_v12 }
 0x38c   :  { %v5160_v23 = vpack.c.bf16 %v2863_v38, %v16545_v31 }
 0x38d   :  { %3372 = vmatpush.bf16.msrb.mxu3 %v10432_v41  ;;  %v16555_v41 = vld [vmem:[#allocation124_spill] sm:$0xff] }
 0x38e   :  { %v5345_v61 = vunpack.c.l.b16 %v5160_v23  ;;  %v6058_v42 = vrot.slane %v5160_v23, 4  ;;  %v2951_v49 = vpop.f32.mrf.mxu2  ;;  %v3040_v4 = vpop.f32.mrf.mxu3 }
 0x38f   :  { %v2952_v39 = vadd.f32 %v2951_v49, %v13222_v53  ;;  %v2776_v48 = vpop.f32.mrf.mxu0  ;;  %v2865_v30 = vpop.f32.mrf.mxu1 }
 0x390   :  { %v2777_v31 = vadd.f32 %v2776_v48, %v2688_v34  ;;  %v13335_v38 = vpack.c.b16 %v5345_v61, %v5344_v8  ;;  %v13337_v36 = vunpack.c.l.b16 %v6058_v42  ;;  %v16553_v34 = vld [vmem:[#allocation121_spill] sm:$0xff] }
 0x391   :  { %v13339_v25 = vadd.f32 %v3040_v4, %v2952_v39  ;;  %2815 = vmatmul.bf16.gmra.mxu0 %v16550_v56  ;;  %v16554_v8 = vld [vmem:[#allocation125_spill] sm:$0xff] }
 0x392   :  { %16548 = vst [vmem:[#allocation118_spill] sm:$0xff] %v13335_v38  ;;  %v2866_v23 = vadd.f32 %v2865_v30, %v2777_v31  ;;  %2904 = vmatmul.bf16.gmra.mxu1 %v16551_v3  ;;  %v2690_v61 = vadd.f32 %v16554_v8, %v13213_v54 }
 0x393   :  { %16549 = vst [vmem:[#allocation117_spill] sm:$0xff] %v13337_v36  ;;  %2993 = vmatmul.bf16.gmra.mxu2 %v16552_v5  ;;  %3082 = vmatmul.bf16.gmra.mxu3 %v16550_v56 }
 0x394   :  { %v5162_v0 = vpack.c.bf16 %v2866_v23, %v16553_v34  ;;  %v16556_v23 = vld [vmem:[#allocation129_spill] sm:$0xff] }
 0x395   :  { %v2693_v34 = vadd.f32 %v16556_v23, %v13213_v54 }
 0x396   :  { %v2954_v42 = vpop.f32.mrf.mxu2  ;;  %v3043_v4 = vpop.f32.mrf.mxu3  ;;  %v6059_v30 = vrot.slane %v5162_v0, 4  ;;  %v5346_v1 = vunpack.c.l.b16 %v5162_v0  ;;  %v16562_v0 = vld [vmem:[#allocation127_spill] sm:$0xff] }
 0x397   :  { %v2955_v39 = vadd.f32 %v2954_v42, %v13222_v53  ;;  %v2778_v48 = vpop.f32.mrf.mxu0  ;;  %v2867_v16 = vpop.f32.mrf.mxu1 }
 0x398   :  { %v2779_v9 = vadd.f32 %v2778_v48, %v2690_v61  ;;  %v13357_v3 = vunpack.c.l.b16 %v6059_v30  ;;  %v16564_v30 = vld [vmem:[#allocation128_spill] sm:$0xff] }
 0x399   :  { %v13351_v12 = vadd.f32 %v3043_v4, %v2955_v39 }
 0x39a   :  { %v2868_v31 = vadd.f32 %v2867_v16, %v2779_v9  ;;  %16557 = vst [vmem:[#allocation122_spill] sm:$0xff] %v13357_v3 }
 0x39c   :  { %v5164_v49 = vpack.c.bf16 %v2868_v31, %v16555_v41  ;;  %v16561_v31 = vld [vmem:[#allocation126_spill] sm:$0xff]  ;;  %v16563_v41 = vld [vmem:[#allocation123_spill] sm:$0xff] }
 0x39e   :  { %v5347_v36 = vunpack.c.l.b16 %v5164_v49  ;;  %v6060_v38 = vrot.slane %v5164_v49, 4  ;;  %v2956_v8 = vpop.f32.mrf.mxu2  ;;  %v3045_v42 = vpop.f32.mrf.mxu3 }
 0x39f   :  { %v2957_v56 = vadd.f32 %v2956_v8, %v13222_v53  ;;  %v2781_v5 = vpop.f32.mrf.mxu0  ;;  %v2870_v4 = vpop.f32.mrf.mxu1 }
 0x3a0   :  { %v13359_v61 = vunpack.c.l.b16 %v6060_v38  ;;  %v2782_v39 = vadd.f32 %v2781_v5, %v2693_v34  ;;  %v13361_v48 = vpack.c.b16 %v5347_v36, %v5346_v1  ;;  %v2695_v1 = vadd.f32 %v13084_v45, %v13213_v54 }
 0x3a1   :  { %v13363_v9 = vadd.f32 %v3045_v42, %v2957_v56  ;;  %2820 = vmatmul.bf16.gmra.mxu0 %v16561_v31  ;;  %v10659_v42 = vld [vmem:[#allocation10 + $0xe0] sm:$0xf] }
 0x3a2   :  { %16558 = vst [vmem:[#allocation121_spill] sm:$0xff] %v13359_v61  ;;  %v2871_v16 = vadd.f32 %v2870_v4, %v2782_v39  ;;  %2909 = vmatmul.bf16.gmra.mxu1 %v16562_v0  ;;  %v11639_v39 = vld [vmem:[#allocation10 + $0xec] sm:$0xf0]  ;;  %v10915_v4 = vld [vmem:[#allocation10 + $0x2e0] sm:$0xf] }
 0x3a3   :  { %16559 = vst [vmem:[#allocation125_spill] sm:$0xff] %v13361_v48  ;;  %2998 = vmatmul.bf16.gmra.mxu2 %v16563_v41  ;;  %3087 = vmatmul.bf16.gmra.mxu3 %v16561_v31  ;;  %v10660_v3 = vor.u32 %v11639_v39, %v10659_v42  ;;  %v11703_v61 = vld [vmem:[#allocation10 + $0x2ec] sm:$0xf0]  ;;  %v10787_v0 = vld [vmem:[#allocation10 + $0x1e0] sm:$0xf] }
 0x3a4   :  { %16560 = vst [vmem:[#allocation124_spill] sm:$0xff] %v13363_v9  ;;  %v5166_v23 = vpack.c.bf16 %v2871_v16, %v16564_v30  ;;  %v10916_v30 = vor.u32 %v11703_v61, %v10915_v4  ;;  %v11671_v9 = vld [vmem:[#allocation10 + $0x1ec] sm:$0xf0]  ;;  %v10661_v42 = vld [vmem:[#allocation10 + $0xf0] sm:$0xf0] }
 0x3a5   :  { %4042 = vmatpush.bf16.msra.mxu0 %v10660_v3  ;;  %v11637_v3 = vld [vmem:[#allocation10 + $0xe4] sm:$0xf] }
 0x3a6   :  { %v2959_v38 = vpop.f32.mrf.mxu2  ;;  %v3048_v56 = vpop.f32.mrf.mxu3  ;;  %v6089_v48 = vrot.slane %v5166_v23, 4  ;;  %4220 = vmatpush.bf16.msra.mxu2 %v10916_v30  ;;  %v5376_v31 = vunpack.c.l.b16 %v5166_v23  ;;  %v10664_v4 = vor.u32 %v11637_v3, %v10661_v42 }
 0x3a7   :  { %v2960_v36 = vadd.f32 %v2959_v38, %v13222_v53  ;;  %v2783_v5 = vpop.f32.mrf.mxu0  ;;  %v2872_v8 = vpop.f32.mrf.mxu1  ;;  %v2698_v38 = vadd.f32 %v13097_v60, %v13213_v54 }
 0x3a8   :  { %v2784_v34 = vadd.f32 %v2783_v5, %v2695_v1  ;;  %4309 = vmatpush.bf16.msra.mxu3 %v10664_v4  ;;  %v2703_v4 = vadd.f32 %v13111_v37, %v13213_v54  ;;  %v16575_v37 = vld [vmem:[#allocation24_spill] sm:$0xff] }
 0x3a9   :  { %v13375_v49 = vadd.f32 %v3048_v56, %v2960_v36  ;;  %v13380_v36 = vunpack.c.l.b16 %v6089_v48 }
 0x3aa   :  { %v2873_v16 = vadd.f32 %v2872_v8, %v2784_v34  ;;  %v10788_v8 = vor.u32 %v11671_v9, %v10787_v0  ;;  %v16568_v9 = vld [vmem:[#allocation130_spill] sm:$0xff]  ;;  %v16569_v0 = vld [vmem:[#allocation131_spill] sm:$0xff] }
 0x3ab   :  { %16565 = vst [vmem:[#allocation129_spill] sm:$0xff] %v13380_v36 }
 0x3ac   :  { %v5168_v45 = vpack.c.bf16 %v2873_v16, %v13082_v33  ;;  %4131 = vmatpush.bf16.msra.mxu1 %v10788_v8 }
 0x3ae   :  { %v5377_v1 = vunpack.c.l.b16 %v5168_v45  ;;  %v6090_v5 = vrot.slane %v5168_v45, 4  ;;  %v2961_v41 = vpop.f32.mrf.mxu2  ;;  %v3050_v34 = vpop.f32.mrf.mxu3 }
 0x3af   :  { %v2962_v56 = vadd.f32 %v2961_v41, %v13222_v53  ;;  %v2786_v61 = vpop.f32.mrf.mxu0  ;;  %v2875_v39 = vpop.f32.mrf.mxu1 }
 0x3b0   :  { %v2787_v33 = vadd.f32 %v2786_v61, %v2698_v38  ;;  %v13383_v16 = vpack.c.b16 %v5377_v1, %v5376_v31  ;;  %v13385_v60 = vunpack.c.l.b16 %v6090_v5  ;;  %v16570_v31 = vld [vmem:[#allocation133_spill] sm:$0xff] }
 0x3b1   :  { %v13387_v23 = vadd.f32 %v3050_v34, %v2962_v56  ;;  %2825 = vmatmul.bf16.gmra.mxu0 %v13086_v21  ;;  %v2700_v45 = vadd.f32 %v16570_v31, %v13213_v54 }
 0x3b2   :  { %16566 = vst [vmem:[#allocation128_spill] sm:$0xff] %v13383_v16  ;;  %v2876_v30 = vadd.f32 %v2875_v39, %v2787_v33  ;;  %2914 = vmatmul.bf16.gmra.mxu1 %v13088_v43  ;;  %v16571_v33 = vld [vmem:[#allocation132_spill] sm:$0xff] }
 0x3b3   :  { %16567 = vst [vmem:[#allocation154_spill] sm:$0xff] %v13385_v60  ;;  %3003 = vmatmul.bf16.gmra.mxu2 %v16568_v9  ;;  %3092 = vmatmul.bf16.gmra.mxu3 %v13086_v21 }
 0x3b4   :  { %v5170_v41 = vpack.c.bf16 %v2876_v30, %v16569_v0 }
 0x3b6   :  { %v2964_v38 = vpop.f32.mrf.mxu2  ;;  %v3053_v5 = vpop.f32.mrf.mxu3  ;;  %v6091_v42 = vrot.slane %v5170_v41, 4  ;;  %v5378_v30 = vunpack.c.l.b16 %v5170_v41 }
 0x3b7   :  { %v2965_v1 = vadd.f32 %v2964_v38, %v13222_v53  ;;  %v2788_v56 = vpop.f32.mrf.mxu0  ;;  %v2877_v61 = vpop.f32.mrf.mxu1 }
 0x3b8   :  { %v2789_v34 = vadd.f32 %v2788_v56, %v2700_v45  ;;  %v13405_v16 = vunpack.c.l.b16 %v6091_v42 }
 0x3b9   :  { %v13399_v8 = vadd.f32 %v3053_v5, %v2965_v1 }
 0x3ba   :  { %v2878_v3 = vadd.f32 %v2877_v61, %v2789_v34  ;;  %16572 = vst [vmem:[#allocation130_spill] sm:$0xff] %v13405_v16  ;;  %v11699_v16 = vld [vmem:[#allocation10 + $0x2cc] sm:$0xf0] }
 0x3bc   :  { %v5172_v39 = vpack.c.bf16 %v2878_v3, %v16571_v33  ;;  %v16576_v3 = vld [vmem:[#allocation27_spill] sm:$0xff]  ;;  %v16577_v33 = vld [vmem:[#allocation26_spill] sm:$0xff] }
 0x3be   :  { %v5379_v0 = vunpack.c.l.b16 %v5172_v39  ;;  %v6092_v48 = vrot.slane %v5172_v39, 4  ;;  %v2966_v31 = vpop.f32.mrf.mxu2  ;;  %v3055_v38 = vpop.f32.mrf.mxu3 }
 0x3bf   :  { %v2967_v36 = vadd.f32 %v2966_v31, %v13222_v53  ;;  %v2791_v60 = vpop.f32.mrf.mxu0  ;;  %v2880_v5 = vpop.f32.mrf.mxu1  ;;  %v10643_v31 = vld [vmem:[#allocation10 + $0xc0] sm:$0xf] }
 0x3c0   :  { %v13407_v45 = vunpack.c.l.b16 %v6092_v48  ;;  %v2792_v1 = vadd.f32 %v2791_v60, %v2703_v4  ;;  %v13409_v56 = vpack.c.b16 %v5379_v0, %v5378_v30  ;;  %v2705_v60 = vadd.f32 %v13116_v13, %v13213_v54 }
 0x3c1   :  { %v13411_v34 = vadd.f32 %v3055_v38, %v2967_v36  ;;  %3106 = vmatmul.bf16.vlgmr.msrb.gmra.mxu0 %v16575_v37  ;;  %v11635_v38 = vld [vmem:[#allocation10 + $0xcc] sm:$0xf0] }
 0x3c2   :  { %16573 = vst [vmem:[#allocation131_spill] sm:$0xff] %v13407_v45  ;;  %v2881_v61 = vadd.f32 %v2880_v5, %v2792_v1  ;;  %3195 = vmatmul.bf16.vlgmr.msrb.gmra.mxu1 %v16576_v3  ;;  %v10899_v1 = vld [vmem:[#allocation10 + $0x2c0] sm:$0xf]  ;;  %v10644_v41 = vor.u32 %v11635_v38, %v10643_v31  ;;  %v11667_v3 = vld [vmem:[#allocation10 + $0x1cc] sm:$0xf0] }
 0x3c3   :  { %16574 = vst [vmem:[#allocation133_spill] sm:$0xff] %v13409_v56  ;;  %3284 = vmatmul.bf16.vlgmr.msrb.gmra.mxu2 %v16577_v33  ;;  %3373 = vmatmul.bf16.vlgmr.msrb.gmra.mxu3 %v16575_v37  ;;  %v10771_v33 = vld [vmem:[#allocation10 + $0x1c0] sm:$0xf]  ;;  %v10645_v31 = vld [vmem:[#allocation10 + $0xd0] sm:$0xf0] }
 0x3c4   :  { %v5174_v42 = vpack.c.bf16 %v2881_v61, %v13109_v51  ;;  %v10900_v61 = vor.u32 %v11699_v16, %v10899_v1  ;;  %4043 = vmatpush.bf16.msra.mxu0 %v10644_v41  ;;  %v11633_v41 = vld [vmem:[#allocation10 + $0xc4] sm:$0xf] }
 0x3c5   :  { %v10648_v1 = vor.u32 %v11633_v41, %v10645_v31 }
 0x3c6   :  { %v2969_v48 = vpop.f32.mrf.mxu2  ;;  %v3058_v39 = vpop.f32.mrf.mxu3  ;;  %v6121_v45 = vrot.slane %v5174_v42, 4  ;;  %4221 = vmatpush.bf16.msra.mxu2 %v10900_v61  ;;  %v5408_v56 = vunpack.c.l.b16 %v5174_v42 }
 0x3c7   :  { %v2970_v36 = vadd.f32 %v2969_v48, %v13222_v53  ;;  %v2793_v4 = vpop.f32.mrf.mxu0  ;;  %v2882_v0 = vpop.f32.mrf.mxu1  ;;  %v2708_v48 = vadd.f32 %v13125_v18, %v13213_v54  ;;  %4310 = vmatpush.bf16.msra.mxu3 %v10648_v1 }
 0x3c8   :  { %v2794_v30 = vadd.f32 %v2793_v4, %v2705_v60 }
 0x3c9   :  { %v13423_v5 = vadd.f32 %v3058_v39, %v2970_v36  ;;  %v13428_v36 = vunpack.c.l.b16 %v6121_v45 }
 0x3ca   :  { %v2883_v51 = vadd.f32 %v2882_v0, %v2794_v30  ;;  %v10772_v0 = vor.u32 %v11667_v3, %v10771_v33  ;;  %v16582_v3 = vld [vmem:[#allocation48_spill] sm:$0xff]  ;;  %v16583_v33 = vld [vmem:[#allocation134_spill] sm:$0xff] }
 0x3cb   :  { %16578 = vst [vmem:[#allocation132_spill] sm:$0xff] %v13428_v36 }
 0x3cc   :  { %v5176_v13 = vpack.c.bf16 %v2883_v51, %v13114_v2  ;;  %4132 = vmatpush.bf16.msra.mxu1 %v10772_v0 }
 0x3ce   :  { %v5409_v60 = vunpack.c.l.b16 %v5176_v13  ;;  %v6122_v4 = vrot.slane %v5176_v13, 4  ;;  %v2971_v37 = vpop.f32.mrf.mxu2  ;;  %v3060_v30 = vpop.f32.mrf.mxu3 }
 0x3cf   :  { %v2972_v39 = vadd.f32 %v2971_v37, %v13222_v53  ;;  %v2796_v16 = vpop.f32.mrf.mxu0  ;;  %v2885_v38 = vpop.f32.mrf.mxu1  ;;  %v16581_v37 = vld [vmem:[#allocation29_spill] sm:$0xff] }
 0x3d0   :  { %v2797_v2 = vadd.f32 %v2796_v16, %v2708_v48  ;;  %v13431_v51 = vpack.c.b16 %v5409_v60, %v5408_v56  ;;  %v13433_v18 = vunpack.c.l.b16 %v6122_v4  ;;  %v16584_v56 = vld [vmem:[#allocation136_spill] sm:$0xff] }
 0x3d1   :  { %v13435_v42 = vadd.f32 %v3060_v30, %v2972_v39  ;;  %3111 = vmatmul.bf16.gmra.mxu0 %v12781_v26  ;;  %v2710_v48 = vadd.f32 %v16584_v56, %v13213_v54 }
 0x3d2   :  { %16579 = vst [vmem:[#allocation155_spill] sm:$0xff] %v13431_v51  ;;  %v2886_v61 = vadd.f32 %v2885_v38, %v2797_v2  ;;  %3200 = vmatmul.bf16.gmra.mxu1 %v16581_v37  ;;  %v16585_v38 = vld [vmem:[#allocation135_spill] sm:$0xff] }
 0x3d3   :  { %16580 = vst [vmem:[#allocation156_spill] sm:$0xff] %v13433_v18  ;;  %3289 = vmatmul.bf16.gmra.mxu2 %v16582_v3  ;;  %3378 = vmatmul.bf16.gmra.mxu3 %v12781_v26 }
 0x3d4   :  { %v5178_v13 = vpack.c.bf16 %v2886_v61, %v16583_v33  ;;  %v2713_v61 = vadd.f32 %v13139_v14, %v13213_v54  ;;  %v16589_v14 = vld [vmem:[#allocation55_spill] sm:$0xff] }
 0x3d6   :  { %v2974_v60 = vpop.f32.mrf.mxu2  ;;  %v3063_v39 = vpop.f32.mrf.mxu3  ;;  %v6123_v2 = vrot.slane %v5178_v13, 4  ;;  %v5410_v33 = vunpack.c.l.b16 %v5178_v13 }
 0x3d7   :  { %v2975_v4 = vadd.f32 %v2974_v60, %v13222_v53  ;;  %v2798_v30 = vpop.f32.mrf.mxu0  ;;  %v2887_v0 = vpop.f32.mrf.mxu1 }
 0x3d8   :  { %v2799_v16 = vadd.f32 %v2798_v30, %v2710_v48  ;;  %v13453_v26 = vunpack.c.l.b16 %v6123_v2 }
 0x3d9   :  { %v13447_v41 = vadd.f32 %v3063_v39, %v2975_v4 }
 0x3da   :  { %v2888_v31 = vadd.f32 %v2887_v0, %v2799_v16  ;;  %16586 = vst [vmem:[#allocation48_spill] sm:$0xff] %v13453_v26  ;;  %v11695_v26 = vld [vmem:[#allocation10 + $0x2ac] sm:$0xf0] }
 0x3dc   :  { %v5180_v1 = vpack.c.bf16 %v2888_v31, %v16585_v38  ;;  %v16590_v31 = vld [vmem:[#allocation53_spill] sm:$0xff]  ;;  %v16591_v38 = vld [vmem:[#allocation54_spill] sm:$0xff] }
 0x3de   :  { %v5411_v45 = vunpack.c.l.b16 %v5180_v1  ;;  %v6124_v36 = vrot.slane %v5180_v1, 4  ;;  %v2976_v56 = vpop.f32.mrf.mxu2  ;;  %v3065_v60 = vpop.f32.mrf.mxu3 }
 0x3df   :  { %v2977_v18 = vadd.f32 %v2976_v56, %v13222_v53  ;;  %v2801_v51 = vpop.f32.mrf.mxu0  ;;  %v2890_v39 = vpop.f32.mrf.mxu1  ;;  %v10627_v56 = vld [vmem:[#allocation10 + $0xa0] sm:$0xf] }
 0x3e0   :  { %v13455_v48 = vunpack.c.l.b16 %v6124_v36  ;;  %v2802_v4 = vadd.f32 %v2801_v51, %v2713_v61  ;;  %v13457_v30 = vpack.c.b16 %v5411_v45, %v5410_v33  ;;  %v2715_v36 = vadd.f32 %v13144_v17, %v13213_v54 }
 0x3e1   :  { %v13459_v16 = vadd.f32 %v3065_v60, %v2977_v18  ;;  %3116 = vmatmul.bf16.gmra.mxu0 %v16589_v14  ;;  %v11631_v60 = vld [vmem:[#allocation10 + $0xac] sm:$0xf0] }
 0x3e2   :  { %16587 = vst [vmem:[#allocation134_spill] sm:$0xff] %v13455_v48  ;;  %v2891_v0 = vadd.f32 %v2890_v39, %v2802_v4  ;;  %3205 = vmatmul.bf16.gmra.mxu1 %v16590_v31  ;;  %v10883_v4 = vld [vmem:[#allocation10 + $0x2a0] sm:$0xf]  ;;  %v10628_v13 = vor.u32 %v11631_v60, %v10627_v56  ;;  %v11663_v31 = vld [vmem:[#allocation10 + $0x1ac] sm:$0xf0] }
 0x3e3   :  { %16588 = vst [vmem:[#allocation136_spill] sm:$0xff] %v13457_v30  ;;  %3294 = vmatmul.bf16.gmra.mxu2 %v16591_v38  ;;  %3383 = vmatmul.bf16.gmra.mxu3 %v16589_v14  ;;  %v10755_v38 = vld [vmem:[#allocation10 + $0x1a0] sm:$0xf]  ;;  %v10629_v56 = vld [vmem:[#allocation10 + $0xb0] sm:$0xf0] }
 0x3e4   :  { %v5182_v2 = vpack.c.bf16 %v2891_v0, %v13137_v44  ;;  %v10884_v0 = vor.u32 %v11695_v26, %v10883_v4  ;;  %4044 = vmatpush.bf16.msra.mxu0 %v10628_v13  ;;  %v11629_v13 = vld [vmem:[#allocation10 + $0xa4] sm:$0xf] }
 0x3e5   :  { %v10632_v4 = vor.u32 %v11629_v13, %v10629_v56 }
 0x3e6   :  { %v2979_v51 = vpop.f32.mrf.mxu2  ;;  %v3068_v45 = vpop.f32.mrf.mxu3  ;;  %v6153_v48 = vrot.slane %v5182_v2, 4  ;;  %4222 = vmatpush.bf16.msra.mxu2 %v10884_v0  ;;  %v5440_v30 = vunpack.c.l.b16 %v5182_v2 }
 0x3e7   :  { %v2980_v18 = vadd.f32 %v2979_v51, %v13222_v53  ;;  %v2803_v1 = vpop.f32.mrf.mxu0  ;;  %v2892_v33 = vpop.f32.mrf.mxu1  ;;  %v2718_v51 = vadd.f32 %v13153_v24, %v13213_v54  ;;  %4311 = vmatpush.bf16.msra.mxu3 %v10632_v4 }
 0x3e8   :  { %v2804_v61 = vadd.f32 %v2803_v1, %v2715_v36 }
 0x3e9   :  { %v13471_v39 = vadd.f32 %v3068_v45, %v2980_v18  ;;  %v13476_v18 = vunpack.c.l.b16 %v6153_v48 }
 0x3ea   :  { %v2893_v44 = vadd.f32 %v2892_v33, %v2804_v61  ;;  %v10756_v33 = vor.u32 %v11663_v31, %v10755_v38  ;;  %v16596_v31 = vld [vmem:[#allocation60_spill] sm:$0xff]  ;;  %v16597_v38 = vld [vmem:[#allocation137_spill] sm:$0xff] }
 0x3eb   :  { %16592 = vst [vmem:[#allocation135_spill] sm:$0xff] %v13476_v18 }
 0x3ec   :  { %v5184_v17 = vpack.c.bf16 %v2893_v44, %v13142_v52  ;;  %4133 = vmatpush.bf16.msra.mxu1 %v10756_v33 }
 0x3ee   :  { %v5441_v36 = vunpack.c.l.b16 %v5184_v17  ;;  %v6154_v1 = vrot.slane %v5184_v17, 4  ;;  %v2981_v14 = vpop.f32.mrf.mxu2  ;;  %v3070_v61 = vpop.f32.mrf.mxu3 }
 0x3ef   :  { %v2982_v45 = vadd.f32 %v2981_v14, %v13222_v53  ;;  %v2806_v26 = vpop.f32.mrf.mxu0  ;;  %v2895_v60 = vpop.f32.mrf.mxu1  ;;  %v16595_v14 = vld [vmem:[#allocation59_spill] sm:$0xff] }
 0x3f0   :  { %v2807_v52 = vadd.f32 %v2806_v26, %v2718_v51  ;;  %v13479_v44 = vpack.c.b16 %v5441_v36, %v5440_v30  ;;  %v13481_v24 = vunpack.c.l.b16 %v6154_v1  ;;  %v16598_v30 = vld [vmem:[#allocation139_spill] sm:$0xff] }
 0x3f1   :  { %v13483_v2 = vadd.f32 %v3070_v61, %v2982_v45  ;;  %3121 = vmatmul.bf16.gmra.mxu0 %v12825_v62  ;;  %v2720_v51 = vadd.f32 %v16598_v30, %v13213_v54 }
 0x3f2   :  { %16593 = vst [vmem:[#allocation157_spill] sm:$0xff] %v13479_v44  ;;  %v2896_v0 = vadd.f32 %v2895_v60, %v2807_v52  ;;  %3210 = vmatmul.bf16.gmra.mxu1 %v16595_v14  ;;  %v16599_v60 = vld [vmem:[#allocation138_spill] sm:$0xff] }
 0x3f3   :  { %16594 = vst [vmem:[#allocation158_spill] sm:$0xff] %v13481_v24  ;;  %3299 = vmatmul.bf16.gmra.mxu2 %v16596_v31  ;;  %3388 = vmatmul.bf16.gmra.mxu3 %v12825_v62 }
 0x3f4   :  { %v5186_v17 = vpack.c.bf16 %v2896_v0, %v16597_v38  ;;  %v2723_v0 = vadd.f32 %v13167_v58, %v13213_v54  ;;  %v16603_v58 = vld [vmem:[#allocation67_spill] sm:$0xff] }
 0x3f6   :  { %v2984_v36 = vpop.f32.mrf.mxu2  ;;  %v3073_v45 = vpop.f32.mrf.mxu3  ;;  %v6155_v52 = vrot.slane %v5186_v17, 4  ;;  %v5442_v38 = vunpack.c.l.b16 %v5186_v17 }
 0x3f7   :  { %v2985_v1 = vadd.f32 %v2984_v36, %v13222_v53  ;;  %v2808_v61 = vpop.f32.mrf.mxu0  ;;  %v2897_v33 = vpop.f32.mrf.mxu1 }
 0x3f8   :  { %v2809_v26 = vadd.f32 %v2808_v61, %v2720_v51  ;;  %v13501_v62 = vunpack.c.l.b16 %v6155_v52 }
 0x3f9   :  { %v13495_v13 = vadd.f32 %v3073_v45, %v2985_v1 }
 0x3fa   :  { %v2898_v56 = vadd.f32 %v2897_v33, %v2809_v26  ;;  %16600 = vst [vmem:[#allocation60_spill] sm:$0xff] %v13501_v62  ;;  %v11691_v62 = vld [vmem:[#allocation10 + $0x28c] sm:$0xf0] }
 0x3fc   :  { %v5188_v4 = vpack.c.bf16 %v2898_v56, %v16599_v60  ;;  %v16604_v56 = vld [vmem:[#allocation65_spill] sm:$0xff]  ;;  %v16605_v60 = vld [vmem:[#allocation66_spill] sm:$0xff] }
 0x3fe   :  { %v5443_v48 = vunpack.c.l.b16 %v5188_v4  ;;  %v6156_v18 = vrot.slane %v5188_v4, 4  ;;  %v2986_v30 = vpop.f32.mrf.mxu2  ;;  %v3075_v36 = vpop.f32.mrf.mxu3 }
 0x3ff   :  { %v2987_v24 = vadd.f32 %v2986_v30, %v13222_v53  ;;  %v2811_v44 = vpop.f32.mrf.mxu0  ;;  %v2900_v45 = vpop.f32.mrf.mxu1  ;;  %v10611_v30 = vld [vmem:[#allocation10 + $0x80] sm:$0xf] }
 0x400   :  { %v13503_v51 = vunpack.c.l.b16 %v6156_v18  ;;  %v2812_v1 = vadd.f32 %v2811_v44, %v2723_v0  ;;  %v13505_v61 = vpack.c.b16 %v5443_v48, %v5442_v38  ;;  %v2725_v18 = vadd.f32 %v13172_v27, %v13213_v54 }
 0x401   :  { %v13507_v26 = vadd.f32 %v3075_v36, %v2987_v24  ;;  %3126 = vmatmul.bf16.gmra.mxu0 %v16603_v58  ;;  %v11627_v36 = vld [vmem:[#allocation10 + $0x8c] sm:$0xf0] }
 0x402   :  { %16601 = vst [vmem:[#allocation137_spill] sm:$0xff] %v13503_v51  ;;  %v2901_v33 = vadd.f32 %v2900_v45, %v2812_v1  ;;  %3215 = vmatmul.bf16.gmra.mxu1 %v16604_v56  ;;  %v10867_v1 = vld [vmem:[#allocation10 + $0x280] sm:$0xf]  ;;  %v10612_v17 = vor.u32 %v11627_v36, %v10611_v30  ;;  %v11659_v56 = vld [vmem:[#allocation10 + $0x18c] sm:$0xf0] }
 0x403   :  { %16602 = vst [vmem:[#allocation139_spill] sm:$0xff] %v13505_v61  ;;  %3304 = vmatmul.bf16.gmra.mxu2 %v16605_v60  ;;  %3393 = vmatmul.bf16.gmra.mxu3 %v16603_v58  ;;  %v10739_v60 = vld [vmem:[#allocation10 + $0x180] sm:$0xf]  ;;  %v10613_v30 = vld [vmem:[#allocation10 + $0x90] sm:$0xf0] }
 0x404   :  { %v5190_v52 = vpack.c.bf16 %v2901_v33, %v13165_v6  ;;  %v10868_v33 = vor.u32 %v11691_v62, %v10867_v1  ;;  %4045 = vmatpush.bf16.msra.mxu0 %v10612_v17  ;;  %v11625_v17 = vld [vmem:[#allocation10 + $0x84] sm:$0xf] }
 0x405   :  { %v10616_v1 = vor.u32 %v11625_v17, %v10613_v30 }
 0x406   :  { %v2989_v44 = vpop.f32.mrf.mxu2  ;;  %v3078_v48 = vpop.f32.mrf.mxu3  ;;  %v6185_v51 = vrot.slane %v5190_v52, 4  ;;  %4223 = vmatpush.bf16.msra.mxu2 %v10868_v33  ;;  %v5472_v61 = vunpack.c.l.b16 %v5190_v52 }
 0x407   :  { %v2990_v24 = vadd.f32 %v2989_v44, %v13222_v53  ;;  %v2813_v4 = vpop.f32.mrf.mxu0  ;;  %v2902_v38 = vpop.f32.mrf.mxu1  ;;  %v2728_v44 = vadd.f32 %v13181_v19, %v13213_v54  ;;  %4312 = vmatpush.bf16.msra.mxu3 %v10616_v1  ;;  %v16614_v1 = vld [vmem:[#allocation141_spill] sm:$0xff] }
 0x408   :  { %v2814_v0 = vadd.f32 %v2813_v4, %v2725_v18 }
 0x409   :  { %v13519_v45 = vadd.f32 %v3078_v48, %v2990_v24  ;;  %v13524_v24 = vunpack.c.l.b16 %v6185_v51  ;;  %v16609_v51 = vld [vmem:[#allocation73_spill] sm:$0xff] }
 0x40a   :  { %v2903_v6 = vadd.f32 %v2902_v38, %v2814_v0  ;;  %v10740_v38 = vor.u32 %v11659_v56, %v10739_v60  ;;  %v16610_v56 = vld [vmem:[#allocation71_spill] sm:$0xff]  ;;  %v16611_v60 = vld [vmem:[#allocation72_spill] sm:$0xff] }
 0x40b   :  { %16606 = vst [vmem:[#allocation138_spill] sm:$0xff] %v13524_v24 }
 0x40c   :  { %v5192_v27 = vpack.c.bf16 %v2903_v6, %v13170_v59  ;;  %4134 = vmatpush.bf16.msra.mxu1 %v10740_v38 }
 0x40e   :  { %v5473_v18 = vunpack.c.l.b16 %v5192_v27  ;;  %v6186_v4 = vrot.slane %v5192_v27, 4  ;;  %v2991_v58 = vpop.f32.mrf.mxu2  ;;  %v3080_v0 = vpop.f32.mrf.mxu3  ;;  %v16612_v27 = vld [vmem:[#allocation140_spill] sm:$0xff] }
 0x40f   :  { %v2992_v48 = vadd.f32 %v2991_v58, %v13222_v53  ;;  %v2816_v62 = vpop.f32.mrf.mxu0  ;;  %v2905_v36 = vpop.f32.mrf.mxu1 }
 0x410   :  { %v2817_v59 = vadd.f32 %v2816_v62, %v2728_v44  ;;  %v13527_v6 = vpack.c.b16 %v5473_v18, %v5472_v61  ;;  %v13529_v19 = vunpack.c.l.b16 %v6186_v4  ;;  %v16613_v61 = vld [vmem:[#allocation142_spill] sm:$0xff] }
 0x411   :  { %v13531_v52 = vadd.f32 %v3080_v0, %v2992_v48  ;;  %3131 = vmatmul.bf16.gmra.mxu0 %v16609_v51  ;;  %v2730_v18 = vadd.f32 %v16613_v61, %v13213_v54 }
 0x412   :  { %16607 = vst [vmem:[#allocation159_spill] sm:$0xff] %v13527_v6  ;;  %v2906_v33 = vadd.f32 %v2905_v36, %v2817_v59  ;;  %3220 = vmatmul.bf16.gmra.mxu1 %v16610_v56 }
 0x413   :  { %16608 = vst [vmem:[#allocation160_spill] sm:$0xff] %v13529_v19  ;;  %3309 = vmatmul.bf16.gmra.mxu2 %v16611_v60  ;;  %3398 = vmatmul.bf16.gmra.mxu3 %v16609_v51 }
 0x414   :  { %v5194_v44 = vpack.c.bf16 %v2906_v33, %v16612_v27  ;;  %v16615_v33 = vld [vmem:[#allocation144_spill] sm:$0xff] }
 0x415   :  { %v2733_v27 = vadd.f32 %v16615_v33, %v13213_v54 }
 0x416   :  { %v2994_v4 = vpop.f32.mrf.mxu2  ;;  %v3083_v0 = vpop.f32.mrf.mxu3  ;;  %v6187_v36 = vrot.slane %v5194_v44, 4  ;;  %v5474_v24 = vunpack.c.l.b16 %v5194_v44  ;;  %v16620_v44 = vld [vmem:[#allocation77_spill] sm:$0xff] }
 0x417   :  { %v2995_v48 = vadd.f32 %v2994_v4, %v13222_v53  ;;  %v2818_v62 = vpop.f32.mrf.mxu0  ;;  %v2907_v17 = vpop.f32.mrf.mxu1 }
 0x418   :  { %v2819_v38 = vadd.f32 %v2818_v62, %v2730_v18  ;;  %v13549_v56 = vunpack.c.l.b16 %v6187_v36  ;;  %v16622_v36 = vld [vmem:[#allocation143_spill] sm:$0xff] }
 0x419   :  { %v13543_v30 = vadd.f32 %v3083_v0, %v2995_v48 }
 0x41a   :  { %v2908_v59 = vadd.f32 %v2907_v17, %v2819_v38  ;;  %16616 = vst [vmem:[#allocation140_spill] sm:$0xff] %v13549_v56 }
 0x41c   :  { %v5196_v58 = vpack.c.bf16 %v2908_v59, %v16614_v1  ;;  %v16619_v59 = vld [vmem:[#allocation79_spill] sm:$0xff]  ;;  %v16621_v1 = vld [vmem:[#allocation78_spill] sm:$0xff] }
 0x41e   :  { %v5475_v19 = vunpack.c.l.b16 %v5196_v58  ;;  %v6188_v6 = vrot.slane %v5196_v58, 4  ;;  %v2996_v61 = vpop.f32.mrf.mxu2  ;;  %v3085_v4 = vpop.f32.mrf.mxu3 }
 0x41f   :  { %v2997_v51 = vadd.f32 %v2996_v61, %v13222_v53  ;;  %v2821_v60 = vpop.f32.mrf.mxu0  ;;  %v2910_v0 = vpop.f32.mrf.mxu1 }
 0x420   :  { %v13551_v18 = vunpack.c.l.b16 %v6188_v6  ;;  %v2822_v48 = vadd.f32 %v2821_v60, %v2733_v27  ;;  %v13553_v62 = vpack.c.b16 %v5475_v19, %v5474_v24  ;;  %v10595_v6 = vld [vmem:[#allocation10 + $0x60] sm:$0xf]  ;;  %v11623_v60 = vld [vmem:[#allocation10 + $0x6c] sm:$0xf0]  ;;  %v2735_v27 = vadd.f32 %v13200_v29, %v13213_v54 }
 0x421   :  { %v13555_v38 = vadd.f32 %v3085_v4, %v2997_v51  ;;  %3136 = vmatmul.bf16.gmra.mxu0 %v16619_v59  ;;  %v10851_v24 = vld [vmem:[#allocation10 + $0x260] sm:$0xf]  ;;  %v10596_v19 = vor.u32 %v11623_v60, %v10595_v6  ;;  %v11687_v51 = vld [vmem:[#allocation10 + $0x26c] sm:$0xf0]  ;;  %v2738_v60 = vadd.f32 %v13210_v7, %v13213_v54 }
 0x422   :  { %16617 = vst [vmem:[#allocation142_spill] sm:$0xff] %v13551_v18  ;;  %v2911_v17 = vadd.f32 %v2910_v0, %v2822_v48  ;;  %3225 = vmatmul.bf16.gmra.mxu1 %v16620_v44  ;;  %v10852_v4 = vor.u32 %v11687_v51, %v10851_v24 }
 0x423   :  { %16618 = vst [vmem:[#allocation141_spill] sm:$0xff] %v13553_v62  ;;  %3314 = vmatmul.bf16.gmra.mxu2 %v16621_v1  ;;  %3403 = vmatmul.bf16.gmra.mxu3 %v16619_v59 }
 0x424   :  { %v5198_v33 = vpack.c.bf16 %v2911_v17, %v16622_v36  ;;  %4046 = vmatpush.bf16.msra.mxu0 %v10596_v19  ;;  %4224 = vmatpush.bf16.msra.mxu2 %v10852_v4  ;;  %v10723_v4 = vld [vmem:[#allocation10 + $0x160] sm:$0xf] }
 0x426   :  { %v2999_v61 = vpop.f32.mrf.mxu2  ;;  %v3088_v0 = vpop.f32.mrf.mxu3  ;;  %v6217_v62 = vrot.slane %v5198_v33, 4  ;;  %v5504_v29 = vunpack.c.l.b16 %v5198_v33 }
 0x427   :  { %v3000_v48 = vadd.f32 %v2999_v61, %v13222_v53  ;;  %v2823_v58 = vpop.f32.mrf.mxu0  ;;  %v2912_v18 = vpop.f32.mrf.mxu1 }
 0x428   :  { %v2824_v56 = vadd.f32 %v2823_v58, %v2735_v27  ;;  %v13572_v61 = vunpack.c.l.b16 %v6217_v62 }
 0x429   :  { %v13567_v17 = vadd.f32 %v3088_v0, %v3000_v48  ;;  %v11655_v48 = vld [vmem:[#allocation10 + $0x16c] sm:$0xf0]  ;;  %v11621_v0 = vld [vmem:[#allocation10 + $0x64] sm:$0xf] }
 0x42a   :  { %v2913_v36 = vadd.f32 %v2912_v18, %v2824_v56  ;;  %16623 = vst [vmem:[#allocation144_spill] sm:$0xff] %v13572_v61  ;;  %v10724_v1 = vor.u32 %v11655_v48, %v10723_v4 }
 0x42c   :  { %v5200_v6 = vpack.c.bf16 %v2913_v36, %v13198_v55  ;;  %v10597_v55 = vld [vmem:[#allocation10 + $0x70] sm:$0xf0]  ;;  %4135 = vmatpush.bf16.msra.mxu1 %v10724_v1 }
 0x42e   :  { %v5505_v59 = vunpack.c.l.b16 %v5200_v6  ;;  %v6218_v24 = vrot.slane %v5200_v6, 4  ;;  %v3001_v51 = vpop.f32.mrf.mxu2  ;;  %v3090_v58 = vpop.f32.mrf.mxu3  ;;  %v10600_v6 = vor.u32 %v11621_v0, %v10597_v55 }
 0x42f   :  { %v3002_v19 = vadd.f32 %v3001_v51, %v13222_v53  ;;  %v2826_v27 = vpop.f32.mrf.mxu0  ;;  %v2915_v18 = vpop.f32.mrf.mxu1 }
 0x430   :  { %v2827_v56 = vadd.f32 %v2826_v27, %v2738_v60  ;;  %v13575_v36 = vpack.c.b16 %v5505_v59, %v5504_v29  ;;  %v13577_v7 = vunpack.c.l.b16 %v6218_v24  ;;  %4313 = vmatpush.bf16.msra.mxu3 %v10600_v6  ;;  %v16626_v59 = vld [vmem:[#allocation146_spill] sm:$0xff] }
 0x431   :  { %v13579_v33 = vadd.f32 %v3090_v58, %v3002_v19  ;;  %3141 = vmatmul.bf16.gmra.mxu0 %v12913_v57  ;;  %v2740_v29 = vadd.f32 %v16626_v59, %v13213_v54 }
 0x432   :  { %16624 = vst [vmem:[#allocation143_spill] sm:$0xff] %v13575_v36  ;;  %v2916_v62 = vadd.f32 %v2915_v18, %v2827_v56  ;;  %3230 = vmatmul.bf16.gmra.mxu1 %v12909_v35  ;;  %v12073_v56 = vld [vmem:[#allocation11 + $0x8] sm:$0x77] }
 0x433   :  { %16625 = vst [vmem:[#allocation161_spill] sm:$0xff] %v13577_v7  ;;  %3319 = vmatmul.bf16.gmra.mxu2 %v12911_v11  ;;  %3408 = vmatmul.bf16.gmra.mxu3 %v12913_v57  ;;  %v1641_v18 = vperm.slane %v12073_v56, 5  ;;  %v16634_v56 = vld [vmem:[#allocation90_spill] sm:$0xff] }
 0x434   :  { %v5202_v60 = vpack.c.bf16 %v2916_v62, %v13208_v22  ;;  %v16627_v22 = vld [vmem:[#allocation145_spill] sm:$0xff] }
 0x435   :  { %v13594_v54 = vperm.slane %v1641_v18, 1  ;;  %v10579_v18 = vld [vmem:[#allocation10 + $0x40] sm:$0xf] }
 0x436   :  { %v3004_v24 = vpop.f32.mrf.mxu2  ;;  %v3093_v58 = vpop.f32.mrf.mxu3  ;;  %v6219_v55 = vrot.slane %v5202_v60, 4  ;;  %v5506_v51 = vunpack.c.l.b16 %v5202_v60  ;;  %v16632_v60 = vld [vmem:[#allocation91_spill] sm:$0xff] }
 0x437   :  { %v3005_v19 = vadd.f32 %v3004_v24, %v13222_v53  ;;  %v2828_v1 = vpop.f32.mrf.mxu0  ;;  %v2917_v4 = vpop.f32.mrf.mxu1 }
 0x438   :  { %v2829_v27 = vadd.f32 %v2828_v1, %v2740_v29  ;;  %v13597_v29 = vunpack.c.l.b16 %v6219_v55  ;;  %v11619_v55 = vld [vmem:[#allocation10 + $0x4c] sm:$0xf0] }
 0x439   :  { %v13591_v48 = vadd.f32 %v3093_v58, %v3005_v19 }
 0x43a   :  { %v2918_v0 = vadd.f32 %v2917_v4, %v2829_v27  ;;  %16628 = vst [vmem:[#allocation146_spill] sm:$0xff] %v13597_v29 }
 0x43c   :  { %v5204_v62 = vpack.c.bf16 %v2918_v0, %v16627_v22  ;;  %v10835_v22 = vld [vmem:[#allocation10 + $0x240] sm:$0xf] }
 0x43e   :  { %v5507_v6 = vunpack.c.l.b16 %v5204_v62  ;;  %v6220_v61 = vrot.slane %v5204_v62, 4  ;;  %v3006_v7 = vpop.f32.mrf.mxu2  ;;  %v3095_v24 = vpop.f32.mrf.mxu3 }
 0x43f   :  { %v3007_v59 = vadd.f32 %v3006_v7, %v13222_v53  ;;  %v3107_v36 = vpop.f32.mrf.mxu0  ;;  %v3196_v1 = vpop.f32.mrf.mxu1  ;;  %v16633_v7 = vld [vmem:[#allocation89_spill] sm:$0xff] }
 0x440   :  { %v13599_v19 = vunpack.c.l.b16 %v6220_v61  ;;  %v3108_v58 = vadd.f32 %v3107_v36, %v13231_v28  ;;  %v13602_v27 = vpack.c.b16 %v5507_v6, %v5506_v51  ;;  %v3197_v53 = vadd.f32 %v3196_v1, %v13594_v54 }
 0x441   :  { %v13604_v4 = vadd.f32 %v3095_v24, %v3007_v59  ;;  %3146 = vmatmul.bf16.gmra.mxu0 %v16632_v60  ;;  %v10580_v59 = vor.u32 %v11619_v55, %v10579_v18  ;;  %v11683_v24 = vld [vmem:[#allocation10 + $0x24c] sm:$0xf0]  ;;  %v10581_v18 = vld [vmem:[#allocation10 + $0x50] sm:$0xf0] }
 0x442   :  { %16629 = vst [vmem:[#allocation145_spill] sm:$0xff] %v13599_v19  ;;  %3235 = vmatmul.bf16.gmra.mxu1 %v16633_v7  ;;  %v10836_v1 = vor.u32 %v11683_v24, %v10835_v22  ;;  %v11651_v7 = vld [vmem:[#allocation10 + $0x14c] sm:$0xf0] }
 0x443   :  { %16630 = vst [vmem:[#allocation162_spill] sm:$0xff] %v13602_v27  ;;  %3324 = vmatmul.bf16.gmra.mxu2 %v16634_v56  ;;  %3413 = vmatmul.bf16.gmra.mxu3 %v16632_v60  ;;  %v10707_v56 = vld [vmem:[#allocation10 + $0x140] sm:$0xf] }
 0x444   :  { %16631 = vst [vmem:[#allocation163_spill] sm:$0xff] %v13604_v4  ;;  %4047 = vmatpush.bf16.msra.mxu0 %v10580_v59  ;;  %4225 = vmatpush.bf16.msra.mxu2 %v10836_v1  ;;  %v11617_v4 = vld [vmem:[#allocation10 + $0x44] sm:$0xf] }
 0x446   :  { %v3285_v61 = vpop.f32.mrf.mxu2  ;;  %v3374_v36 = vpop.f32.mrf.mxu3 }
 0x447   :  { %v3286_v28 = vadd.f32 %v3285_v61, %v3197_v53  ;;  %v3109_v51 = vpop.f32.mrf.mxu0  ;;  %v3198_v6 = vpop.f32.mrf.mxu1 }
 0x448   :  { %v3110_v62 = vadd.f32 %v3109_v51, %v13243_v32  ;;  %v3199_v19 = vadd.f32 %v3198_v6, %v13594_v54  ;;  %v10708_v51 = vor.u32 %v11651_v7, %v10707_v56 }
 0x449   :  { %v3375_v0 = vadd.f32 %v3374_v36, %v3286_v28  ;;  %v10584_v28 = vor.u32 %v11617_v4, %v10581_v18 }
 0x44a   :  { %4136 = vmatpush.bf16.msra.mxu1 %v10708_v51 }
 0x44b   :  { %v5143_v29 = vpack.c.bf16 %v3375_v0, %v3108_v58  ;;  %4314 = vmatpush.bf16.msra.mxu3 %v10584_v28 }
 0x44d   :  { %v7433_v58 = vrot.slane %v5143_v29, 4 }
 0x44e   :  { %v3287_v27 = vpop.f32.mrf.mxu2  ;;  %v3376_v53 = vpop.f32.mrf.mxu3 }
 0x44f   :  { %v3288_v60 = vadd.f32 %v3287_v27, %v3199_v19  ;;  %v3112_v61 = vpop.f32.mrf.mxu0  ;;  %v3201_v32 = vpop.f32.mrf.mxu1  ;;  %v6721_v19 = vunpack.c.l.b16 %v5143_v29 }
 0x450   :  { %v3113_v57 = vadd.f32 %v3112_v61, %v13255_v40  ;;  %v3202_v36 = vadd.f32 %v3201_v32, %v13594_v54 }
 0x451   :  { %v3377_v55 = vadd.f32 %v3376_v53, %v3288_v60  ;;  %3151 = vmatmul.bf16.gmra.mxu0 %v12968_v20  ;;  %v13621_v60 = vunpack.c.l.b16 %v7433_v58 }
 0x452   :  { %3240 = vmatmul.bf16.gmra.mxu1 %v12960_v50 }
 0x453   :  { %v5145_v0 = vpack.c.bf16 %v3377_v55, %v3110_v62  ;;  %3329 = vmatmul.bf16.gmra.mxu2 %v12966_v10  ;;  %3418 = vmatmul.bf16.gmra.mxu3 %v12968_v20  ;;  %16635 = vst [vmem:[#allocation164_spill] sm:$0xff] %v13621_v60 }
 0x455   :  { %v6722_v40 = vunpack.c.l.b16 %v5145_v0  ;;  %v7434_v27 = vrot.slane %v5145_v0, 4 }
 0x456   :  { %v3290_v7 = vpop.f32.mrf.mxu2  ;;  %v3379_v56 = vpop.f32.mrf.mxu3 }
 0x457   :  { %v3291_v4 = vadd.f32 %v3290_v7, %v3202_v36  ;;  %v3114_v22 = vpop.f32.mrf.mxu0  ;;  %v13623_v6 = vpack.c.b16 %v6722_v40, %v6721_v19  ;;  %v13625_v62 = vunpack.c.l.b16 %v7434_v27  ;;  %v3203_v24 = vpop.f32.mrf.mxu1  ;;  %v16638_v40 = vld [vmem:[#allocation98_spill] sm:$0xff]  ;;  %v16639_v27 = vld [vmem:[#allocation99_spill] sm:$0xff] }
 0x458   :  { %v3115_v59 = vadd.f32 %v3114_v22, %v13267_v46  ;;  %v3204_v61 = vadd.f32 %v3203_v24, %v13594_v54 }
 0x459   :  { %16636 = vst [vmem:[#allocation165_spill] sm:$0xff] %v13623_v6  ;;  %v3380_v1 = vadd.f32 %v3379_v56, %v3291_v4 }
 0x45a   :  { %16637 = vst [vmem:[#allocation166_spill] sm:$0xff] %v13625_v62 }
 0x45b   :  { %v5147_v53 = vpack.c.bf16 %v3380_v1, %v3113_v57 }
 0x45d   :  { %v7435_v36 = vrot.slane %v5147_v53, 4  ;;  %v6723_v57 = vunpack.c.l.b16 %v5147_v53  ;;  %v11679_v53 = vld [vmem:[#allocation10 + $0x22c] sm:$0xf0] }
 0x45e   :  { %v3292_v32 = vpop.f32.mrf.mxu2  ;;  %v3381_v18 = vpop.f32.mrf.mxu3 }
 0x45f   :  { %v3293_v51 = vadd.f32 %v3292_v32, %v3204_v61  ;;  %v3117_v55 = vpop.f32.mrf.mxu0  ;;  %v3206_v58 = vpop.f32.mrf.mxu1  ;;  %v13637_v22 = vunpack.c.l.b16 %v7435_v36  ;;  %v11615_v32 = vld [vmem:[#allocation10 + $0x2c] sm:$0xf0]  ;;  %v16645_v36 = vld [vmem:[#allocation106_spill] sm:$0xff] }
 0x460   :  { %v3118_v28 = vadd.f32 %v3117_v55, %v13279_v47  ;;  %v3207_v19 = vadd.f32 %v3206_v58, %v13594_v54  ;;  %v16643_v55 = vld [vmem:[#allocation108_spill] sm:$0xff] }
 0x461   :  { %v3382_v0 = vadd.f32 %v3381_v18, %v3293_v51  ;;  %3156 = vmatmul.bf16.gmra.mxu0 %v12988_v63  ;;  %16640 = vst [vmem:[#allocation167_spill] sm:$0xff] %v13637_v22  ;;  %v10819_v51 = vld [vmem:[#allocation10 + $0x220] sm:$0xf] }
 0x462   :  { %3245 = vmatmul.bf16.gmra.mxu1 %v16638_v40 }
 0x463   :  { %v5149_v46 = vpack.c.bf16 %v3382_v0, %v3115_v59  ;;  %3334 = vmatmul.bf16.gmra.mxu2 %v16639_v27  ;;  %3423 = vmatmul.bf16.gmra.mxu3 %v12988_v63  ;;  %v10563_v59 = vld [vmem:[#allocation10 + $0x20] sm:$0xf] }
 0x464   :  { %v10564_v29 = vor.u32 %v11615_v32, %v10563_v59 }
 0x465   :  { %v6724_v7 = vunpack.c.l.b16 %v5149_v46  ;;  %v7436_v4 = vrot.slane %v5149_v46, 4  ;;  %v10820_v46 = vor.u32 %v11679_v53, %v10819_v51 }
 0x466   :  { %v3295_v56 = vpop.f32.mrf.mxu2  ;;  %v3384_v1 = vpop.f32.mrf.mxu3  ;;  %4048 = vmatpush.bf16.msra.mxu0 %v10564_v29 }
 0x467   :  { %v13639_v47 = vunpack.c.l.b16 %v7436_v4  ;;  %v3296_v24 = vadd.f32 %v3295_v56, %v3207_v19  ;;  %v3119_v61 = vpop.f32.mrf.mxu0  ;;  %v13641_v18 = vpack.c.b16 %v6724_v7, %v6723_v57  ;;  %v3208_v0 = vpop.f32.mrf.mxu1  ;;  %4226 = vmatpush.bf16.msra.mxu2 %v10820_v46  ;;  %v10691_v7 = vld [vmem:[#allocation10 + $0x120] sm:$0xf]  ;;  %v16647_v46 = vld [vmem:[#allocation105_spill] sm:$0xff] }
 0x468   :  { %v3120_v58 = vadd.f32 %v3119_v61, %v16643_v55  ;;  %v3209_v19 = vadd.f32 %v3208_v0, %v13594_v54  ;;  %v11613_v61 = vld [vmem:[#allocation10 + $0x24] sm:$0xf]  ;;  %v16644_v55 = vld [vmem:[#allocation107_spill] sm:$0xff] }
 0x469   :  { %16641 = vst [vmem:[#allocation168_spill] sm:$0xff] %v13639_v47  ;;  %v3385_v60 = vadd.f32 %v3384_v1, %v3296_v24  ;;  %v10565_v1 = vld [vmem:[#allocation10 + $0x30] sm:$0xf0]  ;;  %v16646_v0 = vld [vmem:[#allocation102_spill] sm:$0xff] }
 0x46a   :  { %16642 = vst [vmem:[#allocation169_spill] sm:$0xff] %v13641_v18  ;;  %v11647_v18 = vld [vmem:[#allocation10 + $0x12c] sm:$0xf0]  ;;  %v10568_v53 = vor.u32 %v11613_v61, %v10565_v1 }
 0x46b   :  { %v5151_v4 = vpack.c.bf16 %v3385_v60, %v3118_v28  ;;  %v10692_v24 = vor.u32 %v11647_v18, %v10691_v7 }
 0x46c   :  { %4315 = vmatpush.bf16.msra.mxu3 %v10568_v53 }
 0x46d   :  { %4137 = vmatpush.bf16.msra.mxu1 %v10692_v24  ;;  %v7465_v60 = vrot.slane %v5151_v4, 4 }
 0x46e   :  { %v3297_v56 = vpop.f32.mrf.mxu2  ;;  %v3386_v6 = vpop.f32.mrf.mxu3 }
 0x46f   :  { %v3298_v62 = vadd.f32 %v3297_v56, %v3209_v19  ;;  %v3122_v57 = vpop.f32.mrf.mxu0  ;;  %v3211_v32 = vpop.f32.mrf.mxu1  ;;  %v6753_v19 = vunpack.c.l.b16 %v5151_v4 }
 0x470   :  { %v3123_v59 = vadd.f32 %v3122_v57, %v16644_v55  ;;  %v3212_v28 = vadd.f32 %v3211_v32, %v13594_v54  ;;  %v16651_v32 = vld [vmem:[#allocation153_spill] sm:$0xff] }
 0x471   :  { %v3387_v51 = vadd.f32 %v3386_v6, %v3298_v62  ;;  %3161 = vmatmul.bf16.gmra.mxu0 %v16645_v36  ;;  %v13653_v6 = vunpack.c.l.b16 %v7465_v60 }
 0x472   :  { %3250 = vmatmul.bf16.gmra.mxu1 %v16646_v0 }
 0x473   :  { %v5153_v29 = vpack.c.bf16 %v3387_v51, %v3120_v58  ;;  %3339 = vmatmul.bf16.gmra.mxu2 %v16647_v46  ;;  %3428 = vmatmul.bf16.gmra.mxu3 %v16645_v36  ;;  %16648 = vst [vmem:[#allocation108_spill] sm:$0xff] %v13653_v6 }
 0x475   :  { %v6754_v56 = vunpack.c.l.b16 %v5153_v29  ;;  %v7466_v57 = vrot.slane %v5153_v29, 4 }
 0x476   :  { %v3300_v18 = vpop.f32.mrf.mxu2  ;;  %v3389_v7 = vpop.f32.mrf.mxu3 }
 0x477   :  { %v3301_v62 = vadd.f32 %v3300_v18, %v3212_v28  ;;  %v3124_v61 = vpop.f32.mrf.mxu0  ;;  %v13655_v55 = vpack.c.b16 %v6754_v56, %v6753_v19  ;;  %v13657_v58 = vunpack.c.l.b16 %v7466_v57  ;;  %v3213_v1 = vpop.f32.mrf.mxu1  ;;  %v16652_v57 = vld [vmem:[#allocation113_spill] sm:$0xff] }
 0x478   :  { %v3125_v24 = vadd.f32 %v3124_v61, %v16651_v32  ;;  %v3214_v53 = vadd.f32 %v3213_v1, %v13594_v54  ;;  %v16654_v32 = vld [vmem:[#allocation112_spill] sm:$0xff] }
 0x479   :  { %16649 = vst [vmem:[#allocation107_spill] sm:$0xff] %v13655_v55  ;;  %v3390_v51 = vadd.f32 %v3389_v7, %v3301_v62  ;;  %v16653_v7 = vld [vmem:[#allocation109_spill] sm:$0xff] }
 0x47a   :  { %16650 = vst [vmem:[#allocation170_spill] sm:$0xff] %v13657_v58 }
 0x47b   :  { %v5155_v22 = vpack.c.bf16 %v3390_v51, %v3123_v59 }
 0x47d   :  { %v7467_v55 = vrot.slane %v5155_v22, 4  ;;  %v6755_v59 = vunpack.c.l.b16 %v5155_v22  ;;  %v11675_v22 = vld [vmem:[#allocation10 + $0x20c] sm:$0xf0] }
 0x47e   :  { %v3302_v29 = vpop.f32.mrf.mxu2  ;;  %v3391_v47 = vpop.f32.mrf.mxu3 }
 0x47f   :  { %v3303_v60 = vadd.f32 %v3302_v29, %v3214_v53  ;;  %v3127_v28 = vpop.f32.mrf.mxu0  ;;  %v3216_v19 = vpop.f32.mrf.mxu1  ;;  %v13669_v29 = vunpack.c.l.b16 %v7467_v55 }
 0x480   :  { %v3128_v18 = vadd.f32 %v3127_v28, %v13327_v15  ;;  %v3217_v62 = vadd.f32 %v3216_v19, %v13594_v54  ;;  %v10803_v19 = vld [vmem:[#allocation10 + $0x200] sm:$0xf] }
 0x481   :  { %v3392_v56 = vadd.f32 %v3391_v47, %v3303_v60  ;;  %3166 = vmatmul.bf16.gmra.mxu0 %v16652_v57  ;;  %16655 = vst [vmem:[#allocation153_spill] sm:$0xff] %v13669_v29 }
 0x482   :  { %3255 = vmatmul.bf16.gmra.mxu1 %v16653_v7 }
 0x483   :  { %v5157_v61 = vpack.c.bf16 %v3392_v56, %v3125_v24  ;;  %3344 = vmatmul.bf16.gmra.mxu2 %v16654_v32  ;;  %3433 = vmatmul.bf16.gmra.mxu3 %v16652_v57  ;;  %v10547_v24 = vld [vmem:[#allocation10] sm:$0xf]  ;;  %v11611_v56 = vld [vmem:[#allocation10 + $0xc] sm:$0xf0] }
 0x484   :  { %v10548_v57 = vor.u32 %v11611_v56, %v10547_v24 }
 0x485   :  { %v6756_v1 = vunpack.c.l.b16 %v5157_v61  ;;  %v7468_v51 = vrot.slane %v5157_v61, 4  ;;  %v10804_v61 = vor.u32 %v11675_v22, %v10803_v19  ;;  %v16658_v22 = vld [vmem:[#allocation120_spill] sm:$0xff] }
 0x486   :  { %v3305_v53 = vpop.f32.mrf.mxu2  ;;  %v3394_v60 = vpop.f32.mrf.mxu3  ;;  %4049 = vmatpush.bf16.msra.mxu0 %v10548_v57 }
 0x487   :  { %v13671_v15 = vunpack.c.l.b16 %v7468_v51  ;;  %v3306_v47 = vadd.f32 %v3305_v53, %v3217_v62  ;;  %v3129_v28 = vpop.f32.mrf.mxu0  ;;  %v13673_v4 = vpack.c.b16 %v6756_v1, %v6755_v59  ;;  %v3218_v58 = vpop.f32.mrf.mxu1  ;;  %4227 = vmatpush.bf16.msra.mxu2 %v10804_v61  ;;  %v10675_v1 = vld [vmem:[#allocation10 + $0x100] sm:$0xf]  ;;  %v16660_v61 = vld [vmem:[#allocation119_spill] sm:$0xff] }
 0x488   :  { %v3130_v6 = vadd.f32 %v3129_v28, %v13339_v25  ;;  %v3219_v62 = vadd.f32 %v3218_v58, %v13594_v54  ;;  %v11609_v25 = vld [vmem:[#allocation10 + $0x4] sm:$0xf] }
 0x489   :  { %16656 = vst [vmem:[#allocation171_spill] sm:$0xff] %v13671_v15  ;;  %v3395_v32 = vadd.f32 %v3394_v60, %v3306_v47  ;;  %v10549_v60 = vld [vmem:[#allocation10 + $0x10] sm:$0xf0] }
 0x48a   :  { %16657 = vst [vmem:[#allocation172_spill] sm:$0xff] %v13673_v4  ;;  %v11643_v4 = vld [vmem:[#allocation10 + $0x10c] sm:$0xf0]  ;;  %v10552_v19 = vor.u32 %v11609_v25, %v10549_v60 }
 0x48b   :  { %v5159_v51 = vpack.c.bf16 %v3395_v32, %v3128_v18  ;;  %v10676_v47 = vor.u32 %v11643_v4, %v10675_v1  ;;  %v16659_v32 = vld [vmem:[#allocation116_spill] sm:$0xff] }
 0x48c   :  { %4316 = vmatpush.bf16.msra.mxu3 %v10552_v19 }
 0x48d   :  { %4138 = vmatpush.bf16.msra.mxu1 %v10676_v47  ;;  %v7497_v18 = vrot.slane %v5159_v51, 4 }
 0x48e   :  { %v3307_v53 = vpop.f32.mrf.mxu2  ;;  %v3396_v36 = vpop.f32.mrf.mxu3 }
 0x48f   :  { %v3308_v7 = vadd.f32 %v3307_v53, %v3219_v62  ;;  %v3132_v59 = vpop.f32.mrf.mxu0  ;;  %v3221_v24 = vpop.f32.mrf.mxu1  ;;  %v6785_v62 = vunpack.c.l.b16 %v5159_v51 }
 0x490   :  { %v3133_v28 = vadd.f32 %v3132_v59, %v13351_v12  ;;  %v3222_v58 = vadd.f32 %v3221_v24, %v13594_v54  ;;  %v16664_v24 = vld [vmem:[#allocation124_spill] sm:$0xff] }
 0x491   :  { %v3397_v56 = vadd.f32 %v3396_v36, %v3308_v7  ;;  %3171 = vmatmul.bf16.gmra.mxu0 %v16658_v22  ;;  %v13685_v36 = vunpack.c.l.b16 %v7497_v18 }
 0x492   :  { %3260 = vmatmul.bf16.gmra.mxu1 %v16659_v32 }
 0x493   :  { %v5161_v57 = vpack.c.bf16 %v3397_v56, %v3130_v6  ;;  %3349 = vmatmul.bf16.gmra.mxu2 %v16660_v61  ;;  %3438 = vmatmul.bf16.gmra.mxu3 %v16658_v22  ;;  %16661 = vst [vmem:[#allocation173_spill] sm:$0xff] %v13685_v36 }
 0x495   :  { %v6786_v12 = vunpack.c.l.b16 %v5161_v57  ;;  %v7498_v53 = vrot.slane %v5161_v57, 4 }
 0x496   :  { %v3310_v4 = vpop.f32.mrf.mxu2  ;;  %v3399_v59 = vpop.f32.mrf.mxu3 }
 0x497   :  { %v3311_v7 = vadd.f32 %v3310_v4, %v3222_v58  ;;  %v3134_v1 = vpop.f32.mrf.mxu0  ;;  %v13687_v25 = vpack.c.b16 %v6786_v12, %v6785_v62  ;;  %v13689_v6 = vunpack.c.l.b16 %v7498_v53  ;;  %v3223_v60 = vpop.f32.mrf.mxu1  ;;  %v16665_v53 = vld [vmem:[#allocation127_spill] sm:$0xff] }
 0x498   :  { %v3135_v47 = vadd.f32 %v3134_v1, %v16664_v24  ;;  %v3224_v19 = vadd.f32 %v3223_v60, %v13594_v54  ;;  %v16667_v24 = vld [vmem:[#allocation126_spill] sm:$0xff] }
 0x499   :  { %16662 = vst [vmem:[#allocation174_spill] sm:$0xff] %v13687_v25  ;;  %v3400_v56 = vadd.f32 %v3399_v59, %v3311_v7  ;;  %v16666_v59 = vld [vmem:[#allocation123_spill] sm:$0xff] }
 0x49a   :  { %16663 = vst [vmem:[#allocation175_spill] sm:$0xff] %v13689_v6 }
 0x49b   :  { %v5163_v55 = vpack.c.bf16 %v3400_v56, %v3133_v28 }
 0x49d   :  { %v7499_v15 = vrot.slane %v5163_v55, 4  ;;  %v6787_v28 = vunpack.c.l.b16 %v5163_v55  ;;  %v11640_v55 = vld [vmem:[#allocation10 + $0xf4] sm:$0xf0] }
 0x49e   :  { %v3312_v57 = vpop.f32.mrf.mxu2  ;;  %v3401_v29 = vpop.f32.mrf.mxu3 }
 0x49f   :  { %v3313_v18 = vadd.f32 %v3312_v57, %v3224_v19  ;;  %v3137_v58 = vpop.f32.mrf.mxu0  ;;  %v3226_v62 = vpop.f32.mrf.mxu1  ;;  %v13701_v57 = vunpack.c.l.b16 %v7499_v15 }
 0x4a0   :  { %v3138_v4 = vadd.f32 %v3137_v58, %v13375_v49  ;;  %v3227_v7 = vadd.f32 %v3226_v62, %v13594_v54  ;;  %v10667_v62 = vld [vmem:[#allocation10 + $0xe8] sm:$0xf] }
 0x4a1   :  { %v3402_v12 = vadd.f32 %v3401_v29, %v3313_v18  ;;  %3176 = vmatmul.bf16.gmra.mxu0 %v16665_v53  ;;  %16668 = vst [vmem:[#allocation124_spill] sm:$0xff] %v13701_v57 }
 0x4a2   :  { %3265 = vmatmul.bf16.gmra.mxu1 %v16666_v59 }
 0x4a3   :  { %v5165_v1 = vpack.c.bf16 %v3402_v12, %v3135_v47  ;;  %3354 = vmatmul.bf16.gmra.mxu2 %v16667_v24  ;;  %3443 = vmatmul.bf16.gmra.mxu3 %v16665_v53  ;;  %v11669_v47 = vld [vmem:[#allocation10 + $0x1e4] sm:$0xf]  ;;  %v10789_v12 = vld [vmem:[#allocation10 + $0x1f0] sm:$0xf0] }
 0x4a4   :  { %v10792_v25 = vor.u32 %v11669_v47, %v10789_v12 }
 0x4a5   :  { %v6788_v60 = vunpack.c.l.b16 %v5165_v1  ;;  %v7500_v56 = vrot.slane %v5165_v1, 4  ;;  %v10668_v1 = vor.u32 %v11640_v55, %v10667_v62 }
 0x4a6   :  { %v3315_v19 = vpop.f32.mrf.mxu2  ;;  %v3404_v18 = vpop.f32.mrf.mxu3  ;;  %4398 = vmatpush.bf16.msrb.mxu0 %v10792_v25 }
 0x4a7   :  { %v13703_v49 = vunpack.c.l.b16 %v7500_v56  ;;  %v3316_v29 = vadd.f32 %v3315_v19, %v3227_v7  ;;  %v3139_v58 = vpop.f32.mrf.mxu0  ;;  %v13705_v51 = vpack.c.b16 %v6788_v60, %v6787_v28  ;;  %v3228_v6 = vpop.f32.mrf.mxu1  ;;  %4576 = vmatpush.bf16.msrb.mxu2 %v10668_v1  ;;  %v11701_v60 = vld [vmem:[#allocation10 + $0x2e4] sm:$0xf] }
 0x4a8   :  { %v3140_v36 = vadd.f32 %v3139_v58, %v13387_v23  ;;  %v3229_v7 = vadd.f32 %v3228_v6, %v13594_v54  ;;  %v10795_v23 = vld [vmem:[#allocation10 + $0x1e8] sm:$0xf] }
 0x4a9   :  { %16669 = vst [vmem:[#allocation176_spill] sm:$0xff] %v13703_v49  ;;  %v3405_v53 = vadd.f32 %v3404_v18, %v3316_v29  ;;  %v11672_v18 = vld [vmem:[#allocation10 + $0x1f4] sm:$0xf0] }
 0x4aa   :  { %16670 = vst [vmem:[#allocation177_spill] sm:$0xff] %v13705_v51  ;;  %v10917_v51 = vld [vmem:[#allocation10 + $0x2f0] sm:$0xf0]  ;;  %v10796_v62 = vor.u32 %v11672_v18, %v10795_v23 }
 0x4ab   :  { %v5167_v56 = vpack.c.bf16 %v3405_v53, %v3138_v4  ;;  %v10920_v29 = vor.u32 %v11701_v60, %v10917_v51 }
 0x4ac   :  { %4665 = vmatpush.bf16.msrb.mxu3 %v10796_v62 }
 0x4ad   :  { %4487 = vmatpush.bf16.msrb.mxu1 %v10920_v29  ;;  %v7529_v25 = vrot.slane %v5167_v56, 4  ;;  %v6817_v53 = vunpack.c.l.b16 %v5167_v56 }
 0x4ae   :  { %v3317_v19 = vpop.f32.mrf.mxu2  ;;  %v3406_v59 = vpop.f32.mrf.mxu3 }
 0x4af   :  { %v3318_v24 = vadd.f32 %v3317_v19, %v3229_v7  ;;  %v3142_v28 = vpop.f32.mrf.mxu0  ;;  %v3231_v47 = vpop.f32.mrf.mxu1 }
 0x4b0   :  { %v3143_v58 = vadd.f32 %v3142_v28, %v13399_v8  ;;  %v3232_v6 = vadd.f32 %v3231_v47, %v13594_v54 }
 0x4b1   :  { %v3407_v12 = vadd.f32 %v3406_v59, %v3318_v24  ;;  %3181 = vmatmul.bf16.gmra.mxu0 %v13088_v43  ;;  %v13717_v59 = vunpack.c.l.b16 %v7529_v25 }
 0x4b2   :  { %3270 = vmatmul.bf16.gmra.mxu1 %v16568_v9 }
 0x4b3   :  { %v5169_v4 = vpack.c.bf16 %v3407_v12, %v3140_v36  ;;  %3359 = vmatmul.bf16.gmra.mxu2 %v13086_v21  ;;  %3448 = vmatmul.bf16.gmra.mxu3 %v13088_v43  ;;  %16671 = vst [vmem:[#allocation178_spill] sm:$0xff] %v13717_v59 }
 0x4b5   :  { %v6818_v8 = vunpack.c.l.b16 %v5169_v4  ;;  %v7530_v55 = vrot.slane %v5169_v4, 4 }
 0x4b6   :  { %v3320_v51 = vpop.f32.mrf.mxu2  ;;  %v3409_v1 = vpop.f32.mrf.mxu3 }
 0x4b7   :  { %v3321_v24 = vadd.f32 %v3320_v51, %v3232_v6  ;;  %v3144_v7 = vpop.f32.mrf.mxu0  ;;  %v13719_v19 = vpack.c.b16 %v6818_v8, %v6817_v53  ;;  %v13721_v36 = vunpack.c.l.b16 %v7530_v55  ;;  %v3233_v60 = vpop.f32.mrf.mxu1  ;;  %v16674_v8 = vld [vmem:[#allocation27_spill] sm:$0xff] }
 0x4b8   :  { %v3145_v28 = vadd.f32 %v3144_v7, %v13411_v34  ;;  %v3234_v29 = vadd.f32 %v3233_v60, %v13594_v54 }
 0x4b9   :  { %16672 = vst [vmem:[#allocation179_spill] sm:$0xff] %v13719_v19  ;;  %v3410_v23 = vadd.f32 %v3409_v1, %v3321_v24  ;;  %v16675_v24 = vld [vmem:[#allocation26_spill] sm:$0xff]  ;;  %v16676_v1 = vld [vmem:[#allocation24_spill] sm:$0xff] }
 0x4ba   :  { %16673 = vst [vmem:[#allocation180_spill] sm:$0xff] %v13721_v36  ;;  %v10901_v19 = vld [vmem:[#allocation10 + $0x2d0] sm:$0xf0] }
 0x4bb   :  { %v5171_v47 = vpack.c.bf16 %v3410_v23, %v3143_v58 }
 0x4bd   :  { %v7531_v55 = vrot.slane %v5171_v47, 4  ;;  %v6819_v58 = vunpack.c.l.b16 %v5171_v47  ;;  %v11636_v47 = vld [vmem:[#allocation10 + $0xd4] sm:$0xf0] }
 0x4be   :  { %v3322_v18 = vpop.f32.mrf.mxu2  ;;  %v3411_v62 = vpop.f32.mrf.mxu3 }
 0x4bf   :  { %v3323_v12 = vadd.f32 %v3322_v18, %v3234_v29  ;;  %v3147_v25 = vpop.f32.mrf.mxu0  ;;  %v3236_v6 = vpop.f32.mrf.mxu1  ;;  %v13733_v29 = vunpack.c.l.b16 %v7531_v55 }
 0x4c0   :  { %v3148_v4 = vadd.f32 %v3147_v25, %v13423_v5  ;;  %v3237_v51 = vadd.f32 %v3236_v6, %v13594_v54  ;;  %v10773_v25 = vld [vmem:[#allocation10 + $0x1d0] sm:$0xf0]  ;;  %v10651_v6 = vld [vmem:[#allocation10 + $0xc8] sm:$0xf] }
 0x4c1   :  { %v3412_v53 = vadd.f32 %v3411_v62, %v3323_v12  ;;  %4050 = vmatmul.bf16.vlgmr.msra.gmra.mxu0 %v16674_v8  ;;  %16677 = vst [vmem:[#allocation24_spill] sm:$0xff] %v13733_v29 }
 0x4c2   :  { %4139 = vmatmul.bf16.vlgmr.msra.gmra.mxu1 %v16675_v24 }
 0x4c3   :  { %v5173_v34 = vpack.c.bf16 %v3412_v53, %v3145_v28  ;;  %4228 = vmatmul.bf16.vlgmr.msra.gmra.mxu2 %v16676_v1  ;;  %4317 = vmatmul.bf16.vlgmr.msra.gmra.mxu3 %v16674_v8  ;;  %v11665_v28 = vld [vmem:[#allocation10 + $0x1c4] sm:$0xf] }
 0x4c4   :  { %v10776_v59 = vor.u32 %v11665_v28, %v10773_v25 }
 0x4c5   :  { %v6820_v7 = vunpack.c.l.b16 %v5173_v34  ;;  %v7532_v60 = vrot.slane %v5173_v34, 4  ;;  %v10652_v34 = vor.u32 %v11636_v47, %v10651_v6 }
 0x4c6   :  { %v3325_v23 = vpop.f32.mrf.mxu2  ;;  %v3414_v12 = vpop.f32.mrf.mxu3  ;;  %4399 = vmatpush.bf16.msrb.mxu0 %v10776_v59 }
 0x4c7   :  { %v13735_v5 = vunpack.c.l.b16 %v7532_v60  ;;  %v3326_v18 = vadd.f32 %v3325_v23, %v3237_v51  ;;  %v3149_v62 = vpop.f32.mrf.mxu0  ;;  %v13737_v53 = vpack.c.b16 %v6820_v7, %v6819_v58  ;;  %v3238_v15 = vpop.f32.mrf.mxu1  ;;  %4577 = vmatpush.bf16.msrb.mxu2 %v10652_v34  ;;  %v11697_v7 = vld [vmem:[#allocation10 + $0x2c4] sm:$0xf] }
 0x4c8   :  { %v3150_v56 = vadd.f32 %v3149_v62, %v13435_v42  ;;  %v3239_v51 = vadd.f32 %v3238_v15, %v13594_v54  ;;  %v10779_v42 = vld [vmem:[#allocation10 + $0x1c8] sm:$0xf] }
 0x4c9   :  { %16678 = vst [vmem:[#allocation181_spill] sm:$0xff] %v13735_v5  ;;  %v3415_v36 = vadd.f32 %v3414_v12, %v3326_v18  ;;  %v10904_v18 = vor.u32 %v11697_v7, %v10901_v19  ;;  %v11668_v12 = vld [vmem:[#allocation10 + $0x1d4] sm:$0xf0] }
 0x4ca   :  { %16679 = vst [vmem:[#allocation182_spill] sm:$0xff] %v13737_v53  ;;  %v10780_v6 = vor.u32 %v11668_v12, %v10779_v42 }
 0x4cb   :  { %v5175_v60 = vpack.c.bf16 %v3415_v36, %v3148_v4  ;;  %4488 = vmatpush.bf16.msrb.mxu1 %v10904_v18  ;;  %v16680_v4 = vld [vmem:[#allocation49_spill] sm:$0xff] }
 0x4cc   :  { %4666 = vmatpush.bf16.msrb.mxu3 %v10780_v6 }
 0x4cd   :  { %v7561_v59 = vrot.slane %v5175_v60, 4  ;;  %v6849_v47 = vunpack.c.l.b16 %v5175_v60 }
 0x4ce   :  { %v3327_v23 = vpop.f32.mrf.mxu2  ;;  %v3416_v49 = vpop.f32.mrf.mxu3 }
 0x4cf   :  { %v3328_v57 = vadd.f32 %v3327_v23, %v3239_v51  ;;  %v3152_v58 = vpop.f32.mrf.mxu0  ;;  %v3241_v28 = vpop.f32.mrf.mxu1 }
 0x4d0   :  { %v3153_v62 = vadd.f32 %v3152_v58, %v13447_v41  ;;  %v3242_v15 = vadd.f32 %v3241_v28, %v13594_v54 }
 0x4d1   :  { %v3417_v25 = vadd.f32 %v3416_v49, %v3328_v57  ;;  %4055 = vmatmul.bf16.gmra.mxu0 %v16581_v37  ;;  %v13749_v57 = vunpack.c.l.b16 %v7561_v59 }
 0x4d2   :  { %4144 = vmatmul.bf16.gmra.mxu1 %v16582_v3 }
 0x4d3   :  { %v5177_v36 = vpack.c.bf16 %v3417_v25, %v3150_v56  ;;  %4233 = vmatmul.bf16.gmra.mxu2 %v16680_v4  ;;  %4322 = vmatmul.bf16.gmra.mxu3 %v16581_v37  ;;  %16681 = vst [vmem:[#allocation183_spill] sm:$0xff] %v13749_v57 }
 0x4d5   :  { %v6850_v41 = vunpack.c.l.b16 %v5177_v36  ;;  %v7562_v34 = vrot.slane %v5177_v36, 4 }
 0x4d6   :  { %v3330_v19 = vpop.f32.mrf.mxu2  ;;  %v3419_v51 = vpop.f32.mrf.mxu3 }
 0x4d7   :  { %v3331_v49 = vadd.f32 %v3330_v19, %v3242_v15  ;;  %v3154_v23 = vpop.f32.mrf.mxu0  ;;  %v13751_v58 = vpack.c.b16 %v6850_v41, %v6849_v47  ;;  %v13753_v56 = vunpack.c.l.b16 %v7562_v34  ;;  %v3243_v42 = vpop.f32.mrf.mxu1  ;;  %v16684_v34 = vld [vmem:[#allocation53_spill] sm:$0xff] }
 0x4d8   :  { %v3155_v7 = vadd.f32 %v3154_v23, %v13459_v16  ;;  %v3244_v12 = vadd.f32 %v3243_v42, %v13594_v54  ;;  %v16686_v23 = vld [vmem:[#allocation55_spill] sm:$0xff] }
 0x4d9   :  { %16682 = vst [vmem:[#allocation184_spill] sm:$0xff] %v13751_v58  ;;  %v3420_v28 = vadd.f32 %v3419_v51, %v3331_v49  ;;  %v16685_v51 = vld [vmem:[#allocation54_spill] sm:$0xff]  ;;  %v10885_v58 = vld [vmem:[#allocation10 + $0x2b0] sm:$0xf0] }
 0x4da   :  { %16683 = vst [vmem:[#allocation185_spill] sm:$0xff] %v13753_v56 }
 0x4db   :  { %v5179_v18 = vpack.c.bf16 %v3420_v28, %v3153_v62 }
 0x4dd   :  { %v7563_v19 = vrot.slane %v5179_v18, 4  ;;  %v6851_v62 = vunpack.c.l.b16 %v5179_v18  ;;  %v11632_v18 = vld [vmem:[#allocation10 + $0xb4] sm:$0xf0] }
 0x4de   :  { %v3332_v25 = vpop.f32.mrf.mxu2  ;;  %v3421_v59 = vpop.f32.mrf.mxu3 }
 0x4df   :  { %v3333_v6 = vadd.f32 %v3332_v25, %v3244_v12  ;;  %v3157_v36 = vpop.f32.mrf.mxu0  ;;  %v3246_v47 = vpop.f32.mrf.mxu1  ;;  %v13765_v25 = vunpack.c.l.b16 %v7563_v19 }
 0x4e0   :  { %v3158_v15 = vadd.f32 %v3157_v36, %v13471_v39  ;;  %v3247_v49 = vadd.f32 %v3246_v47, %v13594_v54  ;;  %v10635_v47 = vld [vmem:[#allocation10 + $0xa8] sm:$0xf] }
 0x4e1   :  { %v3422_v41 = vadd.f32 %v3421_v59, %v3333_v6  ;;  %4060 = vmatmul.bf16.gmra.mxu0 %v16684_v34  ;;  %16687 = vst [vmem:[#allocation54_spill] sm:$0xff] %v13765_v25 }
 0x4e2   :  { %4149 = vmatmul.bf16.gmra.mxu1 %v16685_v51 }
 0x4e3   :  { %v5181_v16 = vpack.c.bf16 %v3422_v41, %v3155_v7  ;;  %4238 = vmatmul.bf16.gmra.mxu2 %v16686_v23  ;;  %4327 = vmatmul.bf16.gmra.mxu3 %v16684_v34  ;;  %v11661_v7 = vld [vmem:[#allocation10 + $0x1a4] sm:$0xf]  ;;  %v10757_v41 = vld [vmem:[#allocation10 + $0x1b0] sm:$0xf0] }
 0x4e4   :  { %v10760_v5 = vor.u32 %v11661_v7, %v10757_v41 }
 0x4e5   :  { %v6852_v42 = vunpack.c.l.b16 %v5181_v16  ;;  %v7564_v28 = vrot.slane %v5181_v16, 4  ;;  %v10636_v16 = vor.u32 %v11632_v18, %v10635_v47 }
 0x4e6   :  { %v3335_v12 = vpop.f32.mrf.mxu2  ;;  %v3424_v59 = vpop.f32.mrf.mxu3  ;;  %4400 = vmatpush.bf16.msrb.mxu0 %v10760_v5 }
 0x4e7   :  { %v13767_v39 = vunpack.c.l.b16 %v7564_v28  ;;  %v3336_v6 = vadd.f32 %v3335_v12, %v3247_v49  ;;  %v3159_v36 = vpop.f32.mrf.mxu0  ;;  %v13769_v55 = vpack.c.b16 %v6852_v42, %v6851_v62  ;;  %v3248_v29 = vpop.f32.mrf.mxu1  ;;  %4578 = vmatpush.bf16.msrb.mxu2 %v10636_v16  ;;  %v11693_v42 = vld [vmem:[#allocation10 + $0x2a4] sm:$0xf] }
 0x4e8   :  { %v3160_v60 = vadd.f32 %v3159_v36, %v13483_v2  ;;  %v3249_v49 = vadd.f32 %v3248_v29, %v13594_v54  ;;  %v10763_v2 = vld [vmem:[#allocation10 + $0x1a8] sm:$0xf] }
 0x4e9   :  { %16688 = vst [vmem:[#allocation186_spill] sm:$0xff] %v13767_v39  ;;  %v3425_v57 = vadd.f32 %v3424_v59, %v3336_v6  ;;  %v10888_v6 = vor.u32 %v11693_v42, %v10885_v58  ;;  %v11664_v59 = vld [vmem:[#allocation10 + $0x1b4] sm:$0xf0] }
 0x4ea   :  { %16689 = vst [vmem:[#allocation187_spill] sm:$0xff] %v13769_v55  ;;  %v10764_v47 = vor.u32 %v11664_v59, %v10763_v2 }
 0x4eb   :  { %v5183_v28 = vpack.c.bf16 %v3425_v57, %v3158_v15  ;;  %4489 = vmatpush.bf16.msrb.mxu1 %v10888_v6  ;;  %v16690_v15 = vld [vmem:[#allocation61_spill] sm:$0xff] }
 0x4ec   :  { %4667 = vmatpush.bf16.msrb.mxu3 %v10764_v47 }
 0x4ed   :  { %v7593_v5 = vrot.slane %v5183_v28, 4  ;;  %v6881_v18 = vunpack.c.l.b16 %v5183_v28 }
 0x4ee   :  { %v3337_v12 = vpop.f32.mrf.mxu2  ;;  %v3426_v53 = vpop.f32.mrf.mxu3 }
 0x4ef   :  { %v3338_v56 = vadd.f32 %v3337_v12, %v3249_v49  ;;  %v3162_v62 = vpop.f32.mrf.mxu0  ;;  %v3251_v7 = vpop.f32.mrf.mxu1 }
 0x4f0   :  { %v3163_v36 = vadd.f32 %v3162_v62, %v13495_v13  ;;  %v3252_v29 = vadd.f32 %v3251_v7, %v13594_v54 }
 0x4f1   :  { %v3427_v41 = vadd.f32 %v3426_v53, %v3338_v56  ;;  %4065 = vmatmul.bf16.gmra.mxu0 %v16595_v14  ;;  %v13781_v53 = vunpack.c.l.b16 %v7593_v5 }
 0x4f2   :  { %4154 = vmatmul.bf16.gmra.mxu1 %v16596_v31 }
 0x4f3   :  { %v5185_v57 = vpack.c.bf16 %v3427_v41, %v3160_v60  ;;  %4243 = vmatmul.bf16.gmra.mxu2 %v16690_v15  ;;  %4332 = vmatmul.bf16.gmra.mxu3 %v16595_v14  ;;  %16691 = vst [vmem:[#allocation188_spill] sm:$0xff] %v13781_v53 }
 0x4f5   :  { %v6882_v13 = vunpack.c.l.b16 %v5185_v57  ;;  %v7594_v16 = vrot.slane %v5185_v57, 4 }
 0x4f6   :  { %v3340_v58 = vpop.f32.mrf.mxu2  ;;  %v3429_v49 = vpop.f32.mrf.mxu3 }
 0x4f7   :  { %v3341_v56 = vadd.f32 %v3340_v58, %v3252_v29  ;;  %v3164_v12 = vpop.f32.mrf.mxu0  ;;  %v13783_v62 = vpack.c.b16 %v6882_v13, %v6881_v18  ;;  %v13785_v60 = vunpack.c.l.b16 %v7594_v16  ;;  %v3253_v2 = vpop.f32.mrf.mxu1  ;;  %v16694_v16 = vld [vmem:[#allocation65_spill] sm:$0xff] }
 0x4f8   :  { %v3165_v42 = vadd.f32 %v3164_v12, %v13507_v26  ;;  %v3254_v59 = vadd.f32 %v3253_v2, %v13594_v54  ;;  %v16696_v12 = vld [vmem:[#allocation67_spill] sm:$0xff] }
 0x4f9   :  { %16692 = vst [vmem:[#allocation189_spill] sm:$0xff] %v13783_v62  ;;  %v3430_v7 = vadd.f32 %v3429_v49, %v3341_v56  ;;  %v16695_v49 = vld [vmem:[#allocation66_spill] sm:$0xff] }
 0x4fa   :  { %16693 = vst [vmem:[#allocation190_spill] sm:$0xff] %v13785_v60 }
 0x4fb   :  { %v5187_v6 = vpack.c.bf16 %v3430_v7, %v3163_v36 }
 0x4fd   :  { %v7595_v58 = vrot.slane %v5187_v6, 4  ;;  %v6883_v36 = vunpack.c.l.b16 %v5187_v6  ;;  %v11628_v6 = vld [vmem:[#allocation10 + $0x94] sm:$0xf0] }
 0x4fe   :  { %v3342_v41 = vpop.f32.mrf.mxu2  ;;  %v3431_v5 = vpop.f32.mrf.mxu3 }
 0x4ff   :  { %v3343_v47 = vadd.f32 %v3342_v41, %v3254_v59  ;;  %v3167_v57 = vpop.f32.mrf.mxu0  ;;  %v3256_v18 = vpop.f32.mrf.mxu1  ;;  %v13797_v41 = vunpack.c.l.b16 %v7595_v58 }
 0x500   :  { %v3168_v29 = vadd.f32 %v3167_v57, %v13519_v45  ;;  %v3257_v56 = vadd.f32 %v3256_v18, %v13594_v54  ;;  %v10619_v18 = vld [vmem:[#allocation10 + $0x88] sm:$0xf] }
 0x501   :  { %v3432_v13 = vadd.f32 %v3431_v5, %v3343_v47  ;;  %4070 = vmatmul.bf16.gmra.mxu0 %v16694_v16  ;;  %16697 = vst [vmem:[#allocation66_spill] sm:$0xff] %v13797_v41 }
 0x502   :  { %4159 = vmatmul.bf16.gmra.mxu1 %v16695_v49 }
 0x503   :  { %v5189_v26 = vpack.c.bf16 %v3432_v13, %v3165_v42  ;;  %4248 = vmatmul.bf16.gmra.mxu2 %v16696_v12  ;;  %4337 = vmatmul.bf16.gmra.mxu3 %v16694_v16  ;;  %v11657_v42 = vld [vmem:[#allocation10 + $0x184] sm:$0xf]  ;;  %v10741_v13 = vld [vmem:[#allocation10 + $0x190] sm:$0xf0] }
 0x504   :  { %v10744_v60 = vor.u32 %v11657_v42, %v10741_v13 }
 0x505   :  { %v6884_v2 = vunpack.c.l.b16 %v5189_v26  ;;  %v7596_v7 = vrot.slane %v5189_v26, 4  ;;  %v10620_v26 = vor.u32 %v11628_v6, %v10619_v18  ;;  %v16700_v6 = vld [vmem:[#allocation71_spill] sm:$0xff] }
 0x506   :  { %v3345_v59 = vpop.f32.mrf.mxu2  ;;  %v3434_v5 = vpop.f32.mrf.mxu3  ;;  %4401 = vmatpush.bf16.msrb.mxu0 %v10744_v60 }
 0x507   :  { %v13799_v45 = vunpack.c.l.b16 %v7596_v7  ;;  %v3346_v47 = vadd.f32 %v3345_v59, %v3257_v56  ;;  %v3169_v57 = vpop.f32.mrf.mxu0  ;;  %v13801_v28 = vpack.c.b16 %v6884_v2, %v6883_v36  ;;  %v3258_v53 = vpop.f32.mrf.mxu1  ;;  %4579 = vmatpush.bf16.msrb.mxu2 %v10620_v26  ;;  %v11689_v2 = vld [vmem:[#allocation10 + $0x284] sm:$0xf]  ;;  %v16702_v26 = vld [vmem:[#allocation73_spill] sm:$0xff] }
 0x508   :  { %v3170_v19 = vadd.f32 %v3169_v57, %v13531_v52  ;;  %v3259_v56 = vadd.f32 %v3258_v53, %v13594_v54  ;;  %v10747_v52 = vld [vmem:[#allocation10 + $0x188] sm:$0xf] }
 0x509   :  { %16698 = vst [vmem:[#allocation191_spill] sm:$0xff] %v13799_v45  ;;  %v3435_v25 = vadd.f32 %v3434_v5, %v3346_v47  ;;  %v11660_v5 = vld [vmem:[#allocation10 + $0x194] sm:$0xf0] }
 0x50a   :  { %16699 = vst [vmem:[#allocation192_spill] sm:$0xff] %v13801_v28  ;;  %v10869_v28 = vld [vmem:[#allocation10 + $0x290] sm:$0xf0]  ;;  %v10748_v18 = vor.u32 %v11660_v5, %v10747_v52 }
 0x50b   :  { %v5191_v7 = vpack.c.bf16 %v3435_v25, %v3168_v29  ;;  %v10872_v47 = vor.u32 %v11689_v2, %v10869_v28  ;;  %v16701_v29 = vld [vmem:[#allocation72_spill] sm:$0xff] }
 0x50c   :  { %4668 = vmatpush.bf16.msrb.mxu3 %v10748_v18 }
 0x50d   :  { %4490 = vmatpush.bf16.msrb.mxu1 %v10872_v47  ;;  %v7625_v25 = vrot.slane %v5191_v7, 4 }
 0x50e   :  { %v3347_v59 = vpop.f32.mrf.mxu2  ;;  %v3436_v62 = vpop.f32.mrf.mxu3 }
 0x50f   :  { %v3348_v39 = vadd.f32 %v3347_v59, %v3259_v56  ;;  %v3172_v36 = vpop.f32.mrf.mxu0  ;;  %v3261_v42 = vpop.f32.mrf.mxu1  ;;  %v6913_v56 = vunpack.c.l.b16 %v5191_v7 }
 0x510   :  { %v3173_v57 = vadd.f32 %v3172_v36, %v13543_v30  ;;  %v3262_v53 = vadd.f32 %v3261_v42, %v13594_v54 }
 0x511   :  { %v3437_v13 = vadd.f32 %v3436_v62, %v3348_v39  ;;  %4075 = vmatmul.bf16.gmra.mxu0 %v16700_v6  ;;  %v13813_v39 = vunpack.c.l.b16 %v7625_v25 }
 0x512   :  { %4164 = vmatmul.bf16.gmra.mxu1 %v16701_v29 }
 0x513   :  { %v5193_v60 = vpack.c.bf16 %v3437_v13, %v3170_v19  ;;  %4253 = vmatmul.bf16.gmra.mxu2 %v16702_v26  ;;  %4342 = vmatmul.bf16.gmra.mxu3 %v16700_v6  ;;  %16703 = vst [vmem:[#allocation72_spill] sm:$0xff] %v13813_v39 }
 0x515   :  { %v6914_v30 = vunpack.c.l.b16 %v5193_v60  ;;  %v7626_v59 = vrot.slane %v5193_v60, 4 }
 0x516   :  { %v3350_v28 = vpop.f32.mrf.mxu2  ;;  %v3439_v36 = vpop.f32.mrf.mxu3 }
 0x517   :  { %v3351_v62 = vadd.f32 %v3350_v28, %v3262_v53  ;;  %v3174_v2 = vpop.f32.mrf.mxu0  ;;  %v13815_v52 = vpack.c.b16 %v6914_v30, %v6913_v56  ;;  %v13817_v19 = vunpack.c.l.b16 %v7626_v59  ;;  %v3263_v47 = vpop.f32.mrf.mxu1 }
 0x518   :  { %v3175_v42 = vadd.f32 %v3174_v2, %v13555_v38  ;;  %v3264_v18 = vadd.f32 %v3263_v47, %v13594_v54  ;;  %v16707_v2 = vld [vmem:[#allocation79_spill] sm:$0xff] }
 0x519   :  { %16704 = vst [vmem:[#allocation193_spill] sm:$0xff] %v13815_v52  ;;  %v3440_v5 = vadd.f32 %v3439_v36, %v3351_v62  ;;  %v16706_v36 = vld [vmem:[#allocation78_spill] sm:$0xff] }
 0x51a   :  { %16705 = vst [vmem:[#allocation194_spill] sm:$0xff] %v13817_v19 }
 0x51b   :  { %v5195_v13 = vpack.c.bf16 %v3440_v5, %v3173_v57 }
 0x51d   :  { %v7627_v59 = vrot.slane %v5195_v13, 4  ;;  %v6915_v57 = vunpack.c.l.b16 %v5195_v13  ;;  %v11624_v13 = vld [vmem:[#allocation10 + $0x74] sm:$0xf0] }
 0x51e   :  { %v3352_v60 = vpop.f32.mrf.mxu2  ;;  %v3441_v58 = vpop.f32.mrf.mxu3 }
 0x51f   :  { %v3353_v25 = vadd.f32 %v3352_v60, %v3264_v18  ;;  %v3177_v53 = vpop.f32.mrf.mxu0  ;;  %v3266_v56 = vpop.f32.mrf.mxu1  ;;  %v13829_v60 = vunpack.c.l.b16 %v7627_v59 }
 0x520   :  { %v3178_v28 = vadd.f32 %v3177_v53, %v13567_v17  ;;  %v3267_v62 = vadd.f32 %v3266_v56, %v13594_v54  ;;  %v10603_v56 = vld [vmem:[#allocation10 + $0x68] sm:$0xf] }
 0x521   :  { %v3442_v30 = vadd.f32 %v3441_v58, %v3353_v25  ;;  %4080 = vmatmul.bf16.gmra.mxu0 %v16620_v44  ;;  %16708 = vst [vmem:[#allocation78_spill] sm:$0xff] %v13829_v60 }
 0x522   :  { %4169 = vmatmul.bf16.gmra.mxu1 %v16706_v36 }
 0x523   :  { %v5197_v38 = vpack.c.bf16 %v3442_v30, %v3175_v42  ;;  %4258 = vmatmul.bf16.gmra.mxu2 %v16707_v2  ;;  %4347 = vmatmul.bf16.gmra.mxu3 %v16620_v44  ;;  %v11653_v42 = vld [vmem:[#allocation10 + $0x164] sm:$0xf]  ;;  %v10725_v30 = vld [vmem:[#allocation10 + $0x170] sm:$0xf0]  ;;  %v11656_v44 = vld [vmem:[#allocation10 + $0x174] sm:$0xf0] }
 0x524   :  { %v10728_v41 = vor.u32 %v11653_v42, %v10725_v30 }
 0x525   :  { %v6916_v47 = vunpack.c.l.b16 %v5197_v38  ;;  %v7628_v5 = vrot.slane %v5197_v38, 4  ;;  %v10604_v38 = vor.u32 %v11624_v13, %v10603_v56 }
 0x526   :  { %v3355_v18 = vpop.f32.mrf.mxu2  ;;  %v3444_v25 = vpop.f32.mrf.mxu3  ;;  %4402 = vmatpush.bf16.msrb.mxu0 %v10728_v41 }
 0x527   :  { %v13831_v17 = vunpack.c.l.b16 %v7628_v5  ;;  %v3356_v58 = vadd.f32 %v3355_v18, %v3267_v62  ;;  %v3179_v53 = vpop.f32.mrf.mxu0  ;;  %v13833_v7 = vpack.c.b16 %v6916_v47, %v6915_v57  ;;  %v3268_v19 = vpop.f32.mrf.mxu1  ;;  %v11685_v5 = vld [vmem:[#allocation10 + $0x264] sm:$0xf]  ;;  %v10853_v62 = vld [vmem:[#allocation10 + $0x270] sm:$0xf0]  ;;  %v10731_v18 = vld [vmem:[#allocation10 + $0x168] sm:$0xf]  ;;  %4580 = vmatpush.bf16.msrb.mxu2 %v10604_v38 }
 0x528   :  { %v3180_v39 = vadd.f32 %v3179_v53, %v13579_v33  ;;  %v10856_v55 = vor.u32 %v11685_v5, %v10853_v62  ;;  %v10732_v57 = vor.u32 %v11656_v44, %v10731_v18  ;;  %v3269_v47 = vadd.f32 %v3268_v19, %v13594_v54  ;;  %v16711_v44 = vld [vmem:[#allocation85_spill] sm:$0xff] }
 0x529   :  { %16709 = vst [vmem:[#allocation195_spill] sm:$0xff] %v13831_v17  ;;  %v3445_v45 = vadd.f32 %v3444_v25, %v3356_v58 }
 0x52a   :  { %16710 = vst [vmem:[#allocation196_spill] sm:$0xff] %v13833_v7  ;;  %4491 = vmatpush.bf16.msrb.mxu1 %v10856_v55  ;;  %4669 = vmatpush.bf16.msrb.mxu3 %v10732_v57 }
 0x52b   :  { %v5199_v52 = vpack.c.bf16 %v3445_v45, %v3178_v28 }
 0x52d   :  { %v7657_v56 = vrot.slane %v5199_v52, 4  ;;  %v6945_v55 = vunpack.c.l.b16 %v5199_v52 }
 0x52e   :  { %v3357_v33 = vpop.f32.mrf.mxu2  ;;  %v3446_v58 = vpop.f32.mrf.mxu3 }
 0x52f   :  { %v3358_v53 = vadd.f32 %v3357_v33, %v3269_v47  ;;  %v3182_v25 = vpop.f32.mrf.mxu0  ;;  %v3271_v30 = vpop.f32.mrf.mxu1  ;;  %v13845_v5 = vunpack.c.l.b16 %v7657_v56  ;;  %v12074_v47 = vld [vmem:[#allocation11] sm:$0x77] }
 0x530   :  { %v3183_v42 = vadd.f32 %v3182_v25, %v13591_v48  ;;  %v3272_v28 = vadd.f32 %v3271_v30, %v13594_v54  ;;  %v3550_v33 = vperm.slane %v12074_v47, 2 }
 0x531   :  { %v3447_v41 = vadd.f32 %v3446_v58, %v3358_v53  ;;  %4085 = vmatmul.bf16.gmra.mxu0 %v12909_v35  ;;  %16712 = vst [vmem:[#allocation197_spill] sm:$0xff] %v13845_v5  ;;  %v16715_v53 = vld [vmem:[#allocation163_spill] sm:$0xff] }
 0x532   :  { %4174 = vmatmul.bf16.gmra.mxu1 %v12911_v11 }
 0x533   :  { %v5201_v45 = vpack.c.bf16 %v3447_v41, %v3180_v39  ;;  %4263 = vmatmul.bf16.gmra.mxu2 %v16711_v44  ;;  %4352 = vmatmul.bf16.gmra.mxu3 %v12909_v35 }
 0x535   :  { %v6946_v19 = vunpack.c.l.b16 %v5201_v45  ;;  %v7658_v13 = vrot.slane %v5201_v45, 4  ;;  %v13854_v45 = vperm.slane %v3550_v33, 2  ;;  %v16717_v33 = vld [vmem:[#allocation90_spill] sm:$0xff] }
 0x536   :  { %v3360_v38 = vpop.f32.mrf.mxu2  ;;  %v3449_v62 = vpop.f32.mrf.mxu3 }
 0x537   :  { %v3361_v48 = vadd.f32 %v3360_v38, %v3272_v28  ;;  %v3184_v18 = vpop.f32.mrf.mxu0  ;;  %v13847_v57 = vpack.c.b16 %v6946_v19, %v6945_v55  ;;  %v13849_v39 = vunpack.c.l.b16 %v7658_v13  ;;  %v3273_v25 = vpop.f32.mrf.mxu1  ;;  %v3551_v38 = vperm.slane %v12074_v47, 6  ;;  %v10709_v47 = vld [vmem:[#allocation10 + $0x150] sm:$0xf0] }
 0x538   :  { %v3185_v58 = vadd.f32 %v3184_v18, %v16715_v53  ;;  %v3274_v56 = vadd.f32 %v3273_v25, %v13594_v54  ;;  %v16716_v53 = vld [vmem:[#allocation89_spill] sm:$0xff]  ;;  %v11649_v54 = vld [vmem:[#allocation10 + $0x144] sm:$0xf]  ;;  %v10587_v25 = vld [vmem:[#allocation10 + $0x48] sm:$0xf] }
 0x539   :  { %16713 = vst [vmem:[#allocation198_spill] sm:$0xff] %v13847_v57  ;;  %v3450_v30 = vadd.f32 %v3449_v62, %v3361_v48  ;;  %v13859_v48 = vperm.slane %v3551_v38, 2 }
 0x53a   :  { %16714 = vst [vmem:[#allocation199_spill] sm:$0xff] %v13849_v39 }
 0x53b   :  { %v5203_v41 = vpack.c.bf16 %v3450_v30, %v3183_v42  ;;  %v16718_v30 = vld [vmem:[#allocation91_spill] sm:$0xff] }
 0x53d   :  { %v7659_v62 = vrot.slane %v5203_v41, 4 }
 0x53e   :  { %v3362_v28 = vpop.f32.mrf.mxu2  ;;  %v3451_v19 = vpop.f32.mrf.mxu3 }
 0x53f   :  { %v3363_v55 = vadd.f32 %v3362_v28, %v3274_v56  ;;  %v4051_v13 = vpop.f32.mrf.mxu0  ;;  %v4140_v60 = vpop.f32.mrf.mxu1  ;;  %v6947_v56 = vunpack.c.l.b16 %v5203_v41  ;;  %v13864_v38 = vunpack.c.l.b16 %v7659_v62 }
 0x540   :  { %v4052_v59 = vadd.f32 %v4051_v13, %v13854_v45 }
 0x541   :  { %v3452_v17 = vadd.f32 %v3451_v19, %v3363_v55  ;;  %4090 = vmatmul.bf16.gmra.mxu0 %v16716_v53  ;;  %v10712_v55 = vor.u32 %v11649_v54, %v10709_v47  ;;  %16719 = vst [vmem:[#allocation163_spill] sm:$0xff] %v13864_v38  ;;  %v11681_v47 = vld [vmem:[#allocation10 + $0x244] sm:$0xf] }
 0x542   :  { %v4141_v18 = vadd.f32 %v4140_v60, %v4052_v59  ;;  %4179 = vmatmul.bf16.gmra.mxu1 %v16717_v33  ;;  %v11620_v60 = vld [vmem:[#allocation10 + $0x54] sm:$0xf0] }
 0x543   :  { %v5205_v42 = vpack.c.bf16 %v3452_v17, %v3185_v58  ;;  %4268 = vmatmul.bf16.gmra.mxu2 %v16718_v30  ;;  %4357 = vmatmul.bf16.gmra.mxu3 %v16716_v53  ;;  %v10588_v19 = vor.u32 %v11620_v60, %v10587_v25  ;;  %v10837_v25 = vld [vmem:[#allocation10 + $0x250] sm:$0xf0]  ;;  %v11652_v60 = vld [vmem:[#allocation10 + $0x154] sm:$0xf0] }
 0x544   :  { %4403 = vmatpush.bf16.msrb.mxu0 %v10712_v55 }
 0x545   :  { %v6948_v28 = vunpack.c.l.b16 %v5205_v42  ;;  %v7660_v13 = vrot.slane %v5205_v42, 4  ;;  %4581 = vmatpush.bf16.msrb.mxu2 %v10588_v19 }
 0x546   :  { %v4229_v59 = vpop.f32.mrf.mxu2  ;;  %v4318_v58 = vpop.f32.mrf.mxu3 }
 0x547   :  { %v13866_v52 = vunpack.c.l.b16 %v7660_v13  ;;  %v13868_v17 = vadd.f32 %v4229_v59, %v4141_v18  ;;  %v4053_v5 = vpop.f32.mrf.mxu0  ;;  %v13870_v39 = vpack.c.b16 %v6948_v28, %v6947_v56  ;;  %v13873_v57 = vadd.f32 %v4318_v58, %v13859_v48  ;;  %v4142_v42 = vpop.f32.mrf.mxu1  ;;  %v10715_v18 = vld [vmem:[#allocation10 + $0x148] sm:$0xf] }
 0x548   :  { %v4054_v41 = vadd.f32 %v4053_v5, %v13854_v45  ;;  %v10840_v13 = vor.u32 %v11681_v47, %v10837_v25  ;;  %v10716_v59 = vor.u32 %v11652_v60, %v10715_v18 }
 0x549   :  { %16720 = vst [vmem:[#allocation200_spill] sm:$0xff] %v13866_v52 }
 0x54a   :  { %16721 = vst [vmem:[#allocation201_spill] sm:$0xff] %v13870_v39  ;;  %v4143_v54 = vadd.f32 %v4142_v42, %v4054_v41  ;;  %4492 = vmatpush.bf16.msrb.mxu1 %v10840_v13  ;;  %4670 = vmatpush.bf16.msrb.mxu3 %v10716_v59 }
 0x54e   :  { %v4231_v56 = vpop.f32.mrf.mxu2  ;;  %v4320_v55 = vpop.f32.mrf.mxu3 }
 0x54f   :  { %v13878_v28 = vadd.f32 %v4231_v56, %v4143_v54  ;;  %v4056_v58 = vpop.f32.mrf.mxu0  ;;  %v13881_v5 = vadd.f32 %v4320_v55, %v13859_v48  ;;  %v4145_v62 = vpop.f32.mrf.mxu1 }
 0x550   :  { %v4057_v19 = vadd.f32 %v4056_v58, %v13854_v45 }
 0x551   :  { %4095 = vmatmul.bf16.gmra.mxu0 %v12960_v50 }
 0x552   :  { %v4146_v41 = vadd.f32 %v4145_v62, %v4057_v19  ;;  %4184 = vmatmul.bf16.gmra.mxu1 %v12966_v10 }
 0x553   :  { %4273 = vmatmul.bf16.gmra.mxu2 %v12968_v20  ;;  %4362 = vmatmul.bf16.gmra.mxu3 %v12960_v50  ;;  %v10909_v50 = vld [vmem:[#allocation10 + $0x2d8] sm:$0xf0]  ;;  %v11630_v20 = vld [vmem:[#allocation10 + $0xac] sm:$0xf] }
 0x556   :  { %v4234_v42 = vpop.f32.mrf.mxu2  ;;  %v4323_v47 = vpop.f32.mrf.mxu3 }
 0x557   :  { %v13888_v54 = vadd.f32 %v4234_v42, %v4146_v41  ;;  %v4058_v25 = vpop.f32.mrf.mxu0  ;;  %v13891_v18 = vadd.f32 %v4323_v47, %v13859_v48  ;;  %v4147_v60 = vpop.f32.mrf.mxu1  ;;  %v11645_v47 = vld [vmem:[#allocation10 + $0x124] sm:$0xf] }
 0x558   :  { %v4059_v13 = vadd.f32 %v4058_v25, %v13854_v45  ;;  %v10693_v25 = vld [vmem:[#allocation10 + $0x130] sm:$0xf0] }
 0x559   :  { %16722 = vst [vmem:[#allocation202_spill] sm:$0xff] %v13888_v54 }
 0x55a   :  { %v4148_v62 = vadd.f32 %v4147_v60, %v4059_v13  ;;  %v10571_v13 = vld [vmem:[#allocation10 + $0x28] sm:$0xf]  ;;  %v10696_v60 = vor.u32 %v11645_v47, %v10693_v25  ;;  %v11648_v25 = vld [vmem:[#allocation10 + $0x134] sm:$0xf0] }
 0x55c   :  { %4404 = vmatpush.bf16.msrb.mxu0 %v10696_v60 }
 0x55e   :  { %v4236_v59 = vpop.f32.mrf.mxu2  ;;  %v4325_v55 = vpop.f32.mrf.mxu3 }
 0x55f   :  { %v13894_v56 = vadd.f32 %v4236_v59, %v4148_v62  ;;  %v4061_v58 = vpop.f32.mrf.mxu0  ;;  %v13897_v19 = vadd.f32 %v4325_v55, %v13859_v48  ;;  %v4150_v42 = vpop.f32.mrf.mxu1  ;;  %v11616_v62 = vld [vmem:[#allocation10 + $0x34] sm:$0xf0] }
 0x560   :  { %v4062_v41 = vadd.f32 %v4061_v58, %v13854_v45  ;;  %v10572_v55 = vor.u32 %v11616_v62, %v10571_v13 }
 0x561   :  { %16723 = vst [vmem:[#allocation203_spill] sm:$0xff] %v13894_v56  ;;  %4100 = vmatmul.bf16.gmra.mxu0 %v16638_v40  ;;  %v10699_v56 = vld [vmem:[#allocation10 + $0x128] sm:$0xf] }
 0x562   :  { %16724 = vst [vmem:[#allocation204_spill] sm:$0xff] %v13897_v19  ;;  %v4151_v38 = vadd.f32 %v4150_v42, %v4062_v41  ;;  %4189 = vmatmul.bf16.gmra.mxu1 %v16639_v27  ;;  %4582 = vmatpush.bf16.msrb.mxu2 %v10572_v55  ;;  %v10821_v27 = vld [vmem:[#allocation10 + $0x230] sm:$0xf0]  ;;  %v10700_v19 = vor.u32 %v11648_v25, %v10699_v56 }
 0x563   :  { %4278 = vmatmul.bf16.gmra.mxu2 %v12988_v63  ;;  %4367 = vmatmul.bf16.gmra.mxu3 %v16638_v40  ;;  %v11677_v63 = vld [vmem:[#allocation10 + $0x224] sm:$0xf] }
 0x564   :  { %v10824_v47 = vor.u32 %v11677_v63, %v10821_v27  ;;  %4671 = vmatpush.bf16.msrb.mxu3 %v10700_v19  ;;  %v16729_v63 = vld [vmem:[#allocation106_spill] sm:$0xff] }
 0x566   :  { %v4239_v59 = vpop.f32.mrf.mxu2  ;;  %v4328_v58 = vpop.f32.mrf.mxu3  ;;  %4493 = vmatpush.bf16.msrb.mxu1 %v10824_v47 }
 0x567   :  { %v13904_v52 = vadd.f32 %v4239_v59, %v4151_v38  ;;  %v4063_v39 = vpop.f32.mrf.mxu0  ;;  %v13907_v41 = vadd.f32 %v4328_v58, %v13859_v48  ;;  %v4152_v7 = vpop.f32.mrf.mxu1 }
 0x568   :  { %v4064_v42 = vadd.f32 %v4063_v39, %v13854_v45 }
 0x569   :  { %16725 = vst [vmem:[#allocation205_spill] sm:$0xff] %v13904_v52 }
 0x56a   :  { %16726 = vst [vmem:[#allocation206_spill] sm:$0xff] %v13907_v41  ;;  %v4153_v40 = vadd.f32 %v4152_v7, %v4064_v42 }
 0x56e   :  { %v4241_v38 = vpop.f32.mrf.mxu2  ;;  %v4330_v60 = vpop.f32.mrf.mxu3 }
 0x56f   :  { %v13910_v13 = vadd.f32 %v4241_v38, %v4153_v40  ;;  %v4066_v62 = vpop.f32.mrf.mxu0  ;;  %v13913_v59 = vadd.f32 %v4330_v60, %v13859_v48  ;;  %v4155_v55 = vpop.f32.mrf.mxu1 }
 0x570   :  { %v4067_v39 = vadd.f32 %v4066_v62, %v13854_v45 }
 0x571   :  { %16727 = vst [vmem:[#allocation207_spill] sm:$0xff] %v13910_v13  ;;  %4105 = vmatmul.bf16.gmra.mxu0 %v16646_v0 }
 0x572   :  { %16728 = vst [vmem:[#allocation208_spill] sm:$0xff] %v13913_v59  ;;  %v4156_v7 = vadd.f32 %v4155_v55, %v4067_v39  ;;  %4194 = vmatmul.bf16.gmra.mxu1 %v16647_v46  ;;  %v11638_v59 = vld [vmem:[#allocation10 + $0xec] sm:$0xf] }
 0x573   :  { %4283 = vmatmul.bf16.gmra.mxu2 %v16729_v63  ;;  %4372 = vmatmul.bf16.gmra.mxu3 %v16646_v0  ;;  %v16734_v0 = vld [vmem:[#allocation109_spill] sm:$0xff] }
 0x574   :  { %v16736_v63 = vld [vmem:[#allocation113_spill] sm:$0xff] }
 0x576   :  { %v4244_v27 = vpop.f32.mrf.mxu2  ;;  %v4333_v56 = vpop.f32.mrf.mxu3 }
 0x577   :  { %v13920_v40 = vadd.f32 %v4244_v27, %v4156_v7  ;;  %v4068_v19 = vpop.f32.mrf.mxu0  ;;  %v13923_v58 = vadd.f32 %v4333_v56, %v13859_v48  ;;  %v4157_v47 = vpop.f32.mrf.mxu1  ;;  %v16735_v56 = vld [vmem:[#allocation112_spill] sm:$0xff] }
 0x578   :  { %v4069_v42 = vadd.f32 %v4068_v19, %v13854_v45  ;;  %v11641_v19 = vld [vmem:[#allocation10 + $0x104] sm:$0xf] }
 0x579   :  { %16730 = vst [vmem:[#allocation209_spill] sm:$0xff] %v13920_v40 }
 0x57a   :  { %16731 = vst [vmem:[#allocation210_spill] sm:$0xff] %v13923_v58  ;;  %v4158_v25 = vadd.f32 %v4157_v47, %v4069_v42  ;;  %v10677_v42 = vld [vmem:[#allocation10 + $0x110] sm:$0xf0]  ;;  %v11673_v47 = vld [vmem:[#allocation10 + $0x204] sm:$0xf] }
 0x57b   :  { %v11644_v58 = vld [vmem:[#allocation10 + $0x114] sm:$0xf0] }
 0x57e   :  { %v4246_v38 = vpop.f32.mrf.mxu2  ;;  %v4335_v62 = vpop.f32.mrf.mxu3 }
 0x57f   :  { %v13926_v60 = vadd.f32 %v4246_v38, %v4158_v25  ;;  %v4071_v39 = vpop.f32.mrf.mxu0  ;;  %v13929_v55 = vadd.f32 %v4335_v62, %v13859_v48  ;;  %v4160_v27 = vpop.f32.mrf.mxu1  ;;  %v10680_v25 = vor.u32 %v11641_v19, %v10677_v42  ;;  %v10805_v38 = vld [vmem:[#allocation10 + $0x210] sm:$0xf0]  ;;  %v11612_v62 = vld [vmem:[#allocation10 + $0x14] sm:$0xf0] }
 0x580   :  { %v4072_v7 = vadd.f32 %v4071_v39, %v13854_v45  ;;  %v10683_v39 = vld [vmem:[#allocation10 + $0x108] sm:$0xf] }
 0x581   :  { %16732 = vst [vmem:[#allocation211_spill] sm:$0xff] %v13926_v60  ;;  %4110 = vmatmul.bf16.gmra.mxu0 %v16734_v0  ;;  %v10555_v60 = vld [vmem:[#allocation10 + $0x8] sm:$0xf]  ;;  %v10684_v13 = vor.u32 %v11644_v58, %v10683_v39  ;;  %v10925_v39 = vld [vmem:[#allocation10 + $0x2f8] sm:$0xf0] }
 0x582   :  { %16733 = vst [vmem:[#allocation212_spill] sm:$0xff] %v13929_v55  ;;  %v4161_v40 = vadd.f32 %v4160_v27, %v4072_v7  ;;  %4199 = vmatmul.bf16.gmra.mxu1 %v16735_v56  ;;  %v10808_v55 = vor.u32 %v11673_v47, %v10805_v38  ;;  %v10556_v46 = vor.u32 %v11612_v62, %v10555_v60  ;;  %v10923_v7 = vld [vmem:[#allocation10 + $0x2e8] sm:$0xf]  ;;  %v11704_v56 = vld [vmem:[#allocation10 + $0x2f4] sm:$0xf0] }
 0x583   :  { %4288 = vmatmul.bf16.gmra.mxu2 %v16736_v63  ;;  %4377 = vmatmul.bf16.gmra.mxu3 %v16734_v0  ;;  %v10669_v63 = vld [vmem:[#allocation10 + $0xf8] sm:$0xf0]  ;;  %v10924_v19 = vor.u32 %v11704_v56, %v10923_v7  ;;  %v11670_v0 = vld [vmem:[#allocation10 + $0x1ec] sm:$0xf] }
 0x584   :  { %4405 = vmatpush.bf16.msrb.mxu0 %v10680_v25  ;;  %4494 = vmatpush.bf16.msrb.mxu1 %v10808_v55  ;;  %v10672_v42 = vor.u32 %v11638_v59, %v10669_v63  ;;  %v10797_v47 = vld [vmem:[#allocation10 + $0x1f8] sm:$0xf0]  ;;  %v11702_v60 = vld [vmem:[#allocation10 + $0x2ec] sm:$0xf] }
 0x585   :  { %4583 = vmatpush.bf16.msrb.mxu2 %v10556_v46  ;;  %4672 = vmatpush.bf16.msrb.mxu3 %v10684_v13  ;;  %v10800_v62 = vor.u32 %v11670_v0, %v10797_v47  ;;  %v10928_v55 = vor.u32 %v11702_v60, %v10925_v39  ;;  %v11634_v56 = vld [vmem:[#allocation10 + $0xcc] sm:$0xf]  ;;  %v10653_v59 = vld [vmem:[#allocation10 + $0xd8] sm:$0xf0]  ;;  %v10891_v0 = vld [vmem:[#allocation10 + $0x2a8] sm:$0xf] }
 0x586   :  { %v4249_v27 = vpop.f32.mrf.mxu2  ;;  %v4338_v41 = vpop.f32.mrf.mxu3  ;;  %v11666_v63 = vld [vmem:[#allocation10 + $0x1cc] sm:$0xf]  ;;  %v11696_v47 = vld [vmem:[#allocation10 + $0x2b4] sm:$0xf0]  ;;  %v10765_v39 = vld [vmem:[#allocation10 + $0x1b8] sm:$0xf0] }
 0x587   :  { %v13936_v52 = vadd.f32 %v4249_v27, %v4161_v40  ;;  %v4073_v54 = vpop.f32.mrf.mxu0  ;;  %v13939_v38 = vadd.f32 %v4338_v41, %v13859_v48  ;;  %v4162_v58 = vpop.f32.mrf.mxu1  ;;  %v10907_v40 = vld [vmem:[#allocation10 + $0x2c8] sm:$0xf]  ;;  %v11700_v27 = vld [vmem:[#allocation10 + $0x2d4] sm:$0xf0]  ;;  %v10781_v41 = vld [vmem:[#allocation10 + $0x1d8] sm:$0xf0] }
 0x588   :  { %v4074_v25 = vadd.f32 %v4073_v54, %v13854_v45  ;;  %4754 = vmatpush.bf16.msra.mxu0 %v10924_v19  ;;  %4843 = vmatpush.bf16.msra.mxu1 %v10672_v42  ;;  %v10908_v46 = vor.u32 %v11700_v27, %v10907_v40  ;;  %v10784_v54 = vor.u32 %v11666_v63, %v10781_v41  ;;  %v10637_v42 = vld [vmem:[#allocation10 + $0xb8] sm:$0xf0]  ;;  %v11662_v60 = vld [vmem:[#allocation10 + $0x1ac] sm:$0xf]  ;;  %v11692_v63 = vld [vmem:[#allocation10 + $0x294] sm:$0xf0] }
 0x589   :  { %16737 = vst [vmem:[#allocation213_spill] sm:$0xff] %v13936_v52  ;;  %4932 = vmatpush.bf16.msra.mxu2 %v10800_v62  ;;  %v10656_v52 = vor.u32 %v11634_v56, %v10653_v59  ;;  %5021 = vmatpush.bf16.msra.mxu3 %v10928_v55  ;;  %v10892_v19 = vor.u32 %v11696_v47, %v10891_v0  ;;  %v11694_v62 = vld [vmem:[#allocation10 + $0x2ac] sm:$0xf]  ;;  %v10893_v27 = vld [vmem:[#allocation10 + $0x2b8] sm:$0xf0] }
 0x58a   :  { %16738 = vst [vmem:[#allocation214_spill] sm:$0xff] %v13939_v38  ;;  %v4163_v7 = vadd.f32 %v4162_v58, %v4074_v25  ;;  %v11698_v38 = vld [vmem:[#allocation10 + $0x2cc] sm:$0xf]  ;;  %v10640_v25 = vor.u32 %v11630_v20, %v10637_v42  ;;  %v10768_v58 = vor.u32 %v11662_v60, %v10765_v39  ;;  %v10896_v20 = vor.u32 %v11694_v62, %v10893_v27  ;;  %v10621_v0 = vld [vmem:[#allocation10 + $0x98] sm:$0xf0] }
 0x58b   :  { %v10912_v13 = vor.u32 %v11698_v38, %v10909_v50  ;;  %v11626_v41 = vld [vmem:[#allocation10 + $0x8c] sm:$0xf] }
 0x58c   :  { %4755 = vmatpush.bf16.msra.mxu0 %v10908_v46  ;;  %4844 = vmatpush.bf16.msra.mxu1 %v10656_v52  ;;  %v10875_v46 = vld [vmem:[#allocation10 + $0x288] sm:$0xf]  ;;  %v11658_v47 = vld [vmem:[#allocation10 + $0x18c] sm:$0xf] }
 0x58d   :  { %4933 = vmatpush.bf16.msra.mxu2 %v10784_v54  ;;  %5022 = vmatpush.bf16.msra.mxu3 %v10912_v13  ;;  %v10876_v54 = vor.u32 %v11692_v63, %v10875_v46  ;;  %v10624_v13 = vor.u32 %v11626_v41, %v10621_v0  ;;  %v11690_v39 = vld [vmem:[#allocation10 + $0x28c] sm:$0xf]  ;;  %v10861_v0 = vld [vmem:[#allocation10 + $0x278] sm:$0xf0] }
 0x58e   :  { %v4251_v40 = vpop.f32.mrf.mxu2  ;;  %v4340_v55 = vpop.f32.mrf.mxu3  ;;  %v11622_v62 = vld [vmem:[#allocation10 + $0x6c] sm:$0xf] }
 0x58f   :  { %v13942_v56 = vadd.f32 %v4251_v40, %v4163_v7  ;;  %v4076_v59 = vpop.f32.mrf.mxu0  ;;  %v13945_v50 = vadd.f32 %v4340_v55, %v13859_v48  ;;  %v4165_v38 = vpop.f32.mrf.mxu1  ;;  %v10749_v7 = vld [vmem:[#allocation10 + $0x198] sm:$0xf0]  ;;  %v11686_v41 = vld [vmem:[#allocation10 + $0x26c] sm:$0xf] }
 0x590   :  { %v4077_v52 = vadd.f32 %v4076_v59, %v13854_v45  ;;  %4756 = vmatpush.bf16.msra.mxu0 %v10892_v19  ;;  %4845 = vmatpush.bf16.msra.mxu1 %v10640_v25  ;;  %v10752_v60 = vor.u32 %v11658_v47, %v10749_v7  ;;  %v10877_v40 = vld [vmem:[#allocation10 + $0x298] sm:$0xf0]  ;;  %v10859_v19 = vld [vmem:[#allocation10 + $0x268] sm:$0xf]  ;;  %v11688_v25 = vld [vmem:[#allocation10 + $0x274] sm:$0xf0] }
 0x591   :  { %4115 = vmatmul.bf16.gmra.mxu0 %v16659_v32  ;;  %4934 = vmatpush.bf16.msra.mxu2 %v10768_v58  ;;  %v10880_v27 = vor.u32 %v11690_v39, %v10877_v40  ;;  %v10860_v55 = vor.u32 %v11688_v25, %v10859_v19  ;;  %v10605_v59 = vld [vmem:[#allocation10 + $0x78] sm:$0xf0]  ;;  %v10843_v39 = vld [vmem:[#allocation10 + $0x248] sm:$0xf]  ;;  %v11684_v40 = vld [vmem:[#allocation10 + $0x254] sm:$0xf0] }
 0x592   :  { %v4166_v42 = vadd.f32 %v4165_v38, %v4077_v52  ;;  %4204 = vmatmul.bf16.gmra.mxu1 %v16660_v61  ;;  %5023 = vmatpush.bf16.msra.mxu3 %v10896_v20  ;;  %v11654_v52 = vld [vmem:[#allocation10 + $0x16c] sm:$0xf]  ;;  %v10733_v58 = vld [vmem:[#allocation10 + $0x178] sm:$0xf0]  ;;  %v10608_v46 = vor.u32 %v11622_v62, %v10605_v59 }
 0x593   :  { %4293 = vmatmul.bf16.gmra.mxu2 %v16658_v22  ;;  %4382 = vmatmul.bf16.gmra.mxu3 %v16659_v32  ;;  %v10736_v63 = vor.u32 %v11654_v52, %v10733_v58  ;;  %v11618_v19 = vld [vmem:[#allocation10 + $0x4c] sm:$0xf]  ;;  %v10589_v25 = vld [vmem:[#allocation10 + $0x58] sm:$0xf0] }
 0x594   :  { %4757 = vmatpush.bf16.msra.mxu0 %v10876_v54  ;;  %4846 = vmatpush.bf16.msra.mxu1 %v10624_v13  ;;  %v10864_v13 = vor.u32 %v11686_v41, %v10861_v0  ;;  %v11650_v62 = vld [vmem:[#allocation10 + $0x14c] sm:$0xf]  ;;  %v10717_v59 = vld [vmem:[#allocation10 + $0x158] sm:$0xf0]  ;;  %v10592_v52 = vor.u32 %v11618_v19, %v10589_v25 }
 0x595   :  { %4935 = vmatpush.bf16.msra.mxu2 %v10752_v60  ;;  %v10844_v60 = vor.u32 %v11684_v40, %v10843_v39  ;;  %v10720_v58 = vor.u32 %v11650_v62, %v10717_v59  ;;  %v11614_v61 = vld [vmem:[#allocation10 + $0x2c] sm:$0xf]  ;;  %v10701_v0 = vld [vmem:[#allocation10 + $0x138] sm:$0xf0]  ;;  %v10811_v62 = vld [vmem:[#allocation10 + $0x208] sm:$0xf] }
 0x596   :  { %v4254_v38 = vpop.f32.mrf.mxu2  ;;  %v4343_v7 = vpop.f32.mrf.mxu3  ;;  %5024 = vmatpush.bf16.msra.mxu3 %v10880_v27  ;;  %v11646_v41 = vld [vmem:[#allocation10 + $0x12c] sm:$0xf]  ;;  %v11676_v59 = vld [vmem:[#allocation10 + $0x214] sm:$0xf0] }
 0x597   :  { %v13952_v47 = vadd.f32 %v4254_v38, %v4166_v42  ;;  %v4078_v32 = vpop.f32.mrf.mxu0  ;;  %v13955_v22 = vadd.f32 %v4343_v7, %v13859_v48  ;;  %v4167_v54 = vpop.f32.mrf.mxu1  ;;  %v11682_v38 = vld [vmem:[#allocation10 + $0x24c] sm:$0xf]  ;;  %v10845_v7 = vld [vmem:[#allocation10 + $0x258] sm:$0xf0] }
 0x598   :  { %v4079_v20 = vadd.f32 %v4078_v32, %v13854_v45  ;;  %4758 = vmatpush.bf16.msra.mxu0 %v10860_v55  ;;  %4847 = vmatpush.bf16.msra.mxu1 %v10608_v46  ;;  %v11680_v32 = vld [vmem:[#allocation10 + $0x234] sm:$0xf0]  ;;  %v10573_v55 = vld [vmem:[#allocation10 + $0x38] sm:$0xf0]  ;;  %v11678_v46 = vld [vmem:[#allocation10 + $0x22c] sm:$0xf] }
 0x599   :  { %16739 = vst [vmem:[#allocation215_spill] sm:$0xff] %v13952_v47  ;;  %4936 = vmatpush.bf16.msra.mxu2 %v10736_v63  ;;  %v10827_v47 = vld [vmem:[#allocation10 + $0x228] sm:$0xf]  ;;  %v10829_v63 = vld [vmem:[#allocation10 + $0x238] sm:$0xf0] }
 0x59a   :  { %16740 = vst [vmem:[#allocation216_spill] sm:$0xff] %v13955_v22  ;;  %v4168_v42 = vadd.f32 %v4167_v54, %v4079_v20  ;;  %5025 = vmatpush.bf16.msra.mxu3 %v10864_v13  ;;  %v10848_v22 = vor.u32 %v11682_v38, %v10845_v7  ;;  %v10828_v27 = vor.u32 %v11680_v32, %v10827_v47  ;;  %v11610_v38 = vld [vmem:[#allocation10 + $0xc] sm:$0xf] }
 0x59b   :  { %v10576_v20 = vor.u32 %v11614_v61, %v10573_v55  ;;  %v10704_v47 = vor.u32 %v11646_v41, %v10701_v0  ;;  %v10812_v61 = vor.u32 %v11676_v59, %v10811_v62  ;;  %v11642_v7 = vld [vmem:[#allocation10 + $0x10c] sm:$0xf] }
 0x59c   :  { %4759 = vmatpush.bf16.msra.mxu0 %v10844_v60  ;;  %4848 = vmatpush.bf16.msra.mxu1 %v10592_v52  ;;  %v10832_v52 = vor.u32 %v11678_v46, %v10829_v63  ;;  %v16742_v55 = vld [vmem:[#allocation123_spill] sm:$0xff] }
 0x59d   :  { %4937 = vmatpush.bf16.msra.mxu2 %v10720_v58  ;;  %v10557_v58 = vld [vmem:[#allocation10 + $0x18] sm:$0xf0]  ;;  %v16744_v41 = vld [vmem:[#allocation127_spill] sm:$0xff] }
 0x59e   :  { %v4256_v39 = vpop.f32.mrf.mxu2  ;;  %v4345_v40 = vpop.f32.mrf.mxu3  ;;  %5026 = vmatpush.bf16.msra.mxu3 %v10848_v22 }
 0x59f   :  { %v13958_v54 = vadd.f32 %v4256_v39, %v4168_v42  ;;  %v4081_v19 = vpop.f32.mrf.mxu0  ;;  %v13961_v25 = vadd.f32 %v4345_v40, %v13859_v48  ;;  %v4170_v60 = vpop.f32.mrf.mxu1  ;;  %v10685_v42 = vld [vmem:[#allocation10 + $0x118] sm:$0xf0]  ;;  %v10560_v39 = vor.u32 %v11610_v38, %v10557_v58  ;;  %v11674_v40 = vld [vmem:[#allocation10 + $0x20c] sm:$0xf] }
 0x5a0   :  { %v4082_v13 = vadd.f32 %v4081_v19, %v13854_v45  ;;  %4760 = vmatpush.bf16.msra.mxu0 %v10828_v27  ;;  %4849 = vmatpush.bf16.msra.mxu1 %v10576_v20  ;;  %v16743_v19 = vld [vmem:[#allocation126_spill] sm:$0xff]  ;;  %v10688_v22 = vor.u32 %v11642_v7, %v10685_v42 }
 0x5a1   :  { %16741 = vst [vmem:[#allocation217_spill] sm:$0xff] %v13958_v54  ;;  %4120 = vmatmul.bf16.gmra.mxu0 %v16742_v55  ;;  %v10813_v54 = vld [vmem:[#allocation10 + $0x218] sm:$0xf0]  ;;  %4938 = vmatpush.bf16.msra.mxu2 %v10704_v47 }
 0x5a2   :  { %v4171_v32 = vadd.f32 %v4170_v60, %v4082_v13  ;;  %4209 = vmatmul.bf16.gmra.mxu1 %v16743_v19  ;;  %5027 = vmatpush.bf16.msra.mxu3 %v10832_v52  ;;  %v10816_v27 = vor.u32 %v11674_v40, %v10813_v54 }
 0x5a3   :  { %4298 = vmatmul.bf16.gmra.mxu2 %v16744_v41  ;;  %4387 = vmatmul.bf16.gmra.mxu3 %v16742_v55 }
 0x5a4   :  { %4761 = vmatpush.bf16.msra.mxu0 %v10812_v61  ;;  %4850 = vmatpush.bf16.msra.mxu1 %v10560_v39 }
 0x5a5   :  { %4939 = vmatpush.bf16.msra.mxu2 %v10688_v22 }
 0x5a6   :  { %v4259_v0 = vpop.f32.mrf.mxu2  ;;  %v4348_v63 = vpop.f32.mrf.mxu3  ;;  %5028 = vmatpush.bf16.msra.mxu3 %v10816_v27 }
 0x5a7   :  { %v13968_v46 = vadd.f32 %v4259_v0, %v4171_v32  ;;  %v4083_v20 = vpop.f32.mrf.mxu0  ;;  %v13971_v13 = vadd.f32 %v4348_v63, %v13859_v48  ;;  %v4172_v62 = vpop.f32.mrf.mxu1 }
 0x5a8   :  { %v4084_v60 = vadd.f32 %v4083_v20, %v13854_v45 }
 0x5aa   :  { %v4173_v59 = vadd.f32 %v4172_v62, %v4084_v60 }
 0x5ae   :  { %v4261_v47 = vpop.f32.mrf.mxu2  ;;  %v4350_v52 = vpop.f32.mrf.mxu3 }
 0x5af   :  { %v13974_v38 = vadd.f32 %v4261_v47, %v4173_v59  ;;  %v4086_v54 = vpop.f32.mrf.mxu0  ;;  %v13977_v61 = vadd.f32 %v4350_v52, %v13859_v48  ;;  %v4175_v7 = vpop.f32.mrf.mxu1 }
 0x5b0   :  { %v4087_v58 = vadd.f32 %v4086_v54, %v13854_v45 }
 0x5b1   :  { %4125 = vmatmul.bf16.gmra.mxu0 %v16568_v9 }
 0x5b2   :  { %v4176_v42 = vadd.f32 %v4175_v7, %v4087_v58  ;;  %4214 = vmatmul.bf16.gmra.mxu1 %v13086_v21 }
 0x5b3   :  { %4303 = vmatmul.bf16.gmra.mxu2 %v13088_v43  ;;  %4392 = vmatmul.bf16.gmra.mxu3 %v16568_v9 }
 0x5b6   :  { %v4264_v32 = vpop.f32.mrf.mxu2  ;;  %v4353_v40 = vpop.f32.mrf.mxu3 }
 0x5b7   :  { %v13984_v39 = vadd.f32 %v4264_v32, %v4176_v42  ;;  %v4088_v22 = vpop.f32.mrf.mxu0  ;;  %v13987_v27 = vadd.f32 %v4353_v40, %v13859_v48  ;;  %v4177_v63 = vpop.f32.mrf.mxu1  ;;  %v16745_v42 = vld [vmem:[#allocation152_spill] sm:$0xff]  ;;  %v16746_v32 = vld [vmem:[#allocation115_spill] sm:$0xff]  ;;  %v16747_v40 = vld [vmem:[#allocation125_spill] sm:$0xff] }
 0x5b8   :  { %v4089_v0 = vadd.f32 %v4088_v22, %v13854_v45  ;;  %v16748_v22 = vld [vmem:[#allocation133_spill] sm:$0xff] }
 0x5ba   :  { %v4178_v20 = vadd.f32 %v4177_v63, %v4089_v0 }
 0x5be   :  { %v4266_v60 = vpop.f32.mrf.mxu2  ;;  %v4355_v59 = vpop.f32.mrf.mxu3 }
 0x5bf   :  { %v13990_v62 = vadd.f32 %v4266_v60, %v4178_v20  ;;  %v4091_v47 = vpop.f32.mrf.mxu0  ;;  %v13993_v52 = vadd.f32 %v4355_v59, %v13859_v48  ;;  %v4180_v58 = vpop.f32.mrf.mxu1 }
 0x5c0   :  { %v4092_v54 = vadd.f32 %v4091_v47, %v13854_v45 }
 0x5c1   :  { %4406 = vmatmul.bf16.vlgmr.msrb.gmra.mxu0 %v16675_v24 }
 0x5c2   :  { %v4181_v7 = vadd.f32 %v4180_v58, %v4092_v54  ;;  %4495 = vmatmul.bf16.vlgmr.msrb.gmra.mxu1 %v16676_v1  ;;  %5294 = vmatpush.bf16.xpose.msrb.mxu0 %v16745_v42  ;;  %v16751_v42 = vld [vmem:[#allocation104_spill] sm:$0xff] }
 0x5c3   :  { %4584 = vmatmul.bf16.vlgmr.msrb.gmra.mxu2 %v16674_v8  ;;  %4673 = vmatmul.bf16.vlgmr.msrb.gmra.mxu3 %v16675_v24  ;;  %v16750_v24 = vld [vmem:[#allocation148_spill] sm:$0xff] }
 0x5c4   :  { %5326 = vmatpush.bf16.xpose.msrb.mxu1 %v16746_v32  ;;  %5358 = vmatpush.bf16.xpose.msrb.mxu2 %v16747_v40  ;;  %v16752_v32 = vld [vmem:[#allocation118_spill] sm:$0xff]  ;;  %v16753_v40 = vld [vmem:[#allocation128_spill] sm:$0xff] }
 0x5c5   :  { %5390 = vmatpush.bf16.xpose.msrb.mxu3 %v16748_v22 }
 0x5c6   :  { %v4269_v0 = vpop.f32.mrf.mxu2  ;;  %v4358_v20 = vpop.f32.mrf.mxu3 }
 0x5c7   :  { %v14004_v63 = vadd.f32 %v4269_v0, %v4181_v7  ;;  %v4093_v60 = vpop.f32.mrf.mxu0  ;;  %v14007_v59 = vadd.f32 %v4358_v20, %v13859_v48  ;;  %v4182_v54 = vpop.f32.mrf.mxu1 }
 0x5c8   :  { %v4094_v47 = vadd.f32 %v4093_v60, %v13854_v45 }
 0x5c9   :  { %16749 = vst [vmem:[#allocation123_spill] sm:$0xff] %v14004_v63 }
 0x5ca   :  { %v4183_v58 = vadd.f32 %v4182_v54, %v4094_v47  ;;  %5295 = vmatpush.bf16.xpose.msrb.mxu0 %v16750_v24 }
 0x5cc   :  { %5327 = vmatpush.bf16.xpose.msrb.mxu1 %v16751_v42  ;;  %5359 = vmatpush.bf16.xpose.msrb.mxu2 %v16752_v32 }
 0x5cd   :  { %5391 = vmatpush.bf16.xpose.msrb.mxu3 %v16753_v40 }
 0x5ce   :  { %v4271_v22 = vpop.f32.mrf.mxu2  ;;  %v4360_v0 = vpop.f32.mrf.mxu3 }
 0x5cf   :  { %v14014_v7 = vadd.f32 %v4271_v22, %v4183_v58  ;;  %v4096_v63 = vpop.f32.mrf.mxu0  ;;  %v14017_v20 = vadd.f32 %v4360_v0, %v13859_v48  ;;  %v4185_v8 = vpop.f32.mrf.mxu1 }
 0x5d0   :  { %v4097_v60 = vadd.f32 %v4096_v63, %v13854_v45 }
 0x5d1   :  { %4411 = vmatmul.bf16.gmra.mxu0 %v16582_v3 }
 0x5d2   :  { %v4186_v47 = vadd.f32 %v4185_v8, %v4097_v60  ;;  %4500 = vmatmul.bf16.gmra.mxu1 %v16680_v4 }
 0x5d3   :  { %4589 = vmatmul.bf16.gmra.mxu2 %v16581_v37  ;;  %4678 = vmatmul.bf16.gmra.mxu3 %v16582_v3 }
 0x5d6   :  { %v4274_v24 = vpop.f32.mrf.mxu2  ;;  %v4363_v58 = vpop.f32.mrf.mxu3 }
 0x5d7   :  { %v14024_v54 = vadd.f32 %v4274_v24, %v4186_v47  ;;  %v4098_v42 = vpop.f32.mrf.mxu0  ;;  %v14027_v32 = vadd.f32 %v4363_v58, %v13859_v48  ;;  %v4187_v40 = vpop.f32.mrf.mxu1 }
 0x5d8   :  { %v4099_v63 = vadd.f32 %v4098_v42, %v13854_v45 }
 0x5d9   :  { %16754 = vst [vmem:[#allocation126_spill] sm:$0xff] %v14024_v54 }
 0x5da   :  { %v4188_v8 = vadd.f32 %v4187_v40, %v4099_v63 }
 0x5de   :  { %v4276_v22 = vpop.f32.mrf.mxu2  ;;  %v4365_v60 = vpop.f32.mrf.mxu3 }
 0x5df   :  { %v14030_v0 = vadd.f32 %v4276_v22, %v4188_v8  ;;  %v4101_v4 = vpop.f32.mrf.mxu0  ;;  %v14033_v37 = vadd.f32 %v4365_v60, %v13859_v48  ;;  %v4190_v24 = vpop.f32.mrf.mxu1 }
 0x5e0   :  { %v4102_v47 = vadd.f32 %v4101_v4, %v13854_v45 }
 0x5e1   :  { %16755 = vst [vmem:[#allocation127_spill] sm:$0xff] %v14030_v0  ;;  %4416 = vmatmul.bf16.gmra.mxu0 %v16685_v51 }
 0x5e2   :  { %v4191_v54 = vadd.f32 %v4190_v24, %v4102_v47  ;;  %4505 = vmatmul.bf16.gmra.mxu1 %v16686_v23 }
 0x5e3   :  { %4594 = vmatmul.bf16.gmra.mxu2 %v16684_v34  ;;  %4683 = vmatmul.bf16.gmra.mxu3 %v16685_v51 }
 0x5e6   :  { %v4279_v58 = vpop.f32.mrf.mxu2  ;;  %v4368_v63 = vpop.f32.mrf.mxu3 }
 0x5e7   :  { %v14040_v42 = vadd.f32 %v4279_v58, %v4191_v54  ;;  %v4103_v40 = vpop.f32.mrf.mxu0  ;;  %v14043_v8 = vadd.f32 %v4368_v63, %v13859_v48  ;;  %v4192_v22 = vpop.f32.mrf.mxu1 }
 0x5e8   :  { %v4104_v4 = vadd.f32 %v4103_v40, %v13854_v45 }
 0x5e9   :  { %16756 = vst [vmem:[#allocation152_spill] sm:$0xff] %v14040_v42 }
 0x5ea   :  { %v4193_v60 = vadd.f32 %v4192_v22, %v4104_v4 }
 0x5ee   :  { %v4281_v47 = vpop.f32.mrf.mxu2  ;;  %v4370_v23 = vpop.f32.mrf.mxu3 }
 0x5ef   :  { %v14046_v24 = vadd.f32 %v4281_v47, %v4193_v60  ;;  %v4106_v0 = vpop.f32.mrf.mxu0  ;;  %v14049_v34 = vadd.f32 %v4370_v23, %v13859_v48  ;;  %v4195_v58 = vpop.f32.mrf.mxu1 }
 0x5f0   :  { %v4107_v54 = vadd.f32 %v4106_v0, %v13854_v45 }
 0x5f1   :  { %16757 = vst [vmem:[#allocation115_spill] sm:$0xff] %v14046_v24  ;;  %4421 = vmatmul.bf16.gmra.mxu0 %v16596_v31 }
 0x5f2   :  { %v4196_v42 = vadd.f32 %v4195_v58, %v4107_v54  ;;  %4510 = vmatmul.bf16.gmra.mxu1 %v16690_v15 }
 0x5f3   :  { %4599 = vmatmul.bf16.gmra.mxu2 %v16595_v14  ;;  %4688 = vmatmul.bf16.gmra.mxu3 %v16596_v31 }
 0x5f6   :  { %v4284_v63 = vpop.f32.mrf.mxu2  ;;  %v4373_v4 = vpop.f32.mrf.mxu3 }
 0x5f7   :  { %v14056_v40 = vadd.f32 %v4284_v63, %v4196_v42  ;;  %v4108_v22 = vpop.f32.mrf.mxu0  ;;  %v14059_v23 = vadd.f32 %v4373_v4, %v13859_v48  ;;  %v4197_v60 = vpop.f32.mrf.mxu1 }
 0x5f8   :  { %v4109_v0 = vadd.f32 %v4108_v22, %v13854_v45 }
 0x5f9   :  { %16758 = vst [vmem:[#allocation125_spill] sm:$0xff] %v14056_v40 }
 0x5fa   :  { %v4198_v47 = vadd.f32 %v4197_v60, %v4109_v0 }
 0x5fe   :  { %v4286_v54 = vpop.f32.mrf.mxu2  ;;  %v4375_v15 = vpop.f32.mrf.mxu3 }
 0x5ff   :  { %v14062_v58 = vadd.f32 %v4286_v54, %v4198_v47  ;;  %v4111_v24 = vpop.f32.mrf.mxu0  ;;  %v14065_v14 = vadd.f32 %v4375_v15, %v13859_v48  ;;  %v4200_v63 = vpop.f32.mrf.mxu1 }
 0x600   :  { %v4112_v42 = vadd.f32 %v4111_v24, %v13854_v45 }
 0x601   :  { %16759 = vst [vmem:[#allocation133_spill] sm:$0xff] %v14062_v58  ;;  %4426 = vmatmul.bf16.gmra.mxu0 %v16695_v49 }
 0x602   :  { %v4201_v40 = vadd.f32 %v4200_v63, %v4112_v42  ;;  %4515 = vmatmul.bf16.gmra.mxu1 %v16696_v12 }
 0x603   :  { %4604 = vmatmul.bf16.gmra.mxu2 %v16694_v16  ;;  %4693 = vmatmul.bf16.gmra.mxu3 %v16695_v49 }
 0x606   :  { %v4289_v4 = vpop.f32.mrf.mxu2  ;;  %v4378_v0 = vpop.f32.mrf.mxu3 }
 0x607   :  { %v14072_v22 = vadd.f32 %v4289_v4, %v4201_v40  ;;  %v4113_v60 = vpop.f32.mrf.mxu0  ;;  %v14075_v15 = vadd.f32 %v4378_v0, %v13859_v48  ;;  %v4202_v47 = vpop.f32.mrf.mxu1 }
 0x608   :  { %v4114_v24 = vadd.f32 %v4113_v60, %v13854_v45 }
 0x609   :  { %16760 = vst [vmem:[#allocation148_spill] sm:$0xff] %v14072_v22 }
 0x60a   :  { %v4203_v54 = vadd.f32 %v4202_v47, %v4114_v24 }
 0x60e   :  { %v4291_v42 = vpop.f32.mrf.mxu2  ;;  %v4380_v12 = vpop.f32.mrf.mxu3 }
 0x60f   :  { %v14078_v63 = vadd.f32 %v4291_v42, %v4203_v54  ;;  %v4116_v58 = vpop.f32.mrf.mxu0  ;;  %v14081_v16 = vadd.f32 %v4380_v12, %v13859_v48  ;;  %v4205_v4 = vpop.f32.mrf.mxu1 }
 0x610   :  { %v4117_v40 = vadd.f32 %v4116_v58, %v13854_v45 }
 0x611   :  { %16761 = vst [vmem:[#allocation104_spill] sm:$0xff] %v14078_v63  ;;  %4431 = vmatmul.bf16.gmra.mxu0 %v16701_v29 }
 0x612   :  { %v4206_v22 = vadd.f32 %v4205_v4, %v4117_v40  ;;  %4520 = vmatmul.bf16.gmra.mxu1 %v16702_v26 }
 0x613   :  { %4609 = vmatmul.bf16.gmra.mxu2 %v16700_v6  ;;  %4698 = vmatmul.bf16.gmra.mxu3 %v16701_v29 }
 0x616   :  { %v4294_v0 = vpop.f32.mrf.mxu2  ;;  %v4383_v24 = vpop.f32.mrf.mxu3 }
 0x617   :  { %v14088_v60 = vadd.f32 %v4294_v0, %v4206_v22  ;;  %v4118_v47 = vpop.f32.mrf.mxu0  ;;  %v14091_v12 = vadd.f32 %v4383_v24, %v13859_v48  ;;  %v4207_v54 = vpop.f32.mrf.mxu1  ;;  %v16765_v24 = vld [vmem:[#allocation77_spill] sm:$0xff] }
 0x618   :  { %v4119_v58 = vadd.f32 %v4118_v47, %v13854_v45 }
 0x619   :  { %16762 = vst [vmem:[#allocation118_spill] sm:$0xff] %v14088_v60 }
 0x61a   :  { %v4208_v42 = vadd.f32 %v4207_v54, %v4119_v58 }
 0x61e   :  { %v4296_v40 = vpop.f32.mrf.mxu2  ;;  %v4385_v26 = vpop.f32.mrf.mxu3 }
 0x61f   :  { %v14094_v4 = vadd.f32 %v4296_v40, %v4208_v42  ;;  %v4121_v63 = vpop.f32.mrf.mxu0  ;;  %v14097_v6 = vadd.f32 %v4385_v26, %v13859_v48  ;;  %v4210_v0 = vpop.f32.mrf.mxu1 }
 0x620   :  { %v4122_v22 = vadd.f32 %v4121_v63, %v13854_v45 }
 0x621   :  { %16763 = vst [vmem:[#allocation128_spill] sm:$0xff] %v14094_v4  ;;  %4436 = vmatmul.bf16.gmra.mxu0 %v16706_v36 }
 0x622   :  { %16764 = vst [vmem:[#allocation218_spill] sm:$0xff] %v14097_v6  ;;  %v4211_v60 = vadd.f32 %v4210_v0, %v4122_v22  ;;  %4525 = vmatmul.bf16.gmra.mxu1 %v16707_v2 }
 0x623   :  { %4614 = vmatmul.bf16.gmra.mxu2 %v16765_v24  ;;  %4703 = vmatmul.bf16.gmra.mxu3 %v16706_v36 }
 0x626   :  { %v4299_v47 = vpop.f32.mrf.mxu2  ;;  %v4388_v54 = vpop.f32.mrf.mxu3 }
 0x627   :  { %v14104_v58 = vadd.f32 %v4299_v47, %v4211_v60  ;;  %v4123_v42 = vpop.f32.mrf.mxu0  ;;  %v14107_v26 = vadd.f32 %v4388_v54, %v13859_v48  ;;  %v4212_v40 = vpop.f32.mrf.mxu1 }
 0x628   :  { %v4124_v63 = vadd.f32 %v4123_v42, %v13854_v45 }
 0x629   :  { %16766 = vst [vmem:[#allocation219_spill] sm:$0xff] %v14104_v58 }
 0x62a   :  { %v4213_v22 = vadd.f32 %v4212_v40, %v4124_v63 }
 0x62e   :  { %v4301_v0 = vpop.f32.mrf.mxu2  ;;  %v4390_v2 = vpop.f32.mrf.mxu3 }
 0x62f   :  { %v14110_v4 = vadd.f32 %v4301_v0, %v4213_v22  ;;  %v4126_v6 = vpop.f32.mrf.mxu0  ;;  %v14113_v24 = vadd.f32 %v4390_v2, %v13859_v48  ;;  %v4215_v47 = vpop.f32.mrf.mxu1 }
 0x630   :  { %v4127_v60 = vadd.f32 %v4126_v6, %v13854_v45 }
 0x631   :  { %16767 = vst [vmem:[#allocation220_spill] sm:$0xff] %v14110_v4  ;;  %4441 = vmatmul.bf16.gmra.mxu0 %v12911_v11 }
 0x632   :  { %v4216_v58 = vadd.f32 %v4215_v47, %v4127_v60  ;;  %4530 = vmatmul.bf16.gmra.mxu1 %v16711_v44  ;;  %v14126_v47 = vld [vmem:[#allocation11 + $0x8] sm:$0x77] }
 0x633   :  { %4619 = vmatmul.bf16.gmra.mxu2 %v12909_v35  ;;  %4708 = vmatmul.bf16.gmra.mxu3 %v12911_v11  ;;  %16769 = vst [vmem:[#allocation222_spill] sm:$0xff] %v14126_v47  ;;  %v3552_v44 = vperm.slane %v14126_v47, 2 }
 0x636   :  { %v4304_v54 = vpop.f32.mrf.mxu2  ;;  %v4393_v63 = vpop.f32.mrf.mxu3 }
 0x637   :  { %v14120_v42 = vadd.f32 %v4304_v54, %v4216_v58  ;;  %v4128_v40 = vpop.f32.mrf.mxu0  ;;  %v14123_v2 = vadd.f32 %v4393_v63, %v13859_v48  ;;  %v4217_v22 = vpop.f32.mrf.mxu1 }
 0x638   :  { %v4129_v6 = vadd.f32 %v4128_v40, %v13854_v45  ;;  %v14136_v45 = vperm.slane %v3552_v44, 2 }
 0x639   :  { %16768 = vst [vmem:[#allocation221_spill] sm:$0xff] %v14120_v42 }
 0x63a   :  { %v4218_v0 = vadd.f32 %v4217_v22, %v4129_v6 }
 0x63e   :  { %v4306_v60 = vpop.f32.mrf.mxu2  ;;  %v4395_v11 = vpop.f32.mrf.mxu3 }
 0x63f   :  { %v14129_v35 = vadd.f32 %v4306_v60, %v4218_v0  ;;  %v4407_v4 = vpop.f32.mrf.mxu0  ;;  %v14132_v58 = vadd.f32 %v4395_v11, %v13859_v48  ;;  %v4496_v63 = vpop.f32.mrf.mxu1 }
 0x640   :  { %v4408_v54 = vadd.f32 %v4407_v4, %v13873_v57 }
 0x641   :  { %16770 = vst [vmem:[#allocation223_spill] sm:$0xff] %v14129_v35  ;;  %4446 = vmatmul.bf16.gmra.mxu0 %v16717_v33 }
 0x642   :  { %v4497_v42 = vadd.f32 %v4496_v63, %v4408_v54  ;;  %4535 = vmatmul.bf16.gmra.mxu1 %v16718_v30 }
 0x643   :  { %4624 = vmatmul.bf16.gmra.mxu2 %v16716_v53  ;;  %4713 = vmatmul.bf16.gmra.mxu3 %v16717_v33 }
 0x644   :  { %v5206_v40 = vpack.c.bf16 %v4497_v42, %v13868_v17 }
 0x646   :  { %v4585_v6 = vpop.f32.mrf.mxu2  ;;  %v4674_v48 = vpop.f32.mrf.mxu3  ;;  %v6439_v60 = vrot.slane %v5206_v40, 4  ;;  %v5728_v63 = vunpack.c.l.b16 %v5206_v40 }
 0x647   :  { %v4586_v11 = vadd.f32 %v4585_v6, %v14136_v45  ;;  %v4409_v22 = vpop.f32.mrf.mxu0  ;;  %v4498_v4 = vpop.f32.mrf.mxu1 }
 0x648   :  { %v4410_v57 = vadd.f32 %v4409_v22, %v13881_v5  ;;  %v14148_v6 = vunpack.c.l.b16 %v6439_v60 }
 0x649   :  { %v14144_v0 = vadd.f32 %v4674_v48, %v4586_v11 }
 0x64a   :  { %v4499_v44 = vadd.f32 %v4498_v4, %v4410_v57  ;;  %16771 = vst [vmem:[#allocation224_spill] sm:$0xff] %v14148_v6  ;;  %v16775_v57 = vld [vmem:[#allocation97_spill] sm:$0xff]  ;;  %v16776_v4 = vld [vmem:[#allocation95_spill] sm:$0xff] }
 0x64c   :  { %v5208_v54 = vpack.c.bf16 %v4499_v44, %v13878_v28  ;;  %v16777_v44 = vld [vmem:[#allocation202_spill] sm:$0xff] }
 0x64e   :  { %v5729_v53 = vunpack.c.l.b16 %v5208_v54  ;;  %v6440_v30 = vrot.slane %v5208_v54, 4  ;;  %v4587_v17 = vpop.f32.mrf.mxu2  ;;  %v4676_v33 = vpop.f32.mrf.mxu3 }
 0x64f   :  { %v4588_v42 = vadd.f32 %v4587_v17, %v14136_v45  ;;  %v4412_v35 = vpop.f32.mrf.mxu0  ;;  %v4501_v5 = vpop.f32.mrf.mxu1 }
 0x650   :  { %v4413_v47 = vadd.f32 %v4412_v35, %v13891_v18  ;;  %v14151_v22 = vpack.c.b16 %v5729_v53, %v5728_v63  ;;  %v14153_v11 = vunpack.c.l.b16 %v6440_v30  ;;  %v16778_v18 = vld [vmem:[#allocation204_spill] sm:$0xff] }
 0x651   :  { %v14155_v48 = vadd.f32 %v4676_v33, %v4588_v42  ;;  %4451 = vmatmul.bf16.gmra.mxu0 %v12966_v10 }
 0x652   :  { %16772 = vst [vmem:[#allocation225_spill] sm:$0xff] %v14151_v22  ;;  %v4502_v28 = vadd.f32 %v4501_v5, %v4413_v47  ;;  %4540 = vmatmul.bf16.gmra.mxu1 %v16775_v57  ;;  %v16780_v5 = vld [vmem:[#allocation203_spill] sm:$0xff] }
 0x653   :  { %16773 = vst [vmem:[#allocation226_spill] sm:$0xff] %v14153_v11  ;;  %4629 = vmatmul.bf16.gmra.mxu2 %v16776_v4  ;;  %4718 = vmatmul.bf16.gmra.mxu3 %v12966_v10 }
 0x654   :  { %16774 = vst [vmem:[#allocation227_spill] sm:$0xff] %v14155_v48  ;;  %v5210_v60 = vpack.c.bf16 %v4502_v28, %v16777_v44 }
 0x656   :  { %v4590_v35 = vpop.f32.mrf.mxu2  ;;  %v4679_v30 = vpop.f32.mrf.mxu3  ;;  %v6441_v42 = vrot.slane %v5210_v60, 4  ;;  %v5730_v6 = vunpack.c.l.b16 %v5210_v60  ;;  %v16786_v60 = vld [vmem:[#allocation99_spill] sm:$0xff] }
 0x657   :  { %v4591_v53 = vadd.f32 %v4590_v35, %v14136_v45  ;;  %v4414_v33 = vpop.f32.mrf.mxu0  ;;  %v4503_v54 = vpop.f32.mrf.mxu1 }
 0x658   :  { %v4415_v47 = vadd.f32 %v4414_v33, %v16778_v18  ;;  %v14170_v35 = vunpack.c.l.b16 %v6441_v42  ;;  %v16783_v33 = vld [vmem:[#allocation206_spill] sm:$0xff]  ;;  %v16789_v42 = vld [vmem:[#allocation205_spill] sm:$0xff] }
 0x659   :  { %v14166_v63 = vadd.f32 %v4679_v30, %v4591_v53 }
 0x65a   :  { %v4504_v17 = vadd.f32 %v4503_v54, %v4415_v47  ;;  %16781 = vst [vmem:[#allocation204_spill] sm:$0xff] %v14170_v35  ;;  %v16791_v35 = vld [vmem:[#allocation207_spill] sm:$0xff] }
 0x65b   :  { %16779 = vst [vmem:[#allocation202_spill] sm:$0xff] %v14166_v63  ;;  %v16793_v63 = vld [vmem:[#allocation210_spill] sm:$0xff] }
 0x65c   :  { %v5212_v40 = vpack.c.bf16 %v4504_v17, %v16780_v5  ;;  %v16787_v17 = vld [vmem:[#allocation100_spill] sm:$0xff]  ;;  %v16788_v5 = vld [vmem:[#allocation98_spill] sm:$0xff] }
 0x65e   :  { %v5731_v11 = vunpack.c.l.b16 %v5212_v40  ;;  %v6442_v22 = vrot.slane %v5212_v40, 4  ;;  %v4592_v28 = vpop.f32.mrf.mxu2  ;;  %v4681_v10 = vpop.f32.mrf.mxu3 }
 0x65f   :  { %v4593_v44 = vadd.f32 %v4592_v28, %v14136_v45  ;;  %v4417_v4 = vpop.f32.mrf.mxu0  ;;  %v4506_v53 = vpop.f32.mrf.mxu1  ;;  %v16790_v28 = vld [vmem:[#allocation208_spill] sm:$0xff] }
 0x660   :  { %v14172_v57 = vunpack.c.l.b16 %v6442_v22  ;;  %v4418_v18 = vadd.f32 %v4417_v4, %v16783_v33  ;;  %v14175_v30 = vpack.c.b16 %v5731_v11, %v5730_v6 }
 0x661   :  { %v14177_v47 = vadd.f32 %v4681_v10, %v4593_v44  ;;  %4456 = vmatmul.bf16.gmra.mxu0 %v16786_v60 }
 0x662   :  { %16782 = vst [vmem:[#allocation203_spill] sm:$0xff] %v14172_v57  ;;  %v4507_v54 = vadd.f32 %v4506_v53, %v4418_v18  ;;  %4545 = vmatmul.bf16.gmra.mxu1 %v16787_v17 }
 0x663   :  { %16784 = vst [vmem:[#allocation206_spill] sm:$0xff] %v14175_v30  ;;  %4634 = vmatmul.bf16.gmra.mxu2 %v16788_v5  ;;  %4723 = vmatmul.bf16.gmra.mxu3 %v16786_v60 }
 0x664   :  { %16785 = vst [vmem:[#allocation228_spill] sm:$0xff] %v14177_v47  ;;  %v5214_v22 = vpack.c.bf16 %v4507_v54, %v16789_v42 }
 0x666   :  { %v4595_v4 = vpop.f32.mrf.mxu2  ;;  %v4684_v11 = vpop.f32.mrf.mxu3  ;;  %v6473_v40 = vrot.slane %v5214_v22, 4  ;;  %v5762_v30 = vunpack.c.l.b16 %v5214_v22  ;;  %v16797_v22 = vld [vmem:[#allocation105_spill] sm:$0xff] }
 0x667   :  { %v4596_v6 = vadd.f32 %v4595_v4, %v14136_v45  ;;  %v4419_v10 = vpop.f32.mrf.mxu0  ;;  %v4508_v33 = vpop.f32.mrf.mxu1 }
 0x668   :  { %v4420_v44 = vadd.f32 %v4419_v10, %v16790_v28  ;;  %v14192_v4 = vunpack.c.l.b16 %v6473_v40  ;;  %v16800_v40 = vld [vmem:[#allocation209_spill] sm:$0xff] }
 0x669   :  { %v14188_v18 = vadd.f32 %v4684_v11, %v4596_v6 }
 0x66a   :  { %v4509_v53 = vadd.f32 %v4508_v33, %v4420_v44  ;;  %16792 = vst [vmem:[#allocation205_spill] sm:$0xff] %v14192_v4  ;;  %v16798_v44 = vld [vmem:[#allocation106_spill] sm:$0xff] }
 0x66b   :  { %v16799_v33 = vld [vmem:[#allocation102_spill] sm:$0xff] }
 0x66c   :  { %v5216_v57 = vpack.c.bf16 %v4509_v53, %v16791_v35 }
 0x66e   :  { %v5763_v5 = vunpack.c.l.b16 %v5216_v57  ;;  %v6474_v17 = vrot.slane %v5216_v57, 4  ;;  %v4597_v54 = vpop.f32.mrf.mxu2  ;;  %v4686_v60 = vpop.f32.mrf.mxu3  ;;  %v16802_v57 = vld [vmem:[#allocation211_spill] sm:$0xff] }
 0x66f   :  { %v4598_v42 = vadd.f32 %v4597_v54, %v14136_v45  ;;  %v4422_v47 = vpop.f32.mrf.mxu0  ;;  %v4511_v10 = vpop.f32.mrf.mxu1 }
 0x670   :  { %v4423_v48 = vadd.f32 %v4422_v47, %v16793_v63  ;;  %v14195_v28 = vpack.c.b16 %v5763_v5, %v5762_v30  ;;  %v14197_v6 = vunpack.c.l.b16 %v6474_v17  ;;  %v16801_v17 = vld [vmem:[#allocation212_spill] sm:$0xff] }
 0x671   :  { %v14199_v11 = vadd.f32 %v4686_v60, %v4598_v42  ;;  %4461 = vmatmul.bf16.gmra.mxu0 %v16797_v22 }
 0x672   :  { %16794 = vst [vmem:[#allocation208_spill] sm:$0xff] %v14195_v28  ;;  %v4512_v35 = vadd.f32 %v4511_v10, %v4423_v48  ;;  %4550 = vmatmul.bf16.gmra.mxu1 %v16798_v44 }
 0x673   :  { %16795 = vst [vmem:[#allocation207_spill] sm:$0xff] %v14197_v6  ;;  %4639 = vmatmul.bf16.gmra.mxu2 %v16799_v33  ;;  %4728 = vmatmul.bf16.gmra.mxu3 %v16797_v22 }
 0x674   :  { %16796 = vst [vmem:[#allocation210_spill] sm:$0xff] %v14199_v11  ;;  %v5218_v53 = vpack.c.bf16 %v4512_v35, %v16800_v40 }
 0x676   :  { %v4600_v63 = vpop.f32.mrf.mxu2  ;;  %v4689_v47 = vpop.f32.mrf.mxu3  ;;  %v6475_v10 = vrot.slane %v5218_v53, 4  ;;  %v5764_v6 = vunpack.c.l.b16 %v5218_v53  ;;  %v16808_v53 = vld [vmem:[#allocation112_spill] sm:$0xff] }
 0x677   :  { %v4601_v30 = vadd.f32 %v4600_v63, %v14136_v45  ;;  %v4424_v60 = vpop.f32.mrf.mxu0  ;;  %v4513_v5 = vpop.f32.mrf.mxu1 }
 0x678   :  { %v4425_v48 = vadd.f32 %v4424_v60, %v16801_v17  ;;  %v14214_v63 = vunpack.c.l.b16 %v6475_v10  ;;  %v16805_v60 = vld [vmem:[#allocation214_spill] sm:$0xff]  ;;  %v16811_v10 = vld [vmem:[#allocation213_spill] sm:$0xff] }
 0x679   :  { %v14210_v54 = vadd.f32 %v4689_v47, %v4601_v30 }
 0x67a   :  { %v4514_v42 = vadd.f32 %v4513_v5, %v4425_v48  ;;  %16803 = vst [vmem:[#allocation209_spill] sm:$0xff] %v14214_v63  ;;  %v16809_v5 = vld [vmem:[#allocation113_spill] sm:$0xff] }
 0x67c   :  { %v5220_v4 = vpack.c.bf16 %v4514_v42, %v16802_v57  ;;  %v16810_v42 = vld [vmem:[#allocation109_spill] sm:$0xff] }
 0x67e   :  { %v5765_v28 = vunpack.c.l.b16 %v5220_v4  ;;  %v6476_v33 = vrot.slane %v5220_v4, 4  ;;  %v4602_v35 = vpop.f32.mrf.mxu2  ;;  %v4691_v22 = vpop.f32.mrf.mxu3 }
 0x67f   :  { %v4603_v40 = vadd.f32 %v4602_v35, %v14136_v45  ;;  %v4427_v44 = vpop.f32.mrf.mxu0  ;;  %v4516_v30 = vpop.f32.mrf.mxu1 }
 0x680   :  { %v14216_v11 = vunpack.c.l.b16 %v6476_v33  ;;  %v4428_v17 = vadd.f32 %v4427_v44, %v16805_v60  ;;  %v14219_v47 = vpack.c.b16 %v5765_v28, %v5764_v6 }
 0x681   :  { %v14221_v48 = vadd.f32 %v4691_v22, %v4603_v40  ;;  %4466 = vmatmul.bf16.gmra.mxu0 %v16808_v53 }
 0x682   :  { %16804 = vst [vmem:[#allocation212_spill] sm:$0xff] %v14216_v11  ;;  %v4517_v57 = vadd.f32 %v4516_v30, %v4428_v17  ;;  %4555 = vmatmul.bf16.gmra.mxu1 %v16809_v5  ;;  %v16813_v5 = vld [vmem:[#allocation216_spill] sm:$0xff] }
 0x683   :  { %16806 = vst [vmem:[#allocation211_spill] sm:$0xff] %v14219_v47  ;;  %4644 = vmatmul.bf16.gmra.mxu2 %v16810_v42  ;;  %4733 = vmatmul.bf16.gmra.mxu3 %v16808_v53 }
 0x684   :  { %16807 = vst [vmem:[#allocation214_spill] sm:$0xff] %v14221_v48  ;;  %v5222_v33 = vpack.c.bf16 %v4517_v57, %v16811_v10 }
 0x686   :  { %v4605_v44 = vpop.f32.mrf.mxu2  ;;  %v4694_v6 = vpop.f32.mrf.mxu3  ;;  %v6507_v30 = vrot.slane %v5222_v33, 4  ;;  %v5796_v63 = vunpack.c.l.b16 %v5222_v33  ;;  %v16816_v33 = vld [vmem:[#allocation119_spill] sm:$0xff] }
 0x687   :  { %v4606_v28 = vadd.f32 %v4605_v44, %v14136_v45  ;;  %v4429_v22 = vpop.f32.mrf.mxu0  ;;  %v4518_v40 = vpop.f32.mrf.mxu1 }
 0x688   :  { %v4430_v35 = vadd.f32 %v4429_v22, %v13945_v50  ;;  %v14236_v44 = vunpack.c.l.b16 %v6507_v30 }
 0x689   :  { %v14232_v60 = vadd.f32 %v4694_v6, %v4606_v28 }
 0x68a   :  { %v4519_v17 = vadd.f32 %v4518_v40, %v4430_v35  ;;  %16812 = vst [vmem:[#allocation213_spill] sm:$0xff] %v14236_v44  ;;  %v16817_v35 = vld [vmem:[#allocation120_spill] sm:$0xff] }
 0x68b   :  { %v16818_v40 = vld [vmem:[#allocation116_spill] sm:$0xff] }
 0x68c   :  { %v5224_v4 = vpack.c.bf16 %v4519_v17, %v13942_v56  ;;  %v16819_v17 = vld [vmem:[#allocation215_spill] sm:$0xff] }
 0x68e   :  { %v5797_v11 = vunpack.c.l.b16 %v5224_v4  ;;  %v6508_v47 = vrot.slane %v5224_v4, 4  ;;  %v4607_v57 = vpop.f32.mrf.mxu2  ;;  %v4696_v53 = vpop.f32.mrf.mxu3 }
 0x68f   :  { %v4608_v10 = vadd.f32 %v4607_v57, %v14136_v45  ;;  %v4432_v42 = vpop.f32.mrf.mxu0  ;;  %v4521_v50 = vpop.f32.mrf.mxu1 }
 0x690   :  { %v4433_v48 = vadd.f32 %v4432_v42, %v16813_v5  ;;  %v14239_v22 = vpack.c.b16 %v5797_v11, %v5796_v63  ;;  %v14241_v28 = vunpack.c.l.b16 %v6508_v47 }
 0x691   :  { %v14243_v6 = vadd.f32 %v4696_v53, %v4608_v10  ;;  %4471 = vmatmul.bf16.gmra.mxu0 %v16816_v33 }
 0x692   :  { %16814 = vst [vmem:[#allocation216_spill] sm:$0xff] %v14239_v22  ;;  %v4522_v56 = vadd.f32 %v4521_v50, %v4433_v48  ;;  %4560 = vmatmul.bf16.gmra.mxu1 %v16817_v35  ;;  %v16820_v50 = vld [vmem:[#allocation217_spill] sm:$0xff] }
 0x693   :  { %16815 = vst [vmem:[#allocation229_spill] sm:$0xff] %v14241_v28  ;;  %4649 = vmatmul.bf16.gmra.mxu2 %v16818_v40  ;;  %4738 = vmatmul.bf16.gmra.mxu3 %v16816_v33 }
 0x694   :  { %v5226_v30 = vpack.c.bf16 %v4522_v56, %v16819_v17 }
 0x696   :  { %v4610_v11 = vpop.f32.mrf.mxu2  ;;  %v4699_v47 = vpop.f32.mrf.mxu3  ;;  %v6509_v10 = vrot.slane %v5226_v30, 4  ;;  %v5798_v44 = vunpack.c.l.b16 %v5226_v30 }
 0x697   :  { %v4611_v63 = vadd.f32 %v4610_v11, %v14136_v45  ;;  %v4434_v53 = vpop.f32.mrf.mxu0  ;;  %v4523_v5 = vpop.f32.mrf.mxu1 }
 0x698   :  { %v4435_v48 = vadd.f32 %v4434_v53, %v13961_v25  ;;  %v14258_v11 = vunpack.c.l.b16 %v6509_v10 }
 0x699   :  { %v14254_v42 = vadd.f32 %v4699_v47, %v4611_v63 }
 0x69a   :  { %v4524_v57 = vadd.f32 %v4523_v5, %v4435_v48  ;;  %16821 = vst [vmem:[#allocation215_spill] sm:$0xff] %v14258_v11 }
 0x69c   :  { %v5228_v4 = vpack.c.bf16 %v4524_v57, %v16820_v50 }
 0x69e   :  { %v5799_v28 = vunpack.c.l.b16 %v5228_v4  ;;  %v6510_v22 = vrot.slane %v5228_v4, 4  ;;  %v4612_v56 = vpop.f32.mrf.mxu2  ;;  %v4701_v33 = vpop.f32.mrf.mxu3 }
 0x69f   :  { %v4613_v17 = vadd.f32 %v4612_v56, %v14136_v45  ;;  %v4437_v40 = vpop.f32.mrf.mxu0  ;;  %v4526_v63 = vpop.f32.mrf.mxu1 }
 0x6a0   :  { %v14260_v35 = vunpack.c.l.b16 %v6510_v22  ;;  %v4438_v25 = vadd.f32 %v4437_v40, %v13971_v13  ;;  %v14263_v47 = vpack.c.b16 %v5799_v28, %v5798_v44 }
 0x6a1   :  { %v14265_v53 = vadd.f32 %v4701_v33, %v4613_v17  ;;  %4476 = vmatmul.bf16.gmra.mxu0 %v16743_v19 }
 0x6a2   :  { %16822 = vst [vmem:[#allocation217_spill] sm:$0xff] %v14260_v35  ;;  %v4527_v48 = vadd.f32 %v4526_v63, %v4438_v25  ;;  %4565 = vmatmul.bf16.gmra.mxu1 %v16744_v41 }
 0x6a3   :  { %4654 = vmatmul.bf16.gmra.mxu2 %v16742_v55  ;;  %4743 = vmatmul.bf16.gmra.mxu3 %v16743_v19 }
 0x6a4   :  { %v5230_v22 = vpack.c.bf16 %v4527_v48, %v13968_v46 }
 0x6a6   :  { %v4615_v13 = vpop.f32.mrf.mxu2  ;;  %v4704_v28 = vpop.f32.mrf.mxu3  ;;  %v6541_v10 = vrot.slane %v5230_v22, 4  ;;  %v5830_v56 = vunpack.c.l.b16 %v5230_v22 }
 0x6a7   :  { %v4616_v44 = vadd.f32 %v4615_v13, %v14136_v45  ;;  %v4439_v33 = vpop.f32.mrf.mxu0  ;;  %v4528_v30 = vpop.f32.mrf.mxu1 }
 0x6a8   :  { %v4440_v40 = vadd.f32 %v4439_v33, %v13977_v61  ;;  %v14280_v13 = vunpack.c.l.b16 %v6541_v10 }
 0x6a9   :  { %v14276_v5 = vadd.f32 %v4704_v28, %v4616_v44 }
 0x6aa   :  { %v4529_v57 = vadd.f32 %v4528_v30, %v4440_v40  ;;  %16823 = vst [vmem:[#allocation230_spill] sm:$0xff] %v14280_v13 }
 0x6ac   :  { %v5232_v50 = vpack.c.bf16 %v4529_v57, %v13974_v38 }
 0x6ae   :  { %v5831_v17 = vunpack.c.l.b16 %v5232_v50  ;;  %v6542_v25 = vrot.slane %v5232_v50, 4  ;;  %v4617_v46 = vpop.f32.mrf.mxu2  ;;  %v4706_v48 = vpop.f32.mrf.mxu3 }
 0x6af   :  { %v4618_v63 = vadd.f32 %v4617_v46, %v14136_v45  ;;  %v4442_v4 = vpop.f32.mrf.mxu0  ;;  %v4531_v61 = vpop.f32.mrf.mxu1 }
 0x6b0   :  { %v4443_v11 = vadd.f32 %v4442_v4, %v13987_v27  ;;  %v14283_v33 = vpack.c.b16 %v5831_v17, %v5830_v56  ;;  %v14285_v44 = vunpack.c.l.b16 %v6542_v25 }
 0x6b1   :  { %v14287_v28 = vadd.f32 %v4706_v48, %v4618_v63  ;;  %4481 = vmatmul.bf16.gmra.mxu0 %v13086_v21 }
 0x6b2   :  { %16824 = vst [vmem:[#allocation231_spill] sm:$0xff] %v14285_v44  ;;  %v4532_v38 = vadd.f32 %v4531_v61, %v4443_v11  ;;  %4570 = vmatmul.bf16.gmra.mxu1 %v13088_v43 }
 0x6b3   :  { %4659 = vmatmul.bf16.gmra.mxu2 %v16568_v9  ;;  %4748 = vmatmul.bf16.gmra.mxu3 %v13086_v21 }
 0x6b4   :  { %v5234_v40 = vpack.c.bf16 %v4532_v38, %v13984_v39 }
 0x6b6   :  { %v4620_v27 = vpop.f32.mrf.mxu2  ;;  %v4709_v30 = vpop.f32.mrf.mxu3  ;;  %v6543_v17 = vrot.slane %v5234_v40, 4  ;;  %v5832_v46 = vunpack.c.l.b16 %v5234_v40 }
 0x6b7   :  { %v4621_v4 = vadd.f32 %v4620_v27, %v14136_v45  ;;  %v4444_v57 = vpop.f32.mrf.mxu0  ;;  %v4533_v10 = vpop.f32.mrf.mxu1 }
 0x6b8   :  { %v4445_v11 = vadd.f32 %v4444_v57, %v13993_v52  ;;  %v14302_v27 = vunpack.c.l.b16 %v6543_v17 }
 0x6b9   :  { %v14298_v50 = vadd.f32 %v4709_v30, %v4621_v4 }
 0x6ba   :  { %v4534_v56 = vadd.f32 %v4533_v10, %v4445_v11  ;;  %16825 = vst [vmem:[#allocation232_spill] sm:$0xff] %v14302_v27  ;;  %v16827_v11 = vld [vmem:[#allocation27_spill] sm:$0xff]  ;;  %v16828_v10 = vld [vmem:[#allocation26_spill] sm:$0xff] }
 0x6bc   :  { %v5236_v25 = vpack.c.bf16 %v4534_v56, %v13990_v62  ;;  %v16829_v56 = vld [vmem:[#allocation123_spill] sm:$0xff] }
 0x6be   :  { %v5833_v63 = vunpack.c.l.b16 %v5236_v25  ;;  %v6544_v48 = vrot.slane %v5236_v25, 4  ;;  %v4622_v39 = vpop.f32.mrf.mxu2  ;;  %v4711_v38 = vpop.f32.mrf.mxu3  ;;  %v16832_v25 = vld [vmem:[#allocation141_spill] sm:$0xff] }
 0x6bf   :  { %v4623_v61 = vadd.f32 %v4622_v39, %v14136_v45  ;;  %v4447_v22 = vpop.f32.mrf.mxu0  ;;  %v4536_v4 = vpop.f32.mrf.mxu1 }
 0x6c0   :  { %v14304_v13 = vunpack.c.l.b16 %v6544_v48  ;;  %v4448_v52 = vadd.f32 %v4447_v22, %v14007_v59  ;;  %v14307_v30 = vpack.c.b16 %v5833_v63, %v5832_v46  ;;  %v16830_v59 = vld [vmem:[#allocation136_spill] sm:$0xff]  ;;  %v16831_v22 = vld [vmem:[#allocation139_spill] sm:$0xff]  ;;  %v16833_v46 = vld [vmem:[#allocation162_spill] sm:$0xff] }
 0x6c1   :  { %v14309_v57 = vadd.f32 %v4711_v38, %v4623_v61  ;;  %4762 = vmatmul.bf16.vlgmr.msra.gmra.mxu0 %v16676_v1 }
 0x6c2   :  { %16826 = vst [vmem:[#allocation233_spill] sm:$0xff] %v14304_v13  ;;  %v4537_v62 = vadd.f32 %v4536_v4, %v4448_v52  ;;  %4851 = vmatmul.bf16.vlgmr.msra.gmra.mxu1 %v16827_v11  ;;  %5422 = vmatpush.bf16.xpose.msra.mxu0 %v16830_v59  ;;  %v16836_v59 = vld [vmem:[#allocation159_spill] sm:$0xff] }
 0x6c3   :  { %4940 = vmatmul.bf16.vlgmr.msra.gmra.mxu2 %v16828_v10  ;;  %5029 = vmatmul.bf16.vlgmr.msra.gmra.mxu3 %v16676_v1  ;;  %v16834_v10 = vld [vmem:[#allocation155_spill] sm:$0xff] }
 0x6c4   :  { %v5238_v17 = vpack.c.bf16 %v4537_v62, %v16829_v56  ;;  %5454 = vmatpush.bf16.xpose.msra.mxu1 %v16831_v22  ;;  %5486 = vmatpush.bf16.xpose.msra.mxu2 %v16832_v25  ;;  %v16835_v56 = vld [vmem:[#allocation157_spill] sm:$0xff] }
 0x6c5   :  { %5518 = vmatpush.bf16.xpose.msra.mxu3 %v16833_v46 }
 0x6c6   :  { %v4625_v63 = vpop.f32.mrf.mxu2  ;;  %v4714_v39 = vpop.f32.mrf.mxu3  ;;  %v6575_v1 = vrot.slane %v5238_v17, 4  ;;  %v5864_v22 = vunpack.c.l.b16 %v5238_v17 }
 0x6c7   :  { %v4626_v48 = vadd.f32 %v4625_v63, %v14136_v45  ;;  %v4449_v61 = vpop.f32.mrf.mxu0  ;;  %v4538_v52 = vpop.f32.mrf.mxu1  ;;  %v16837_v63 = vld [vmem:[#allocation143_spill] sm:$0xff] }
 0x6c8   :  { %v4450_v38 = vadd.f32 %v4449_v61, %v14017_v20  ;;  %v14332_v61 = vunpack.c.l.b16 %v6575_v1  ;;  %v16842_v1 = vld [vmem:[#allocation126_spill] sm:$0xff] }
 0x6c9   :  { %v14324_v4 = vadd.f32 %v4714_v39, %v4626_v48 }
 0x6ca   :  { %v4539_v62 = vadd.f32 %v4538_v52, %v4450_v38  ;;  %5423 = vmatpush.bf16.xpose.msra.mxu0 %v16834_v10  ;;  %16838 = vst [vmem:[#allocation27_spill] sm:$0xff] %v14332_v61 }
 0x6cc   :  { %v5240_v11 = vpack.c.bf16 %v4539_v62, %v14014_v7  ;;  %5455 = vmatpush.bf16.xpose.msra.mxu1 %v16835_v56  ;;  %5487 = vmatpush.bf16.xpose.msra.mxu2 %v16836_v59 }
 0x6cd   :  { %5519 = vmatpush.bf16.xpose.msra.mxu3 %v16837_v63 }
 0x6ce   :  { %v5865_v25 = vunpack.c.l.b16 %v5240_v11  ;;  %v6576_v46 = vrot.slane %v5240_v11, 4  ;;  %v4627_v40 = vpop.f32.mrf.mxu2  ;;  %v4716_v48 = vpop.f32.mrf.mxu3  ;;  %v16840_v11 = vld [vmem:[#allocation49_spill] sm:$0xff] }
 0x6cf   :  { %v4628_v20 = vadd.f32 %v4627_v40, %v14136_v45  ;;  %v4452_v39 = vpop.f32.mrf.mxu0  ;;  %v4541_v38 = vpop.f32.mrf.mxu1  ;;  %v16841_v40 = vld [vmem:[#allocation29_spill] sm:$0xff] }
 0x6d0   :  { %v4453_v7 = vadd.f32 %v4452_v39, %v14027_v32  ;;  %v14335_v52 = vpack.c.b16 %v5865_v25, %v5864_v22  ;;  %v14337_v62 = vunpack.c.l.b16 %v6576_v46 }
 0x6d1   :  { %v14339_v10 = vadd.f32 %v4716_v48, %v4628_v20  ;;  %4767 = vmatmul.bf16.gmra.mxu0 %v16840_v11 }
 0x6d2   :  { %16839 = vst [vmem:[#allocation26_spill] sm:$0xff] %v14337_v62  ;;  %v4542_v17 = vadd.f32 %v4541_v38, %v4453_v7  ;;  %4856 = vmatmul.bf16.gmra.mxu1 %v16841_v40  ;;  %v16843_v38 = vld [vmem:[#allocation127_spill] sm:$0xff] }
 0x6d3   :  { %4945 = vmatmul.bf16.gmra.mxu2 %v16582_v3  ;;  %5034 = vmatmul.bf16.gmra.mxu3 %v16840_v11 }
 0x6d4   :  { %v5242_v59 = vpack.c.bf16 %v4542_v17, %v16842_v1 }
 0x6d6   :  { %v4630_v32 = vpop.f32.mrf.mxu2  ;;  %v4719_v25 = vpop.f32.mrf.mxu3  ;;  %v6577_v7 = vrot.slane %v5242_v59, 4  ;;  %v5866_v56 = vunpack.c.l.b16 %v5242_v59  ;;  %v16846_v59 = vld [vmem:[#allocation55_spill] sm:$0xff] }
 0x6d7   :  { %v4631_v22 = vadd.f32 %v4630_v32, %v14136_v45  ;;  %v4454_v46 = vpop.f32.mrf.mxu0  ;;  %v4543_v20 = vpop.f32.mrf.mxu1 }
 0x6d8   :  { %v4455_v63 = vadd.f32 %v4454_v46, %v14033_v37  ;;  %v14354_v32 = vunpack.c.l.b16 %v6577_v7  ;;  %v16848_v7 = vld [vmem:[#allocation152_spill] sm:$0xff] }
 0x6d9   :  { %v14350_v48 = vadd.f32 %v4719_v25, %v4631_v22 }
 0x6da   :  { %v4544_v39 = vadd.f32 %v4543_v20, %v4455_v63  ;;  %16844 = vst [vmem:[#allocation123_spill] sm:$0xff] %v14354_v32 }
 0x6dc   :  { %v5244_v40 = vpack.c.bf16 %v4544_v39, %v16843_v38  ;;  %v16847_v39 = vld [vmem:[#allocation53_spill] sm:$0xff] }
 0x6de   :  { %v5867_v3 = vunpack.c.l.b16 %v5244_v40  ;;  %v6578_v44 = vrot.slane %v5244_v40, 4  ;;  %v4632_v17 = vpop.f32.mrf.mxu2  ;;  %v4721_v1 = vpop.f32.mrf.mxu3 }
 0x6df   :  { %v4633_v11 = vadd.f32 %v4632_v17, %v14136_v45  ;;  %v4457_v27 = vpop.f32.mrf.mxu0  ;;  %v4546_v22 = vpop.f32.mrf.mxu1 }
 0x6e0   :  { %v14356_v13 = vunpack.c.l.b16 %v6578_v44  ;;  %v4458_v37 = vadd.f32 %v4457_v27, %v14043_v8  ;;  %v14359_v25 = vpack.c.b16 %v5867_v3, %v5866_v56 }
 0x6e1   :  { %v14361_v46 = vadd.f32 %v4721_v1, %v4633_v11  ;;  %4772 = vmatmul.bf16.gmra.mxu0 %v16846_v59 }
 0x6e2   :  { %16845 = vst [vmem:[#allocation136_spill] sm:$0xff] %v14356_v13  ;;  %v4547_v63 = vadd.f32 %v4546_v22, %v4458_v37  ;;  %4861 = vmatmul.bf16.gmra.mxu1 %v16847_v39  ;;  %v16849_v37 = vld [vmem:[#allocation115_spill] sm:$0xff] }
 0x6e3   :  { %4950 = vmatmul.bf16.gmra.mxu2 %v16685_v51  ;;  %5039 = vmatmul.bf16.gmra.mxu3 %v16846_v59 }
 0x6e4   :  { %v5246_v44 = vpack.c.bf16 %v4547_v63, %v16848_v7 }
 0x6e6   :  { %v4635_v8 = vpop.f32.mrf.mxu2  ;;  %v4724_v56 = vpop.f32.mrf.mxu3  ;;  %v6609_v1 = vrot.slane %v5246_v44, 4  ;;  %v5898_v39 = vunpack.c.l.b16 %v5246_v44  ;;  %v16852_v44 = vld [vmem:[#allocation61_spill] sm:$0xff] }
 0x6e7   :  { %v4636_v27 = vadd.f32 %v4635_v8, %v14136_v45  ;;  %v4459_v38 = vpop.f32.mrf.mxu0  ;;  %v4548_v3 = vpop.f32.mrf.mxu1 }
 0x6e8   :  { %v4460_v40 = vadd.f32 %v4459_v38, %v14049_v34  ;;  %v14376_v8 = vunpack.c.l.b16 %v6609_v1  ;;  %v16854_v1 = vld [vmem:[#allocation125_spill] sm:$0xff] }
 0x6e9   :  { %v14372_v17 = vadd.f32 %v4724_v56, %v4636_v27 }
 0x6ea   :  { %v4549_v11 = vadd.f32 %v4548_v3, %v4460_v40  ;;  %16850 = vst [vmem:[#allocation139_spill] sm:$0xff] %v14376_v8 }
 0x6ec   :  { %v5248_v22 = vpack.c.bf16 %v4549_v11, %v16849_v37  ;;  %v16853_v11 = vld [vmem:[#allocation59_spill] sm:$0xff] }
 0x6ee   :  { %v5899_v51 = vunpack.c.l.b16 %v5248_v22  ;;  %v6610_v20 = vrot.slane %v5248_v22, 4  ;;  %v4637_v63 = vpop.f32.mrf.mxu2  ;;  %v4726_v7 = vpop.f32.mrf.mxu3 }
 0x6ef   :  { %v4638_v59 = vadd.f32 %v4637_v63, %v14136_v45  ;;  %v4462_v61 = vpop.f32.mrf.mxu0  ;;  %v4551_v34 = vpop.f32.mrf.mxu1 }
 0x6f0   :  { %v4463_v62 = vadd.f32 %v4462_v61, %v14059_v23  ;;  %v14379_v38 = vpack.c.b16 %v5899_v51, %v5898_v39  ;;  %v14381_v27 = vunpack.c.l.b16 %v6610_v20 }
 0x6f1   :  { %v14383_v56 = vadd.f32 %v4726_v7, %v4638_v59  ;;  %4777 = vmatmul.bf16.gmra.mxu0 %v16852_v44  ;;  %v16855_v7 = vld [vmem:[#allocation133_spill] sm:$0xff] }
 0x6f2   :  { %16851 = vst [vmem:[#allocation141_spill] sm:$0xff] %v14381_v27  ;;  %v4552_v40 = vadd.f32 %v4551_v34, %v4463_v62  ;;  %4866 = vmatmul.bf16.gmra.mxu1 %v16853_v11 }
 0x6f3   :  { %4955 = vmatmul.bf16.gmra.mxu2 %v16596_v31  ;;  %5044 = vmatmul.bf16.gmra.mxu3 %v16852_v44 }
 0x6f4   :  { %v5250_v37 = vpack.c.bf16 %v4552_v40, %v16854_v1 }
 0x6f6   :  { %v4640_v23 = vpop.f32.mrf.mxu2  ;;  %v4729_v20 = vpop.f32.mrf.mxu3  ;;  %v6611_v59 = vrot.slane %v5250_v37, 4  ;;  %v5900_v11 = vunpack.c.l.b16 %v5250_v37  ;;  %v16858_v37 = vld [vmem:[#allocation67_spill] sm:$0xff] }
 0x6f7   :  { %v4641_v61 = vadd.f32 %v4640_v23, %v14136_v45  ;;  %v4464_v22 = vpop.f32.mrf.mxu0  ;;  %v4553_v39 = vpop.f32.mrf.mxu1 }
 0x6f8   :  { %v4465_v62 = vadd.f32 %v4464_v22, %v14065_v14  ;;  %v14398_v23 = vunpack.c.l.b16 %v6611_v59  ;;  %v16860_v59 = vld [vmem:[#allocation148_spill] sm:$0xff] }
 0x6f9   :  { %v14394_v51 = vadd.f32 %v4729_v20, %v4641_v61 }
 0x6fa   :  { %v4554_v63 = vadd.f32 %v4553_v39, %v4465_v62  ;;  %16856 = vst [vmem:[#allocation162_spill] sm:$0xff] %v14398_v23 }
 0x6fc   :  { %v5252_v34 = vpack.c.bf16 %v4554_v63, %v16855_v7  ;;  %v16859_v63 = vld [vmem:[#allocation65_spill] sm:$0xff] }
 0x6fe   :  { %v5901_v31 = vunpack.c.l.b16 %v5252_v34  ;;  %v6612_v3 = vrot.slane %v5252_v34, 4  ;;  %v4642_v40 = vpop.f32.mrf.mxu2  ;;  %v4731_v1 = vpop.f32.mrf.mxu3 }
 0x6ff   :  { %v4643_v44 = vadd.f32 %v4642_v40, %v14136_v45  ;;  %v4467_v8 = vpop.f32.mrf.mxu0  ;;  %v4556_v61 = vpop.f32.mrf.mxu1 }
 0x700   :  { %v14400_v27 = vunpack.c.l.b16 %v6612_v3  ;;  %v4468_v14 = vadd.f32 %v4467_v8, %v14075_v15  ;;  %v14403_v20 = vpack.c.b16 %v5901_v31, %v5900_v11 }
 0x701   :  { %v14405_v22 = vadd.f32 %v4731_v1, %v4643_v44  ;;  %4782 = vmatmul.bf16.gmra.mxu0 %v16858_v37 }
 0x702   :  { %16857 = vst [vmem:[#allocation155_spill] sm:$0xff] %v14400_v27  ;;  %v4557_v62 = vadd.f32 %v4556_v61, %v4468_v14  ;;  %4871 = vmatmul.bf16.gmra.mxu1 %v16859_v63  ;;  %v16861_v14 = vld [vmem:[#allocation104_spill] sm:$0xff] }
 0x703   :  { %4960 = vmatmul.bf16.gmra.mxu2 %v16695_v49  ;;  %5049 = vmatmul.bf16.gmra.mxu3 %v16858_v37 }
 0x704   :  { %v5254_v3 = vpack.c.bf16 %v4557_v62, %v16860_v59 }
 0x706   :  { %v4645_v15 = vpop.f32.mrf.mxu2  ;;  %v4734_v7 = vpop.f32.mrf.mxu3  ;;  %v6643_v1 = vrot.slane %v5254_v3, 4  ;;  %v5932_v63 = vunpack.c.l.b16 %v5254_v3  ;;  %v16864_v3 = vld [vmem:[#allocation73_spill] sm:$0xff] }
 0x707   :  { %v4646_v8 = vadd.f32 %v4645_v15, %v14136_v45  ;;  %v4469_v34 = vpop.f32.mrf.mxu0  ;;  %v4558_v31 = vpop.f32.mrf.mxu1 }
 0x708   :  { %v4470_v11 = vadd.f32 %v4469_v34, %v14081_v16  ;;  %v14420_v15 = vunpack.c.l.b16 %v6643_v1  ;;  %v16866_v1 = vld [vmem:[#allocation118_spill] sm:$0xff] }
 0x709   :  { %v14416_v40 = vadd.f32 %v4734_v7, %v4646_v8 }
 0x70a   :  { %v4559_v44 = vadd.f32 %v4558_v31, %v4470_v11  ;;  %16862 = vst [vmem:[#allocation157_spill] sm:$0xff] %v14420_v15 }
 0x70c   :  { %v5256_v61 = vpack.c.bf16 %v4559_v44, %v16861_v14  ;;  %v16865_v44 = vld [vmem:[#allocation71_spill] sm:$0xff] }
 0x70e   :  { %v5933_v49 = vunpack.c.l.b16 %v5256_v61  ;;  %v6644_v39 = vrot.slane %v5256_v61, 4  ;;  %v4647_v62 = vpop.f32.mrf.mxu2  ;;  %v4736_v59 = vpop.f32.mrf.mxu3 }
 0x70f   :  { %v4648_v37 = vadd.f32 %v4647_v62, %v14136_v45  ;;  %v4472_v23 = vpop.f32.mrf.mxu0  ;;  %v4561_v16 = vpop.f32.mrf.mxu1 }
 0x710   :  { %v4473_v27 = vadd.f32 %v4472_v23, %v14091_v12  ;;  %v14423_v34 = vpack.c.b16 %v5933_v49, %v5932_v63  ;;  %v14425_v8 = vunpack.c.l.b16 %v6644_v39  ;;  %v16867_v63 = vld [vmem:[#allocation218_spill] sm:$0xff] }
 0x711   :  { %v14427_v7 = vadd.f32 %v4736_v59, %v4648_v37  ;;  %4787 = vmatmul.bf16.gmra.mxu0 %v16864_v3 }
 0x712   :  { %16863 = vst [vmem:[#allocation159_spill] sm:$0xff] %v14425_v8  ;;  %v4562_v11 = vadd.f32 %v4561_v16, %v4473_v27  ;;  %4876 = vmatmul.bf16.gmra.mxu1 %v16865_v44  ;;  %v16868_v16 = vld [vmem:[#allocation128_spill] sm:$0xff] }
 0x713   :  { %4965 = vmatmul.bf16.gmra.mxu2 %v16701_v29  ;;  %5054 = vmatmul.bf16.gmra.mxu3 %v16864_v3 }
 0x714   :  { %v5258_v14 = vpack.c.bf16 %v4562_v11, %v16866_v1 }
 0x716   :  { %v4650_v12 = vpop.f32.mrf.mxu2  ;;  %v4739_v39 = vpop.f32.mrf.mxu3  ;;  %v6645_v59 = vrot.slane %v5258_v14, 4  ;;  %v5934_v31 = vunpack.c.l.b16 %v5258_v14  ;;  %v16871_v14 = vld [vmem:[#allocation79_spill] sm:$0xff] }
 0x717   :  { %v4651_v23 = vadd.f32 %v4650_v12, %v14136_v45  ;;  %v4474_v61 = vpop.f32.mrf.mxu0  ;;  %v4563_v49 = vpop.f32.mrf.mxu1 }
 0x718   :  { %v4475_v27 = vadd.f32 %v4474_v61, %v16867_v63  ;;  %v14442_v12 = vunpack.c.l.b16 %v6645_v59  ;;  %v16873_v59 = vld [vmem:[#allocation219_spill] sm:$0xff] }
 0x719   :  { %v14438_v62 = vadd.f32 %v4739_v39, %v4651_v23 }
 0x71a   :  { %v4564_v37 = vadd.f32 %v4563_v49, %v4475_v27  ;;  %16869 = vst [vmem:[#allocation143_spill] sm:$0xff] %v14442_v12 }
 0x71c   :  { %v5260_v44 = vpack.c.bf16 %v4564_v37, %v16868_v16  ;;  %v16872_v37 = vld [vmem:[#allocation77_spill] sm:$0xff] }
 0x71e   :  { %v5935_v29 = vunpack.c.l.b16 %v5260_v44  ;;  %v6646_v15 = vrot.slane %v5260_v44, 4  ;;  %v4652_v11 = vpop.f32.mrf.mxu2  ;;  %v4741_v1 = vpop.f32.mrf.mxu3 }
 0x71f   :  { %v4653_v3 = vadd.f32 %v4652_v11, %v14136_v45  ;;  %v4477_v8 = vpop.f32.mrf.mxu0  ;;  %v4566_v23 = vpop.f32.mrf.mxu1 }
 0x720   :  { %v14444_v32 = vunpack.c.l.b16 %v6646_v15  ;;  %v4478_v61 = vadd.f32 %v4477_v8, %v14107_v26  ;;  %v14447_v39 = vpack.c.b16 %v5935_v29, %v5934_v31 }
 0x721   :  { %v14449_v63 = vadd.f32 %v4741_v1, %v4653_v3  ;;  %4792 = vmatmul.bf16.gmra.mxu0 %v16871_v14 }
 0x722   :  { %16870 = vst [vmem:[#allocation49_spill] sm:$0xff] %v14444_v32  ;;  %v4567_v27 = vadd.f32 %v4566_v23, %v4478_v61  ;;  %4881 = vmatmul.bf16.gmra.mxu1 %v16872_v37  ;;  %v16874_v61 = vld [vmem:[#allocation220_spill] sm:$0xff] }
 0x723   :  { %4970 = vmatmul.bf16.gmra.mxu2 %v16706_v36  ;;  %5059 = vmatmul.bf16.gmra.mxu3 %v16871_v14 }
 0x724   :  { %v5262_v15 = vpack.c.bf16 %v4567_v27, %v16873_v59 }
 0x726   :  { %v4655_v26 = vpop.f32.mrf.mxu2  ;;  %v4744_v31 = vpop.f32.mrf.mxu3  ;;  %v6677_v1 = vrot.slane %v5262_v15, 4  ;;  %v5966_v37 = vunpack.c.l.b16 %v5262_v15  ;;  %v16878_v15 = vld [vmem:[#allocation85_spill] sm:$0xff] }
 0x727   :  { %v4656_v8 = vadd.f32 %v4655_v26, %v14136_v45  ;;  %v4479_v16 = vpop.f32.mrf.mxu0  ;;  %v4568_v29 = vpop.f32.mrf.mxu1 }
 0x728   :  { %v4480_v44 = vadd.f32 %v4479_v16, %v14113_v24  ;;  %v14464_v26 = vunpack.c.l.b16 %v6677_v1  ;;  %v16881_v1 = vld [vmem:[#allocation221_spill] sm:$0xff] }
 0x729   :  { %v14460_v11 = vadd.f32 %v4744_v31, %v4656_v8 }
 0x72a   :  { %v4569_v3 = vadd.f32 %v4568_v29, %v4480_v44  ;;  %16875 = vst [vmem:[#allocation29_spill] sm:$0xff] %v14464_v26  ;;  %v16883_v29 = vld [vmem:[#allocation223_spill] sm:$0xff] }
 0x72c   :  { %v5264_v23 = vpack.c.bf16 %v4569_v3, %v16874_v61  ;;  %v16879_v3 = vld [vmem:[#allocation83_spill] sm:$0xff]  ;;  %v16880_v61 = vld [vmem:[#allocation84_spill] sm:$0xff] }
 0x72e   :  { %v5967_v36 = vunpack.c.l.b16 %v5264_v23  ;;  %v6678_v49 = vrot.slane %v5264_v23, 4  ;;  %v4657_v27 = vpop.f32.mrf.mxu2  ;;  %v4746_v59 = vpop.f32.mrf.mxu3 }
 0x72f   :  { %v4658_v14 = vadd.f32 %v4657_v27, %v14136_v45  ;;  %v4482_v12 = vpop.f32.mrf.mxu0  ;;  %v4571_v24 = vpop.f32.mrf.mxu1 }
 0x730   :  { %v4483_v32 = vadd.f32 %v4482_v12, %v14123_v2  ;;  %v14467_v16 = vpack.c.b16 %v5967_v36, %v5966_v37  ;;  %v14469_v8 = vunpack.c.l.b16 %v6678_v49 }
 0x731   :  { %v14471_v31 = vadd.f32 %v4746_v59, %v4658_v14  ;;  %4797 = vmatmul.bf16.gmra.mxu0 %v16878_v15  ;;  %v16882_v59 = vld [vmem:[#allocation222_spill] sm:$0xff] }
 0x732   :  { %16876 = vst [vmem:[#allocation126_spill] sm:$0xff] %v14469_v8  ;;  %v4572_v44 = vadd.f32 %v4571_v24, %v4483_v32  ;;  %4886 = vmatmul.bf16.gmra.mxu1 %v16879_v3  ;;  %v3553_v24 = vperm.slane %v16882_v59, 6  ;;  %v16889_v59 = vld [vmem:[#allocation90_spill] sm:$0xff] }
 0x733   :  { %16877 = vst [vmem:[#allocation127_spill] sm:$0xff] %v14471_v31  ;;  %4975 = vmatmul.bf16.gmra.mxu2 %v16880_v61  ;;  %5064 = vmatmul.bf16.gmra.mxu3 %v16878_v15 }
 0x734   :  { %v5266_v23 = vpack.c.bf16 %v4572_v44, %v16881_v1  ;;  %v14486_v8 = vperm.slane %v3553_v24, 2 }
 0x736   :  { %v4660_v2 = vpop.f32.mrf.mxu2  ;;  %v4749_v49 = vpop.f32.mrf.mxu3  ;;  %v6679_v3 = vrot.slane %v5266_v23, 4  ;;  %v5968_v26 = vunpack.c.l.b16 %v5266_v23  ;;  %v16887_v23 = vld [vmem:[#allocation91_spill] sm:$0xff] }
 0x737   :  { %v4661_v12 = vadd.f32 %v4660_v2, %v14136_v45  ;;  %v4484_v37 = vpop.f32.mrf.mxu0  ;;  %v4573_v36 = vpop.f32.mrf.mxu1 }
 0x738   :  { %v4485_v32 = vadd.f32 %v4484_v37, %v14132_v58  ;;  %v14489_v58 = vunpack.c.l.b16 %v6679_v3  ;;  %v16890_v3 = vld [vmem:[#allocation227_spill] sm:$0xff] }
 0x739   :  { %v14482_v27 = vadd.f32 %v4749_v49, %v4661_v12 }
 0x73a   :  { %v4574_v14 = vadd.f32 %v4573_v36, %v4485_v32  ;;  %16884 = vst [vmem:[#allocation55_spill] sm:$0xff] %v14489_v58 }
 0x73c   :  { %v5268_v61 = vpack.c.bf16 %v4574_v14, %v16883_v29  ;;  %v16888_v14 = vld [vmem:[#allocation89_spill] sm:$0xff] }
 0x73e   :  { %v5969_v44 = vunpack.c.l.b16 %v5268_v61  ;;  %v6680_v1 = vrot.slane %v5268_v61, 4  ;;  %v4662_v15 = vpop.f32.mrf.mxu2  ;;  %v4751_v13 = vpop.f32.mrf.mxu3 }
 0x73f   :  { %v4663_v2 = vadd.f32 %v4662_v15, %v14136_v45  ;;  %v4763_v35 = vpop.f32.mrf.mxu0  ;;  %v4852_v37 = vpop.f32.mrf.mxu1 }
 0x740   :  { %v14491_v12 = vunpack.c.l.b16 %v6680_v1  ;;  %v4764_v49 = vadd.f32 %v4763_v35, %v14144_v0  ;;  %v14494_v32 = vpack.c.b16 %v5969_v44, %v5968_v26  ;;  %v4853_v45 = vadd.f32 %v4852_v37, %v14486_v8 }
 0x741   :  { %v14496_v29 = vadd.f32 %v4751_v13, %v4663_v2  ;;  %4802 = vmatmul.bf16.gmra.mxu0 %v16887_v23 }
 0x742   :  { %16885 = vst [vmem:[#allocation53_spill] sm:$0xff] %v14491_v12  ;;  %4891 = vmatmul.bf16.gmra.mxu1 %v16888_v14  ;;  %v16891_v14 = vld [vmem:[#allocation202_spill] sm:$0xff] }
 0x743   :  { %16886 = vst [vmem:[#allocation152_spill] sm:$0xff] %v14496_v29  ;;  %4980 = vmatmul.bf16.gmra.mxu2 %v16889_v59  ;;  %5069 = vmatmul.bf16.gmra.mxu3 %v16887_v23  ;;  %v16892_v23 = vld [vmem:[#allocation97_spill] sm:$0xff] }
 0x746   :  { %v4941_v24 = vpop.f32.mrf.mxu2  ;;  %v5030_v35 = vpop.f32.mrf.mxu3 }
 0x747   :  { %v4942_v0 = vadd.f32 %v4941_v24, %v4853_v45  ;;  %v4765_v26 = vpop.f32.mrf.mxu0  ;;  %v4854_v61 = vpop.f32.mrf.mxu1 }
 0x748   :  { %v4766_v13 = vadd.f32 %v4765_v26, %v16890_v3  ;;  %v4855_v15 = vadd.f32 %v4854_v61, %v14486_v8  ;;  %v16893_v26 = vld [vmem:[#allocation95_spill] sm:$0xff] }
 0x749   :  { %v5031_v44 = vadd.f32 %v5030_v35, %v4942_v0  ;;  %v16894_v0 = vld [vmem:[#allocation96_spill] sm:$0xff] }
 0x74b   :  { %v5207_v1 = vpack.c.bf16 %v5031_v44, %v4764_v49 }
 0x74d   :  { %v7879_v45 = vrot.slane %v5207_v1, 4  ;;  %v7168_v49 = vunpack.c.l.b16 %v5207_v1 }
 0x74e   :  { %v4943_v2 = vpop.f32.mrf.mxu2  ;;  %v5032_v37 = vpop.f32.mrf.mxu3 }
 0x74f   :  { %v4944_v36 = vadd.f32 %v4943_v2, %v4855_v15  ;;  %v4768_v58 = vpop.f32.mrf.mxu0  ;;  %v4857_v59 = vpop.f32.mrf.mxu1  ;;  %v14513_v44 = vunpack.c.l.b16 %v7879_v45 }
 0x750   :  { %v4769_v12 = vadd.f32 %v4768_v58, %v16891_v14  ;;  %v4858_v31 = vadd.f32 %v4857_v59, %v14486_v8 }
 0x751   :  { %v5033_v29 = vadd.f32 %v5032_v37, %v4944_v36  ;;  %4807 = vmatmul.bf16.gmra.mxu0 %v16892_v23  ;;  %16895 = vst [vmem:[#allocation115_spill] sm:$0xff] %v14513_v44 }
 0x752   :  { %4896 = vmatmul.bf16.gmra.mxu1 %v16893_v26 }
 0x753   :  { %v5209_v24 = vpack.c.bf16 %v5033_v29, %v4766_v13  ;;  %4985 = vmatmul.bf16.gmra.mxu2 %v16894_v0  ;;  %5074 = vmatmul.bf16.gmra.mxu3 %v16892_v23  ;;  %v16898_v13 = vld [vmem:[#allocation228_spill] sm:$0xff] }
 0x755   :  { %v7169_v35 = vunpack.c.l.b16 %v5209_v24  ;;  %v7880_v3 = vrot.slane %v5209_v24, 4 }
 0x756   :  { %v4946_v61 = vpop.f32.mrf.mxu2  ;;  %v5035_v36 = vpop.f32.mrf.mxu3 }
 0x757   :  { %v4947_v58 = vadd.f32 %v4946_v61, %v4858_v31  ;;  %v4770_v15 = vpop.f32.mrf.mxu0  ;;  %v14515_v2 = vpack.c.b16 %v7169_v35, %v7168_v49  ;;  %v14517_v29 = vunpack.c.l.b16 %v7880_v3  ;;  %v4859_v14 = vpop.f32.mrf.mxu1  ;;  %v16899_v3 = vld [vmem:[#allocation100_spill] sm:$0xff] }
 0x758   :  { %v4771_v37 = vadd.f32 %v4770_v15, %v16898_v13  ;;  %v4860_v24 = vadd.f32 %v4859_v14, %v14486_v8  ;;  %v16901_v13 = vld [vmem:[#allocation99_spill] sm:$0xff] }
 0x759   :  { %16896 = vst [vmem:[#allocation61_spill] sm:$0xff] %v14515_v2  ;;  %v5036_v59 = vadd.f32 %v5035_v36, %v4947_v58  ;;  %v16900_v36 = vld [vmem:[#allocation98_spill] sm:$0xff] }
 0x75a   :  { %16897 = vst [vmem:[#allocation59_spill] sm:$0xff] %v14517_v29 }
 0x75b   :  { %v5211_v1 = vpack.c.bf16 %v5036_v59, %v4769_v12 }
 0x75d   :  { %v7881_v2 = vrot.slane %v5211_v1, 4  ;;  %v7170_v12 = vunpack.c.l.b16 %v5211_v1 }
 0x75e   :  { %v4948_v26 = vpop.f32.mrf.mxu2  ;;  %v5037_v0 = vpop.f32.mrf.mxu3 }
 0x75f   :  { %v4949_v45 = vadd.f32 %v4948_v26, %v4860_v24  ;;  %v4773_v31 = vpop.f32.mrf.mxu0  ;;  %v4862_v49 = vpop.f32.mrf.mxu1  ;;  %v14529_v26 = vunpack.c.l.b16 %v7881_v2 }
 0x760   :  { %v4774_v61 = vadd.f32 %v4773_v31, %v14188_v18  ;;  %v4863_v58 = vadd.f32 %v4862_v49, %v14486_v8  ;;  %v16904_v49 = vld [vmem:[#allocation210_spill] sm:$0xff] }
 0x761   :  { %v5038_v35 = vadd.f32 %v5037_v0, %v4949_v45  ;;  %4812 = vmatmul.bf16.gmra.mxu0 %v16899_v3  ;;  %16902 = vst [vmem:[#allocation125_spill] sm:$0xff] %v14529_v26 }
 0x762   :  { %4901 = vmatmul.bf16.gmra.mxu1 %v16900_v36 }
 0x763   :  { %v5213_v15 = vpack.c.bf16 %v5038_v35, %v4771_v37  ;;  %4990 = vmatmul.bf16.gmra.mxu2 %v16901_v13  ;;  %5079 = vmatmul.bf16.gmra.mxu3 %v16899_v3 }
 0x765   :  { %v7171_v14 = vunpack.c.l.b16 %v5213_v15  ;;  %v7882_v59 = vrot.slane %v5213_v15, 4 }
 0x766   :  { %v4951_v24 = vpop.f32.mrf.mxu2  ;;  %v5040_v0 = vpop.f32.mrf.mxu3 }
 0x767   :  { %v14531_v18 = vunpack.c.l.b16 %v7882_v59  ;;  %v4952_v45 = vadd.f32 %v4951_v24, %v4863_v58  ;;  %v4775_v31 = vpop.f32.mrf.mxu0  ;;  %v14533_v37 = vpack.c.b16 %v7171_v14, %v7170_v12  ;;  %v4864_v36 = vpop.f32.mrf.mxu1  ;;  %v16905_v12 = vld [vmem:[#allocation106_spill] sm:$0xff] }
 0x768   :  { %v4776_v35 = vadd.f32 %v4775_v31, %v16904_v49  ;;  %v4865_v15 = vadd.f32 %v4864_v36, %v14486_v8  ;;  %v16907_v49 = vld [vmem:[#allocation105_spill] sm:$0xff] }
 0x769   :  { %16903 = vst [vmem:[#allocation133_spill] sm:$0xff] %v14531_v18  ;;  %v5041_v23 = vadd.f32 %v5040_v0, %v4952_v45  ;;  %v16906_v0 = vld [vmem:[#allocation102_spill] sm:$0xff] }
 0x76b   :  { %v5215_v1 = vpack.c.bf16 %v5041_v23, %v4774_v61 }
 0x76d   :  { %v7913_v14 = vrot.slane %v5215_v1, 4  ;;  %v7202_v23 = vunpack.c.l.b16 %v5215_v1 }
 0x76e   :  { %v4953_v13 = vpop.f32.mrf.mxu2  ;;  %v5042_v44 = vpop.f32.mrf.mxu3 }
 0x76f   :  { %v4954_v2 = vadd.f32 %v4953_v13, %v4865_v15  ;;  %v4778_v59 = vpop.f32.mrf.mxu0  ;;  %v4867_v24 = vpop.f32.mrf.mxu1  ;;  %v14545_v13 = vunpack.c.l.b16 %v7913_v14 }
 0x770   :  { %v4779_v58 = vadd.f32 %v4778_v59, %v14210_v54  ;;  %v4868_v45 = vadd.f32 %v4867_v24, %v14486_v8 }
 0x771   :  { %v5043_v29 = vadd.f32 %v5042_v44, %v4954_v2  ;;  %4817 = vmatmul.bf16.gmra.mxu0 %v16905_v12  ;;  %16908 = vst [vmem:[#allocation67_spill] sm:$0xff] %v14545_v13 }
 0x772   :  { %4906 = vmatmul.bf16.gmra.mxu1 %v16906_v0 }
 0x773   :  { %v5217_v31 = vpack.c.bf16 %v5043_v29, %v4776_v35  ;;  %4995 = vmatmul.bf16.gmra.mxu2 %v16907_v49  ;;  %5084 = vmatmul.bf16.gmra.mxu3 %v16905_v12  ;;  %v16909_v35 = vld [vmem:[#allocation214_spill] sm:$0xff] }
 0x775   :  { %v7203_v61 = vunpack.c.l.b16 %v5217_v31  ;;  %v7914_v36 = vrot.slane %v5217_v31, 4 }
 0x776   :  { %v4956_v15 = vpop.f32.mrf.mxu2  ;;  %v5045_v44 = vpop.f32.mrf.mxu3 }
 0x777   :  { %v4957_v54 = vadd.f32 %v4956_v15, %v4868_v45  ;;  %v4780_v2 = vpop.f32.mrf.mxu0  ;;  %v14547_v59 = vpack.c.b16 %v7203_v61, %v7202_v23  ;;  %v14549_v29 = vunpack.c.l.b16 %v7914_v36  ;;  %v4869_v0 = vpop.f32.mrf.mxu1  ;;  %v16910_v36 = vld [vmem:[#allocation113_spill] sm:$0xff] }
 0x778   :  { %v4781_v24 = vadd.f32 %v4780_v2, %v16909_v35  ;;  %v4870_v31 = vadd.f32 %v4869_v0, %v14486_v8  ;;  %v16912_v35 = vld [vmem:[#allocation112_spill] sm:$0xff] }
 0x779   :  { %v5046_v3 = vadd.f32 %v5045_v44, %v4957_v54  ;;  %v16911_v44 = vld [vmem:[#allocation109_spill] sm:$0xff] }
 0x77b   :  { %v5219_v1 = vpack.c.bf16 %v5046_v3, %v4779_v58 }
 0x77d   :  { %v7915_v18 = vrot.slane %v5219_v1, 4  ;;  %v7204_v3 = vunpack.c.l.b16 %v5219_v1 }
 0x77e   :  { %v4958_v49 = vpop.f32.mrf.mxu2  ;;  %v5047_v26 = vpop.f32.mrf.mxu3 }
 0x77f   :  { %v4959_v14 = vadd.f32 %v4958_v49, %v4870_v31  ;;  %v4783_v45 = vpop.f32.mrf.mxu0  ;;  %v4872_v23 = vpop.f32.mrf.mxu1  ;;  %v14561_v49 = vunpack.c.l.b16 %v7915_v18 }
 0x780   :  { %v4784_v15 = vadd.f32 %v4783_v45, %v14232_v60  ;;  %v4873_v54 = vadd.f32 %v4872_v23, %v14486_v8 }
 0x781   :  { %v5048_v61 = vadd.f32 %v5047_v26, %v4959_v14  ;;  %4822 = vmatmul.bf16.gmra.mxu0 %v16910_v36 }
 0x782   :  { %4911 = vmatmul.bf16.gmra.mxu1 %v16911_v44 }
 0x783   :  { %v5221_v2 = vpack.c.bf16 %v5048_v61, %v4781_v24  ;;  %5000 = vmatmul.bf16.gmra.mxu2 %v16912_v35  ;;  %5089 = vmatmul.bf16.gmra.mxu3 %v16910_v36 }
 0x785   :  { %v7205_v58 = vunpack.c.l.b16 %v5221_v2  ;;  %v7916_v0 = vrot.slane %v5221_v2, 4 }
 0x786   :  { %v4961_v31 = vpop.f32.mrf.mxu2  ;;  %v5050_v14 = vpop.f32.mrf.mxu3 }
 0x787   :  { %v14563_v60 = vunpack.c.l.b16 %v7916_v0  ;;  %v4962_v26 = vadd.f32 %v4961_v31, %v4873_v54  ;;  %v4785_v45 = vpop.f32.mrf.mxu0  ;;  %v14565_v24 = vpack.c.b16 %v7205_v58, %v7204_v3  ;;  %v4874_v61 = vpop.f32.mrf.mxu1  ;;  %v16913_v3 = vld [vmem:[#allocation120_spill] sm:$0xff] }
 0x788   :  { %v4786_v23 = vadd.f32 %v4785_v45, %v14243_v6  ;;  %v4875_v2 = vadd.f32 %v4874_v61, %v14486_v8  ;;  %v16915_v45 = vld [vmem:[#allocation119_spill] sm:$0xff] }
 0x789   :  { %v5051_v44 = vadd.f32 %v5050_v14, %v4962_v26  ;;  %v16914_v14 = vld [vmem:[#allocation116_spill] sm:$0xff] }
 0x78b   :  { %v5223_v1 = vpack.c.bf16 %v5051_v44, %v4784_v15 }
 0x78d   :  { %v7947_v58 = vrot.slane %v5223_v1, 4  ;;  %v7236_v15 = vunpack.c.l.b16 %v5223_v1 }
 0x78e   :  { %v4963_v35 = vpop.f32.mrf.mxu2  ;;  %v5052_v12 = vpop.f32.mrf.mxu3 }
 0x78f   :  { %v4964_v18 = vadd.f32 %v4963_v35, %v4875_v2  ;;  %v4788_v0 = vpop.f32.mrf.mxu0  ;;  %v4877_v31 = vpop.f32.mrf.mxu1  ;;  %v14577_v35 = vunpack.c.l.b16 %v7947_v58 }
 0x790   :  { %v4789_v54 = vadd.f32 %v4788_v0, %v14254_v42  ;;  %v4878_v26 = vadd.f32 %v4877_v31, %v14486_v8 }
 0x791   :  { %v5053_v13 = vadd.f32 %v5052_v12, %v4964_v18  ;;  %4827 = vmatmul.bf16.gmra.mxu0 %v16913_v3 }
 0x792   :  { %4916 = vmatmul.bf16.gmra.mxu1 %v16914_v14 }
 0x793   :  { %v5225_v6 = vpack.c.bf16 %v5053_v13, %v4786_v23  ;;  %5005 = vmatmul.bf16.gmra.mxu2 %v16915_v45  ;;  %5094 = vmatmul.bf16.gmra.mxu3 %v16913_v3 }
 0x795   :  { %v7237_v61 = vunpack.c.l.b16 %v5225_v6  ;;  %v7948_v44 = vrot.slane %v5225_v6, 4 }
 0x796   :  { %v4966_v2 = vpop.f32.mrf.mxu2  ;;  %v5055_v12 = vpop.f32.mrf.mxu3 }
 0x797   :  { %v4967_v42 = vadd.f32 %v4966_v2, %v4878_v26  ;;  %v4790_v18 = vpop.f32.mrf.mxu0  ;;  %v14579_v0 = vpack.c.b16 %v7237_v61, %v7236_v15  ;;  %v14581_v13 = vunpack.c.l.b16 %v7948_v44  ;;  %v4879_v31 = vpop.f32.mrf.mxu1 }
 0x798   :  { %v4791_v23 = vadd.f32 %v4790_v18, %v14265_v53  ;;  %v4880_v6 = vadd.f32 %v4879_v31, %v14486_v8 }
 0x799   :  { %v5056_v14 = vadd.f32 %v5055_v12, %v4967_v42 }
 0x79b   :  { %v5227_v1 = vpack.c.bf16 %v5056_v14, %v4789_v54 }
 0x79d   :  { %v7949_v44 = vrot.slane %v5227_v1, 4  ;;  %v7238_v54 = vunpack.c.l.b16 %v5227_v1 }
 0x79e   :  { %v4968_v45 = vpop.f32.mrf.mxu2  ;;  %v5057_v36 = vpop.f32.mrf.mxu3 }
 0x79f   :  { %v4969_v58 = vadd.f32 %v4968_v45, %v4880_v6  ;;  %v4793_v26 = vpop.f32.mrf.mxu0  ;;  %v4882_v15 = vpop.f32.mrf.mxu1  ;;  %v14593_v14 = vunpack.c.l.b16 %v7949_v44 }
 0x7a0   :  { %v4794_v2 = vadd.f32 %v4793_v26, %v14276_v5  ;;  %v4883_v42 = vadd.f32 %v4882_v15, %v14486_v8 }
 0x7a1   :  { %v5058_v61 = vadd.f32 %v5057_v36, %v4969_v58  ;;  %4832 = vmatmul.bf16.gmra.mxu0 %v16744_v41 }
 0x7a2   :  { %4921 = vmatmul.bf16.gmra.mxu1 %v16742_v55 }
 0x7a3   :  { %v5229_v53 = vpack.c.bf16 %v5058_v61, %v4791_v23  ;;  %5010 = vmatmul.bf16.gmra.mxu2 %v16743_v19  ;;  %5099 = vmatmul.bf16.gmra.mxu3 %v16744_v41 }
 0x7a5   :  { %v7239_v12 = vunpack.c.l.b16 %v5229_v53  ;;  %v7950_v18 = vrot.slane %v5229_v53, 4 }
 0x7a6   :  { %v4971_v31 = vpop.f32.mrf.mxu2  ;;  %v5060_v6 = vpop.f32.mrf.mxu3 }
 0x7a7   :  { %v14595_v5 = vunpack.c.l.b16 %v7950_v18  ;;  %v4972_v36 = vadd.f32 %v4971_v31, %v4883_v42  ;;  %v4795_v45 = vpop.f32.mrf.mxu0  ;;  %v14597_v23 = vpack.c.b16 %v7239_v12, %v7238_v54  ;;  %v4884_v58 = vpop.f32.mrf.mxu1 }
 0x7a8   :  { %v4885_v41 = vadd.f32 %v4884_v58, %v14486_v8  ;;  %v4796_v42 = vadd.f32 %v4795_v45, %v14287_v28 }
 0x7a9   :  { %v5061_v26 = vadd.f32 %v5060_v6, %v4972_v36 }
 0x7ab   :  { %v5231_v19 = vpack.c.bf16 %v5061_v26, %v4794_v2 }
 0x7ad   :  { %v7981_v54 = vrot.slane %v5231_v19, 4  ;;  %v7270_v2 = vunpack.c.l.b16 %v5231_v19 }
 0x7ae   :  { %v4973_v1 = vpop.f32.mrf.mxu2  ;;  %v5062_v61 = vpop.f32.mrf.mxu3 }
 0x7af   :  { %v4974_v15 = vadd.f32 %v4973_v1, %v4885_v41  ;;  %v4798_v44 = vpop.f32.mrf.mxu0  ;;  %v4887_v18 = vpop.f32.mrf.mxu1  ;;  %v14609_v26 = vunpack.c.l.b16 %v7981_v54 }
 0x7b0   :  { %v4799_v53 = vadd.f32 %v4798_v44, %v14298_v50  ;;  %v4888_v36 = vadd.f32 %v4887_v18, %v14486_v8 }
 0x7b1   :  { %v5063_v31 = vadd.f32 %v5062_v61, %v4974_v15  ;;  %4837 = vmatmul.bf16.gmra.mxu0 %v13088_v43  ;;  %16916 = vst [vmem:[#allocation65_spill] sm:$0xff] %v14609_v26 }
 0x7b2   :  { %4926 = vmatmul.bf16.gmra.mxu1 %v16568_v9 }
 0x7b3   :  { %v5233_v12 = vpack.c.bf16 %v5063_v31, %v4796_v42  ;;  %5015 = vmatmul.bf16.gmra.mxu2 %v13086_v21  ;;  %5104 = vmatmul.bf16.gmra.mxu3 %v13088_v43 }
 0x7b5   :  { %v7271_v6 = vunpack.c.l.b16 %v5233_v12  ;;  %v7982_v58 = vrot.slane %v5233_v12, 4 }
 0x7b6   :  { %v4976_v50 = vpop.f32.mrf.mxu2  ;;  %v5065_v45 = vpop.f32.mrf.mxu3 }
 0x7b7   :  { %v4977_v28 = vadd.f32 %v4976_v50, %v4888_v36  ;;  %v4800_v41 = vpop.f32.mrf.mxu0  ;;  %v14611_v1 = vpack.c.b16 %v7271_v6, %v7270_v2  ;;  %v14613_v15 = vunpack.c.l.b16 %v7982_v58  ;;  %v4889_v61 = vpop.f32.mrf.mxu1  ;;  %v16918_v6 = vld [vmem:[#allocation32_spill] sm:$0xff] }
 0x7b8   :  { %v4890_v43 = vadd.f32 %v4889_v61, %v14486_v8  ;;  %v4801_v36 = vadd.f32 %v4800_v41, %v14309_v57  ;;  %v16921_v61 = vld [vmem:[#allocation41_spill] sm:$0xff] }
 0x7b9   :  { %16917 = vst [vmem:[#allocation148_spill] sm:$0xff] %v14613_v15  ;;  %v5066_v44 = vadd.f32 %v5065_v45, %v4977_v28  ;;  %v16919_v45 = vld [vmem:[#allocation35_spill] sm:$0xff] }
 0x7bb   :  { %v5235_v9 = vpack.c.bf16 %v5066_v44, %v4799_v53  ;;  %v16920_v53 = vld [vmem:[#allocation38_spill] sm:$0xff] }
 0x7bc   :  { %v16922_v44 = vld [vmem:[#allocation206_spill] sm:$0xff] }
 0x7bd   :  { %v7983_v58 = vrot.slane %v5235_v9, 4 }
 0x7be   :  { %v4978_v19 = vpop.f32.mrf.mxu2  ;;  %v5067_v42 = vpop.f32.mrf.mxu3 }
 0x7bf   :  { %v4979_v18 = vadd.f32 %v4978_v19, %v4890_v43  ;;  %v4803_v31 = vpop.f32.mrf.mxu0  ;;  %v4892_v12 = vpop.f32.mrf.mxu1  ;;  %v7272_v43 = vunpack.c.l.b16 %v5235_v9  ;;  %v14629_v41 = vunpack.c.l.b16 %v7983_v58 }
 0x7c0   :  { %v4804_v54 = vadd.f32 %v4803_v31, %v14324_v4  ;;  %v4893_v28 = vadd.f32 %v4892_v12, %v14486_v8  ;;  %v16923_v31 = vld [vmem:[#allocation211_spill] sm:$0xff] }
 0x7c1   :  { %v5068_v2 = vadd.f32 %v5067_v42, %v4979_v18  ;;  %5296 = vmatmul.bf16.vlgmr.msrb.gmra.mxu0 %v16918_v6  ;;  %v16924_v6 = vld [vmem:[#allocation225_spill] sm:$0xff] }
 0x7c2   :  { %5328 = vmatmul.bf16.vlgmr.msrb.gmra.mxu1 %v16919_v45  ;;  %5745 = vmatpush.bf16.msrb.mxu0 %v16922_v44  ;;  %v16925_v45 = vld [vmem:[#allocation208_spill] sm:$0xff] }
 0x7c3   :  { %v5237_v50 = vpack.c.bf16 %v5068_v2, %v4801_v36  ;;  %5360 = vmatmul.bf16.vlgmr.msrb.gmra.mxu2 %v16920_v53  ;;  %5392 = vmatmul.bf16.vlgmr.msrb.gmra.mxu3 %v16921_v61  ;;  %v16926_v53 = vld [vmem:[#allocation216_spill] sm:$0xff] }
 0x7c4   :  { %5779 = vmatpush.bf16.msrb.mxu1 %v16923_v31  ;;  %5813 = vmatpush.bf16.msrb.mxu2 %v14263_v47 }
 0x7c5   :  { %v7273_v4 = vunpack.c.l.b16 %v5237_v50  ;;  %v7984_v19 = vrot.slane %v5237_v50, 4  ;;  %5847 = vmatpush.bf16.msrb.mxu3 %v14307_v30 }
 0x7c6   :  { %v4981_v57 = vpop.f32.mrf.mxu2  ;;  %v5070_v12 = vpop.f32.mrf.mxu3  ;;  %5746 = vmatpush.bf16.msrb.mxu0 %v16924_v6 }
 0x7c7   :  { %v14631_v18 = vunpack.c.l.b16 %v7984_v19  ;;  %v4982_v42 = vadd.f32 %v4981_v57, %v4893_v28  ;;  %v4805_v36 = vpop.f32.mrf.mxu0  ;;  %v14633_v2 = vpack.c.b16 %v7273_v4, %v7272_v43  ;;  %v4894_v9 = vpop.f32.mrf.mxu1 }
 0x7c8   :  { %5780 = vmatpush.bf16.msrb.mxu1 %v16925_v45  ;;  %5814 = vmatpush.bf16.msrb.mxu2 %v16926_v53  ;;  %v4895_v58 = vadd.f32 %v4894_v9, %v14486_v8  ;;  %v4806_v31 = vadd.f32 %v4805_v36, %v14339_v10  ;;  %v16930_v9 = vld [vmem:[#allocation30_spill] sm:$0xff] }
 0x7c9   :  { %v5071_v50 = vadd.f32 %v5070_v12, %v4982_v42  ;;  %5848 = vmatpush.bf16.msrb.mxu3 %v14283_v33  ;;  %v16927_v42 = vld [vmem:[#allocation44_spill] sm:$0xff]  ;;  %v16928_v33 = vld [vmem:[#allocation46_spill] sm:$0xff] }
 0x7cb   :  { %v5239_v30 = vpack.c.bf16 %v5071_v50, %v4804_v54  ;;  %v16929_v54 = vld [vmem:[#allocation21_spill] sm:$0xff] }
 0x7cd   :  { %v8015_v12 = vrot.slane %v5239_v30, 4  ;;  %v7304_v50 = vunpack.c.l.b16 %v5239_v30 }
 0x7ce   :  { %v4983_v28 = vpop.f32.mrf.mxu2  ;;  %v5072_v44 = vpop.f32.mrf.mxu3 }
 0x7cf   :  { %v4984_v61 = vadd.f32 %v4983_v28, %v4895_v58  ;;  %v4808_v43 = vpop.f32.mrf.mxu0  ;;  %v4897_v19 = vpop.f32.mrf.mxu1  ;;  %v14653_v36 = vunpack.c.l.b16 %v8015_v12 }
 0x7d0   :  { %v4809_v4 = vadd.f32 %v4808_v43, %v14350_v48  ;;  %v4898_v45 = vadd.f32 %v4897_v19, %v14486_v8 }
 0x7d1   :  { %v5073_v57 = vadd.f32 %v5072_v44, %v4984_v61  ;;  %5424 = vmatmul.bf16.vlgmr.msra.gmra.mxu0 %v16927_v42 }
 0x7d2   :  { %5456 = vmatmul.bf16.vlgmr.msra.gmra.mxu1 %v16928_v33  ;;  %5881 = vmatpush.bf16.msra.mxu0 %v14359_v25 }
 0x7d3   :  { %v5241_v6 = vpack.c.bf16 %v5073_v57, %v4806_v31  ;;  %5488 = vmatmul.bf16.vlgmr.msra.gmra.mxu2 %v16929_v54  ;;  %5520 = vmatmul.bf16.vlgmr.msra.gmra.mxu3 %v16930_v9 }
 0x7d4   :  { %5915 = vmatpush.bf16.msra.mxu1 %v14403_v20  ;;  %5949 = vmatpush.bf16.msra.mxu2 %v14447_v39 }
 0x7d5   :  { %v7305_v48 = vunpack.c.l.b16 %v5241_v6  ;;  %v8016_v53 = vrot.slane %v5241_v6, 4  ;;  %5983 = vmatpush.bf16.msra.mxu3 %v14494_v32 }
 0x7d6   :  { %v4986_v10 = vpop.f32.mrf.mxu2  ;;  %v5075_v28 = vpop.f32.mrf.mxu3  ;;  %5882 = vmatpush.bf16.msra.mxu0 %v14335_v52 }
 0x7d7   :  { %v4987_v58 = vadd.f32 %v4986_v10, %v4898_v45  ;;  %v4810_v61 = vpop.f32.mrf.mxu0  ;;  %v14655_v44 = vpack.c.b16 %v7305_v48, %v7304_v50  ;;  %v14657_v43 = vunpack.c.l.b16 %v8016_v53  ;;  %v4899_v25 = vpop.f32.mrf.mxu1 }
 0x7d8   :  { %5916 = vmatpush.bf16.msra.mxu1 %v14379_v38  ;;  %5950 = vmatpush.bf16.msra.mxu2 %v14423_v34  ;;  %v4900_v32 = vadd.f32 %v4899_v25, %v14486_v8  ;;  %v4811_v6 = vadd.f32 %v4810_v61, %v14361_v46 }
 0x7d9   :  { %v5076_v30 = vadd.f32 %v5075_v28, %v4987_v58  ;;  %5984 = vmatpush.bf16.msra.mxu3 %v14467_v16 }
 0x7db   :  { %v5243_v39 = vpack.c.bf16 %v5076_v30, %v4809_v4 }
 0x7dd   :  { %v8017_v45 = vrot.slane %v5243_v39, 4  ;;  %v7306_v54 = vunpack.c.l.b16 %v5243_v39 }
 0x7de   :  { %v4988_v19 = vpop.f32.mrf.mxu2  ;;  %v5077_v57 = vpop.f32.mrf.mxu3 }
 0x7df   :  { %v4989_v31 = vadd.f32 %v4988_v19, %v4900_v32  ;;  %v4813_v42 = vpop.f32.mrf.mxu0  ;;  %v4902_v12 = vpop.f32.mrf.mxu1  ;;  %v14669_v50 = vunpack.c.l.b16 %v8017_v45 }
 0x7e0   :  { %v4814_v52 = vadd.f32 %v4813_v42, %v14372_v17  ;;  %v4903_v33 = vadd.f32 %v4902_v12, %v14486_v8 }
 0x7e1   :  { %v5078_v38 = vadd.f32 %v5077_v57, %v4989_v31 }
 0x7e3   :  { %v5245_v34 = vpack.c.bf16 %v5078_v38, %v4811_v6 }
 0x7e5   :  { %v7307_v9 = vunpack.c.l.b16 %v5245_v34  ;;  %v8018_v16 = vrot.slane %v5245_v34, 4 }
 0x7e6   :  { %v4991_v4 = vpop.f32.mrf.mxu2  ;;  %v5080_v10 = vpop.f32.mrf.mxu3 }
 0x7e7   :  { %v14671_v48 = vunpack.c.l.b16 %v8018_v16  ;;  %v4992_v53 = vadd.f32 %v4991_v4, %v4903_v33  ;;  %v4815_v58 = vpop.f32.mrf.mxu0  ;;  %v14673_v17 = vpack.c.b16 %v7307_v9, %v7306_v54  ;;  %v4904_v28 = vpop.f32.mrf.mxu1 }
 0x7e8   :  { %v4905_v30 = vadd.f32 %v4904_v28, %v14486_v8  ;;  %v4816_v12 = vadd.f32 %v4815_v58, %v14383_v56 }
 0x7e9   :  { %v5081_v46 = vadd.f32 %v5080_v10, %v4992_v53 }
 0x7eb   :  { %v5247_v25 = vpack.c.bf16 %v5081_v46, %v4814_v52 }
 0x7ed   :  { %v8049_v38 = vrot.slane %v5247_v25, 4  ;;  %v7338_v33 = vunpack.c.l.b16 %v5247_v25 }
 0x7ee   :  { %v4993_v39 = vpop.f32.mrf.mxu2  ;;  %v5082_v19 = vpop.f32.mrf.mxu3 }
 0x7ef   :  { %v4994_v32 = vadd.f32 %v4993_v39, %v4905_v30  ;;  %v4818_v31 = vpop.f32.mrf.mxu0  ;;  %v4907_v42 = vpop.f32.mrf.mxu1  ;;  %v14681_v16 = vunpack.c.l.b16 %v8049_v38 }
 0x7f0   :  { %v4819_v57 = vadd.f32 %v4818_v31, %v14394_v51  ;;  %v4908_v34 = vadd.f32 %v4907_v42, %v14486_v8 }
 0x7f1   :  { %v5083_v6 = vadd.f32 %v5082_v19, %v4994_v32  ;;  %16931 = vst [vmem:[#allocation104_spill] sm:$0xff] %v14681_v16 }
 0x7f3   :  { %v5249_v45 = vpack.c.bf16 %v5083_v6, %v4816_v12 }
 0x7f5   :  { %v7339_v54 = vunpack.c.l.b16 %v5249_v45  ;;  %v8050_v9 = vrot.slane %v5249_v45, 4 }
 0x7f6   :  { %v4996_v52 = vpop.f32.mrf.mxu2  ;;  %v5085_v53 = vpop.f32.mrf.mxu3 }
 0x7f7   :  { %v4997_v4 = vadd.f32 %v4996_v52, %v4908_v34  ;;  %v4820_v10 = vpop.f32.mrf.mxu0  ;;  %v14683_v28 = vpack.c.b16 %v7339_v54, %v7338_v33  ;;  %v14685_v51 = vunpack.c.l.b16 %v8050_v9  ;;  %v4909_v46 = vpop.f32.mrf.mxu1 }
 0x7f8   :  { %v4910_v25 = vadd.f32 %v4909_v46, %v14486_v8  ;;  %v4821_v6 = vadd.f32 %v4820_v10, %v14405_v22 }
 0x7f9   :  { %16932 = vst [vmem:[#allocation73_spill] sm:$0xff] %v14685_v51  ;;  %v5086_v56 = vadd.f32 %v5085_v53, %v4997_v4 }
 0x7fb   :  { %v5251_v30 = vpack.c.bf16 %v5086_v56, %v4819_v57 }
 0x7fd   :  { %v8051_v45 = vrot.slane %v5251_v30, 4  ;;  %v7340_v54 = vunpack.c.l.b16 %v5251_v30 }
 0x7fe   :  { %v4998_v39 = vpop.f32.mrf.mxu2  ;;  %v5087_v19 = vpop.f32.mrf.mxu3 }
 0x7ff   :  { %v4999_v32 = vadd.f32 %v4998_v39, %v4910_v25  ;;  %v4823_v31 = vpop.f32.mrf.mxu0  ;;  %v4912_v12 = vpop.f32.mrf.mxu1  ;;  %v14693_v4 = vunpack.c.l.b16 %v8051_v45 }
 0x800   :  { %v4824_v42 = vadd.f32 %v4823_v31, %v14416_v40  ;;  %v4913_v33 = vadd.f32 %v4912_v12, %v14486_v8 }
 0x801   :  { %v5088_v38 = vadd.f32 %v5087_v19, %v4999_v32 }
 0x803   :  { %v5253_v34 = vpack.c.bf16 %v5088_v38, %v4821_v6 }
 0x805   :  { %v7341_v9 = vunpack.c.l.b16 %v5253_v34  ;;  %v8052_v52 = vrot.slane %v5253_v34, 4 }
 0x806   :  { %v5001_v57 = vpop.f32.mrf.mxu2  ;;  %v5090_v56 = vpop.f32.mrf.mxu3 }
 0x807   :  { %v14695_v53 = vunpack.c.l.b16 %v8052_v52  ;;  %v5002_v46 = vadd.f32 %v5001_v57, %v4913_v33  ;;  %v4825_v25 = vpop.f32.mrf.mxu0  ;;  %v14697_v40 = vpack.c.b16 %v7341_v9, %v7340_v54  ;;  %v4914_v39 = vpop.f32.mrf.mxu1 }
 0x808   :  { %v4915_v30 = vadd.f32 %v4914_v39, %v14486_v8  ;;  %v4826_v34 = vadd.f32 %v4825_v25, %v14427_v7 }
 0x809   :  { %v5091_v22 = vadd.f32 %v5090_v56, %v5002_v46 }
 0x80b   :  { %v5255_v32 = vpack.c.bf16 %v5091_v22, %v4824_v42 }
 0x80d   :  { %v8083_v54 = vrot.slane %v5255_v32, 4  ;;  %v7372_v57 = vunpack.c.l.b16 %v5255_v32 }
 0x80e   :  { %v5003_v19 = vpop.f32.mrf.mxu2  ;;  %v5092_v12 = vpop.f32.mrf.mxu3 }
 0x80f   :  { %v5004_v31 = vadd.f32 %v5003_v19, %v4915_v30  ;;  %v4828_v6 = vpop.f32.mrf.mxu0  ;;  %v4917_v45 = vpop.f32.mrf.mxu1  ;;  %v14705_v22 = vunpack.c.l.b16 %v8083_v54 }
 0x810   :  { %v4829_v38 = vadd.f32 %v4828_v6, %v14438_v62  ;;  %v4918_v52 = vadd.f32 %v4917_v45, %v14486_v8 }
 0x811   :  { %v5093_v33 = vadd.f32 %v5092_v12, %v5004_v31  ;;  %16933 = vst [vmem:[#allocation71_spill] sm:$0xff] %v14705_v22 }
 0x813   :  { %v5257_v9 = vpack.c.bf16 %v5093_v33, %v4826_v34 }
 0x815   :  { %v7373_v46 = vunpack.c.l.b16 %v5257_v9  ;;  %v8084_v56 = vrot.slane %v5257_v9, 4 }
 0x816   :  { %v5006_v42 = vpop.f32.mrf.mxu2  ;;  %v5095_v30 = vpop.f32.mrf.mxu3 }
 0x817   :  { %v5007_v39 = vadd.f32 %v5006_v42, %v4918_v52  ;;  %v4830_v19 = vpop.f32.mrf.mxu0  ;;  %v14707_v21 = vpack.c.b16 %v7373_v46, %v7372_v57  ;;  %v14709_v62 = vunpack.c.l.b16 %v8084_v56  ;;  %v4919_v6 = vpop.f32.mrf.mxu1 }
 0x818   :  { %v4920_v32 = vadd.f32 %v4919_v6, %v14486_v8  ;;  %v4831_v52 = vadd.f32 %v4830_v19, %v14449_v63 }
 0x819   :  { %16934 = vst [vmem:[#allocation118_spill] sm:$0xff] %v14709_v62  ;;  %v5096_v7 = vadd.f32 %v5095_v30, %v5007_v39 }
 0x81b   :  { %v5259_v31 = vpack.c.bf16 %v5096_v7, %v4829_v38 }
 0x81d   :  { %v8085_v46 = vrot.slane %v5259_v31, 4  ;;  %v7374_v39 = vunpack.c.l.b16 %v5259_v31 }
 0x81e   :  { %v5008_v12 = vpop.f32.mrf.mxu2  ;;  %v5097_v34 = vpop.f32.mrf.mxu3 }
 0x81f   :  { %v5009_v45 = vadd.f32 %v5008_v12, %v4920_v32  ;;  %v4833_v33 = vpop.f32.mrf.mxu0  ;;  %v4922_v9 = vpop.f32.mrf.mxu1  ;;  %v14717_v7 = vunpack.c.l.b16 %v8085_v46 }
 0x820   :  { %v4834_v54 = vadd.f32 %v4833_v33, %v14460_v11  ;;  %v4923_v42 = vadd.f32 %v4922_v9, %v14486_v8 }
 0x821   :  { %v5098_v57 = vadd.f32 %v5097_v34, %v5009_v45  ;;  %16935 = vst [vmem:[#allocation218_spill] sm:$0xff] %v14717_v7 }
 0x823   :  { %v5261_v56 = vpack.c.bf16 %v5098_v57, %v4831_v52 }
 0x825   :  { %v7375_v30 = vunpack.c.l.b16 %v5261_v56  ;;  %v8086_v25 = vrot.slane %v5261_v56, 4  ;;  %v16937_v56 = vld [vmem:[#allocation127_spill] sm:$0xff] }
 0x826   :  { %v5011_v38 = vpop.f32.mrf.mxu2  ;;  %v5100_v12 = vpop.f32.mrf.mxu3 }
 0x827   :  { %v14719_v6 = vunpack.c.l.b16 %v8086_v25  ;;  %v5012_v32 = vadd.f32 %v5011_v38, %v4923_v42  ;;  %v4835_v58 = vpop.f32.mrf.mxu0  ;;  %v14721_v11 = vpack.c.b16 %v7375_v30, %v7374_v39  ;;  %v4924_v33 = vpop.f32.mrf.mxu1 }
 0x828   :  { %v4925_v31 = vadd.f32 %v4924_v33, %v14486_v8  ;;  %v4836_v42 = vadd.f32 %v4835_v58, %v16937_v56 }
 0x829   :  { %16936 = vst [vmem:[#allocation128_spill] sm:$0xff] %v14719_v6  ;;  %v5101_v63 = vadd.f32 %v5100_v12, %v5012_v32 }
 0x82b   :  { %v5263_v45 = vpack.c.bf16 %v5101_v63, %v4834_v54 }
 0x82d   :  { %v8117_v39 = vrot.slane %v5263_v45, 4  ;;  %v7406_v12 = vunpack.c.l.b16 %v5263_v45 }
 0x82e   :  { %v5013_v34 = vpop.f32.mrf.mxu2  ;;  %v5102_v52 = vpop.f32.mrf.mxu3 }
 0x82f   :  { %v5014_v9 = vadd.f32 %v5013_v34, %v4925_v31  ;;  %v4838_v57 = vpop.f32.mrf.mxu0  ;;  %v4927_v46 = vpop.f32.mrf.mxu1  ;;  %v14729_v63 = vunpack.c.l.b16 %v8117_v39 }
 0x830   :  { %v4839_v25 = vadd.f32 %v4838_v57, %v14482_v27  ;;  %v4928_v32 = vadd.f32 %v4927_v46, %v14486_v8 }
 0x831   :  { %v5103_v38 = vadd.f32 %v5102_v52, %v5014_v9  ;;  %16938 = vst [vmem:[#allocation79_spill] sm:$0xff] %v14729_v63 }
 0x833   :  { %v5265_v30 = vpack.c.bf16 %v5103_v38, %v4836_v42 }
 0x835   :  { %v7407_v47 = vunpack.c.l.b16 %v5265_v30  ;;  %v8118_v19 = vrot.slane %v5265_v30, 4  ;;  %v16940_v30 = vld [vmem:[#allocation152_spill] sm:$0xff] }
 0x836   :  { %v5016_v54 = vpop.f32.mrf.mxu2  ;;  %v5105_v31 = vpop.f32.mrf.mxu3 }
 0x837   :  { %v5017_v33 = vadd.f32 %v5016_v54, %v4928_v32  ;;  %v4840_v34 = vpop.f32.mrf.mxu0  ;;  %v14731_v10 = vpack.c.b16 %v7407_v47, %v7406_v12  ;;  %v14733_v27 = vunpack.c.l.b16 %v8118_v19  ;;  %v4929_v57 = vpop.f32.mrf.mxu1 }
 0x838   :  { %v4930_v45 = vadd.f32 %v4929_v57, %v14486_v8  ;;  %v4841_v19 = vadd.f32 %v4840_v34, %v16940_v30 }
 0x839   :  { %16939 = vst [vmem:[#allocation77_spill] sm:$0xff] %v14733_v27  ;;  %v5106_v58 = vadd.f32 %v5105_v31, %v5017_v33 }
 0x83b   :  { %v5267_v52 = vpack.c.bf16 %v5106_v58, %v4839_v25 }
 0x83d   :  { %v8119_v25 = vrot.slane %v5267_v52, 4  ;;  %v7408_v8 = vunpack.c.l.b16 %v5267_v52 }
 0x83e   :  { %v5018_v46 = vpop.f32.mrf.mxu2  ;;  %v5107_v42 = vpop.f32.mrf.mxu3 }
 0x83f   :  { %v5019_v56 = vadd.f32 %v5018_v46, %v4930_v45  ;;  %v5297_v38 = vpop.f32.mrf.mxu0  ;;  %v14738_v39 = vpop.f32.mrf.mxu1  ;;  %v14744_v58 = vunpack.c.l.b16 %v8119_v25 }
 0x840   :  { %v5527_v47 = vsel %vm5526_vm0, %v5297_v38, -inf  ;;  %v5533_v12 = vsel %vm5526_vm0, %v14738_v39, -inf }
 0x841   :  { %v5108_v32 = vadd.f32 %v5107_v42, %v5019_v56  ;;  %5528 = vmax.xlane.f32.xlu0 %v5527_v47  ;;  %5534 = vmax.xlane.f32.xlu2 %v5533_v12  ;;  %16941 = vst [vmem:[#allocation219_spill] sm:$0xff] %v14744_v58 }
 0x843   :  { %v5269_v54 = vpack.c.bf16 %v5108_v32, %v4841_v19 }
 0x845   :  { %v7409_v33 = vunpack.c.l.b16 %v5269_v54  ;;  %v8120_v31 = vrot.slane %v5269_v54, 4 }
 0x846   :  { %v5361_v57 = vpop.f32.mrf.mxu2  ;;  %v5393_v46 = vpop.f32.mrf.mxu3 }
 0x847   :  { %v14746_v45 = vunpack.c.l.b16 %v8120_v31  ;;  %v5539_v9 = vsel %vm5526_vm0, %v5361_v57, -inf  ;;  %v5299_v34 = vpop.f32.mrf.mxu0  ;;  %v14749_v56 = vpack.c.b16 %v7409_v33, %v7408_v8  ;;  %v5545_v47 = vsel %vm5526_vm0, %v5393_v46, -inf  ;;  %v14755_v30 = vpop.f32.mrf.mxu1 }
 0x848   :  { %5540 = vmax.xlane.f32.xlu1 %v5539_v9  ;;  %v5530_v42 = vsel %vm5526_vm0, %v5299_v34, -inf  ;;  %v5536_v54 = vsel %vm5526_vm0, %v14755_v30, -inf }
 0x849   :  { %16942 = vst [vmem:[#allocation220_spill] sm:$0xff] %v14746_v45  ;;  %5531 = vmax.xlane.f32.xlu0 %v5530_v42  ;;  %5546 = vmax.xlane.f32.xlu2 %v5545_v47 }
 0x84e   :  { %v5363_v19 = vpop.f32.mrf.mxu2  ;;  %v14762_v25 = vpop.f32.mrf.mxu3 }
 0x84f   :  { %v5542_v32 = vsel %vm5526_vm0, %v5363_v19, -inf  ;;  %v14758_v12 = vpop.f32.mrf.mxu0  ;;  %v5548_v31 = vsel %vm5526_vm0, %v14762_v25, -inf  ;;  %v14774_v47 = vpop.f32.mrf.mxu1 }
 0x850   :  { %5543 = vmax.xlane.f32.xlu1 %v5542_v32  ;;  %v5551_v9 = vsel %vm5526_vm0, %v14758_v12, -inf }
 0x851   :  { %5552 = vmax.xlane.f32.xlu0 %v5551_v9  ;;  %5537 = vmax.xlane.f32.xlu2 %v5536_v54  ;;  %v5557_v54 = vsel %vm5526_vm0, %v14774_v47, -inf }
 0x856   :  { %v14766_v8 = vpop.f32.mrf.mxu2  ;;  %v14776_v32 = vpop.f32.mrf.mxu3 }
 0x857   :  { %v14768_v33 = vpop.f32.mrf.mxu0  ;;  %v5563_v3 = vsel %vm5526_vm0, %v14766_v8, -inf  ;;  %v5569_v55 = vsel %vm5526_vm0, %v14776_v32, -inf }
 0x858   :  { %v5554_v42 = vsel %vm5526_vm0, %v14768_v33, -inf }
 0x859   :  { %5549 = vmax.xlane.f32.xlu0 %v5548_v31  ;;  %5555 = vmax.xlane.f32.xlu1 %v5554_v42  ;;  %v14786_v31 = vpop.f32.mrf.mxu1 }
 0x85e   :  { %v14778_v52 = vpop.f32.mrf.mxu2  ;;  %v14788_v42 = vpop.f32.mrf.mxu3 }
 0x85f   :  { %v5566_v9 = vsel %vm5526_vm0, %v14778_v52, -inf  ;;  %v5572_v20 = vsel %vm5526_vm0, %v14788_v42, -inf }
 0x860   :  { %5567 = vmax.xlane.f32.xlu2 %v5566_v9  ;;  %v5560_v9 = vsel %vm5526_vm0, %v14786_v31, -inf }
 0x861   :  { %5558 = vmax.xlane.f32.xlu0 %v5557_v54  ;;  %5564 = vmax.xlane.f32.xlu1 %v5563_v3 }
 0x868   :  { %5570 = vmax.xlane.f32.xlu2 %v5569_v55 }
 0x869   :  { %5573 = vmax.xlane.f32.xlu0 %v5572_v20  ;;  %5561 = vmax.xlane.f32.xlu1 %v5560_v9 }
 0x8b4   :  { %v5529_v61 = vpop.xlane.xlu0 %5528  ;;  %v5535_v63 = vpop.xlane.xlu2 %5534 }
 0x8b5   :  { %v5575_v54 = vsub.f32 %v5297_v38, %v5529_v61  ;;  %v5577_v26 = vsub.f32 %v14738_v39, %v5535_v63 }
 0x8b7   :  { %v5591_v3 = vmul.f32 1.442695, %v5575_v54  ;;  %v5595_v38 = vmul.f32 1.442695, %v5577_v26 }
 0x8b9   :  { %11815 = vpow2.f32 %v5591_v3 }
 0x8bb   :  { %v5541_v27 = vpop.xlane.xlu1 %5540 }
 0x8bc   :  { %v5579_v58 = vsub.f32 %v5361_v57, %v5541_v27  ;;  %v5532_v45 = vpop.xlane.xlu0 %5531  ;;  %v5547_v22 = vpop.xlane.xlu2 %5546 }
 0x8bd   :  { %v5576_v62 = vsub.f32 %v5299_v34, %v5532_v45  ;;  %v5581_v55 = vsub.f32 %v5393_v46, %v5547_v22 }
 0x8be   :  { %v5599_v7 = vmul.f32 1.442695, %v5579_v58 }
 0x8bf   :  { %v14796_v6 = vpop.eup %11815  ;;  %v5593_v15 = vmul.f32 1.442695, %v5576_v62  ;;  %v5603_v61 = vmul.f32 1.442695, %v5581_v55 }
 0x8c0   :  { %11817 = vpow2.f32 %v5599_v7  ;;  %v5623_v20 = vsel %vm5526_vm0, %v14796_v6, 0.0 }
 0x8c1   :  { %11819 = vpow2.f32 %v5593_v15  ;;  %5624 = vadd.xlane.f32.xlu1 %v5623_v20 }
 0x8c2   :  { %11821 = vpow2.f32 %v5603_v61 }
 0x8c3   :  { %v5544_v9 = vpop.xlane.xlu1 %5543  ;;  %11823 = vpow2.f32 %v5595_v38 }
 0x8c4   :  { %v5580_v27 = vsub.f32 %v5363_v19, %v5544_v9  ;;  %v5553_v57 = vpop.xlane.xlu0 %5552  ;;  %v5538_v54 = vpop.xlane.xlu2 %5537 }
 0x8c5   :  { %v5583_v58 = vsub.f32 %v14758_v12, %v5553_v57  ;;  %v5578_v62 = vsub.f32 %v14755_v30, %v5538_v54 }
 0x8c6   :  { %v14802_v22 = vpop.eup %11817  ;;  %v5601_v45 = vmul.f32 1.442695, %v5580_v27 }
 0x8c7   :  { %v14805_v7 = vpop.eup %11819  ;;  %v5635_v15 = vsel %vm5526_vm0, %v14802_v22, 0.0  ;;  %v5607_v63 = vmul.f32 1.442695, %v5583_v58  ;;  %v5597_v39 = vmul.f32 1.442695, %v5578_v62 }
 0x8c8   :  { %11825 = vpow2.f32 %v5601_v45  ;;  %5636 = vadd.xlane.f32.xlu0 %v5635_v15  ;;  %v5626_v26 = vsel %vm5526_vm0, %v14805_v7, 0.0  ;;  %v14811_v46 = vpop.eup %11821 }
 0x8c9   :  { %5627 = vadd.xlane.f32.xlu2 %v5626_v26  ;;  %v14813_v12 = vpop.eup %11823  ;;  %11827 = vpow2.f32 %v5607_v63  ;;  %v5641_v61 = vsel %vm5526_vm0, %v14811_v46, 0.0 }
 0x8ca   :  { %11829 = vpow2.f32 %v5597_v39  ;;  %v5629_v9 = vsel %vm5526_vm0, %v14813_v12, 0.0 }
 0x8cc   :  { %v5550_v34 = vpop.xlane.xlu0 %5549  ;;  %v5556_v19 = vpop.xlane.xlu1 %5555 }
 0x8cd   :  { %v5584_v30 = vsub.f32 %v14768_v33, %v5556_v19  ;;  %v5582_v55 = vsub.f32 %v14762_v25, %v5550_v34 }
 0x8ce   :  { %v14816_v3 = vpop.eup %11825 }
 0x8cf   :  { %v5609_v20 = vmul.f32 1.442695, %v5584_v30  ;;  %v5638_v38 = vsel %vm5526_vm0, %v14816_v3, 0.0  ;;  %v5605_v27 = vmul.f32 1.442695, %v5582_v55  ;;  %v14825_v33 = vpop.eup %11827 }
 0x8d0   :  { %5642 = vadd.xlane.f32.xlu0 %v5641_v61  ;;  %5639 = vadd.xlane.f32.xlu1 %v5638_v38  ;;  %v14827_v54 = vpop.eup %11829  ;;  %v5647_v34 = vsel %vm5526_vm0, %v14825_v33, 0.0 }
 0x8d1   :  { %5630 = vadd.xlane.f32.xlu2 %v5629_v9  ;;  %11831 = vpow2.f32 %v5609_v20  ;;  %v5632_v39 = vsel %vm5526_vm0, %v14827_v54, 0.0 }
 0x8d2   :  { %11833 = vpow2.f32 %v5605_v27 }
 0x8d3   :  { %v5568_v57 = vpop.xlane.xlu2 %5567 }
 0x8d4   :  { %v5588_v25 = vsub.f32 %v14778_v52, %v5568_v57  ;;  %v5559_v58 = vpop.xlane.xlu0 %5558  ;;  %v5565_v45 = vpop.xlane.xlu1 %5564 }
 0x8d5   :  { %v5587_v62 = vsub.f32 %v14766_v8, %v5565_v45  ;;  %v5585_v26 = vsub.f32 %v14774_v47, %v5559_v58 }
 0x8d6   :  { %v5617_v15 = vmul.f32 1.442695, %v5588_v25 }
 0x8d7   :  { %v5615_v63 = vmul.f32 1.442695, %v5587_v62  ;;  %v14836_v19 = vpop.eup %11831  ;;  %v5611_v8 = vmul.f32 1.442695, %v5585_v26 }
 0x8d8   :  { %11835 = vpow2.f32 %v5617_v15  ;;  %5633 = vadd.xlane.f32.xlu0 %v5632_v39  ;;  %5648 = vadd.xlane.f32.xlu1 %v5647_v34  ;;  %v5650_v52 = vsel %vm5526_vm0, %v14836_v19, 0.0  ;;  %v14840_v47 = vpop.eup %11833 }
 0x8d9   :  { %11837 = vpow2.f32 %v5615_v63  ;;  %5651 = vadd.xlane.f32.xlu2 %v5650_v52  ;;  %v5644_v45 = vsel %vm5526_vm0, %v14840_v47, 0.0 }
 0x8da   :  { %11839 = vpow2.f32 %v5611_v8 }
 0x8db   :  { %v5571_v30 = vpop.xlane.xlu2 %5570 }
 0x8dc   :  { %v5589_v55 = vsub.f32 %v14776_v32, %v5571_v30  ;;  %v5574_v20 = vpop.xlane.xlu0 %5573  ;;  %v5562_v61 = vpop.xlane.xlu1 %5561 }
 0x8dd   :  { %v5586_v38 = vsub.f32 %v14786_v31, %v5562_v61  ;;  %v5590_v57 = vsub.f32 %v14788_v42, %v5574_v20 }
 0x8de   :  { %v14844_v9 = vpop.eup %11835  ;;  %v5619_v27 = vmul.f32 1.442695, %v5589_v55 }
 0x8df   :  { %v5613_v25 = vmul.f32 1.442695, %v5586_v38  ;;  %v5662_v58 = vsel %vm5526_vm0, %v14844_v9, 0.0  ;;  %v14851_v62 = vpop.eup %11837  ;;  %v5621_v31 = vmul.f32 1.442695, %v5590_v57 }
 0x8e0   :  { %11841 = vpow2.f32 %v5619_v27  ;;  %5663 = vadd.xlane.f32.xlu0 %v5662_v58  ;;  %5645 = vadd.xlane.f32.xlu1 %v5644_v45  ;;  %v5659_v32 = vsel %vm5526_vm0, %v14851_v62, 0.0  ;;  %v14855_v15 = vpop.eup %11839 }
 0x8e1   :  { %11843 = vpow2.f32 %v5613_v25  ;;  %5660 = vadd.xlane.f32.xlu2 %v5659_v32  ;;  %v5653_v63 = vsel %vm5526_vm0, %v14855_v15, 0.0 }
 0x8e2   :  { %11845 = vpow2.f32 %v5621_v31 }
 0x8e6   :  { %v14857_v42 = vpop.eup %11841 }
 0x8e7   :  { %v5665_v26 = vsel %vm5526_vm0, %v14857_v42, 0.0  ;;  %v14863_v39 = vpop.eup %11843 }
 0x8e8   :  { %5666 = vadd.xlane.f32.xlu0 %v5665_v26  ;;  %5654 = vadd.xlane.f32.xlu1 %v5653_v63  ;;  %v5656_v34 = vsel %vm5526_vm0, %v14863_v39, 0.0  ;;  %v14867_v52 = vpop.eup %11845 }
 0x8e9   :  { %5657 = vadd.xlane.f32.xlu2 %v5656_v34  ;;  %v5668_v8 = vsel %vm5526_vm0, %v14867_v52, 0.0 }
 0x8f0   :  { %5669 = vadd.xlane.f32.xlu1 %v5668_v8 }
 0x934   :  { %v5625_v30 = vpop.xlane.xlu1 %5624 }
 0x935   :  { %11847 = vrcp.f32 %v5625_v30 }
 0x93b   :  { %v5637_v55 = vpop.xlane.xlu0 %5636  ;;  %v11848_v61 = vpop.eup %11847 }
 0x93c   :  { %v5628_v20 = vpop.xlane.xlu2 %5627  ;;  %v5687_v38 = vmul.f32 %v11848_v61, %v14796_v6 }
 0x93d   :  { %11849 = vrcp.f32 %v5628_v20 }
 0x93e   :  { %11851 = vrcp.f32 %v5637_v55  ;;  %v5703_v58 = vpack.c.bf16 %v5687_v38, %v5687_v38  ;;  %v16943_v38 = vld [vmem:[#allocation151_spill] sm:$0xff] }
 0x940   :  { %v5721_v63 = vunpack.c.l.b16 %v5703_v58 }
 0x943   :  { %v11850_v27 = vpop.eup %11849  ;;  %v5643_v57 = vpop.xlane.xlu0 %5642 }
 0x944   :  { %v5640_v25 = vpop.xlane.xlu1 %5639  ;;  %v5688_v45 = vmul.f32 %v11850_v27, %v14805_v7  ;;  %v5631_v32 = vpop.xlane.xlu2 %5630  ;;  %v16944_v27 = vld [vmem:[#allocation150_spill] sm:$0xff] }
 0x945   :  { %v11852_v31 = vpop.eup %11851  ;;  %11853 = vrcp.f32 %v5640_v25  ;;  %v16945_v25 = vpack.c.b16 %v16943_v38, %v16944_v27  ;;  %v16949_v38 = vld [vmem:[#allocation149_spill] sm:$0xff] }
 0x946   :  { %v5704_v26 = vpack.c.bf16 %v5688_v45, %v5688_v45  ;;  %11855 = vrcp.f32 %v5631_v32  ;;  %v5691_v34 = vmul.f32 %v11852_v31, %v14802_v22 }
 0x948   :  { %v5722_v8 = vunpack.c.l.b16 %v5704_v26  ;;  %v5707_v61 = vpack.c.bf16 %v5691_v34, %v5691_v34 }
 0x94a   :  { %v5723_v30 = vpack.c.b16 %v5722_v8, %v5721_v63  ;;  %v5789_v45 = vunpack.c.l.b16 %v5707_v61 }
 0x94b   :  { %v11854_v20 = vpop.eup %11853  ;;  %v5634_v55 = vpop.xlane.xlu0 %5633 }
 0x94c   :  { %v5649_v16 = vpop.xlane.xlu1 %5648  ;;  %v11856_v6 = vpop.eup %11855  ;;  %v5692_v51 = vmul.f32 %v11854_v20, %v14816_v3  ;;  %11857 = vrcp.f32 %v5634_v55  ;;  %10929 = vmatmul.msk.bf16.vlgmr.msrb.gmra.mxu0 %vm5526_vm0, %v5723_v30  ;;  %v16946_v55 = vld [vmem:[#allocation121_spill] sm:$0xff] }
 0x94d   :  { %11859 = vrcp.f32 %v5649_v16  ;;  %v5652_v7 = vpop.xlane.xlu2 %5651  ;;  %6015 = vmatpush.bf16.xpose.msrb.mxu0 %v16945_v25  ;;  %v5689_v22 = vmul.f32 %v11856_v6, %v14813_v12  ;;  %v16947_v6 = vld [vmem:[#allocation122_spill] sm:$0xff] }
 0x94e   :  { %v5708_v58 = vpack.c.bf16 %v5692_v51, %v5692_v51  ;;  %11861 = vrcp.f32 %v5652_v7  ;;  %v16948_v61 = vpack.c.b16 %v16946_v55, %v16947_v6 }
 0x94f   :  { %11863 = vrcp.f32 %v5643_v57  ;;  %v5705_v3 = vpack.c.bf16 %v5689_v22, %v5689_v22 }
 0x950   :  { %v5790_v32 = vunpack.c.l.b16 %v5708_v58 }
 0x952   :  { %v11858_v31 = vpop.eup %11857  ;;  %v5791_v26 = vpack.c.b16 %v5790_v32, %v5789_v45 }
 0x953   :  { %v11860_v63 = vpop.eup %11859  ;;  %v5690_v34 = vmul.f32 %v11858_v31, %v14827_v54  ;;  %v5664_v8 = vpop.xlane.xlu0 %5663  ;;  %v16950_v54 = vld [vmem:[#allocation147_spill] sm:$0xff] }
 0x954   :  { %v5646_v16 = vpop.xlane.xlu1 %5645  ;;  %v11862_v30 = vpop.eup %11861  ;;  %v5695_v20 = vmul.f32 %v11860_v63, %v14825_v33  ;;  %11865 = vrcp.f32 %v5664_v8  ;;  %10931 = vmatmul.msk.bf16.vlgmr.msrb.gmra.mxu2 %vm5526_vm0, %v5791_v26  ;;  %v16951_v27 = vpack.c.b16 %v16949_v38, %v16950_v54  ;;  %v5755_v33 = vunpack.c.l.b16 %v5705_v3 }
 0x955   :  { %v11864_v51 = vpop.eup %11863  ;;  %v5706_v57 = vpack.c.bf16 %v5690_v34, %v5690_v34  ;;  %v5696_v12 = vmul.f32 %v11862_v30, %v14836_v19  ;;  %6079 = vmatpush.bf16.xpose.msrb.mxu2 %v16948_v61  ;;  %11867 = vrcp.f32 %v5646_v16  ;;  %v5661_v7 = vpop.xlane.xlu2 %5660  ;;  %v16955_v61 = vld [vmem:[#allocation117_spill] sm:$0xff] }
 0x956   :  { %6016 = vmatpush.bf16.xpose.msrb.mxu0 %v16951_v27  ;;  %v5711_v25 = vpack.c.bf16 %v5695_v20, %v5695_v20  ;;  %11869 = vrcp.f32 %v5661_v7  ;;  %v5693_v45 = vmul.f32 %v11864_v51, %v14811_v46  ;;  %v16956_v7 = vld [vmem:[#allocation114_spill] sm:$0xff] }
 0x957   :  { %v5756_v58 = vunpack.c.l.b16 %v5706_v57  ;;  %v5712_v22 = vpack.c.bf16 %v5696_v12, %v5696_v12  ;;  %v16952_v57 = vld [vmem:[#allocation110_spill] sm:$0xff]  ;;  %v16953_v12 = vld [vmem:[#allocation111_spill] sm:$0xff]  ;;  %v16957_v38 = vpack.c.b16 %v16955_v61, %v16956_v7  ;;  %v16971_v7 = vld [vmem:[#allocation140_spill] sm:$0xff] }
 0x958   :  { %v5857_v31 = vunpack.c.l.b16 %v5711_v25  ;;  %v5709_v20 = vpack.c.bf16 %v5693_v45, %v5693_v45  ;;  %v16954_v6 = vpack.c.b16 %v16952_v57, %v16953_v12  ;;  %v16958_v27 = vld [vmem:[#allocation134_spill] sm:$0xff] }
 0x959   :  { %v5757_v32 = vpack.c.b16 %v5756_v58, %v5755_v33  ;;  %v5858_v19 = vunpack.c.l.b16 %v5712_v22  ;;  %v16965_v57 = vld [vmem:[#allocation130_spill] sm:$0xff] }
 0x95a   :  { %v11866_v26 = vpop.eup %11865  ;;  %v5823_v58 = vunpack.c.l.b16 %v5709_v20 }
 0x95b   :  { %v11868_v63 = vpop.eup %11867  ;;  %v5859_v34 = vpack.c.b16 %v5858_v19, %v5857_v31  ;;  %v5700_v8 = vmul.f32 %v11866_v26, %v14844_v9  ;;  %10930 = vmatmul.msk.bf16.vlgmr.msrb.gmra.mxu1 %vm5526_vm0, %v5757_v32  ;;  %v5667_v16 = vpop.xlane.xlu0 %5666 }
 0x95c   :  { %v5655_v30 = vpop.xlane.xlu1 %5654  ;;  %v11870_v55 = vpop.eup %11869  ;;  %v5694_v3 = vmul.f32 %v11868_v63, %v14840_v47  ;;  %6047 = vmatpush.bf16.xpose.msrb.mxu1 %v16954_v6  ;;  %11871 = vrcp.f32 %v5667_v16  ;;  %v16959_v47 = vld [vmem:[#allocation48_spill] sm:$0xff] }
 0x95d   :  { %v5716_v46 = vpack.c.bf16 %v5700_v8, %v5700_v8  ;;  %v5699_v51 = vmul.f32 %v11870_v55, %v14851_v62  ;;  %6080 = vmatpush.bf16.xpose.msrb.mxu2 %v16957_v38  ;;  %11873 = vrcp.f32 %v5655_v30  ;;  %v5658_v9 = vpop.xlane.xlu2 %5657  ;;  %10933 = vmatmul.msk.bf16.vlgmr.msra.gmra.mxu0 %vm5526_vm0, %v5859_v34  ;;  %v16960_v25 = vpack.c.b16 %v16958_v27, %v16959_v47  ;;  %v16961_v34 = vld [vmem:[#allocation103_spill] sm:$0xff]  ;;  %v16962_v30 = vld [vmem:[#allocation101_spill] sm:$0xff] }
 0x95e   :  { %v5710_v54 = vpack.c.bf16 %v5694_v3, %v5694_v3  ;;  %11875 = vrcp.f32 %v5658_v9  ;;  %v16963_v55 = vpack.c.b16 %v16961_v34, %v16962_v30  ;;  %v16964_v3 = vld [vmem:[#allocation131_spill] sm:$0xff]  ;;  %v16982_v30 = vld [vmem:[#allocation160_spill] sm:$0xff] }
 0x95f   :  { %6143 = vmatpush.bf16.xpose.msra.mxu0 %v16960_v25  ;;  %v5715_v33 = vpack.c.bf16 %v5699_v51, %v5699_v51  ;;  %v5926_v45 = vunpack.c.l.b16 %v5716_v46  ;;  %v16966_v12 = vpack.c.b16 %v16964_v3, %v16965_v57  ;;  %v16967_v46 = vld [vmem:[#allocation156_spill] sm:$0xff] }
 0x960   :  { %v5824_v22 = vunpack.c.l.b16 %v5710_v54  ;;  %v16968_v51 = vld [vmem:[#allocation132_spill] sm:$0xff] }
 0x961   :  { %v5925_v32 = vunpack.c.l.b16 %v5715_v33  ;;  %v16969_v61 = vpack.c.b16 %v16967_v46, %v16968_v51  ;;  %v16986_v3 = vld [vmem:[#allocation204_spill] sm:$0xff] }
 0x962   :  { %v11872_v62 = vpop.eup %11871  ;;  %v5825_v31 = vpack.c.b16 %v5824_v22, %v5823_v58  ;;  %v16989_v46 = vld [vmem:[#allocation224_spill] sm:$0xff] }
 0x963   :  { %v11874_v19 = vpop.eup %11873  ;;  %v5927_v26 = vpack.c.b16 %v5926_v45, %v5925_v32  ;;  %v5701_v9 = vmul.f32 %v11872_v62, %v14857_v42  ;;  %v16973_v45 = vld [vmem:[#allocation154_spill] sm:$0xff]  ;;  %v16974_v32 = vld [vmem:[#allocation129_spill] sm:$0xff]  ;;  %v16980_v62 = vld [vmem:[#allocation60_spill] sm:$0xff] }
 0x964   :  { %v5670_v63 = vpop.xlane.xlu1 %5669  ;;  %v11876_v8 = vpop.eup %11875  ;;  %v5697_v16 = vmul.f32 %v11874_v19, %v14855_v15  ;;  %10932 = vmatmul.msk.bf16.vlgmr.msrb.gmra.mxu3 %vm5526_vm0, %v5825_v31  ;;  %6048 = vmatpush.bf16.xpose.msrb.mxu1 %v16963_v55  ;;  %v16970_v15 = vld [vmem:[#allocation142_spill] sm:$0xff]  ;;  %v16975_v31 = vpack.c.b16 %v16973_v45, %v16974_v32  ;;  %v16976_v19 = vld [vmem:[#allocation33_spill] sm:$0xff] }
 0x965   :  { %11877 = vrcp.f32 %v5670_v63  ;;  %v5698_v20 = vmul.f32 %v11876_v8, %v14863_v39  ;;  %6111 = vmatpush.bf16.xpose.msrb.mxu3 %v16966_v12  ;;  %10935 = vmatmul.msk.bf16.vlgmr.msra.gmra.mxu2 %vm5526_vm0, %v5927_v26  ;;  %v16972_v38 = vpack.c.b16 %v16970_v15, %v16971_v7  ;;  %v5717_v25 = vpack.c.bf16 %v5701_v9, %v5701_v9  ;;  %v16977_v26 = vld [vmem:[#allocation31_spill] sm:$0xff]  ;;  %v16979_v42 = vld [vmem:[#allocation137_spill] sm:$0xff]  ;;  %v16983_v55 = vld [vmem:[#allocation138_spill] sm:$0xff] }
 0x966   :  { %v5713_v6 = vpack.c.bf16 %v5697_v16, %v5697_v16  ;;  %v16978_v63 = vpack.c.b16 %v16976_v19, %v16977_v26  ;;  %v16981_v8 = vpack.c.b16 %v16979_v42, %v16980_v62  ;;  %v16992_v15 = vld [vmem:[#allocation146_spill] sm:$0xff]  ;;  %v16995_v9 = vld [vmem:[#allocation37_spill] sm:$0xff]  ;;  %v17007_v19 = vld [vmem:[#allocation144_spill] sm:$0xff] }
 0x967   :  { %6144 = vmatpush.bf16.xpose.msra.mxu0 %v16969_v61  ;;  %6207 = vmatpush.bf16.xpose.msra.mxu2 %v16972_v38  ;;  %v5714_v54 = vpack.c.bf16 %v5698_v20, %v5698_v20  ;;  %v5959_v16 = vunpack.c.l.b16 %v5717_v25  ;;  %v16985_v20 = vld [vmem:[#allocation203_spill] sm:$0xff]  ;;  %v16991_v61 = vld [vmem:[#allocation145_spill] sm:$0xff]  ;;  %v17010_v42 = vld [vmem:[#allocation34_spill] sm:$0xff] }
 0x968   :  { %v5891_v27 = vunpack.c.l.b16 %v5713_v6  ;;  %v16987_v57 = vpack.c.b16 %v16985_v20, %v16986_v3  ;;  %v16988_v6 = vld [vmem:[#allocation226_spill] sm:$0xff]  ;;  %v16993_v7 = vpack.c.b16 %v16991_v61, %v16992_v15  ;;  %v16994_v38 = vld [vmem:[#allocation39_spill] sm:$0xff]  ;;  %v17000_v25 = vld [vmem:[#allocation217_spill] sm:$0xff] }
 0x969   :  { %v5892_v39 = vunpack.c.l.b16 %v5714_v54  ;;  %v16990_v51 = vpack.c.b16 %v16988_v6, %v16989_v46  ;;  %v16996_v54 = vpack.c.b16 %v16994_v38, %v16995_v9  ;;  %v17004_v45 = vld [vmem:[#allocation213_spill] sm:$0xff]  ;;  %v17018_v20 = vld [vmem:[#allocation136_spill] sm:$0xff]  ;;  %v17019_v3 = vld [vmem:[#allocation123_spill] sm:$0xff] }
 0x96a   :  { %v17022_v6 = vld [vmem:[#allocation205_spill] sm:$0xff]  ;;  %v17025_v61 = vld [vmem:[#allocation27_spill] sm:$0xff]  ;;  %v17028_v38 = vld [vmem:[#allocation40_spill] sm:$0xff] }
 0x96b   :  { %v11878_v47 = vpop.eup %11877  ;;  %v5893_v33 = vpack.c.b16 %v5892_v39, %v5891_v27  ;;  %v16997_v27 = vld [vmem:[#allocation158_spill] sm:$0xff]  ;;  %v16998_v39 = vld [vmem:[#allocation135_spill] sm:$0xff] }
 0x96c   :  { %v5702_v58 = vmul.f32 %v11878_v47, %v14867_v52  ;;  %v16984_v52 = vpack.c.b16 %v16982_v30, %v16983_v55  ;;  %v16999_v47 = vpack.c.b16 %v16997_v27, %v16998_v39  ;;  %v17015_v30 = vld [vmem:[#allocation212_spill] sm:$0xff]  ;;  %v17016_v55 = vld [vmem:[#allocation209_spill] sm:$0xff] }
 0x96d   :  { %6112 = vmatpush.bf16.xpose.msrb.mxu3 %v16975_v31  ;;  %10934 = vmatmul.msk.bf16.vlgmr.msra.gmra.mxu1 %vm5526_vm0, %v5893_v33  ;;  %v17001_v33 = vld [vmem:[#allocation215_spill] sm:$0xff]  ;;  %v17006_v31 = vld [vmem:[#allocation161_spill] sm:$0xff]  ;;  %v17031_v27 = vld [vmem:[#allocation232_spill] sm:$0xff] }
 0x96e   :  { %v5718_v22 = vpack.c.bf16 %v5702_v58, %v5702_v58  ;;  %6017 = vmatmul.bf16.vlgmr.msrb.gmra.mxu0 %v16978_v63  ;;  %6175 = vmatpush.bf16.xpose.msra.mxu1 %v16981_v8  ;;  %v17002_v58 = vpack.c.b16 %v17000_v25, %v17001_v33  ;;  %v17008_v26 = vpack.c.b16 %v17006_v31, %v17007_v19  ;;  %v17009_v63 = vld [vmem:[#allocation36_spill] sm:$0xff]  ;;  %v17012_v8 = vld [vmem:[#allocation45_spill] sm:$0xff]  ;;  %v17034_v25 = vld [vmem:[#allocation23_spill] sm:$0xff] }
 0x96f   :  { %6208 = vmatpush.bf16.xpose.msra.mxu2 %v16984_v52  ;;  %6465 = vmatpush.bf16.msrb.mxu0 %v16987_v57  ;;  %v17011_v62 = vpack.c.b16 %v17009_v63, %v17010_v42  ;;  %v17017_v52 = vpack.c.b16 %v17015_v30, %v17016_v55  ;;  %v17020_v57 = vpack.c.b16 %v17018_v20, %v17019_v3  ;;  %v17040_v31 = vld [vmem:[#allocation230_spill] sm:$0xff]  ;;  %v17043_v63 = vld [vmem:[#allocation157_spill] sm:$0xff]  ;;  %v17052_v20 = vld [vmem:[#allocation139_spill] sm:$0xff] }
 0x970   :  { %v5960_v34 = vunpack.c.l.b16 %v5718_v22  ;;  %v17003_v22 = vld [vmem:[#allocation229_spill] sm:$0xff]  ;;  %v17049_v30 = vld [vmem:[#allocation162_spill] sm:$0xff] }
 0x971   :  { %v17005_v32 = vpack.c.b16 %v17003_v22, %v17004_v45  ;;  %v17037_v22 = vld [vmem:[#allocation143_spill] sm:$0xff] }
 0x972   :  { %v5961_v12 = vpack.c.b16 %v5960_v34, %v5959_v16  ;;  %v17013_v16 = vld [vmem:[#allocation43_spill] sm:$0xff] }
 0x973   :  { %6466 = vmatpush.bf16.msrb.mxu0 %v16990_v51  ;;  %v17014_v34 = vpack.c.b16 %v17012_v8, %v17013_v16  ;;  %v17024_v51 = vld [vmem:[#allocation26_spill] sm:$0xff]  ;;  %v17046_v8 = vld [vmem:[#allocation20_spill] sm:$0xff] }
 0x974   :  { %10936 = vmatmul.msk.bf16.vlgmr.msra.gmra.mxu3 %vm5526_vm0, %v5961_v12  ;;  %v17021_v12 = vld [vmem:[#allocation207_spill] sm:$0xff]  ;;  %v17026_v15 = vpack.c.b16 %v17024_v51, %v17025_v61 }
 0x975   :  { %6239 = vmatpush.bf16.xpose.msra.mxu3 %v16993_v7  ;;  %6081 = vmatmul.bf16.vlgmr.msrb.gmra.mxu2 %v16996_v54  ;;  %v17023_v46 = vpack.c.b16 %v17021_v12, %v17022_v6  ;;  %v17027_v7 = vld [vmem:[#allocation42_spill] sm:$0xff]  ;;  %v17030_v54 = vld [vmem:[#allocation233_spill] sm:$0xff]  ;;  %v17058_v51 = vld [vmem:[#allocation55_spill] sm:$0xff] }
 0x976   :  { %6176 = vmatpush.bf16.xpose.msra.mxu1 %v16999_v47  ;;  %v17029_v9 = vpack.c.b16 %v17027_v7, %v17028_v38  ;;  %v17032_v39 = vpack.c.b16 %v17030_v54, %v17031_v27  ;;  %v17033_v47 = vld [vmem:[#allocation22_spill] sm:$0xff]  ;;  %v17055_v12 = vld [vmem:[#allocation25_spill] sm:$0xff] }
 0x977   :  { %6533 = vmatpush.bf16.msrb.mxu2 %v17002_v58  ;;  %v17035_v33 = vpack.c.b16 %v17033_v47, %v17034_v25  ;;  %v17036_v58 = vld [vmem:[#allocation49_spill] sm:$0xff] }
 0x978   :  { %v17038_v45 = vpack.c.b16 %v17036_v58, %v17037_v22  ;;  %v17061_v7 = vld [vmem:[#allocation29_spill] sm:$0xff] }
 0x97b   :  { %6534 = vmatpush.bf16.msrb.mxu2 %v17005_v32  ;;  %v17039_v32 = vld [vmem:[#allocation231_spill] sm:$0xff] }
 0x97c   :  { %v17041_v19 = vpack.c.b16 %v17039_v32, %v17040_v31 }
 0x97d   :  { %6240 = vmatpush.bf16.xpose.msra.mxu3 %v17008_v26  ;;  %6049 = vmatmul.bf16.vlgmr.msrb.gmra.mxu1 %v17011_v62  ;;  %v17042_v26 = vld [vmem:[#allocation159_spill] sm:$0xff] }
 0x97e   :  { %6145 = vmatmul.bf16.vlgmr.msra.gmra.mxu0 %v17014_v34  ;;  %6499 = vmatpush.bf16.msrb.mxu1 %v17017_v52  ;;  %v17044_v42 = vpack.c.b16 %v17042_v26, %v17043_v63  ;;  %v17045_v62 = vld [vmem:[#allocation47_spill] sm:$0xff]  ;;  %v17051_v52 = vld [vmem:[#allocation141_spill] sm:$0xff] }
 0x97f   :  { %6601 = vmatpush.bf16.msra.mxu0 %v17020_v57  ;;  %v17047_v16 = vpack.c.b16 %v17045_v62, %v17046_v8  ;;  %v17048_v34 = vld [vmem:[#allocation155_spill] sm:$0xff]  ;;  %v17053_v3 = vpack.c.b16 %v17051_v52, %v17052_v20  ;;  %v17054_v57 = vld [vmem:[#allocation28_spill] sm:$0xff] }
 0x980   :  { %v17050_v55 = vpack.c.b16 %v17048_v34, %v17049_v30  ;;  %v17056_v6 = vpack.c.b16 %v17054_v57, %v17055_v12 }
 0x982   :  { %6500 = vmatpush.bf16.msrb.mxu1 %v17023_v46  ;;  %v17057_v46 = vld [vmem:[#allocation53_spill] sm:$0xff] }
 0x983   :  { %6602 = vmatpush.bf16.msra.mxu0 %v17026_v15  ;;  %v17059_v61 = vpack.c.b16 %v17057_v46, %v17058_v51  ;;  %v17060_v15 = vld [vmem:[#allocation126_spill] sm:$0xff] }
 0x984   :  { %6113 = vmatmul.bf16.vlgmr.msrb.gmra.mxu3 %v17029_v9  ;;  %v17062_v38 = vpack.c.b16 %v17060_v15, %v17061_v7 }
 0x985   :  { %6567 = vmatpush.bf16.msrb.mxu3 %v17032_v39  ;;  %6209 = vmatmul.bf16.vlgmr.msra.gmra.mxu2 %v17035_v33 }
 0x986   :  { %6669 = vmatpush.bf16.msra.mxu2 %v17038_v45 }
 0x989   :  { %6568 = vmatpush.bf16.msrb.mxu3 %v17041_v19 }
 0x98a   :  { %6670 = vmatpush.bf16.msra.mxu2 %v17044_v42 }
 0x98d   :  { %6177 = vmatmul.bf16.vlgmr.msra.gmra.mxu1 %v17047_v16 }
 0x98e   :  { %6635 = vmatpush.bf16.msra.mxu1 %v17050_v55 }
 0x992   :  { %6636 = vmatpush.bf16.msra.mxu1 %v17053_v3 }
 0x994   :  { %6241 = vmatmul.bf16.vlgmr.msra.gmra.mxu3 %v17056_v6 }
 0x995   :  { %6703 = vmatpush.bf16.msra.mxu3 %v17059_v61 }
 0x999   :  { %6704 = vmatpush.bf16.msra.mxu3 %v17062_v38 }
 0x9c9   :  { %v15015_v9 = vpop.f32.mrf.mxu0 }
 0x9d1   :  { %v15017_v54 = vpop.f32.mrf.mxu0 }
 0x9d7   :  { %v15019_v27 = vpop.f32.mrf.mxu2 }
 0x9d8   :  { %17063 = vst [vmem:[#allocation85_spill] sm:$0xff] %v15019_v27  ;;  %v15021_v39 = vpop.f32.mrf.mxu1 }
 0x9d9   :  { %17064 = vst [vmem:[#allocation83_spill] sm:$0xff] %v15021_v39 }
 0x9da   :  { %v15023_v47 = vpop.f32.mrf.mxu0 }
 0x9db   :  { %17065 = vst [vmem:[#allocation84_spill] sm:$0xff] %v15023_v47 }
 0x9df   :  { %v15025_v25 = vpop.f32.mrf.mxu2 }
 0x9e0   :  { %17066 = vst [vmem:[#allocation221_spill] sm:$0xff] %v15025_v25  ;;  %v15027_v33 = vpop.f32.mrf.mxu1 }
 0x9e1   :  { %17067 = vst [vmem:[#allocation222_spill] sm:$0xff] %v15027_v33 }
 0x9e2   :  { %v15029_v58 = vpop.f32.mrf.mxu0 }
 0x9e3   :  { %17068 = vst [vmem:[#allocation223_spill] sm:$0xff] %v15029_v58 }
 0x9e7   :  { %v15031_v22 = vpop.f32.mrf.mxu3 }
 0x9e8   :  { %17069 = vst [vmem:[#allocation91_spill] sm:$0xff] %v15031_v22  ;;  %v15033_v45 = vpop.f32.mrf.mxu2 }
 0x9e9   :  { %17070 = vst [vmem:[#allocation89_spill] sm:$0xff] %v15033_v45 }
 0x9ea   :  { %v15035_v32 = vpop.f32.mrf.mxu1 }
 0x9eb   :  { %17071 = vst [vmem:[#allocation90_spill] sm:$0xff] %v15035_v32  ;;  %v6018_v31 = vpop.f32.mrf.mxu0 }
 0x9ec   :  { %v6247_v19 = vsel %vm5526_vm0, %v6018_v31, -inf }
 0x9ed   :  { %6248 = vmax.xlane.f32.xlu2 %v6247_v19 }
 0x9ef   :  { %v15038_v26 = vpop.f32.mrf.mxu3 }
 0x9f0   :  { %17072 = vst [vmem:[#allocation227_spill] sm:$0xff] %v15038_v26  ;;  %v15040_v63 = vpop.f32.mrf.mxu2 }
 0x9f1   :  { %17073 = vst [vmem:[#allocation202_spill] sm:$0xff] %v15040_v63 }
 0x9f2   :  { %v15042_v42 = vpop.f32.mrf.mxu1 }
 0x9f3   :  { %17074 = vst [vmem:[#allocation97_spill] sm:$0xff] %v15042_v42  ;;  %v6020_v62 = vpop.f32.mrf.mxu0 }
 0x9f4   :  { %v6250_v8 = vsel %vm5526_vm0, %v6020_v62, -inf }
 0x9f5   :  { %6251 = vmax.xlane.f32.xlu0 %v6250_v8 }
 0x9f7   :  { %v15045_v16 = vpop.f32.mrf.mxu3 }
 0x9f8   :  { %17075 = vst [vmem:[#allocation95_spill] sm:$0xff] %v15045_v16  ;;  %v15047_v34 = vpop.f32.mrf.mxu2 }
 0x9f9   :  { %v6259_v19 = vsel %vm5526_vm0, %v15047_v34, -inf }
 0x9fa   :  { %v6050_v30 = vpop.f32.mrf.mxu1 }
 0x9fb   :  { %v15049_v55 = vpop.f32.mrf.mxu0  ;;  %v6253_v52 = vsel %vm5526_vm0, %v6050_v30, -inf }
 0x9fc   :  { %v6271_v7 = vsel %vm5526_vm0, %v15049_v55, -inf }
 0x9fd   :  { %6254 = vmax.xlane.f32.xlu0 %v6253_v52 }
 0x9ff   :  { %v15052_v20 = vpop.f32.mrf.mxu3 }
 0xa00   :  { %17076 = vst [vmem:[#allocation96_spill] sm:$0xff] %v15052_v20  ;;  %v6084_v3 = vpop.f32.mrf.mxu2 }
 0xa01   :  { %v6262_v57 = vsel %vm5526_vm0, %v6084_v3, -inf }
 0xa02   :  { %6263 = vmax.xlane.f32.xlu2 %v6262_v57  ;;  %v6052_v12 = vpop.f32.mrf.mxu1 }
 0xa03   :  { %v6148_v6 = vpop.f32.mrf.mxu0  ;;  %v6256_v46 = vsel %vm5526_vm0, %v6052_v12, -inf }
 0xa04   :  { %v6274_v51 = vsel %vm5526_vm0, %v6148_v6, -inf  ;;  %6257 = vmax.xlane.f32.xlu1 %v6256_v46 }
 0xa05   :  { %6275 = vmax.xlane.f32.xlu0 %v6274_v51 }
 0xa07   :  { %v15057_v61 = vpop.f32.mrf.mxu3 }
 0xa08   :  { %v15059_v15 = vpop.f32.mrf.mxu2 }
 0xa09   :  { %v6283_v8 = vsel %vm5526_vm0, %v15059_v15, -inf }
 0xa0a   :  { %6272 = vmax.xlane.f32.xlu2 %v6271_v7  ;;  %v15063_v38 = vpop.f32.mrf.mxu1  ;;  %v6265_v7 = vsel %vm5526_vm0, %v15057_v61, -inf }
 0xa0c   :  { %6260 = vmax.xlane.f32.xlu1 %v6259_v19 }
 0xa0d   :  { %6284 = vmax.xlane.f32.xlu0 %v6283_v8  ;;  %v6277_v8 = vsel %vm5526_vm0, %v15063_v38, -inf }
 0xa0f   :  { %v15069_v52 = vpop.f32.mrf.mxu3 }
 0xa10   :  { %v6268_v57 = vsel %vm5526_vm0, %v15069_v52, -inf  ;;  %v15081_v19 = vpop.f32.mrf.mxu2 }
 0xa11   :  { %v6286_v16 = vsel %vm5526_vm0, %v15081_v19, -inf }
 0xa12   :  { %v15073_v46 = vpop.f32.mrf.mxu1  ;;  %6269 = vmax.xlane.f32.xlu2 %v6268_v57 }
 0xa13   :  { %v6280_v51 = vsel %vm5526_vm0, %v15073_v46, -inf }
 0xa14   :  { %6266 = vmax.xlane.f32.xlu1 %v6265_v7 }
 0xa15   :  { %6281 = vmax.xlane.f32.xlu0 %v6280_v51 }
 0xa17   :  { %v15079_v20 = vpop.f32.mrf.mxu3 }
 0xa18   :  { %v6289_v51 = vsel %vm5526_vm0, %v15079_v20, -inf }
 0xa1a   :  { %6278 = vmax.xlane.f32.xlu2 %v6277_v8 }
 0xa1c   :  { %6287 = vmax.xlane.f32.xlu1 %v6286_v16 }
 0xa1f   :  { %v15087_v57 = vpop.f32.mrf.mxu3 }
 0xa20   :  { %v6292_v63 = vsel %vm5526_vm0, %v15087_v57, -inf }
 0xa22   :  { %6293 = vmax.xlane.f32.xlu2 %v6292_v63 }
 0xa24   :  { %6290 = vmax.xlane.f32.xlu1 %v6289_v51 }
 0xa60   :  { %v6249_v7 = vpop.xlane.xlu2 %6248 }
 0xa61   :  { %v6295_v45 = vsub.f32 %v6018_v31, %v6249_v7 }
 0xa63   :  { %v6311_v42 = vmul.f32 1.442695, %v6295_v45 }
 0xa65   :  { %11879 = vpow2.f32 %v6311_v42 }
 0xa68   :  { %v6252_v32 = vpop.xlane.xlu0 %6251 }
 0xa69   :  { %v6296_v8 = vsub.f32 %v6020_v62, %v6252_v32 }
 0xa6b   :  { %v15093_v58 = vpop.eup %11879  ;;  %v6313_v47 = vmul.f32 1.442695, %v6296_v8 }
 0xa6c   :  { %v6343_v16 = vsel %vm5526_vm0, %v15093_v58, 0.0 }
 0xa6d   :  { %11881 = vpow2.f32 %v6313_v47  ;;  %6344 = vadd.xlane.f32.xlu0 %v6343_v16 }
 0xa70   :  { %v6255_v26 = vpop.xlane.xlu0 %6254 }
 0xa71   :  { %v6297_v63 = vsub.f32 %v6050_v30, %v6255_v26 }
 0xa73   :  { %v15097_v22 = vpop.eup %11881  ;;  %v6315_v25 = vmul.f32 1.442695, %v6297_v63 }
 0xa74   :  { %v6346_v31 = vsel %vm5526_vm0, %v15097_v22, 0.0 }
 0xa75   :  { %11883 = vpow2.f32 %v6315_v25  ;;  %6347 = vadd.xlane.f32.xlu1 %v6346_v31  ;;  %v6264_v45 = vpop.xlane.xlu2 %6263 }
 0xa76   :  { %v6300_v32 = vsub.f32 %v6084_v3, %v6264_v45 }
 0xa77   :  { %v6258_v42 = vpop.xlane.xlu1 %6257 }
 0xa78   :  { %v6321_v62 = vmul.f32 1.442695, %v6300_v32  ;;  %v6276_v51 = vpop.xlane.xlu0 %6275  ;;  %v6298_v7 = vsub.f32 %v6052_v12, %v6258_v42 }
 0xa79   :  { %v6304_v8 = vsub.f32 %v6148_v6, %v6276_v51 }
 0xa7a   :  { %11885 = vpow2.f32 %v6321_v62  ;;  %v6317_v47 = vmul.f32 1.442695, %v6298_v7 }
 0xa7b   :  { %v15101_v16 = vpop.eup %11883  ;;  %v6329_v26 = vmul.f32 1.442695, %v6304_v8 }
 0xa7c   :  { %11887 = vpow2.f32 %v6317_v47  ;;  %v6349_v30 = vsel %vm5526_vm0, %v15101_v16, 0.0 }
 0xa7d   :  { %11889 = vpow2.f32 %v6329_v26  ;;  %6350 = vadd.xlane.f32.xlu1 %v6349_v30  ;;  %v6273_v25 = vpop.xlane.xlu2 %6272 }
 0xa7e   :  { %v6303_v63 = vsub.f32 %v15049_v55, %v6273_v25 }
 0xa7f   :  { %v6261_v3 = vpop.xlane.xlu1 %6260 }
 0xa80   :  { %v15106_v31 = vpop.eup %11885  ;;  %v6327_v45 = vmul.f32 1.442695, %v6303_v63  ;;  %v6285_v12 = vpop.xlane.xlu0 %6284  ;;  %v6299_v6 = vsub.f32 %v15047_v34, %v6261_v3 }
 0xa81   :  { %v6307_v32 = vsub.f32 %v15059_v15, %v6285_v12  ;;  %v6358_v42 = vsel %vm5526_vm0, %v15106_v31, 0.0 }
 0xa82   :  { %v15112_v62 = vpop.eup %11887  ;;  %11891 = vpow2.f32 %v6327_v45  ;;  %v6319_v51 = vmul.f32 1.442695, %v6299_v6  ;;  %6359 = vadd.xlane.f32.xlu0 %v6358_v42 }
 0xa83   :  { %v15114_v7 = vpop.eup %11889  ;;  %v6335_v55 = vmul.f32 1.442695, %v6307_v32  ;;  %v6352_v8 = vsel %vm5526_vm0, %v15112_v62, 0.0 }
 0xa84   :  { %11893 = vpow2.f32 %v6319_v51  ;;  %v6370_v34 = vsel %vm5526_vm0, %v15114_v7, 0.0  ;;  %6353 = vadd.xlane.f32.xlu2 %v6352_v8 }
 0xa85   :  { %11895 = vpow2.f32 %v6335_v55  ;;  %6371 = vadd.xlane.f32.xlu1 %v6370_v34  ;;  %v6270_v15 = vpop.xlane.xlu2 %6269 }
 0xa86   :  { %v6302_v47 = vsub.f32 %v15069_v52, %v6270_v15 }
 0xa87   :  { %v6267_v26 = vpop.xlane.xlu1 %6266 }
 0xa88   :  { %v15121_v30 = vpop.eup %11891  ;;  %v6325_v25 = vmul.f32 1.442695, %v6302_v47  ;;  %v6282_v63 = vpop.xlane.xlu0 %6281  ;;  %v6301_v3 = vsub.f32 %v15057_v61, %v6267_v26 }
 0xa89   :  { %v6306_v45 = vsub.f32 %v15073_v46, %v6282_v63  ;;  %v6367_v12 = vsel %vm5526_vm0, %v15121_v30, 0.0 }
 0xa8a   :  { %v15127_v6 = vpop.eup %11893  ;;  %11897 = vpow2.f32 %v6325_v25  ;;  %v6323_v32 = vmul.f32 1.442695, %v6301_v3  ;;  %6368 = vadd.xlane.f32.xlu0 %v6367_v12 }
 0xa8b   :  { %v15129_v42 = vpop.eup %11895  ;;  %v6333_v52 = vmul.f32 1.442695, %v6306_v45  ;;  %v6355_v51 = vsel %vm5526_vm0, %v15127_v6, 0.0 }
 0xa8c   :  { %11899 = vpow2.f32 %v6323_v32  ;;  %v6379_v61 = vsel %vm5526_vm0, %v15129_v42, 0.0  ;;  %6356 = vadd.xlane.f32.xlu2 %v6355_v51 }
 0xa8d   :  { %11901 = vpow2.f32 %v6333_v52  ;;  %6380 = vadd.xlane.f32.xlu1 %v6379_v61  ;;  %v6279_v46 = vpop.xlane.xlu2 %6278 }
 0xa8e   :  { %v6305_v55 = vsub.f32 %v15063_v38, %v6279_v46 }
 0xa8f   :  { %v6288_v8 = vpop.xlane.xlu1 %6287 }
 0xa90   :  { %v15136_v34 = vpop.eup %11897  ;;  %v6331_v15 = vmul.f32 1.442695, %v6305_v55  ;;  %v6308_v47 = vsub.f32 %v15081_v19, %v6288_v8 }
 0xa91   :  { %v6364_v26 = vsel %vm5526_vm0, %v15136_v34, 0.0 }
 0xa92   :  { %v15141_v25 = vpop.eup %11899  ;;  %11903 = vpow2.f32 %v6331_v15  ;;  %v6337_v63 = vmul.f32 1.442695, %v6308_v47  ;;  %6365 = vadd.xlane.f32.xlu0 %v6364_v26 }
 0xa93   :  { %v15143_v3 = vpop.eup %11901  ;;  %v6361_v45 = vsel %vm5526_vm0, %v15141_v25, 0.0 }
 0xa94   :  { %11905 = vpow2.f32 %v6337_v63  ;;  %v6376_v38 = vsel %vm5526_vm0, %v15143_v3, 0.0  ;;  %6362 = vadd.xlane.f32.xlu2 %v6361_v45 }
 0xa95   :  { %6377 = vadd.xlane.f32.xlu1 %v6376_v38  ;;  %v6294_v19 = vpop.xlane.xlu2 %6293 }
 0xa96   :  { %v6310_v12 = vsub.f32 %v15087_v57, %v6294_v19 }
 0xa97   :  { %v6291_v32 = vpop.xlane.xlu1 %6290 }
 0xa98   :  { %v15150_v52 = vpop.eup %11903  ;;  %v6341_v51 = vmul.f32 1.442695, %v6310_v12  ;;  %v6309_v61 = vsub.f32 %v15079_v20, %v6291_v32 }
 0xa99   :  { %v6373_v46 = vsel %vm5526_vm0, %v15150_v52, 0.0 }
 0xa9a   :  { %v15155_v55 = vpop.eup %11905  ;;  %11907 = vpow2.f32 %v6341_v51  ;;  %v6339_v8 = vmul.f32 1.442695, %v6309_v61  ;;  %6374 = vadd.xlane.f32.xlu0 %v6373_v46 }
 0xa9b   :  { %v6382_v15 = vsel %vm5526_vm0, %v15155_v55, 0.0 }
 0xa9c   :  { %11909 = vpow2.f32 %v6339_v8  ;;  %6383 = vadd.xlane.f32.xlu2 %v6382_v15 }
 0xaa0   :  { %v15159_v57 = vpop.eup %11907 }
 0xaa1   :  { %v6388_v47 = vsel %vm5526_vm0, %v15159_v57, 0.0 }
 0xaa2   :  { %v15163_v26 = vpop.eup %11909  ;;  %6389 = vadd.xlane.f32.xlu0 %v6388_v47 }
 0xaa3   :  { %v6385_v20 = vsel %vm5526_vm0, %v15163_v26, 0.0 }
 0xaa4   :  { %6386 = vadd.xlane.f32.xlu2 %v6385_v20 }
 0xae0   :  { %v6345_v63 = vpop.xlane.xlu0 %6344 }
 0xae1   :  { %11911 = vrcp.f32 %v6345_v63 }
 0xae7   :  { %v11912_v38 = vpop.eup %11911 }
 0xae8   :  { %v6348_v45 = vpop.xlane.xlu1 %6347  ;;  %v6407_v19 = vmul.f32 %v11912_v38, %v15093_v58 }
 0xae9   :  { %11913 = vrcp.f32 %v6348_v45  ;;  %v17077_v45 = vld [vmem:[#allocation169_spill] sm:$0xff] }
 0xaea   :  { %v6423_v32 = vpack.c.bf16 %v6407_v19, %v6407_v19 }
 0xaec   :  { %v6445_v8 = vunpack.c.l.b16 %v6423_v32 }
 0xaef   :  { %v11914_v12 = vpop.eup %11913 }
 0xaf0   :  { %v6408_v51 = vmul.f32 %v11914_v12, %v15097_v22  ;;  %v6351_v61 = vpop.xlane.xlu1 %6350 }
 0xaf1   :  { %11915 = vrcp.f32 %v6351_v61 }
 0xaf2   :  { %v6424_v46 = vpack.c.bf16 %v6408_v51, %v6408_v51 }
 0xaf4   :  { %v6446_v15 = vunpack.c.l.b16 %v6424_v46 }
 0xaf5   :  { %v6360_v47 = vpop.xlane.xlu0 %6359 }
 0xaf6   :  { %v6447_v27 = vpack.c.b16 %v6446_v15, %v6445_v8  ;;  %v17078_v8 = vld [vmem:[#allocation165_spill] sm:$0xff] }
 0xaf7   :  { %v6354_v33 = vpop.xlane.xlu2 %6353  ;;  %v11916_v20 = vpop.eup %11915 }
 0xaf8   :  { %11917 = vrcp.f32 %v6354_v33  ;;  %10937 = vmatmul.msk.bf16.vlgmr.msrb.gmra.mxu0 %vm5526_vm0, %v6447_v27  ;;  %v6372_v63 = vpop.xlane.xlu1 %6371  ;;  %v6409_v58 = vmul.f32 %v11916_v20, %v15101_v16 }
 0xaf9   :  { %6735 = vmatpush.bf16.xpose.msrb.mxu0 %v17077_v45  ;;  %11919 = vrcp.f32 %v6372_v63 }
 0xafa   :  { %11921 = vrcp.f32 %v6360_v47  ;;  %v6425_v12 = vpack.c.bf16 %v6409_v58, %v6409_v58 }
 0xafc   :  { %v6479_v15 = vunpack.c.l.b16 %v6425_v12 }
 0xafd   :  { %v6369_v22 = vpop.xlane.xlu0 %6368 }
 0xafe   :  { %v11918_v38 = vpop.eup %11917  ;;  %11923 = vrcp.f32 %v6369_v22 }
 0xaff   :  { %v11920_v19 = vpop.eup %11919  ;;  %v6410_v32 = vmul.f32 %v11918_v38, %v15112_v62  ;;  %v6357_v51 = vpop.xlane.xlu2 %6356 }
 0xb00   :  { %v11922_v61 = vpop.eup %11921  ;;  %11925 = vrcp.f32 %v6357_v51  ;;  %v6381_v33 = vpop.xlane.xlu1 %6380  ;;  %v6416_v27 = vmul.f32 %v11920_v19, %v15114_v7  ;;  %v17079_v7 = vld [vmem:[#allocation172_spill] sm:$0xff] }
 0xb01   :  { %v6426_v46 = vpack.c.bf16 %v6410_v32, %v6410_v32  ;;  %6736 = vmatpush.bf16.xpose.msrb.mxu0 %v17078_v8  ;;  %v6412_v47 = vmul.f32 %v11922_v61, %v15106_v31 }
 0xb02   :  { %v6432_v45 = vpack.c.bf16 %v6416_v27, %v6416_v27 }
 0xb03   :  { %v6480_v16 = vunpack.c.l.b16 %v6426_v46  ;;  %v6428_v38 = vpack.c.bf16 %v6412_v47, %v6412_v47 }
 0xb04   :  { %v11924_v20 = vpop.eup %11923  ;;  %v6582_v19 = vunpack.c.l.b16 %v6432_v45 }
 0xb05   :  { %v6481_v63 = vpack.c.b16 %v6480_v16, %v6479_v15  ;;  %v6415_v58 = vmul.f32 %v11924_v20, %v15121_v30  ;;  %v6366_v22 = vpop.xlane.xlu0 %6365  ;;  %v6514_v30 = vunpack.c.l.b16 %v6428_v38 }
 0xb06   :  { %v11926_v62 = vpop.eup %11925  ;;  %11927 = vrcp.f32 %v6366_v22  ;;  %v17081_v22 = vld [vmem:[#allocation177_spill] sm:$0xff] }
 0xb07   :  { %v6431_v51 = vpack.c.bf16 %v6415_v58, %v6415_v58  ;;  %v6411_v32 = vmul.f32 %v11926_v62, %v15127_v6  ;;  %v6363_v39 = vpop.xlane.xlu2 %6362  ;;  %10938 = vmatmul.msk.bf16.vlgmr.msrb.gmra.mxu1 %vm5526_vm0, %v6481_v63  ;;  %v17082_v62 = vld [vmem:[#allocation107_spill] sm:$0xff] }
 0xb08   :  { %11929 = vrcp.f32 %v6363_v39  ;;  %6767 = vmatpush.bf16.xpose.msrb.mxu1 %v17079_v7  ;;  %v6378_v31 = vpop.xlane.xlu1 %6377  ;;  %v17080_v39 = vld [vmem:[#allocation187_spill] sm:$0xff] }
 0xb09   :  { %v6581_v12 = vunpack.c.l.b16 %v6431_v51  ;;  %v6427_v61 = vpack.c.bf16 %v6411_v32, %v6411_v32  ;;  %11931 = vrcp.f32 %v6378_v31 }
 0xb0a   :  { %11933 = vrcp.f32 %v6381_v33 }
 0xb0b   :  { %v6583_v46 = vpack.c.b16 %v6582_v19, %v6581_v12  ;;  %v6513_v27 = vunpack.c.l.b16 %v6427_v61 }
 0xb0c   :  { %v11928_v8 = vpop.eup %11927 }
 0xb0d   :  { %v6515_v15 = vpack.c.b16 %v6514_v30, %v6513_v27  ;;  %v6414_v47 = vmul.f32 %v11928_v8, %v15136_v34  ;;  %v6375_v6 = vpop.xlane.xlu0 %6374  ;;  %10941 = vmatmul.msk.bf16.vlgmr.msra.gmra.mxu0 %vm5526_vm0, %v6583_v46  ;;  %v17083_v46 = vld [vmem:[#allocation184_spill] sm:$0xff] }
 0xb0e   :  { %v11930_v16 = vpop.eup %11929  ;;  %11935 = vrcp.f32 %v6375_v6  ;;  %6863 = vmatpush.bf16.xpose.msra.mxu0 %v17080_v39 }
 0xb0f   :  { %v11932_v20 = vpop.eup %11931  ;;  %v6430_v63 = vpack.c.bf16 %v6414_v47, %v6414_v47  ;;  %v6413_v45 = vmul.f32 %v11930_v16, %v15141_v25  ;;  %10939 = vmatmul.msk.bf16.vlgmr.msrb.gmra.mxu2 %vm5526_vm0, %v6515_v15  ;;  %v6384_v33 = vpop.xlane.xlu2 %6383  ;;  %v17085_v47 = vld [vmem:[#allocation182_spill] sm:$0xff] }
 0xb10   :  { %v11934_v58 = vpop.eup %11933  ;;  %6799 = vmatpush.bf16.xpose.msrb.mxu2 %v17081_v22  ;;  %11937 = vrcp.f32 %v6384_v33  ;;  %6768 = vmatpush.bf16.xpose.msrb.mxu1 %v17082_v62  ;;  %v6418_v38 = vmul.f32 %v11932_v20, %v15143_v3  ;;  %v17087_v62 = vld [vmem:[#allocation192_spill] sm:$0xff] }
 0xb11   :  { %v6429_v34 = vpack.c.bf16 %v6413_v45, %v6413_v45  ;;  %v6419_v51 = vmul.f32 %v11934_v58, %v15129_v42  ;;  %v6548_v32 = vunpack.c.l.b16 %v6430_v63  ;;  %v17084_v42 = vld [vmem:[#allocation174_spill] sm:$0xff] }
 0xb12   :  { %v6434_v12 = vpack.c.bf16 %v6418_v38, %v6418_v38 }
 0xb13   :  { %v6547_v7 = vunpack.c.l.b16 %v6429_v34  ;;  %v6435_v27 = vpack.c.bf16 %v6419_v51, %v6419_v51  ;;  %v17088_v51 = vld [vmem:[#allocation179_spill] sm:$0xff] }
 0xb14   :  { %v11936_v31 = vpop.eup %11935  ;;  %v6616_v6 = vunpack.c.l.b16 %v6434_v12 }
 0xb15   :  { %v6549_v19 = vpack.c.b16 %v6548_v32, %v6547_v7  ;;  %v6417_v25 = vmul.f32 %v11936_v31, %v15150_v52  ;;  %v6390_v61 = vpop.xlane.xlu0 %6389  ;;  %v6649_v39 = vunpack.c.l.b16 %v6435_v27  ;;  %v17089_v32 = vld [vmem:[#allocation196_spill] sm:$0xff]  ;;  %v17097_v27 = vld [vmem:[#allocation198_spill] sm:$0xff] }
 0xb16   :  { %v11938_v30 = vpop.eup %11937  ;;  %11939 = vrcp.f32 %v6390_v61  ;;  %6864 = vmatpush.bf16.xpose.msra.mxu0 %v17083_v46  ;;  %v17093_v61 = vld [vmem:[#allocation201_spill] sm:$0xff]  ;;  %v17096_v46 = vld [vmem:[#allocation63_spill] sm:$0xff] }
 0xb17   :  { %v6433_v8 = vpack.c.bf16 %v6417_v25, %v6417_v25  ;;  %v6420_v15 = vmul.f32 %v11938_v30, %v15155_v55  ;;  %10940 = vmatmul.msk.bf16.vlgmr.msrb.gmra.mxu3 %vm5526_vm0, %v6549_v19  ;;  %v6387_v3 = vpop.xlane.xlu2 %6386  ;;  %v17086_v55 = vld [vmem:[#allocation51_spill] sm:$0xff]  ;;  %v17091_v25 = vld [vmem:[#allocation189_spill] sm:$0xff] }
 0xb18   :  { %6800 = vmatpush.bf16.xpose.msrb.mxu2 %v17084_v42  ;;  %6831 = vmatpush.bf16.xpose.msrb.mxu3 %v17085_v47  ;;  %11941 = vrcp.f32 %v6387_v3  ;;  %v17095_v30 = vld [vmem:[#allocation75_spill] sm:$0xff] }
 0xb19   :  { %v6615_v16 = vunpack.c.l.b16 %v6433_v8  ;;  %v6436_v52 = vpack.c.bf16 %v6420_v15, %v6420_v15  ;;  %v17098_v8 = vld [vmem:[#allocation69_spill] sm:$0xff] }
 0xb1b   :  { %v6617_v20 = vpack.c.b16 %v6616_v6, %v6615_v16  ;;  %v6650_v63 = vunpack.c.l.b16 %v6436_v52 }
 0xb1c   :  { %v11940_v45 = vpop.eup %11939 }
 0xb1d   :  { %v6651_v33 = vpack.c.b16 %v6650_v63, %v6649_v39  ;;  %v6422_v58 = vmul.f32 %v11940_v45, %v15159_v57  ;;  %10942 = vmatmul.msk.bf16.vlgmr.msra.gmra.mxu1 %vm5526_vm0, %v6617_v20  ;;  %6737 = vmatmul.bf16.vlgmr.msrb.gmra.mxu0 %v17086_v55  ;;  %v17090_v57 = vld [vmem:[#allocation61_spill] sm:$0xff] }
 0xb1e   :  { %v11942_v22 = vpop.eup %11941  ;;  %6895 = vmatpush.bf16.xpose.msra.mxu1 %v17087_v62  ;;  %7185 = vmatpush.bf16.msrb.mxu0 %v14533_v37  ;;  %v17092_v37 = vld [vmem:[#allocation193_spill] sm:$0xff] }
 0xb1f   :  { %v6438_v34 = vpack.c.bf16 %v6422_v58, %v6422_v58  ;;  %v6421_v38 = vmul.f32 %v11942_v22, %v15163_v26  ;;  %10943 = vmatmul.msk.bf16.vlgmr.msra.gmra.mxu2 %vm5526_vm0, %v6651_v33  ;;  %v17094_v26 = vld [vmem:[#allocation57_spill] sm:$0xff] }
 0xb20   :  { %6832 = vmatpush.bf16.xpose.msrb.mxu3 %v17088_v51  ;;  %6927 = vmatpush.bf16.xpose.msra.mxu2 %v17089_v32 }
 0xb21   :  { %v6437_v7 = vpack.c.bf16 %v6421_v38, %v6421_v38  ;;  %v6684_v31 = vunpack.c.l.b16 %v6438_v34 }
 0xb22   :  { %7186 = vmatpush.bf16.msrb.mxu0 %v17090_v57 }
 0xb23   :  { %v6683_v19 = vunpack.c.l.b16 %v6437_v7 }
 0xb25   :  { %v6685_v12 = vpack.c.b16 %v6684_v31, %v6683_v19 }
 0xb26   :  { %6896 = vmatpush.bf16.xpose.msra.mxu1 %v17091_v25 }
 0xb27   :  { %10944 = vmatmul.msk.bf16.vlgmr.msra.gmra.mxu3 %vm5526_vm0, %v6685_v12 }
 0xb28   :  { %6928 = vmatpush.bf16.xpose.msra.mxu2 %v17092_v37  ;;  %6959 = vmatpush.bf16.xpose.msra.mxu3 %v17093_v61 }
 0xb2d   :  { %6769 = vmatmul.bf16.vlgmr.msrb.gmra.mxu1 %v17094_v26  ;;  %6865 = vmatmul.bf16.vlgmr.msra.gmra.mxu0 %v17095_v30 }
 0xb2e   :  { %7219 = vmatpush.bf16.msrb.mxu1 %v14565_v24  ;;  %7321 = vmatpush.bf16.msra.mxu0 %v14673_v17  ;;  %v17099_v24 = vld [vmem:[#allocation81_spill] sm:$0xff]  ;;  %v17100_v17 = vld [vmem:[#allocation87_spill] sm:$0xff] }
 0xb2f   :  { %6801 = vmatmul.bf16.vlgmr.msrb.gmra.mxu2 %v17096_v46 }
 0xb30   :  { %6960 = vmatpush.bf16.xpose.msra.mxu3 %v17097_v27  ;;  %7253 = vmatpush.bf16.msrb.mxu2 %v14597_v23 }
 0xb32   :  { %7220 = vmatpush.bf16.msrb.mxu1 %v14547_v59  ;;  %7322 = vmatpush.bf16.msra.mxu0 %v14655_v44  ;;  %v17101_v59 = vld [vmem:[#allocation93_spill] sm:$0xff] }
 0xb34   :  { %7254 = vmatpush.bf16.msrb.mxu2 %v14579_v0 }
 0xb37   :  { %6833 = vmatmul.bf16.vlgmr.msrb.gmra.mxu3 %v17098_v8 }
 0xb38   :  { %7287 = vmatpush.bf16.msrb.mxu3 %v14633_v2 }
 0xb3c   :  { %7288 = vmatpush.bf16.msrb.mxu3 %v14611_v1 }
 0xb3d   :  { %6897 = vmatmul.bf16.vlgmr.msra.gmra.mxu1 %v17099_v24 }
 0xb3e   :  { %7355 = vmatpush.bf16.msra.mxu1 %v14697_v40 }
 0xb3f   :  { %6929 = vmatmul.bf16.vlgmr.msra.gmra.mxu2 %v17100_v17 }
 0xb40   :  { %7389 = vmatpush.bf16.msra.mxu2 %v14721_v11 }
 0xb42   :  { %7356 = vmatpush.bf16.msra.mxu1 %v14683_v28 }
 0xb44   :  { %7390 = vmatpush.bf16.msra.mxu2 %v14707_v21 }
 0xb47   :  { %6961 = vmatmul.bf16.vlgmr.msra.gmra.mxu3 %v17101_v59 }
 0xb48   :  { %7423 = vmatpush.bf16.msra.mxu3 %v14749_v56 }
 0xb4c   :  { %7424 = vmatpush.bf16.msra.mxu3 %v14731_v10 }
 0xb75   :  { %v15231_v0 = vpop.f32.mrf.mxu0 }
 0xb7d   :  { %v15233_v23 = vpop.f32.mrf.mxu0 }
 0xb84   :  { %v15235_v1 = vpop.f32.mrf.mxu1 }
 0xb8a   :  { %v15237_v2 = vpop.f32.mrf.mxu0 }
 0xb8c   :  { %v15243_v28 = vpop.f32.mrf.mxu1 }
 0xb92   :  { %v15239_v44 = vpop.f32.mrf.mxu2  ;;  %v15241_v40 = vpop.f32.mrf.mxu0 }
 0xb9a   :  { %v15245_v21 = vpop.f32.mrf.mxu2  ;;  %v15247_v11 = vpop.f32.mrf.mxu3 }
 0xb9b   :  { %v15249_v56 = vpop.f32.mrf.mxu1  ;;  %v6738_v10 = vpop.f32.mrf.mxu0 }
 0xb9c   :  { %v6967_v15 = vsel %vm5526_vm0, %v6738_v10, -inf }
 0xb9d   :  { %6968 = vmax.xlane.f32.xlu1 %v6967_v15 }
 0xba2   :  { %v15252_v3 = vpop.f32.mrf.mxu3  ;;  %v15254_v42 = vpop.f32.mrf.mxu2 }
 0xba3   :  { %v15256_v47 = vpop.f32.mrf.mxu1  ;;  %v6740_v6 = vpop.f32.mrf.mxu0 }
 0xba4   :  { %v6970_v16 = vsel %vm5526_vm0, %v6740_v6, -inf }
 0xba5   :  { %6971 = vmax.xlane.f32.xlu2 %v6970_v16 }
 0xbaa   :  { %v15259_v52 = vpop.f32.mrf.mxu2  ;;  %v15261_v39 = vpop.f32.mrf.mxu3 }
 0xbab   :  { %v6770_v20 = vpop.f32.mrf.mxu1  ;;  %v6866_v63 = vpop.f32.mrf.mxu0 }
 0xbac   :  { %v6991_v45 = vsel %vm5526_vm0, %v6866_v63, -inf  ;;  %v6973_v33 = vsel %vm5526_vm0, %v6770_v20, -inf }
 0xbad   :  { %6992 = vmax.xlane.f32.xlu2 %v6991_v45  ;;  %6974 = vmax.xlane.f32.xlu0 %v6973_v33 }
 0xbb2   :  { %v15265_v58 = vpop.f32.mrf.mxu3  ;;  %v15267_v55 = vpop.f32.mrf.mxu2 }
 0xbb3   :  { %17102 = vst [vmem:[#allocation228_spill] sm:$0xff] %v15265_v58  ;;  %v15269_v22 = vpop.f32.mrf.mxu1  ;;  %v6868_v62 = vpop.f32.mrf.mxu0  ;;  %v6979_v31 = vsel %vm5526_vm0, %v15267_v55, -inf }
 0xbb4   :  { %v6994_v34 = vsel %vm5526_vm0, %v6868_v62, -inf  ;;  %v6976_v38 = vsel %vm5526_vm0, %v15269_v22, -inf }
 0xbb5   :  { %6995 = vmax.xlane.f32.xlu0 %v6994_v34  ;;  %6977 = vmax.xlane.f32.xlu1 %v6976_v38 }
 0xbba   :  { %v15274_v51 = vpop.f32.mrf.mxu2  ;;  %v15276_v32 = vpop.f32.mrf.mxu3 }
 0xbbb   :  { %v15278_v7 = vpop.f32.mrf.mxu1  ;;  %v6982_v57 = vsel %vm5526_vm0, %v15274_v51, -inf  ;;  %v6985_v61 = vsel %vm5526_vm0, %v15276_v32, -inf }
 0xbbc   :  { %6983 = vmax.xlane.f32.xlu2 %v6982_v57  ;;  %v6997_v19 = vsel %vm5526_vm0, %v15278_v7, -inf }
 0xbbd   :  { %6980 = vmax.xlane.f32.xlu1 %v6979_v31  ;;  %6998 = vmax.xlane.f32.xlu0 %v6997_v19 }
 0xbc2   :  { %v15286_v12 = vpop.f32.mrf.mxu3  ;;  %v15288_v25 = vpop.f32.mrf.mxu2 }
 0xbc3   :  { %v15290_v37 = vpop.f32.mrf.mxu1  ;;  %v6988_v26 = vsel %vm5526_vm0, %v15286_v12, -inf  ;;  %v7003_v17 = vsel %vm5526_vm0, %v15288_v25, -inf }
 0xbc4   :  { %6986 = vmax.xlane.f32.xlu2 %v6985_v61  ;;  %v7000_v30 = vsel %vm5526_vm0, %v15290_v37, -inf }
 0xbc5   :  { %6989 = vmax.xlane.f32.xlu0 %v6988_v26  ;;  %7001 = vmax.xlane.f32.xlu1 %v7000_v30 }
 0xbca   :  { %v15298_v46 = vpop.f32.mrf.mxu2  ;;  %v15300_v27 = vpop.f32.mrf.mxu3 }
 0xbcb   :  { %v7006_v8 = vsel %vm5526_vm0, %v15298_v46, -inf  ;;  %v7009_v24 = vsel %vm5526_vm0, %v15300_v27, -inf }
 0xbcc   :  { %7007 = vmax.xlane.f32.xlu2 %v7006_v8 }
 0xbcd   :  { %7010 = vmax.xlane.f32.xlu0 %v7009_v24  ;;  %7004 = vmax.xlane.f32.xlu1 %v7003_v17 }
 0xbd2   :  { %v15308_v59 = vpop.f32.mrf.mxu3 }
 0xbd3   :  { %v7012_v15 = vsel %vm5526_vm0, %v15308_v59, -inf }
 0xbd5   :  { %7013 = vmax.xlane.f32.xlu1 %v7012_v15 }
 0xc10   :  { %v6969_v16 = vpop.xlane.xlu1 %6968 }
 0xc11   :  { %v7015_v45 = vsub.f32 %v6738_v10, %v6969_v16 }
 0xc13   :  { %v7031_v33 = vmul.f32 1.442695, %v7015_v45 }
 0xc15   :  { %11943 = vpow2.f32 %v7031_v33 }
 0xc18   :  { %v6972_v34 = vpop.xlane.xlu2 %6971 }
 0xc19   :  { %v7016_v38 = vsub.f32 %v6740_v6, %v6972_v34 }
 0xc1b   :  { %v15312_v57 = vpop.eup %11943  ;;  %v7033_v31 = vmul.f32 1.442695, %v7016_v38 }
 0xc1c   :  { %v7063_v19 = vsel %vm5526_vm0, %v15312_v57, 0.0 }
 0xc1d   :  { %11945 = vpow2.f32 %v7033_v31  ;;  %7064 = vadd.xlane.f32.xlu2 %v7063_v19 }
 0xc20   :  { %v6993_v61 = vpop.xlane.xlu2 %6992  ;;  %v6975_v26 = vpop.xlane.xlu0 %6974 }
 0xc21   :  { %v7023_v30 = vsub.f32 %v6866_v63, %v6993_v61  ;;  %v7017_v8 = vsub.f32 %v6770_v20, %v6975_v26 }
 0xc23   :  { %v15316_v24 = vpop.eup %11945  ;;  %v7047_v17 = vmul.f32 1.442695, %v7023_v30  ;;  %v7035_v10 = vmul.f32 1.442695, %v7017_v8 }
 0xc24   :  { %v7066_v15 = vsel %vm5526_vm0, %v15316_v24, 0.0 }
 0xc25   :  { %11947 = vpow2.f32 %v7047_v17  ;;  %7067 = vadd.xlane.f32.xlu0 %v7066_v15 }
 0xc26   :  { %11949 = vpow2.f32 %v7035_v10 }
 0xc28   :  { %v6996_v6 = vpop.xlane.xlu0 %6995  ;;  %v6978_v16 = vpop.xlane.xlu1 %6977 }
 0xc29   :  { %v7024_v45 = vsub.f32 %v6868_v62, %v6996_v6  ;;  %v7018_v33 = vsub.f32 %v15269_v22, %v6978_v16 }
 0xc2b   :  { %v15321_v34 = vpop.eup %11947  ;;  %v7049_v38 = vmul.f32 1.442695, %v7024_v45  ;;  %v7037_v63 = vmul.f32 1.442695, %v7018_v33 }
 0xc2c   :  { %v15323_v20 = vpop.eup %11949  ;;  %v7087_v31 = vsel %vm5526_vm0, %v15321_v34, 0.0 }
 0xc2d   :  { %11951 = vpow2.f32 %v7049_v38  ;;  %7088 = vadd.xlane.f32.xlu0 %v7087_v31  ;;  %v7069_v19 = vsel %vm5526_vm0, %v15323_v20, 0.0 }
 0xc2e   :  { %11953 = vpow2.f32 %v7037_v63  ;;  %7070 = vadd.xlane.f32.xlu1 %v7069_v19 }
 0xc2f   :  { %v6984_v61 = vpop.xlane.xlu2 %6983 }
 0xc30   :  { %v7020_v62 = vsub.f32 %v15274_v51, %v6984_v61  ;;  %v6999_v22 = vpop.xlane.xlu0 %6998  ;;  %v6981_v26 = vpop.xlane.xlu1 %6980 }
 0xc31   :  { %v7025_v30 = vsub.f32 %v15278_v7, %v6999_v22  ;;  %v7019_v8 = vsub.f32 %v15267_v55, %v6981_v26 }
 0xc32   :  { %v7041_v17 = vmul.f32 1.442695, %v7020_v62 }
 0xc33   :  { %v15332_v10 = vpop.eup %11951  ;;  %v7051_v15 = vmul.f32 1.442695, %v7025_v30  ;;  %v7039_v6 = vmul.f32 1.442695, %v7019_v8 }
 0xc34   :  { %v15334_v16 = vpop.eup %11953  ;;  %11955 = vpow2.f32 %v7041_v17  ;;  %v7090_v45 = vsel %vm5526_vm0, %v15332_v10, 0.0 }
 0xc35   :  { %11957 = vpow2.f32 %v7051_v15  ;;  %v7072_v51 = vsel %vm5526_vm0, %v15334_v16, 0.0 }
 0xc36   :  { %11959 = vpow2.f32 %v7039_v6  ;;  %7091 = vadd.xlane.f32.xlu1 %v7090_v45  ;;  %7073 = vadd.xlane.f32.xlu2 %v7072_v51 }
 0xc37   :  { %v6987_v7 = vpop.xlane.xlu2 %6986 }
 0xc38   :  { %v7021_v55 = vsub.f32 %v15276_v32, %v6987_v7  ;;  %v6990_v33 = vpop.xlane.xlu0 %6989  ;;  %v7002_v38 = vpop.xlane.xlu1 %7001 }
 0xc39   :  { %v7022_v63 = vsub.f32 %v15286_v12, %v6990_v33  ;;  %v7026_v31 = vsub.f32 %v15290_v37, %v7002_v38 }
 0xc3a   :  { %v15343_v19 = vpop.eup %11955  ;;  %v7043_v61 = vmul.f32 1.442695, %v7021_v55 }
 0xc3b   :  { %v15345_v62 = vpop.eup %11957  ;;  %v7045_v22 = vmul.f32 1.442695, %v7022_v63  ;;  %v7053_v26 = vmul.f32 1.442695, %v7026_v31  ;;  %v7078_v30 = vsel %vm5526_vm0, %v15343_v19, 0.0 }
 0xc3c   :  { %v15349_v8 = vpop.eup %11959  ;;  %11961 = vpow2.f32 %v7043_v61  ;;  %7079 = vadd.xlane.f32.xlu0 %v7078_v30  ;;  %v7093_v32 = vsel %vm5526_vm0, %v15345_v62, 0.0 }
 0xc3d   :  { %11963 = vpow2.f32 %v7045_v22  ;;  %v7075_v12 = vsel %vm5526_vm0, %v15349_v8, 0.0 }
 0xc3e   :  { %11965 = vpow2.f32 %v7053_v26  ;;  %7094 = vadd.xlane.f32.xlu1 %v7093_v32  ;;  %7076 = vadd.xlane.f32.xlu2 %v7075_v12 }
 0xc3f   :  { %v7008_v37 = vpop.xlane.xlu2 %7007 }
 0xc40   :  { %v7028_v17 = vsub.f32 %v15298_v46, %v7008_v37  ;;  %v7011_v15 = vpop.xlane.xlu0 %7010  ;;  %v7005_v6 = vpop.xlane.xlu1 %7004 }
 0xc41   :  { %v7029_v45 = vsub.f32 %v15300_v27, %v7011_v15  ;;  %v7027_v51 = vsub.f32 %v15288_v25, %v7005_v6 }
 0xc42   :  { %v15358_v7 = vpop.eup %11961  ;;  %v7057_v55 = vmul.f32 1.442695, %v7028_v17 }
 0xc43   :  { %v15360_v33 = vpop.eup %11963  ;;  %v7059_v38 = vmul.f32 1.442695, %v7029_v45  ;;  %v7055_v63 = vmul.f32 1.442695, %v7027_v51  ;;  %v7081_v31 = vsel %vm5526_vm0, %v15358_v7, 0.0 }
 0xc44   :  { %v15364_v61 = vpop.eup %11965  ;;  %11967 = vpow2.f32 %v7057_v55  ;;  %7082 = vadd.xlane.f32.xlu0 %v7081_v31  ;;  %v7084_v46 = vsel %vm5526_vm0, %v15360_v33, 0.0 }
 0xc45   :  { %11969 = vpow2.f32 %v7059_v38  ;;  %v7096_v25 = vsel %vm5526_vm0, %v15364_v61, 0.0 }
 0xc46   :  { %11971 = vpow2.f32 %v7055_v63  ;;  %7085 = vadd.xlane.f32.xlu1 %v7084_v46  ;;  %7097 = vadd.xlane.f32.xlu2 %v7096_v25 }
 0xc48   :  { %v7014_v27 = vpop.xlane.xlu1 %7013 }
 0xc49   :  { %v7030_v22 = vsub.f32 %v15308_v59, %v7014_v27 }
 0xc4a   :  { %v15371_v26 = vpop.eup %11967 }
 0xc4b   :  { %v15373_v30 = vpop.eup %11969  ;;  %v7061_v32 = vmul.f32 1.442695, %v7030_v22  ;;  %v7102_v12 = vsel %vm5526_vm0, %v15371_v26, 0.0 }
 0xc4c   :  { %v15377_v37 = vpop.eup %11971  ;;  %7103 = vadd.xlane.f32.xlu0 %v7102_v12  ;;  %v7105_v17 = vsel %vm5526_vm0, %v15373_v30, 0.0 }
 0xc4d   :  { %11973 = vpow2.f32 %v7061_v32  ;;  %v7099_v15 = vsel %vm5526_vm0, %v15377_v37, 0.0 }
 0xc4e   :  { %7106 = vadd.xlane.f32.xlu1 %v7105_v17  ;;  %7100 = vadd.xlane.f32.xlu2 %v7099_v15  ;;  %v17103_v15 = vld [vmem:[#allocation168_spill] sm:$0xff] }
 0xc53   :  { %v15383_v59 = vpop.eup %11973 }
 0xc54   :  { %v7108_v6 = vsel %vm5526_vm0, %v15383_v59, 0.0 }
 0xc56   :  { %7109 = vadd.xlane.f32.xlu2 %v7108_v6  ;;  %v17104_v6 = vld [vmem:[#allocation167_spill] sm:$0xff] }
 0xc90   :  { %v7065_v45 = vpop.xlane.xlu2 %7064 }
 0xc91   :  { %11975 = vrcp.f32 %v7065_v45  ;;  %v17105_v45 = vpack.c.b16 %v17103_v15, %v17104_v6 }
 0xc97   :  { %v11976_v55 = vpop.eup %11975 }
 0xc98   :  { %v7068_v51 = vpop.xlane.xlu0 %7067  ;;  %v7127_v38 = vmul.f32 %v11976_v55, %v15312_v57 }
 0xc99   :  { %11977 = vrcp.f32 %v7068_v51 }
 0xc9a   :  { %v7143_v31 = vpack.c.bf16 %v7127_v38, %v7127_v38 }
 0xc9c   :  { %v7161_v32 = vunpack.c.l.b16 %v7143_v31 }
 0xc9f   :  { %v11978_v63 = vpop.eup %11977 }
 0xca0   :  { %v7128_v46 = vmul.f32 %v11978_v63, %v15316_v24  ;;  %v7089_v22 = vpop.xlane.xlu0 %7088 }
 0xca1   :  { %v7071_v25 = vpop.xlane.xlu1 %7070 }
 0xca2   :  { %v7144_v27 = vpack.c.bf16 %v7128_v46, %v7128_v46  ;;  %11979 = vrcp.f32 %v7071_v25 }
 0xca3   :  { %11981 = vrcp.f32 %v7089_v22 }
 0xca4   :  { %v7162_v12 = vunpack.c.l.b16 %v7144_v27 }
 0xca6   :  { %v7163_v17 = vpack.c.b16 %v7162_v12, %v7161_v32  ;;  %v17106_v32 = vld [vmem:[#allocation166_spill] sm:$0xff]  ;;  %v17107_v12 = vld [vmem:[#allocation164_spill] sm:$0xff] }
 0xca8   :  { %10945 = vmatmul.msk.bf16.vlgmr.msrb.gmra.mxu0 %vm5526_vm0, %v7163_v17  ;;  %v11980_v55 = vpop.eup %11979  ;;  %v17108_v17 = vpack.c.b16 %v17106_v32, %v17107_v12 }
 0xca9   :  { %7455 = vmatpush.bf16.xpose.msrb.mxu0 %v17105_v45  ;;  %v7074_v51 = vpop.xlane.xlu2 %7073  ;;  %v7092_v57 = vpop.xlane.xlu1 %7091  ;;  %v7129_v24 = vmul.f32 %v11980_v55, %v15323_v20 }
 0xcaa   :  { %11983 = vrcp.f32 %v7074_v51  ;;  %v11982_v38 = vpop.eup %11981 }
 0xcab   :  { %11985 = vrcp.f32 %v7092_v57  ;;  %v7135_v63 = vmul.f32 %v11982_v38, %v15321_v34  ;;  %v7145_v27 = vpack.c.bf16 %v7129_v24, %v7129_v24 }
 0xcad   :  { %v7151_v45 = vpack.c.bf16 %v7135_v63, %v7135_v63  ;;  %v7195_v34 = vunpack.c.l.b16 %v7145_v27  ;;  %v17109_v27 = vld [vmem:[#allocation171_spill] sm:$0xff] }
 0xcaf   :  { %v7080_v31 = vpop.xlane.xlu0 %7079 }
 0xcb0   :  { %v11984_v46 = vpop.eup %11983  ;;  %11987 = vrcp.f32 %v7080_v31  ;;  %v7297_v31 = vunpack.c.l.b16 %v7151_v45 }
 0xcb1   :  { %v11986_v25 = vpop.eup %11985  ;;  %v7130_v22 = vmul.f32 %v11984_v46, %v15334_v16  ;;  %7456 = vmatpush.bf16.xpose.msrb.mxu0 %v17108_v17  ;;  %v7077_v15 = vpop.xlane.xlu2 %7076 }
 0xcb2   :  { %v7095_v6 = vpop.xlane.xlu1 %7094  ;;  %v7136_v51 = vmul.f32 %v11986_v25, %v15332_v10  ;;  %11989 = vrcp.f32 %v7077_v15  ;;  %v17110_v15 = vld [vmem:[#allocation153_spill] sm:$0xff] }
 0xcb3   :  { %v7146_v20 = vpack.c.bf16 %v7130_v22, %v7130_v22  ;;  %11991 = vrcp.f32 %v7095_v6  ;;  %v17111_v6 = vpack.c.b16 %v17109_v27, %v17110_v15  ;;  %v17119_v27 = vld [vmem:[#allocation108_spill] sm:$0xff] }
 0xcb4   :  { %v7152_v57 = vpack.c.bf16 %v7136_v51, %v7136_v51  ;;  %v17112_v51 = vld [vmem:[#allocation186_spill] sm:$0xff] }
 0xcb5   :  { %v7196_v55 = vunpack.c.l.b16 %v7146_v20  ;;  %v17113_v20 = vld [vmem:[#allocation54_spill] sm:$0xff] }
 0xcb6   :  { %v11988_v38 = vpop.eup %11987  ;;  %v7298_v24 = vunpack.c.l.b16 %v7152_v57  ;;  %v17114_v57 = vpack.c.b16 %v17112_v51, %v17113_v20 }
 0xcb7   :  { %v7197_v58 = vpack.c.b16 %v7196_v55, %v7195_v34  ;;  %v7132_v16 = vmul.f32 %v11988_v38, %v15343_v19  ;;  %v7083_v46 = vpop.xlane.xlu0 %7082 }
 0xcb8   :  { %v11990_v32 = vpop.eup %11989  ;;  %v7299_v12 = vpack.c.b16 %v7298_v24, %v7297_v31  ;;  %11993 = vrcp.f32 %v7083_v46 }
 0xcb9   :  { %v7148_v17 = vpack.c.bf16 %v7132_v16, %v7132_v16  ;;  %v7131_v63 = vmul.f32 %v11990_v32, %v15349_v8  ;;  %v7098_v10 = vpop.xlane.xlu2 %7097  ;;  %10946 = vmatmul.msk.bf16.vlgmr.msrb.gmra.mxu1 %vm5526_vm0, %v7197_v58  ;;  %v11992_v22 = vpop.eup %11991 }
 0xcba   :  { %v7086_v25 = vpop.xlane.xlu1 %7085  ;;  %11995 = vrcp.f32 %v7098_v10  ;;  %10949 = vmatmul.msk.bf16.vlgmr.msra.gmra.mxu0 %vm5526_vm0, %v7299_v12  ;;  %7487 = vmatpush.bf16.xpose.msrb.mxu1 %v17111_v6  ;;  %v7137_v34 = vmul.f32 %v11992_v22, %v15345_v62  ;;  %v17116_v62 = vld [vmem:[#allocation124_spill] sm:$0xff] }
 0xcbb   :  { %v7230_v19 = vunpack.c.l.b16 %v7148_v17  ;;  %v7147_v45 = vpack.c.bf16 %v7131_v63, %v7131_v63  ;;  %7583 = vmatpush.bf16.xpose.msra.mxu0 %v17114_v57  ;;  %11997 = vrcp.f32 %v7086_v25  ;;  %v17115_v25 = vld [vmem:[#allocation176_spill] sm:$0xff] }
 0xcbc   :  { %v7153_v46 = vpack.c.bf16 %v7137_v34, %v7137_v34  ;;  %v17117_v22 = vpack.c.b16 %v17115_v25, %v17116_v62  ;;  %v17124_v25 = vld [vmem:[#allocation175_spill] sm:$0xff]  ;;  %v17127_v62 = vld [vmem:[#allocation52_spill] sm:$0xff] }
 0xcbd   :  { %v7229_v8 = vunpack.c.l.b16 %v7147_v45  ;;  %v17122_v45 = vld [vmem:[#allocation183_spill] sm:$0xff] }
 0xcbe   :  { %v11994_v58 = vpop.eup %11993  ;;  %v7331_v57 = vunpack.c.l.b16 %v7153_v46 }
 0xcbf   :  { %v7231_v55 = vpack.c.b16 %v7230_v19, %v7229_v8  ;;  %v7133_v38 = vmul.f32 %v11994_v58, %v15358_v7  ;;  %v7104_v31 = vpop.xlane.xlu0 %7103  ;;  %v17118_v7 = vld [vmem:[#allocation170_spill] sm:$0xff]  ;;  %v17121_v19 = vld [vmem:[#allocation185_spill] sm:$0xff] }
 0xcc0   :  { %v11996_v24 = vpop.eup %11995  ;;  %11999 = vrcp.f32 %v7104_v31  ;;  %v17120_v15 = vpack.c.b16 %v17118_v7, %v17119_v27  ;;  %v17123_v51 = vpack.c.b16 %v17121_v19, %v17122_v45  ;;  %v17130_v7 = vld [vmem:[#allocation181_spill] sm:$0xff]  ;;  %v17131_v27 = vld [vmem:[#allocation24_spill] sm:$0xff] }
 0xcc1   :  { %v11998_v16 = vpop.eup %11997  ;;  %v7149_v32 = vpack.c.bf16 %v7133_v38, %v7133_v38  ;;  %v7138_v12 = vmul.f32 %v11996_v24, %v15364_v61  ;;  %10947 = vmatmul.msk.bf16.vlgmr.msrb.gmra.mxu2 %vm5526_vm0, %v7231_v55  ;;  %v7101_v17 = vpop.xlane.xlu2 %7100  ;;  %v17136_v45 = vld [vmem:[#allocation133_spill] sm:$0xff] }
 0xcc2   :  { %v7107_v63 = vpop.xlane.xlu1 %7106  ;;  %v7134_v10 = vmul.f32 %v11998_v16, %v15360_v33  ;;  %7519 = vmatpush.bf16.xpose.msrb.mxu2 %v17117_v22  ;;  %12001 = vrcp.f32 %v7101_v17  ;;  %7488 = vmatpush.bf16.xpose.msrb.mxu1 %v17120_v15  ;;  %v17133_v15 = vld [vmem:[#allocation191_spill] sm:$0xff] }
 0xcc3   :  { %v7154_v6 = vpack.c.bf16 %v7138_v12, %v7138_v12  ;;  %7584 = vmatpush.bf16.xpose.msra.mxu0 %v17123_v51  ;;  %v7263_v61 = vunpack.c.l.b16 %v7149_v32  ;;  %12003 = vrcp.f32 %v7107_v63  ;;  %v17125_v32 = vld [vmem:[#allocation173_spill] sm:$0xff] }
 0xcc4   :  { %v7150_v20 = vpack.c.bf16 %v7134_v10, %v7134_v10  ;;  %v17126_v10 = vpack.c.b16 %v17124_v25, %v17125_v32  ;;  %v17137_v51 = vld [vmem:[#allocation125_spill] sm:$0xff]  ;;  %v17145_v32 = vld [vmem:[#allocation180_spill] sm:$0xff] }
 0xcc5   :  { %v7332_v8 = vunpack.c.l.b16 %v7154_v6  ;;  %v17134_v6 = vld [vmem:[#allocation66_spill] sm:$0xff] }
 0xcc6   :  { %v12000_v33 = vpop.eup %11999  ;;  %v7264_v34 = vunpack.c.l.b16 %v7150_v20  ;;  %v17135_v19 = vpack.c.b16 %v17133_v15, %v17134_v6  ;;  %v17155_v15 = vld [vmem:[#allocation72_spill] sm:$0xff] }
 0xcc7   :  { %v7333_v58 = vpack.c.b16 %v7332_v8, %v7331_v57  ;;  %v7140_v55 = vmul.f32 %v12000_v33, %v15371_v26  ;;  %v17128_v26 = vld [vmem:[#allocation50_spill] sm:$0xff] }
 0xcc8   :  { %v12002_v38 = vpop.eup %12001  ;;  %v7265_v31 = vpack.c.b16 %v7264_v34, %v7263_v61  ;;  %v17129_v22 = vpack.c.b16 %v17127_v62, %v17128_v26  ;;  %v17138_v61 = vpack.c.b16 %v17136_v45, %v17137_v51  ;;  %v17139_v34 = vld [vmem:[#allocation59_spill] sm:$0xff]  ;;  %v17158_v45 = vld [vmem:[#allocation74_spill] sm:$0xff] }
 0xcc9   :  { %v7156_v24 = vpack.c.bf16 %v7140_v55, %v7140_v55  ;;  %v7139_v16 = vmul.f32 %v12002_v38, %v15377_v37  ;;  %v7110_v12 = vpop.xlane.xlu2 %7109  ;;  %10950 = vmatmul.msk.bf16.vlgmr.msra.gmra.mxu1 %vm5526_vm0, %v7333_v58  ;;  %v12004_v17 = vpop.eup %12003  ;;  %v17132_v37 = vpack.c.b16 %v17130_v7, %v17131_v27  ;;  %v17140_v58 = vld [vmem:[#allocation115_spill] sm:$0xff]  ;;  %v17151_v7 = vld [vmem:[#allocation58_spill] sm:$0xff] }
 0xcca   :  { %7520 = vmatpush.bf16.xpose.msrb.mxu2 %v17126_v10  ;;  %12005 = vrcp.f32 %v7110_v12  ;;  %10948 = vmatmul.msk.bf16.vlgmr.msrb.gmra.mxu3 %vm5526_vm0, %v7265_v31  ;;  %v7141_v57 = vmul.f32 %v12004_v17, %v15373_v30  ;;  %v17141_v55 = vpack.c.b16 %v17139_v34, %v17140_v58  ;;  %v17146_v10 = vld [vmem:[#allocation178_spill] sm:$0xff]  ;;  %v17149_v17 = vld [vmem:[#allocation188_spill] sm:$0xff]  ;;  %v17165_v34 = vld [vmem:[#allocation67_spill] sm:$0xff] }
 0xccb   :  { %v7366_v46 = vunpack.c.l.b16 %v7156_v24  ;;  %v7155_v63 = vpack.c.bf16 %v7139_v16, %v7139_v16  ;;  %7457 = vmatmul.bf16.vlgmr.msrb.gmra.mxu0 %v17129_v22  ;;  %7551 = vmatpush.bf16.xpose.msrb.mxu3 %v17132_v37  ;;  %v17142_v24 = vld [vmem:[#allocation195_spill] sm:$0xff]  ;;  %v17143_v16 = vld [vmem:[#allocation78_spill] sm:$0xff]  ;;  %v17166_v58 = vpack.c.b16 %v14549_v29, %v17165_v34  ;;  %v17175_v29 = vpack.c.b16 %v14581_v13, %v14577_v35  ;;  %v17187_v13 = vld [vmem:[#allocation148_spill] sm:$0xff] }
 0xccc   :  { %7615 = vmatpush.bf16.xpose.msra.mxu1 %v17135_v19  ;;  %7905 = vmatpush.bf16.msrb.mxu0 %v17138_v61  ;;  %v7157_v38 = vpack.c.bf16 %v7141_v57, %v7141_v57  ;;  %v17144_v12 = vpack.c.b16 %v17142_v24, %v17143_v16  ;;  %v17148_v30 = vld [vmem:[#allocation190_spill] sm:$0xff]  ;;  %v17157_v19 = vld [vmem:[#allocation76_spill] sm:$0xff]  ;;  %v17173_v16 = vld [vmem:[#allocation197_spill] sm:$0xff] }
 0xccd   :  { %v7365_v20 = vunpack.c.l.b16 %v7155_v63  ;;  %v17147_v63 = vpack.c.b16 %v17145_v32, %v17146_v10  ;;  %v17154_v37 = vld [vmem:[#allocation194_spill] sm:$0xff]  ;;  %v17159_v51 = vpack.c.b16 %v17157_v19, %v17158_v45  ;;  %v17160_v61 = vld [vmem:[#allocation200_spill] sm:$0xff]  ;;  %v17184_v10 = vld [vmem:[#allocation73_spill] sm:$0xff] }
 0xcce   :  { %v7399_v62 = vunpack.c.l.b16 %v7157_v38  ;;  %v17156_v6 = vpack.c.b16 %v17154_v37, %v17155_v15  ;;  %v17168_v38 = vld [vmem:[#allocation64_spill] sm:$0xff]  ;;  %v17205_v45 = vld [vmem:[#allocation77_spill] sm:$0xff] }
 0xccf   :  { %v7367_v8 = vpack.c.b16 %v7366_v46, %v7365_v20  ;;  %v17150_v46 = vpack.c.b16 %v17148_v30, %v17149_v17  ;;  %v17161_v20 = vld [vmem:[#allocation163_spill] sm:$0xff]  ;;  %v17188_v30 = vld [vmem:[#allocation65_spill] sm:$0xff]  ;;  %v17202_v15 = vld [vmem:[#allocation220_spill] sm:$0xff] }
 0xcd0   :  { %v12006_v33 = vpop.eup %12005  ;;  %7906 = vmatpush.bf16.msrb.mxu0 %v17141_v55  ;;  %v17162_v57 = vpack.c.b16 %v17160_v61, %v17161_v20  ;;  %v17167_v55 = vpack.c.b16 %v14657_v43, %v14653_v36  ;;  %v17179_v43 = vld [vmem:[#allocation70_spill] sm:$0xff]  ;;  %v17189_v17 = vpack.c.b16 %v17187_v13, %v17188_v30 }
 0xcd1   :  { %v7142_v31 = vmul.f32 %v12006_v33, %v15383_v59  ;;  %10951 = vmatmul.msk.bf16.vlgmr.msra.gmra.mxu2 %vm5526_vm0, %v7367_v8  ;;  %v17152_v59 = vld [vmem:[#allocation56_spill] sm:$0xff]  ;;  %v17163_v8 = vpack.c.b16 %v14563_v60, %v14561_v49  ;;  %v17164_v33 = vpack.c.b16 %v14671_v48, %v14669_v50  ;;  %v17171_v49 = vpack.c.b16 %v14595_v5, %v14593_v14  ;;  %v17172_v60 = vld [vmem:[#allocation199_spill] sm:$0xff]  ;;  %v17176_v48 = vld [vmem:[#allocation82_spill] sm:$0xff] }
 0xcd2   :  { %7647 = vmatpush.bf16.xpose.msra.mxu2 %v17144_v12  ;;  %v17153_v27 = vpack.c.b16 %v17151_v7, %v17152_v59  ;;  %v17174_v50 = vpack.c.b16 %v17172_v60, %v17173_v16  ;;  %v17177_v12 = vld [vmem:[#allocation80_spill] sm:$0xff]  ;;  %v17182_v14 = vpack.c.b16 %v14695_v53, %v14693_v4  ;;  %v17183_v5 = vpack.c.b16 %v14631_v18, %v14629_v41  ;;  %v17194_v7 = vld [vmem:[#allocation218_spill] sm:$0xff]  ;;  %v17197_v59 = vld [vmem:[#allocation71_spill] sm:$0xff] }
 0xcd3   :  { %v7158_v25 = vpack.c.bf16 %v7142_v31, %v7142_v31  ;;  %7552 = vmatpush.bf16.xpose.msrb.mxu3 %v17147_v63  ;;  %v17169_v31 = vld [vmem:[#allocation62_spill] sm:$0xff]  ;;  %v17178_v36 = vpack.c.b16 %v17176_v48, %v17177_v12  ;;  %v17185_v63 = vld [vmem:[#allocation104_spill] sm:$0xff] }
 0xcd4   :  { %7616 = vmatpush.bf16.xpose.msra.mxu1 %v17150_v46  ;;  %v17170_v24 = vpack.c.b16 %v17168_v38, %v17169_v31  ;;  %v17186_v35 = vpack.c.b16 %v17184_v10, %v17185_v63  ;;  %v17190_v46 = vld [vmem:[#allocation88_spill] sm:$0xff]  ;;  %v17196_v53 = vld [vmem:[#allocation118_spill] sm:$0xff] }
 0xcd5   :  { %v7400_v26 = vunpack.c.l.b16 %v7158_v25  ;;  %v17180_v25 = vld [vmem:[#allocation68_spill] sm:$0xff]  ;;  %v17198_v41 = vpack.c.b16 %v17196_v53, %v17197_v59  ;;  %v17199_v18 = vld [vmem:[#allocation94_spill] sm:$0xff] }
 0xcd6   :  { %v17181_v32 = vpack.c.b16 %v17179_v43, %v17180_v25 }
 0xcd7   :  { %v7401_v22 = vpack.c.b16 %v7400_v26, %v7399_v62  ;;  %v17191_v62 = vld [vmem:[#allocation86_spill] sm:$0xff] }
 0xcd8   :  { %v17192_v26 = vpack.c.b16 %v17190_v46, %v17191_v62 }
 0xcd9   :  { %7489 = vmatmul.bf16.vlgmr.msrb.gmra.mxu1 %v17153_v27  ;;  %v17200_v27 = vld [vmem:[#allocation92_spill] sm:$0xff] }
 0xcda   :  { %10952 = vmatmul.msk.bf16.vlgmr.msra.gmra.mxu3 %vm5526_vm0, %v7401_v22  ;;  %7648 = vmatpush.bf16.xpose.msra.mxu2 %v17156_v6  ;;  %v17193_v22 = vld [vmem:[#allocation128_spill] sm:$0xff]  ;;  %v17201_v37 = vpack.c.b16 %v17199_v18, %v17200_v27  ;;  %v17203_v6 = vld [vmem:[#allocation219_spill] sm:$0xff] }
 0xcdb   :  { %7585 = vmatmul.bf16.vlgmr.msra.gmra.mxu0 %v17159_v51  ;;  %7679 = vmatpush.bf16.xpose.msra.mxu3 %v17162_v57  ;;  %v17195_v4 = vpack.c.b16 %v17193_v22, %v17194_v7  ;;  %v17204_v19 = vpack.c.b16 %v17202_v15, %v17203_v6  ;;  %v17206_v51 = vld [vmem:[#allocation79_spill] sm:$0xff] }
 0xcdc   :  { %7939 = vmatpush.bf16.msrb.mxu1 %v17163_v8  ;;  %8041 = vmatpush.bf16.msra.mxu0 %v17164_v33  ;;  %v17207_v61 = vpack.c.b16 %v17205_v45, %v17206_v51 }
 0xce0   :  { %7940 = vmatpush.bf16.msrb.mxu1 %v17166_v58  ;;  %8042 = vmatpush.bf16.msra.mxu0 %v17167_v55 }
 0xce1   :  { %7521 = vmatmul.bf16.vlgmr.msrb.gmra.mxu2 %v17170_v24 }
 0xce2   :  { %7973 = vmatpush.bf16.msrb.mxu2 %v17171_v49 }
 0xce3   :  { %7680 = vmatpush.bf16.xpose.msra.mxu3 %v17174_v50 }
 0xce6   :  { %7974 = vmatpush.bf16.msrb.mxu2 %v17175_v29 }
 0xce9   :  { %7617 = vmatmul.bf16.vlgmr.msra.gmra.mxu1 %v17178_v36 }
 0xcea   :  { %7553 = vmatmul.bf16.vlgmr.msrb.gmra.mxu3 %v17181_v32  ;;  %8075 = vmatpush.bf16.msra.mxu1 %v17182_v14 }
 0xceb   :  { %8007 = vmatpush.bf16.msrb.mxu3 %v17183_v5 }
 0xcee   :  { %8076 = vmatpush.bf16.msra.mxu1 %v17186_v35 }
 0xcef   :  { %8008 = vmatpush.bf16.msrb.mxu3 %v17189_v17 }
 0xcf1   :  { %7649 = vmatmul.bf16.vlgmr.msra.gmra.mxu2 %v17192_v26 }
 0xcf2   :  { %8109 = vmatpush.bf16.msra.mxu2 %v17195_v4 }
 0xcf6   :  { %8110 = vmatpush.bf16.msra.mxu2 %v17198_v41 }
 0xcfa   :  { %7681 = vmatmul.bf16.vlgmr.msra.gmra.mxu3 %v17201_v37 }
 0xcfb   :  { %8143 = vmatpush.bf16.msra.mxu3 %v17204_v19 }
 0xcff   :  { %8144 = vmatpush.bf16.msra.mxu3 %v17207_v61 }
 0xd25   :  { %v15531_v20 = vpop.f32.mrf.mxu0 }
 0xd2d   :  { %v15533_v57 = vpop.f32.mrf.mxu0 }
 0xd36   :  { %v15535_v8 = vpop.f32.mrf.mxu1 }
 0xd37   :  { %v15537_v33 = vpop.f32.mrf.mxu0 }
 0xd3e   :  { %v15539_v34 = vpop.f32.mrf.mxu1 }
 0xd3f   :  { %v15541_v58 = vpop.f32.mrf.mxu0 }
 0xd44   :  { %v15543_v55 = vpop.f32.mrf.mxu2 }
 0xd46   :  { %v15545_v38 = vpop.f32.mrf.mxu1 }
 0xd48   :  { %v7458_v31 = vpop.f32.mrf.mxu0 }
 0xd49   :  { %v7687_v24 = vsel %vm5526_vm0, %v7458_v31, -inf }
 0xd4a   :  { %7688 = vmax.xlane.f32.xlu0 %v7687_v24 }
 0xd4c   :  { %v15548_v49 = vpop.f32.mrf.mxu2 }
 0xd4d   :  { %v15550_v60 = vpop.f32.mrf.mxu3 }
 0xd4e   :  { %v15552_v16 = vpop.f32.mrf.mxu1 }
 0xd50   :  { %v7460_v50 = vpop.f32.mrf.mxu0 }
 0xd51   :  { %v7690_v29 = vsel %vm5526_vm0, %v7460_v50, -inf }
 0xd52   :  { %7691 = vmax.xlane.f32.xlu1 %v7690_v29 }
 0xd54   :  { %v15555_v48 = vpop.f32.mrf.mxu2 }
 0xd55   :  { %v15557_v12 = vpop.f32.mrf.mxu3 }
 0xd56   :  { %v7490_v36 = vpop.f32.mrf.mxu1 }
 0xd57   :  { %v7693_v43 = vsel %vm5526_vm0, %v7490_v36, -inf }
 0xd58   :  { %7694 = vmax.xlane.f32.xlu2 %v7693_v43  ;;  %v15574_v22 = vpop.f32.mrf.mxu0 }
 0xd59   :  { %v7711_v7 = vsel %vm5526_vm0, %v15574_v22, -inf }
 0xd5c   :  { %v15560_v25 = vpop.f32.mrf.mxu2 }
 0xd5d   :  { %v15562_v32 = vpop.f32.mrf.mxu3 }
 0xd5e   :  { %v7492_v14 = vpop.f32.mrf.mxu1 }
 0xd5f   :  { %v7696_v5 = vsel %vm5526_vm0, %v7492_v14, -inf }
 0xd60   :  { %7697 = vmax.xlane.f32.xlu0 %v7696_v5  ;;  %v15582_v45 = vpop.f32.mrf.mxu0 }
 0xd64   :  { %v7522_v10 = vpop.f32.mrf.mxu2 }
 0xd65   :  { %v15565_v63 = vpop.f32.mrf.mxu3  ;;  %v7699_v35 = vsel %vm5526_vm0, %v7522_v10, -inf }
 0xd66   :  { %7700 = vmax.xlane.f32.xlu1 %v7699_v35 }
 0xd6c   :  { %v7524_v13 = vpop.f32.mrf.mxu2 }
 0xd6d   :  { %v7554_v30 = vpop.f32.mrf.mxu3  ;;  %v7702_v17 = vsel %vm5526_vm0, %v7524_v13, -inf }
 0xd6e   :  { %7703 = vmax.xlane.f32.xlu2 %v7702_v17  ;;  %v7705_v46 = vsel %vm5526_vm0, %v7554_v30, -inf }
 0xd6f   :  { %7706 = vmax.xlane.f32.xlu0 %v7705_v46 }
 0xd75   :  { %v15570_v62 = vpop.f32.mrf.mxu3 }
 0xd76   :  { %v7708_v26 = vsel %vm5526_vm0, %v15570_v62, -inf }
 0xd77   :  { %7709 = vmax.xlane.f32.xlu1 %v7708_v26 }
 0xd7f   :  { %7712 = vmax.xlane.f32.xlu1 %v7711_v7 }
 0xdbd   :  { %v7689_v4 = vpop.xlane.xlu0 %7688 }
 0xdbe   :  { %v7735_v53 = vsub.f32 %v7458_v31, %v7689_v4  ;;  %v7714_v31 = vsel %vm5526_vm0, %v15582_v45, -inf  ;;  %v15598_v4 = vpop.f32.mrf.mxu1 }
 0xdc0   :  { %v7751_v59 = vmul.f32 1.442695, %v7735_v53  ;;  %v15600_v53 = vpop.f32.mrf.mxu2 }
 0xdc2   :  { %12007 = vpow2.f32 %v7751_v59 }
 0xdc5   :  { %v7692_v41 = vpop.xlane.xlu1 %7691 }
 0xdc6   :  { %v7736_v18 = vsub.f32 %v7460_v50, %v7692_v41 }
 0xdc8   :  { %v15578_v27 = vpop.eup %12007  ;;  %v7753_v37 = vmul.f32 1.442695, %v7736_v18 }
 0xdc9   :  { %v7783_v15 = vsel %vm5526_vm0, %v15578_v27, 0.0 }
 0xdca   :  { %12009 = vpow2.f32 %v7753_v37  ;;  %7784 = vadd.xlane.f32.xlu2 %v7783_v15 }
 0xdcb   :  { %v7695_v6 = vpop.xlane.xlu2 %7694 }
 0xdcc   :  { %v7737_v19 = vsub.f32 %v7490_v36, %v7695_v6  ;;  %v7717_v6 = vsel %vm5526_vm0, %v15598_v4, -inf }
 0xdce   :  { %v7755_v51 = vmul.f32 1.442695, %v7737_v19 }
 0xdd0   :  { %v15584_v61 = vpop.eup %12009  ;;  %12011 = vpow2.f32 %v7755_v51  ;;  %v15608_v51 = vpop.f32.mrf.mxu1 }
 0xdd1   :  { %v7786_v24 = vsel %vm5526_vm0, %v15584_v61, 0.0 }
 0xdd2   :  { %7715 = vmax.xlane.f32.xlu2 %v7714_v31  ;;  %7787 = vadd.xlane.f32.xlu0 %v7786_v24 }
 0xdd3   :  { %v7698_v50 = vpop.xlane.xlu0 %7697 }
 0xdd4   :  { %v7738_v29 = vsub.f32 %v7492_v14, %v7698_v50 }
 0xdd6   :  { %v15590_v43 = vpop.eup %12011  ;;  %v7757_v5 = vmul.f32 1.442695, %v7738_v29  ;;  %v7720_v29 = vsel %vm5526_vm0, %v15608_v51, -inf }
 0xdd7   :  { %v7789_v36 = vsel %vm5526_vm0, %v15590_v43, 0.0 }
 0xdd8   :  { %12013 = vpow2.f32 %v7757_v5 }
 0xdd9   :  { %v7701_v35 = vpop.xlane.xlu1 %7700 }
 0xdda   :  { %7790 = vadd.xlane.f32.xlu0 %v7789_v36  ;;  %v7739_v17 = vsub.f32 %v7522_v10, %v7701_v35  ;;  %v15621_v36 = vpop.f32.mrf.mxu3 }
 0xddc   :  { %v7759_v46 = vmul.f32 1.442695, %v7739_v17 }
 0xdde   :  { %v15594_v26 = vpop.eup %12013  ;;  %12015 = vpow2.f32 %v7759_v46 }
 0xddf   :  { %v7792_v7 = vsel %vm5526_vm0, %v15594_v26, 0.0 }
 0xde0   :  { %7793 = vadd.xlane.f32.xlu1 %v7792_v7  ;;  %v7723_v7 = vsel %vm5526_vm0, %v15600_v53, -inf }
 0xde1   :  { %v7704_v14 = vpop.xlane.xlu2 %7703 }
 0xde2   :  { %v7740_v59 = vsub.f32 %v7524_v13, %v7704_v14  ;;  %v7707_v41 = vpop.xlane.xlu0 %7706  ;;  %v15612_v13 = vpop.f32.mrf.mxu2 }
 0xde3   :  { %v7741_v15 = vsub.f32 %v7554_v30, %v7707_v41  ;;  %v7726_v5 = vsel %vm5526_vm0, %v15612_v13, -inf }
 0xde4   :  { %v15602_v18 = vpop.eup %12015  ;;  %v7761_v37 = vmul.f32 1.442695, %v7740_v59  ;;  %v7729_v59 = vsel %vm5526_vm0, %v15621_v36, -inf }
 0xde5   :  { %v7795_v10 = vsel %vm5526_vm0, %v15602_v18, 0.0  ;;  %v7763_v19 = vmul.f32 1.442695, %v7741_v15  ;;  %v15634_v15 = vpop.f32.mrf.mxu3 }
 0xde6   :  { %12017 = vpow2.f32 %v7761_v37  ;;  %7796 = vadd.xlane.f32.xlu2 %v7795_v10 }
 0xde7   :  { %12019 = vpow2.f32 %v7763_v19 }
 0xde8   :  { %7718 = vmax.xlane.f32.xlu1 %v7717_v6 }
 0xdea   :  { %v7710_v31 = vpop.xlane.xlu1 %7709 }
 0xdeb   :  { %v7742_v30 = vsub.f32 %v15570_v62, %v7710_v31 }
 0xdec   :  { %v15610_v24 = vpop.eup %12017 }
 0xded   :  { %v7798_v50 = vsel %vm5526_vm0, %v15610_v24, 0.0  ;;  %v7765_v35 = vmul.f32 1.442695, %v7742_v30  ;;  %v15623_v17 = vpop.eup %12019 }
 0xdee   :  { %7799 = vadd.xlane.f32.xlu0 %v7798_v50  ;;  %7721 = vmax.xlane.f32.xlu2 %v7720_v29  ;;  %v7801_v14 = vsel %vm5526_vm0, %v15623_v17, 0.0 }
 0xdef   :  { %12021 = vpow2.f32 %v7765_v35 }
 0xdf0   :  { %7727 = vmax.xlane.f32.xlu1 %v7726_v5 }
 0xdf2   :  { %v7713_v46 = vpop.xlane.xlu1 %7712 }
 0xdf3   :  { %v7743_v62 = vsub.f32 %v15574_v22, %v7713_v46  ;;  %v7732_v22 = vsel %vm5526_vm0, %v15634_v15, -inf }
 0xdf5   :  { %v7767_v41 = vmul.f32 1.442695, %v7743_v62  ;;  %v15632_v37 = vpop.eup %12021 }
 0xdf6   :  { %7724 = vmax.xlane.f32.xlu0 %v7723_v7  ;;  %7802 = vadd.xlane.f32.xlu2 %v7801_v14  ;;  %v7804_v10 = vsel %vm5526_vm0, %v15632_v37, 0.0 }
 0xdf7   :  { %12023 = vpow2.f32 %v7767_v41 }
 0xdf8   :  { %7730 = vmax.xlane.f32.xlu1 %v7729_v59 }
 0xdfd   :  { %v15640_v6 = vpop.eup %12023 }
 0xdfe   :  { %7733 = vmax.xlane.f32.xlu2 %v7732_v22  ;;  %7805 = vadd.xlane.f32.xlu0 %v7804_v10  ;;  %v7807_v19 = vsel %vm5526_vm0, %v15640_v6, 0.0 }
 0xe06   :  { %7808 = vadd.xlane.f32.xlu0 %v7807_v19 }
 0xe3d   :  { %v7785_v31 = vpop.xlane.xlu2 %7784 }
 0xe3e   :  { %12025 = vrcp.f32 %v7785_v31 }
 0xe44   :  { %v12026_v29 = vpop.eup %12025 }
 0xe45   :  { %v7716_v30 = vpop.xlane.xlu2 %7715  ;;  %v7788_v50 = vpop.xlane.xlu0 %7787  ;;  %v7847_v46 = vmul.f32 %v12026_v29, %v15578_v27 }
 0xe46   :  { %v7744_v5 = vsub.f32 %v15582_v45, %v7716_v30  ;;  %12027 = vrcp.f32 %v7788_v50 }
 0xe47   :  { %v7863_v7 = vpack.c.bf16 %v7847_v46, %v7847_v46 }
 0xe48   :  { %v7769_v35 = vmul.f32 1.442695, %v7744_v5 }
 0xe49   :  { %v7885_v10 = vunpack.c.l.b16 %v7863_v7 }
 0xe4a   :  { %12029 = vpow2.f32 %v7769_v35 }
 0xe4c   :  { %v12028_v62 = vpop.eup %12027 }
 0xe4d   :  { %v7848_v14 = vmul.f32 %v12028_v62, %v15584_v61  ;;  %v7791_v59 = vpop.xlane.xlu0 %7790 }
 0xe4e   :  { %12031 = vrcp.f32 %v7791_v59 }
 0xe4f   :  { %v7864_v41 = vpack.c.bf16 %v7848_v14, %v7848_v14 }
 0xe50   :  { %v15647_v22 = vpop.eup %12029 }
 0xe51   :  { %v7886_v19 = vunpack.c.l.b16 %v7864_v41  ;;  %v7810_v31 = vsel %vm5526_vm0, %v15647_v22, 0.0 }
 0xe52   :  { %7811 = vadd.xlane.f32.xlu1 %v7810_v31 }
 0xe53   :  { %v7887_v45 = vpack.c.b16 %v7886_v19, %v7885_v10  ;;  %v7794_v30 = vpop.xlane.xlu1 %7793 }
 0xe54   :  { %v12032_v50 = vpop.eup %12031  ;;  %12033 = vrcp.f32 %v7794_v30 }
 0xe55   :  { %10953 = vmatmul.msk.bf16.vlgmr.msrb.gmra.mxu0 %vm5526_vm0, %v7887_v45  ;;  %v7849_v27 = vmul.f32 %v12032_v50, %v15590_v43 }
 0xe57   :  { %v7865_v5 = vpack.c.bf16 %v7849_v27, %v7849_v27 }
 0xe59   :  { %v7797_v61 = vpop.xlane.xlu2 %7796  ;;  %v7919_v59 = vunpack.c.l.b16 %v7865_v5 }
 0xe5a   :  { %v12034_v29 = vpop.eup %12033  ;;  %12035 = vrcp.f32 %v7797_v61 }
 0xe5b   :  { %v7850_v35 = vmul.f32 %v12034_v29, %v15594_v26  ;;  %v7719_v46 = vpop.xlane.xlu1 %7718 }
 0xe5c   :  { %v7745_v62 = vsub.f32 %v15598_v4, %v7719_v46 }
 0xe5d   :  { %v7866_v7 = vpack.c.bf16 %v7850_v35, %v7850_v35 }
 0xe5e   :  { %v7771_v14 = vmul.f32 1.442695, %v7745_v62 }
 0xe5f   :  { %v7920_v41 = vunpack.c.l.b16 %v7866_v7 }
 0xe60   :  { %12037 = vpow2.f32 %v7771_v14  ;;  %v12036_v45 = vpop.eup %12035 }
 0xe61   :  { %v7921_v10 = vpack.c.b16 %v7920_v41, %v7919_v59  ;;  %v7800_v19 = vpop.xlane.xlu0 %7799  ;;  %v7722_v31 = vpop.xlane.xlu2 %7721  ;;  %v7851_v4 = vmul.f32 %v12036_v45, %v15602_v18 }
 0xe62   :  { %12039 = vrcp.f32 %v7800_v19  ;;  %v7746_v43 = vsub.f32 %v15608_v51, %v7722_v31 }
 0xe63   :  { %10954 = vmatmul.msk.bf16.vlgmr.msrb.gmra.mxu1 %vm5526_vm0, %v7921_v10  ;;  %v7728_v30 = vpop.xlane.xlu1 %7727  ;;  %v7867_v35 = vpack.c.bf16 %v7851_v4, %v7851_v4 }
 0xe64   :  { %v7773_v26 = vmul.f32 1.442695, %v7746_v43  ;;  %v7748_v50 = vsub.f32 %v15612_v13, %v7728_v30 }
 0xe65   :  { %v7953_v10 = vunpack.c.l.b16 %v7867_v35 }
 0xe66   :  { %v15659_v27 = vpop.eup %12037  ;;  %12041 = vpow2.f32 %v7773_v26  ;;  %v7777_v61 = vmul.f32 1.442695, %v7748_v50 }
 0xe67   :  { %v7813_v29 = vsel %vm5526_vm0, %v15659_v27, 0.0 }
 0xe68   :  { %v12040_v5 = vpop.eup %12039  ;;  %12043 = vpow2.f32 %v7777_v61  ;;  %7814 = vadd.xlane.f32.xlu2 %v7813_v29 }
 0xe69   :  { %v7852_v51 = vmul.f32 %v12040_v5, %v15610_v24  ;;  %v7725_v46 = vpop.xlane.xlu0 %7724  ;;  %v7803_v62 = vpop.xlane.xlu2 %7802 }
 0xe6a   :  { %v7747_v7 = vsub.f32 %v15600_v53, %v7725_v46  ;;  %12045 = vrcp.f32 %v7803_v62 }
 0xe6b   :  { %v7868_v13 = vpack.c.bf16 %v7852_v51, %v7852_v51  ;;  %v7731_v14 = vpop.xlane.xlu1 %7730 }
 0xe6c   :  { %v15665_v18 = vpop.eup %12041  ;;  %v7775_v59 = vmul.f32 1.442695, %v7747_v7  ;;  %v7749_v41 = vsub.f32 %v15621_v36, %v7731_v14 }
 0xe6d   :  { %v7954_v19 = vunpack.c.l.b16 %v7868_v13  ;;  %v7816_v31 = vsel %vm5526_vm0, %v15665_v18, 0.0 }
 0xe6e   :  { %v15670_v45 = vpop.eup %12043  ;;  %12047 = vpow2.f32 %v7775_v59  ;;  %v7779_v24 = vmul.f32 1.442695, %v7749_v41  ;;  %7817 = vadd.xlane.f32.xlu0 %v7816_v31 }
 0xe6f   :  { %v7955_v43 = vpack.c.b16 %v7954_v19, %v7953_v10  ;;  %v7822_v53 = vsel %vm5526_vm0, %v15670_v45, 0.0  ;;  %v11047_v10 = vld [vmem:[#allocation13 + $0xa8] sm:$0xf]  ;;  %v11727_v19 = vld [vmem:[#allocation13 + $0xb0] sm:$0xf0] }
 0xe70   :  { %12049 = vpow2.f32 %v7779_v24  ;;  %7823 = vadd.xlane.f32.xlu2 %v7822_v53  ;;  %v12046_v26 = vpop.eup %12045  ;;  %v11048_v31 = vor.u32 %v11727_v19, %v11047_v10  ;;  %v11035_v24 = vld [vmem:[#allocation13 + $0x90] sm:$0xf]  ;;  %v11706_v10 = vld [vmem:[#allocation13 + $0x8] sm:$0xf0] }
 0xe71   :  { %10955 = vmatmul.msk.bf16.vlgmr.msrb.gmra.mxu2 %vm5526_vm0, %v7955_v43  ;;  %v7734_v30 = vpop.xlane.xlu2 %7733  ;;  %v7806_v36 = vpop.xlane.xlu0 %7805  ;;  %v7853_v29 = vmul.f32 %v12046_v26, %v15623_v17  ;;  %v11724_v43 = vld [vmem:[#allocation13 + $0x98] sm:$0xf0]  ;;  %v11011_v26 = vld [vmem:[#allocation13 + $0x60] sm:$0xf] }
 0xe72   :  { %v7750_v50 = vsub.f32 %v15634_v15, %v7734_v30  ;;  %12051 = vrcp.f32 %v7806_v36  ;;  %8831 = vmatpush.bf16.msrb.mxu0 %v11048_v31  ;;  %v11036_v53 = vor.u32 %v11724_v43, %v11035_v24  ;;  %v11721_v30 = vld [vmem:[#allocation13 + $0x80] sm:$0xf0]  ;;  %v11143_v31 = vld [vmem:[#allocation13 + $0x168] sm:$0xf]  ;;  %v11751_v24 = vld [vmem:[#allocation13 + $0x170] sm:$0xf0] }
 0xe73   :  { %v7869_v62 = vpack.c.bf16 %v7853_v29, %v7853_v29  ;;  %v10999_v29 = vld [vmem:[#allocation13 + $0x48] sm:$0xf]  ;;  %v11144_v43 = vor.u32 %v11751_v24, %v11143_v31  ;;  %v11772_v31 = vld [vmem:[#allocation13 + $0x218] sm:$0xf0] }
 0xe74   :  { %v15676_v4 = vpop.eup %12047  ;;  %v7781_v61 = vmul.f32 1.442695, %v7750_v50  ;;  %v11718_v50 = vld [vmem:[#allocation13 + $0x68] sm:$0xf0] }
 0xe75   :  { %v7819_v5 = vsel %vm5526_vm0, %v15676_v4, 0.0  ;;  %v7987_v14 = vunpack.c.l.b16 %v7869_v62  ;;  %v11712_v62 = vld [vmem:[#allocation13 + $0x38] sm:$0xf0]  ;;  %8880 = vmatpush.bf16.msrb.mxu1 %v11144_v43 }
 0xe76   :  { %v15681_v35 = vpop.eup %12049  ;;  %12053 = vpow2.f32 %v7781_v61  ;;  %7820 = vadd.xlane.f32.xlu1 %v7819_v5  ;;  %8832 = vmatpush.bf16.msrb.mxu0 %v11036_v53  ;;  %v11012_v61 = vor.u32 %v11718_v50, %v11011_v26  ;;  %v11715_v5 = vld [vmem:[#allocation13 + $0x50] sm:$0xf0] }
 0xe77   :  { %v7825_v51 = vsel %vm5526_vm0, %v15681_v35, 0.0 }
 0xe78   :  { %v12052_v46 = vpop.eup %12051  ;;  %7826 = vadd.xlane.f32.xlu0 %v7825_v51  ;;  %v11000_v51 = vor.u32 %v11715_v5, %v10999_v29  ;;  %v11745_v29 = vld [vmem:[#allocation13 + $0x140] sm:$0xf0]  ;;  %v11239_v5 = vld [vmem:[#allocation13 + $0x228] sm:$0xf] }
 0xe79   :  { %v7854_v15 = vmul.f32 %v12052_v46, %v15632_v37  ;;  %v11023_v37 = vld [vmem:[#allocation13 + $0x78] sm:$0xf]  ;;  %v10987_v46 = vld [vmem:[#allocation13 + $0x30] sm:$0xf] }
 0xe7a   :  { %v11024_v36 = vor.u32 %v11721_v30, %v11023_v37  ;;  %v11131_v30 = vld [vmem:[#allocation13 + $0x150] sm:$0xf] }
 0xe7b   :  { %v7870_v7 = vpack.c.bf16 %v7854_v15, %v7854_v15  ;;  %v10988_v15 = vor.u32 %v11712_v62, %v10987_v46  ;;  %v11775_v46 = vld [vmem:[#allocation13 + $0x230] sm:$0xf0] }
 0xe7c   :  { %v15686_v13 = vpop.eup %12053  ;;  %8833 = vmatpush.bf16.msrb.mxu0 %v11024_v36  ;;  %v11748_v36 = vld [vmem:[#allocation13 + $0x158] sm:$0xf0] }
 0xe7d   :  { %v7988_v17 = vunpack.c.l.b16 %v7870_v7  ;;  %v7828_v59 = vsel %vm5526_vm0, %v15686_v13, 0.0  ;;  %v10975_v7 = vld [vmem:[#allocation13 + $0x18] sm:$0xf]  ;;  %v11132_v26 = vor.u32 %v11748_v36, %v11131_v30 }
 0xe7e   :  { %7829 = vadd.xlane.f32.xlu1 %v7828_v59  ;;  %v11215_v30 = vld [vmem:[#allocation13 + $0x1f8] sm:$0xf] }
 0xe7f   :  { %v7989_v41 = vpack.c.b16 %v7988_v17, %v7987_v14  ;;  %v11709_v14 = vld [vmem:[#allocation13 + $0x20] sm:$0xf0]  ;;  %v7809_v17 = vpop.xlane.xlu0 %7808  ;;  %8881 = vmatpush.bf16.msrb.mxu1 %v11132_v26 }
 0xe80   :  { %8834 = vmatpush.bf16.msrb.mxu0 %v11012_v61  ;;  %v10976_v59 = vor.u32 %v11709_v14, %v10975_v7  ;;  %12055 = vrcp.f32 %v7809_v17  ;;  %v11119_v61 = vld [vmem:[#allocation13 + $0x138] sm:$0xf]  ;;  %v11107_v17 = vld [vmem:[#allocation13 + $0x120] sm:$0xf] }
 0xe81   :  { %10956 = vmatmul.msk.bf16.vlgmr.msrb.gmra.mxu3 %vm5526_vm0, %v7989_v41  ;;  %v10963_v41 = vld [vmem:[#allocation13] sm:$0xf] }
 0xe82   :  { %v10964_v19 = vor.u32 %v11706_v10, %v10963_v41  ;;  %v11227_v41 = vld [vmem:[#allocation13 + $0x210] sm:$0xf] }
 0xe84   :  { %8835 = vmatpush.bf16.msrb.mxu0 %v11000_v51  ;;  %v11120_v51 = vor.u32 %v11745_v29, %v11119_v61  ;;  %v11799_v61 = vld [vmem:[#allocation13 + $0x2f0] sm:$0xf0] }
 0xe86   :  { %v12056_v37 = vpop.eup %12055  ;;  %8882 = vmatpush.bf16.msrb.mxu1 %v11120_v51  ;;  %v11083_v51 = vld [vmem:[#allocation13 + $0xf0] sm:$0xf] }
 0xe87   :  { %v7855_v50 = vmul.f32 %v12056_v37, %v15640_v6  ;;  %v11228_v6 = vor.u32 %v11772_v31, %v11227_v41  ;;  %v11739_v37 = vld [vmem:[#allocation13 + $0x110] sm:$0xf0]  ;;  %v11191_v31 = vld [vmem:[#allocation13 + $0x1c8] sm:$0xf] }
 0xe88   :  { %8836 = vmatpush.bf16.msrb.mxu0 %v10988_v15  ;;  %v11240_v15 = vor.u32 %v11775_v46, %v11239_v5  ;;  %v11736_v46 = vld [vmem:[#allocation13 + $0xf8] sm:$0xf0] }
 0xe89   :  { %v7871_v7 = vpack.c.bf16 %v7855_v50, %v7855_v50  ;;  %v11769_v50 = vld [vmem:[#allocation13 + $0x200] sm:$0xf0] }
 0xe8a   :  { %8929 = vmatpush.bf16.msrb.mxu2 %v11240_v15  ;;  %v11216_v29 = vor.u32 %v11769_v50, %v11215_v30  ;;  %v11084_v15 = vor.u32 %v11736_v46, %v11083_v51  ;;  %v11730_v50 = vld [vmem:[#allocation13 + $0xc8] sm:$0xf0] }
 0xe8b   :  { %v8021_v24 = vunpack.c.l.b16 %v7871_v7  ;;  %v11766_v7 = vld [vmem:[#allocation13 + $0x1e8] sm:$0xf0] }
 0xe8c   :  { %8837 = vmatpush.bf16.msrb.mxu0 %v10976_v59  ;;  %v11742_v59 = vld [vmem:[#allocation13 + $0x128] sm:$0xf0] }
 0xe8d   :  { %v11790_v51 = vld [vmem:[#allocation13 + $0x2a8] sm:$0xf0] }
 0xe8e   :  { %8930 = vmatpush.bf16.msrb.mxu2 %v11228_v6 }
 0xe90   :  { %8838 = vmatpush.bf16.msrb.mxu0 %v10964_v19  ;;  %v11108_v19 = vor.u32 %v11742_v59, %v11107_v17  ;;  %v11796_v17 = vld [vmem:[#allocation13 + $0x2d8] sm:$0xf0] }
 0xe92   :  { %8883 = vmatpush.bf16.msrb.mxu1 %v11108_v19  ;;  %8931 = vmatpush.bf16.msrb.mxu2 %v11216_v29  ;;  %v11733_v19 = vld [vmem:[#allocation13 + $0xe0] sm:$0xf0]  ;;  %v11760_v29 = vld [vmem:[#allocation13 + $0x1b8] sm:$0xf0] }
 0xec5   :  { %v7812_v53 = vpop.xlane.xlu1 %7811 }
 0xec6   :  { %12057 = vrcp.f32 %v7812_v53  ;;  %v11095_v53 = vld [vmem:[#allocation13 + $0x108] sm:$0xf] }
 0xec7   :  { %v11096_v26 = vor.u32 %v11739_v37, %v11095_v53  ;;  %v11311_v53 = vld [vmem:[#allocation13 + $0x2b8] sm:$0xf]  ;;  %v11793_v37 = vld [vmem:[#allocation13 + $0x2c0] sm:$0xf0] }
 0xec9   :  { %8884 = vmatpush.bf16.msrb.mxu1 %v11096_v26  ;;  %v11059_v26 = vld [vmem:[#allocation13 + $0xc0] sm:$0xf] }
 0xecc   :  { %v12058_v62 = vpop.eup %12057 }
 0xecd   :  { %v7856_v14 = vmul.f32 %v12058_v62, %v15647_v22  ;;  %v11335_v22 = vld [vmem:[#allocation13 + $0x2e8] sm:$0xf]  ;;  %v11203_v62 = vld [vmem:[#allocation13 + $0x1e0] sm:$0xf]  ;;  %8885 = vmatpush.bf16.msrb.mxu1 %v11084_v15 }
 0xece   :  { %v11336_v5 = vor.u32 %v11799_v61, %v11335_v22  ;;  %v11204_v59 = vor.u32 %v11766_v7, %v11203_v62  ;;  %v11179_v22 = vld [vmem:[#allocation13 + $0x1b0] sm:$0xf]  ;;  %v11060_v61 = vor.u32 %v11730_v50, %v11059_v26  ;;  %v11167_v7 = vld [vmem:[#allocation13 + $0x198] sm:$0xf] }
 0xecf   :  { %v7872_v10 = vpack.c.bf16 %v7856_v14, %v7856_v14  ;;  %v11323_v14 = vld [vmem:[#allocation13 + $0x2d0] sm:$0xf]  ;;  %v11180_v46 = vor.u32 %v11760_v29, %v11179_v22  ;;  %v11781_v29 = vld [vmem:[#allocation13 + $0x260] sm:$0xf0] }
 0xed0   :  { %8978 = vmatpush.bf16.msrb.mxu3 %v11336_v5  ;;  %v11324_v41 = vor.u32 %v11796_v17, %v11323_v14  ;;  %8932 = vmatpush.bf16.msrb.mxu2 %v11204_v59  ;;  %v11299_v5 = vld [vmem:[#allocation13 + $0x2a0] sm:$0xf]  ;;  %v11757_v14 = vld [vmem:[#allocation13 + $0x1a0] sm:$0xf0]  ;;  %v11287_v17 = vld [vmem:[#allocation13 + $0x288] sm:$0xf] }
 0xed1   :  { %v8022_v43 = vunpack.c.l.b16 %v7872_v10  ;;  %v11071_v10 = vld [vmem:[#allocation13 + $0xd8] sm:$0xf]  ;;  %v11300_v62 = vor.u32 %v11790_v51, %v11299_v5 }
 0xed3   :  { %v8023_v36 = vpack.c.b16 %v8022_v43, %v8021_v24  ;;  %v11072_v24 = vor.u32 %v11733_v19, %v11071_v10  ;;  %v11763_v43 = vld [vmem:[#allocation13 + $0x1d0] sm:$0xf0]  ;;  %v15696_v19 = vpack.c.bf16 %v15017_v54, %v15015_v9 }
 0xed4   :  { %8979 = vmatpush.bf16.msrb.mxu3 %v11324_v41  ;;  %v11192_v30 = vor.u32 %v11763_v43, %v11191_v31  ;;  %v11168_v41 = vor.u32 %v11757_v14, %v11167_v7  ;;  %v11787_v10 = vld [vmem:[#allocation13 + $0x290] sm:$0xf0]  ;;  %v11155_v43 = vld [vmem:[#allocation13 + $0x180] sm:$0xf] }
 0xed5   :  { %10957 = vmatmul.msk.bf16.vlgmr.msra.gmra.mxu0 %vm5526_vm0, %v8023_v36  ;;  %v11312_v36 = vor.u32 %v11793_v37, %v11311_v53  ;;  %8886 = vmatpush.bf16.msrb.mxu1 %v11072_v24  ;;  %v11754_v53 = vld [vmem:[#allocation13 + $0x188] sm:$0xf0]  ;;  %v11275_v37 = vld [vmem:[#allocation13 + $0x270] sm:$0xf]  ;;  %v11251_v14 = vld [vmem:[#allocation13 + $0x240] sm:$0xf] }
 0xed6   :  { %8933 = vmatpush.bf16.msrb.mxu2 %v11192_v30  ;;  %v11156_v30 = vor.u32 %v11754_v53, %v11155_v43  ;;  %v17208_v43 = vld [vmem:[#allocation83_spill] sm:$0xff]  ;;  %v17209_v53 = vld [vmem:[#allocation222_spill] sm:$0xff] }
 0xed8   :  { %8980 = vmatpush.bf16.msrb.mxu3 %v11312_v36  ;;  %v11784_v36 = vld [vmem:[#allocation13 + $0x278] sm:$0xf0] }
 0xed9   :  { %8887 = vmatpush.bf16.msrb.mxu1 %v11060_v61  ;;  %v11276_v26 = vor.u32 %v11784_v36, %v11275_v37  ;;  %v11263_v61 = vld [vmem:[#allocation13 + $0x258] sm:$0xf]  ;;  %v15706_v37 = vpack.c.bf16 %v17209_v53, %v17208_v43 }
 0xeda   :  { %8934 = vmatpush.bf16.msrb.mxu2 %v11180_v46  ;;  %v17212_v53 = vld [vmem:[#allocation91_spill] sm:$0xff] }
 0xedb   :  { %v7815_v6 = vpop.xlane.xlu2 %7814 }
 0xedc   :  { %12059 = vrcp.f32 %v7815_v6  ;;  %8981 = vmatpush.bf16.msrb.mxu3 %v11300_v62  ;;  %v11288_v6 = vor.u32 %v11787_v10, %v11287_v17  ;;  %v11778_v17 = vld [vmem:[#allocation13 + $0x248] sm:$0xf0] }
 0xede   :  { %8935 = vmatpush.bf16.msrb.mxu2 %v11168_v41 }
 0xee0   :  { %8982 = vmatpush.bf16.msrb.mxu3 %v11288_v6  ;;  %v7942_v43 = vpop.f32.mrf.mxu1 }
 0xee1   :  { %v7818_v15 = vpop.xlane.xlu0 %7817 }
 0xee2   :  { %v12060_v59 = vpop.eup %12059  ;;  %12061 = vrcp.f32 %v7818_v15  ;;  %8936 = vmatpush.bf16.msrb.mxu2 %v11156_v30 }
 0xee3   :  { %v7824_v31 = vpop.xlane.xlu2 %7823  ;;  %v7857_v24 = vmul.f32 %v12060_v59, %v15659_v27  ;;  %v11264_v27 = vor.u32 %v11781_v29, %v11263_v61  ;;  %v11252_v59 = vor.u32 %v11778_v17, %v11251_v14  ;;  %v15725_v14 = vpack.c.bf16 %v15533_v57, %v15531_v20  ;;  %v11798_v17 = vld [vmem:[#allocation13 + $0x2ec] sm:$0xf] }
 0xee4   :  { %12063 = vrcp.f32 %v7824_v31  ;;  %8983 = vmatpush.bf16.msrb.mxu3 %v11276_v26  ;;  %v15730_v20 = vpack.c.bf16 %v15243_v28, %v15235_v1  ;;  %v15743_v1 = vpack.c.bf16 %v15539_v34, %v15535_v8  ;;  %v11723_v28 = vld [vmem:[#allocation13 + $0x94] sm:$0xf]  ;;  %v15748_v8 = vpack.c.bf16 %v15245_v21, %v15239_v44  ;;  %v11720_v21 = vld [vmem:[#allocation13 + $0x7c] sm:$0xf] }
 0xee5   :  { %8839 = vmatmul.bf16.vlgmr.msrb.gmra.mxu0 %v15696_v19  ;;  %v7873_v22 = vpack.c.bf16 %v7857_v24, %v7857_v24  ;;  %v15761_v44 = vpack.c.bf16 %v15548_v49, %v15543_v55  ;;  %v15766_v55 = vpack.c.bf16 %v15252_v3, %v15247_v11  ;;  %v11765_v3 = vld [vmem:[#allocation13 + $0x1e4] sm:$0xf] }
 0xee7   :  { %v8055_v62 = vunpack.c.l.b16 %v7873_v22 }
 0xee8   :  { %v12062_v50 = vpop.eup %12061  ;;  %8984 = vmatpush.bf16.msrb.mxu3 %v11264_v27 }
 0xee9   :  { %v7858_v9 = vmul.f32 %v12062_v50, %v15665_v18  ;;  %v7821_v54 = vpop.xlane.xlu1 %7820 }
 0xeea   :  { %v12064_v5 = vpop.eup %12063  ;;  %12065 = vrcp.f32 %v7821_v54 }
 0xeeb   :  { %v7874_v51 = vpack.c.bf16 %v7858_v9, %v7858_v9  ;;  %v7827_v46 = vpop.xlane.xlu0 %7826  ;;  %v7860_v7 = vmul.f32 %v12064_v5, %v15670_v45  ;;  %v15714_v5 = vpack.c.bf16 %v15233_v23, %v15231_v0  ;;  %v11726_v0 = vld [vmem:[#allocation13 + $0xac] sm:$0xf]  ;;  %v11049_v23 = vld [vmem:[#allocation13 + $0xb4] sm:$0xf0] }
 0xeec   :  { %12067 = vrcp.f32 %v7827_v46  ;;  %8985 = vmatpush.bf16.msrb.mxu3 %v11252_v59  ;;  %v17211_v46 = vld [vmem:[#allocation221_spill] sm:$0xff]  ;;  %v11052_v59 = vor.u32 %v11726_v0, %v11049_v23  ;;  %v11768_v0 = vld [vmem:[#allocation13 + $0x1fc] sm:$0xf] }
 0xeed   :  { %v8056_v15 = vunpack.c.l.b16 %v7874_v51  ;;  %v7876_v10 = vpack.c.bf16 %v7860_v7, %v7860_v7  ;;  %v17210_v51 = vld [vmem:[#allocation85_spill] sm:$0xff] }
 0xeee   :  { %9027 = vmatpush.bf16.msra.mxu0 %v11052_v59  ;;  %v11217_v23 = vld [vmem:[#allocation13 + $0x204] sm:$0xf0] }
 0xeef   :  { %v8057_v18 = vpack.c.b16 %v8056_v15, %v8055_v62  ;;  %v8090_v30 = vunpack.c.l.b16 %v7876_v10  ;;  %v15720_v62 = vpack.c.bf16 %v17211_v46, %v17210_v51  ;;  %v11241_v15 = vld [vmem:[#allocation13 + $0x234] sm:$0xf0]  ;;  %v7944_v51 = vpop.f32.mrf.mxu1  ;;  %v11025_v59 = vld [vmem:[#allocation13 + $0x84] sm:$0xf0] }
 0xef0   :  { %v12066_v41 = vpop.eup %12065  ;;  %v11145_v10 = vld [vmem:[#allocation13 + $0x174] sm:$0xf0]  ;;  %v15750_v34 = vpack.c.bf16 %v7944_v51, %v7942_v43  ;;  %v10989_v51 = vld [vmem:[#allocation13 + $0x3c] sm:$0xf0] }
 0xef1   :  { %v7859_v31 = vmul.f32 %v12066_v41, %v15676_v4  ;;  %10958 = vmatmul.msk.bf16.vlgmr.msra.gmra.mxu1 %vm5526_vm0, %v8057_v18  ;;  %v7830_v6 = vpop.xlane.xlu1 %7829  ;;  %v11337_v18 = vld [vmem:[#allocation13 + $0x2f4] sm:$0xf0]  ;;  %v11750_v41 = vld [vmem:[#allocation13 + $0x16c] sm:$0xf] }
 0xef2   :  { %v12068_v24 = vpop.eup %12067  ;;  %12069 = vrcp.f32 %v7830_v6  ;;  %v11148_v6 = vor.u32 %v11750_v41, %v11145_v10  ;;  %v11028_v41 = vor.u32 %v11720_v21, %v11025_v59  ;;  %v11313_v10 = vld [vmem:[#allocation13 + $0x2c4] sm:$0xf0]  ;;  %v11741_v59 = vld [vmem:[#allocation13 + $0x124] sm:$0xf] }
 0xef3   :  { %v7875_v45 = vpack.c.bf16 %v7859_v31, %v7859_v31  ;;  %v7861_v26 = vmul.f32 %v12068_v24, %v15681_v35  ;;  %v7908_v35 = vpop.f32.mrf.mxu0  ;;  %v11340_v31 = vor.u32 %v11798_v17, %v11337_v18  ;;  %v11220_v17 = vor.u32 %v11768_v0, %v11217_v23  ;;  %v11792_v18 = vld [vmem:[#allocation13 + $0x2bc] sm:$0xf]  ;;  %v10977_v21 = vld [vmem:[#allocation13 + $0x24] sm:$0xf0] }
 0xef4   :  { %9076 = vmatpush.bf16.msra.mxu1 %v11148_v6  ;;  %v7976_v46 = vpop.f32.mrf.mxu2  ;;  %v11121_v6 = vld [vmem:[#allocation13 + $0x144] sm:$0xf0] }
 0xef5   :  { %v8089_v36 = vunpack.c.l.b16 %v7875_v45  ;;  %8844 = vmatmul.bf16.gmra.mxu0 %v15706_v37  ;;  %v7877_v4 = vpack.c.bf16 %v7861_v26, %v7861_v26  ;;  %v17213_v45 = vld [vmem:[#allocation227_spill] sm:$0xff]  ;;  %v11229_v26 = vld [vmem:[#allocation13 + $0x21c] sm:$0xf0] }
 0xef7   :  { %v8091_v50 = vpack.c.b16 %v8090_v30, %v8089_v36  ;;  %v8123_v61 = vunpack.c.l.b16 %v7877_v4  ;;  %v15738_v30 = vpack.c.bf16 %v17213_v45, %v17212_v53  ;;  %v11771_v36 = vld [vmem:[#allocation13 + $0x214] sm:$0xf]  ;;  %v11717_v45 = vld [vmem:[#allocation13 + $0x64] sm:$0xf] }
 0xef8   :  { %v12070_v22 = vpop.eup %12069  ;;  %v11795_v4 = vld [vmem:[#allocation13 + $0x2d4] sm:$0xf] }
 0xef9   :  { %v7862_v9 = vmul.f32 %v12070_v22, %v15686_v13  ;;  %10959 = vmatmul.msk.bf16.vlgmr.msra.gmra.mxu2 %vm5526_vm0, %v8091_v50  ;;  %v11774_v13 = vld [vmem:[#allocation13 + $0x22c] sm:$0xf]  ;;  %v11232_v50 = vor.u32 %v11771_v36, %v11229_v26  ;;  %v11037_v22 = vld [vmem:[#allocation13 + $0x9c] sm:$0xf0]  ;;  %v11013_v36 = vld [vmem:[#allocation13 + $0x6c] sm:$0xf0] }
 0xefa   :  { %v11244_v7 = vor.u32 %v11774_v13, %v11241_v15  ;;  %v17214_v13 = vld [vmem:[#allocation84_spill] sm:$0xff]  ;;  %v17215_v15 = vld [vmem:[#allocation223_spill] sm:$0xff]  ;;  %v11016_v26 = vor.u32 %v11717_v45, %v11013_v36 }
 0xefb   :  { %v7878_v54 = vpack.c.bf16 %v7862_v9, %v7862_v9  ;;  %v7910_v24 = vpop.f32.mrf.mxu0  ;;  %v11040_v9 = vor.u32 %v11723_v28, %v11037_v22  ;;  %v17216_v28 = vld [vmem:[#allocation90_spill] sm:$0xff]  ;;  %v17217_v22 = vld [vmem:[#allocation97_spill] sm:$0xff] }
 0xefc   :  { %9125 = vmatpush.bf16.msra.mxu2 %v11244_v7  ;;  %v15732_v57 = vpack.c.bf16 %v7910_v24, %v7908_v35  ;;  %v15756_v7 = vpack.c.bf16 %v17215_v15, %v17214_v13  ;;  %v11316_v24 = vor.u32 %v11792_v18, %v11313_v10  ;;  %v7978_v53 = vpop.f32.mrf.mxu2  ;;  %v11789_v13 = vld [vmem:[#allocation13 + $0x2a4] sm:$0xf]  ;;  %v11301_v15 = vld [vmem:[#allocation13 + $0x2ac] sm:$0xf0] }
 0xefd   :  { %v8124_v29 = vunpack.c.l.b16 %v7878_v54  ;;  %v11325_v54 = vld [vmem:[#allocation13 + $0x2dc] sm:$0xf0]  ;;  %9028 = vmatpush.bf16.msra.mxu0 %v11040_v9  ;;  %v15768_v49 = vpack.c.bf16 %v7978_v53, %v7976_v46  ;;  %v11714_v9 = vld [vmem:[#allocation13 + $0x4c] sm:$0xf]  ;;  %v11304_v23 = vor.u32 %v11789_v13, %v11301_v15  ;;  %v11109_v18 = vld [vmem:[#allocation13 + $0x12c] sm:$0xf0] }
 0xefe   :  { %v17220_v53 = vld [vmem:[#allocation202_spill] sm:$0xff] }
 0xeff   :  { %v8125_v27 = vpack.c.b16 %v8124_v29, %v8123_v61  ;;  %v11747_v61 = vld [vmem:[#allocation13 + $0x154] sm:$0xf]  ;;  %v11133_v29 = vld [vmem:[#allocation13 + $0x15c] sm:$0xf0] }
 0xf00   :  { %9126 = vmatpush.bf16.msra.mxu2 %v11232_v50  ;;  %v11136_v35 = vor.u32 %v11747_v61, %v11133_v29  ;;  %v11205_v61 = vld [vmem:[#allocation13 + $0x1ec] sm:$0xf0]  ;;  %v11759_v15 = vld [vmem:[#allocation13 + $0x1b4] sm:$0xf] }
 0xf01   :  { %10960 = vmatmul.msk.bf16.vlgmr.msra.gmra.mxu3 %vm5526_vm0, %v8125_v27  ;;  %8888 = vmatmul.bf16.vlgmr.msrb.gmra.mxu1 %v15714_v5  ;;  %v11328_v27 = vor.u32 %v11795_v4, %v11325_v54  ;;  %v15774_v4 = vpack.c.bf16 %v17217_v22, %v17216_v28  ;;  %v11001_v54 = vld [vmem:[#allocation13 + $0x54] sm:$0xf0]  ;;  %v11208_v29 = vor.u32 %v11765_v3, %v11205_v61  ;;  %v11738_v22 = vld [vmem:[#allocation13 + $0x10c] sm:$0xf] }
 0xf02   :  { %9174 = vmatpush.bf16.msra.mxu3 %v11340_v31  ;;  %9077 = vmatpush.bf16.msra.mxu1 %v11136_v35  ;;  %v11744_v31 = vld [vmem:[#allocation13 + $0x13c] sm:$0xf]  ;;  %v11004_v11 = vor.u32 %v11714_v9, %v11001_v54  ;;  %v11711_v35 = vld [vmem:[#allocation13 + $0x34] sm:$0xf]  ;;  %v11289_v28 = vld [vmem:[#allocation13 + $0x294] sm:$0xf0]  ;;  %v15802_v3 = vpack.c.bf16 %v15256_v47, %v15249_v56 }
 0xf03   :  { %v11124_v43 = vor.u32 %v11744_v31, %v11121_v6  ;;  %9029 = vmatpush.bf16.msra.mxu0 %v11028_v41  ;;  %v10992_v46 = vor.u32 %v11711_v35, %v10989_v51  ;;  %v11705_v31 = vld [vmem:[#allocation13 + $0x4] sm:$0xf]  ;;  %v10965_v6 = vld [vmem:[#allocation13 + $0xc] sm:$0xf0]  ;;  %v11097_v54 = vld [vmem:[#allocation13 + $0x114] sm:$0xf0] }
 0xf04   :  { %9127 = vmatpush.bf16.msra.mxu2 %v11220_v17  ;;  %v8010_v50 = vpop.f32.mrf.mxu3  ;;  %v11708_v17 = vld [vmem:[#allocation13 + $0x1c] sm:$0xf]  ;;  %v11735_v35 = vld [vmem:[#allocation13 + $0xf4] sm:$0xf]  ;;  %v11085_v51 = vld [vmem:[#allocation13 + $0xfc] sm:$0xf0] }
 0xf05   :  { %8849 = vmatmul.bf16.gmra.mxu0 %v15720_v62  ;;  %v10980_v41 = vor.u32 %v11708_v17, %v10977_v21  ;;  %v11088_v13 = vor.u32 %v11735_v35, %v11085_v51  ;;  %v11181_v56 = vld [vmem:[#allocation13 + $0x1bc] sm:$0xf0]  ;;  %v11073_v17 = vld [vmem:[#allocation13 + $0xe4] sm:$0xf0]  ;;  %v11253_v51 = vld [vmem:[#allocation13 + $0x24c] sm:$0xf0] }
 0xf06   :  { %9175 = vmatpush.bf16.msra.mxu3 %v11328_v27  ;;  %9078 = vmatpush.bf16.msra.mxu1 %v11124_v43  ;;  %v15779_v27 = vpack.c.bf16 %v15557_v12, %v15550_v60  ;;  %v11112_v60 = vor.u32 %v11741_v59, %v11109_v18  ;;  %v15784_v12 = vpack.c.bf16 %v15241_v40, %v15237_v2  ;;  %v17219_v43 = vld [vmem:[#allocation89_spill] sm:$0xff]  ;;  %v11193_v40 = vld [vmem:[#allocation13 + $0x1d4] sm:$0xf0]  ;;  %v11783_v59 = vld [vmem:[#allocation13 + $0x274] sm:$0xf] }
 0xf07   :  { %9030 = vmatpush.bf16.msra.mxu0 %v11016_v26  ;;  %v15792_v45 = vpack.c.bf16 %v17220_v53, %v17219_v43  ;;  %v11762_v2 = vld [vmem:[#allocation13 + $0x1cc] sm:$0xf]  ;;  %v15797_v26 = vpack.c.bf16 %v15541_v58, %v15537_v33  ;;  %v17221_v33 = vld [vmem:[#allocation95_spill] sm:$0xff]  ;;  %v17222_v58 = vld [vmem:[#allocation96_spill] sm:$0xff]  ;;  %v11184_v47 = vor.u32 %v11759_v15, %v11181_v56 }
 0xf08   :  { %9128 = vmatpush.bf16.msra.mxu2 %v11208_v29  ;;  %v11196_v36 = vor.u32 %v11762_v2, %v11193_v40  ;;  %v15807_v29 = vpack.c.bf16 %v17222_v58, %v17221_v33  ;;  %v11277_v18 = vld [vmem:[#allocation13 + $0x27c] sm:$0xf0]  ;;  %v11756_v43 = vld [vmem:[#allocation13 + $0x19c] sm:$0xf]  ;;  %v11169_v53 = vld [vmem:[#allocation13 + $0x1a4] sm:$0xf0] }
 0xf09   :  { %8937 = vmatmul.bf16.vlgmr.msrb.gmra.mxu2 %v15725_v14  ;;  %v11172_v2 = vor.u32 %v11756_v43, %v11169_v53  ;;  %v11753_v40 = vld [vmem:[#allocation13 + $0x184] sm:$0xf]  ;;  %v11343_v43 = vld [vmem:[#allocation13 + $0x2f0] sm:$0xf] }
 0xf0a   :  { %9176 = vmatpush.bf16.msra.mxu3 %v11316_v24  ;;  %9079 = vmatpush.bf16.msra.mxu1 %v11112_v60  ;;  %v10968_v24 = vor.u32 %v11705_v31, %v10965_v6  ;;  %v11280_v60 = vor.u32 %v11783_v59, %v11277_v18  ;;  %v15820_v31 = vpack.c.bf16 %v15259_v52, %v15254_v42  ;;  %v11247_v59 = vld [vmem:[#allocation13 + $0x230] sm:$0xf]  ;;  %v11776_v18 = vld [vmem:[#allocation13 + $0x238] sm:$0xf0] }
 0xf0b   :  { %9031 = vmatpush.bf16.msra.mxu0 %v11004_v11  ;;  %v11100_v11 = vor.u32 %v11738_v22, %v11097_v54  ;;  %v11265_v22 = vld [vmem:[#allocation13 + $0x264] sm:$0xf0] }
 0xf0c   :  { %v8012_v0 = vpop.f32.mrf.mxu3  ;;  %9129 = vmatpush.bf16.msra.mxu2 %v11196_v36  ;;  %v11157_v36 = vld [vmem:[#allocation13 + $0x18c] sm:$0xf0] }
 0xf0d   :  { %v15786_v10 = vpack.c.bf16 %v8012_v0, %v8010_v50  ;;  %v11786_v50 = vld [vmem:[#allocation13 + $0x28c] sm:$0xf]  ;;  %v11160_v42 = vor.u32 %v11753_v40, %v11157_v36  ;;  %v11800_v36 = vld [vmem:[#allocation13 + $0x2f8] sm:$0xf0] }
 0xf0e   :  { %9177 = vmatpush.bf16.msra.mxu3 %v11304_v23  ;;  %v11292_v9 = vor.u32 %v11786_v50, %v11289_v28  ;;  %9080 = vmatpush.bf16.msra.mxu1 %v11100_v11  ;;  %v11732_v23 = vld [vmem:[#allocation13 + $0xdc] sm:$0xf]  ;;  %v15828_v50 = vpack.c.bf16 %v15560_v25, %v15555_v48  ;;  %v17223_v11 = vld [vmem:[#allocation228_spill] sm:$0xff]  ;;  %v15843_v25 = vpack.c.bf16 %v15565_v63, %v15562_v32 }
 0xf0f   :  { %9032 = vmatpush.bf16.msra.mxu0 %v10992_v46  ;;  %17218 = vst [vmem:[#allocation100_spill] sm:$0xff] %v15786_v10  ;;  %v15812_v46 = vpack.c.bf16 %v15552_v16, %v15545_v38  ;;  %v11729_v38 = vld [vmem:[#allocation13 + $0xc4] sm:$0xf]  ;;  %v11061_v16 = vld [vmem:[#allocation13 + $0xcc] sm:$0xf0] }
 0xf10   :  { %9130 = vmatpush.bf16.msra.mxu2 %v11184_v47  ;;  %v11064_v6 = vor.u32 %v11729_v38, %v11061_v16  ;;  %v11780_v28 = vld [vmem:[#allocation13 + $0x25c] sm:$0xf]  ;;  %v11055_v16 = vld [vmem:[#allocation13 + $0xb0] sm:$0xf] }
 0xf11   :  { %8893 = vmatmul.bf16.gmra.mxu1 %v15730_v20  ;;  %8986 = vmatmul.bf16.vlgmr.msrb.gmra.mxu3 %v15732_v57 }
 0xf12   :  { %9178 = vmatpush.bf16.msra.mxu3 %v11292_v9  ;;  %9081 = vmatpush.bf16.msra.mxu1 %v11088_v13  ;;  %v11268_v9 = vor.u32 %v11780_v28, %v11265_v22  ;;  %v11752_v28 = vld [vmem:[#allocation13 + $0x178] sm:$0xf0]  ;;  %v11344_v22 = vor.u32 %v11800_v36, %v11343_v43  ;;  %v11725_v36 = vld [vmem:[#allocation13 + $0xa0] sm:$0xf0] }
 0xf13   :  { %9033 = vmatpush.bf16.msra.mxu0 %v10980_v41  ;;  %v11076_v41 = vor.u32 %v11732_v23, %v11073_v17  ;;  %v15858_v23 = vld [vmem:[%s16073_s7] sm:$0x7]  ;;  %s12289_s7 = smov [#allocation14]  }
 0xf14   :  { %9131 = vmatpush.bf16.msra.mxu2 %v11172_v2  ;;  %s9471_s10 = sshll.u32 %s12289_s7, 4  ;;  %s9472_s10 = int_to_ptr.vmem [resolvable:$true] %s9471_s10 }
 0xf15   :  { %8854 = vmatmul.bf16.gmra.mxu0 %v15738_v30 }
 0xf16   :  { %9082 = vmatpush.bf16.msra.mxu1 %v11076_v41  ;;  %9179 = vmatpush.bf16.msra.mxu3 %v11280_v60  ;;  %v11248_v41 = vor.u32 %v11776_v18, %v11247_v59  ;;  %v15865_v60 = vperm.slane %v15858_v23, 0 }
 0xf17   :  { %9034 = vmatpush.bf16.msra.mxu0 %v10968_v24 }
 0xf18   :  { %9132 = vmatpush.bf16.msra.mxu2 %v11160_v42  ;;  %v11151_v42 = vld [vmem:[#allocation13 + $0x170] sm:$0xf] }
 0xf19   :  { %8942 = vmatmul.bf16.gmra.mxu2 %v15743_v1 }
 0xf1a   :  { %9083 = vmatpush.bf16.msra.mxu1 %v11064_v6  ;;  %9180 = vmatpush.bf16.msra.mxu3 %v11268_v9  ;;  %v11728_v6 = vld [vmem:[#allocation13 + $0xb8] sm:$0xf0]  ;;  %v11152_v9 = vor.u32 %v11752_v28, %v11151_v42  ;;  %v11331_v42 = vld [vmem:[#allocation13 + $0x2d8] sm:$0xf] }
 0xf1b   :  { %v11056_v40 = vor.u32 %v11728_v6, %v11055_v16  ;;  %v11773_v16 = vld [vmem:[#allocation13 + $0x220] sm:$0xf0] }
 0xf1c   :  { %9321 = vmatpush.bf16.msrb.mxu2 %v11248_v41 }
 0xf1d   :  { %9223 = vmatpush.bf16.msrb.mxu0 %v11056_v40  ;;  %v11043_v40 = vld [vmem:[#allocation13 + $0x98] sm:$0xf] }
 0xf1e   :  { %9272 = vmatpush.bf16.msrb.mxu1 %v11152_v9  ;;  %v11749_v9 = vld [vmem:[#allocation13 + $0x160] sm:$0xf0] }
 0xf21   :  { %8898 = vmatmul.bf16.gmra.mxu1 %v15748_v8  ;;  %8991 = vmatmul.bf16.gmra.mxu3 %v15750_v34 }
 0xf25   :  { %8859 = vmatmul.bf16.gmra.mxu0 %v15756_v7 }
 0xf29   :  { %8947 = vmatmul.bf16.gmra.mxu2 %v15761_v44 }
 0xf31   :  { %8903 = vmatmul.bf16.gmra.mxu1 %v15766_v55  ;;  %8996 = vmatmul.bf16.gmra.mxu3 %v15768_v49 }
 0xf35   :  { %8864 = vmatmul.bf16.gmra.mxu0 %v15774_v4 }
 0xf39   :  { %8952 = vmatmul.bf16.gmra.mxu2 %v15779_v27 }
 0xf41   :  { %8908 = vmatmul.bf16.gmra.mxu1 %v15784_v12  ;;  %9001 = vmatmul.bf16.gmra.mxu3 %v15786_v10 }
 0xf45   :  { %8869 = vmatmul.bf16.gmra.mxu0 %v15792_v45 }
 0xf49   :  { %8957 = vmatmul.bf16.gmra.mxu2 %v15797_v26 }
 0xf51   :  { %8913 = vmatmul.bf16.gmra.mxu1 %v15802_v3 }
 0xf52   :  { %v8044_v61 = vpop.f32.mrf.mxu0 }
 0xf55   :  { %8874 = vmatmul.bf16.gmra.mxu0 %v15807_v29 }
 0xf59   :  { %8962 = vmatmul.bf16.gmra.mxu2 %v15812_v46 }
 0xf5a   :  { %v8046_v0 = vpop.f32.mrf.mxu0 }
 0xf5b   :  { %v15815_v21 = vpack.c.bf16 %v8046_v0, %v8044_v61  ;;  %v15835_v61 = vpack.c.bf16 %v17223_v11, %v15261_v39  ;;  %v11777_v39 = vld [vmem:[#allocation13 + $0x244] sm:$0xf] }
 0xf5c   :  { %v11256_v15 = vor.u32 %v11777_v39, %v11253_v51 }
 0xf5d   :  { %9006 = vmatmul.bf16.gmra.mxu3 %v15815_v21 }
 0xf5e   :  { %9181 = vmatpush.bf16.msra.mxu3 %v11256_v15 }
 0xf61   :  { %8918 = vmatmul.bf16.gmra.mxu1 %v15820_v31 }
 0xf62   :  { %v15823_v24 = vpop.f32.mrf.mxu0  ;;  %9370 = vmatpush.bf16.msrb.mxu3 %v11344_v22  ;;  %v11139_v22 = vld [vmem:[#allocation13 + $0x158] sm:$0xf] }
 0xf63   :  { %v8841_v11 = vadd.f32 %v15823_v24, %v15865_v60  ;;  %v11235_v24 = vld [vmem:[#allocation13 + $0x218] sm:$0xf] }
 0xf65   :  { %9035 = vmatmul.bf16.vlgmr.msra.gmra.mxu0 %v15696_v19 }
 0xf69   :  { %8967 = vmatmul.bf16.gmra.mxu2 %v15828_v50 }
 0xf6a   :  { %v15831_v52 = vpop.f32.mrf.mxu0 }
 0xf6b   :  { %v8843_v18 = vadd.f32 %v15831_v52, %v15865_v60 }
 0xf6e   :  { %v8078_v54 = vpop.f32.mrf.mxu1 }
 0xf71   :  { %8923 = vmatmul.bf16.gmra.mxu1 %v15835_v61 }
 0xf72   :  { %v15838_v33 = vpop.f32.mrf.mxu0 }
 0xf75   :  { %9040 = vmatmul.bf16.gmra.mxu0 %v15706_v37 }
 0xf76   :  { %v8080_v48 = vpop.f32.mrf.mxu1 }
 0xf77   :  { %v15845_v58 = vpack.c.bf16 %v8080_v48, %v8078_v54 }
 0xf79   :  { %8972 = vmatmul.bf16.gmra.mxu2 %v15843_v25  ;;  %9011 = vmatmul.bf16.gmra.mxu3 %v15845_v58 }
 0xf7a   :  { %v15849_v35 = vpop.f32.mrf.mxu0 }
 0xf7c   :  { %v8112_v13 = vpop.f32.mrf.mxu2 }
 0xf7e   :  { %v8889_v56 = vpop.f32.mrf.mxu1 }
 0xf7f   :  { %v8890_v48 = vadd.f32 %v8889_v56, %v8841_v11  ;;  %v11236_v56 = vor.u32 %v11773_v16, %v11235_v24 }
 0xf81   :  { %9084 = vmatmul.bf16.vlgmr.msra.gmra.mxu1 %v15714_v5  ;;  %9322 = vmatpush.bf16.msrb.mxu2 %v11236_v56 }
 0xf82   :  { %v15852_v47 = vpop.f32.mrf.mxu0 }
 0xf84   :  { %v8114_v32 = vpop.f32.mrf.mxu2  ;;  %v8146_v63 = vpop.f32.mrf.mxu3 }
 0xf85   :  { %9045 = vmatmul.bf16.gmra.mxu0 %v15720_v62  ;;  %v15860_v17 = vpack.c.bf16 %v8114_v32, %v8112_v13 }
 0xf86   :  { %v8891_v0 = vpop.f32.mrf.mxu1 }
 0xf87   :  { %v8892_v6 = vadd.f32 %v8891_v0, %v8843_v18  ;;  %v11140_v0 = vor.u32 %v11749_v9, %v11139_v22 }
 0xf89   :  { %9016 = vmatmul.bf16.gmra.mxu3 %v15860_v17  ;;  %9133 = vmatmul.bf16.vlgmr.msra.gmra.mxu2 %v15725_v14 }
 0xf8a   :  { %v15867_v38 = vpop.f32.mrf.mxu0  ;;  %9273 = vmatpush.bf16.msrb.mxu1 %v11140_v0  ;;  %v11746_v0 = vld [vmem:[#allocation13 + $0x148] sm:$0xf0] }
 0xf8c   :  { %v8148_v53 = vpop.f32.mrf.mxu3  ;;  %v8938_v2 = vpop.f32.mrf.mxu2 }
 0xf8d   :  { %v8939_v51 = vadd.f32 %v8938_v2, %v8890_v48  ;;  %v15877_v41 = vpack.c.bf16 %v8148_v53, %v8146_v63  ;;  %v11044_v63 = vor.u32 %v11725_v36, %v11043_v40  ;;  %v11797_v53 = vld [vmem:[#allocation13 + $0x2e0] sm:$0xf0]  ;;  %v11770_v40 = vld [vmem:[#allocation13 + $0x208] sm:$0xf0] }
 0xf8e   :  { %v8894_v54 = vpop.f32.mrf.mxu1  ;;  %v11332_v48 = vor.u32 %v11797_v53, %v11331_v42  ;;  %v11319_v53 = vld [vmem:[#allocation13 + $0x2c0] sm:$0xf] }
 0xf8f   :  { %9224 = vmatpush.bf16.msrb.mxu0 %v11044_v63  ;;  %v11722_v63 = vld [vmem:[#allocation13 + $0x88] sm:$0xf0] }
 0xf90   :  { %9371 = vmatpush.bf16.msrb.mxu3 %v11332_v48  ;;  %v11127_v48 = vld [vmem:[#allocation13 + $0x140] sm:$0xf] }
 0xf91   :  { %9089 = vmatmul.bf16.gmra.mxu1 %v15730_v20 }
 0xf92   :  { %v15872_v39 = vpop.f32.mrf.mxu0 }
 0xf94   :  { %v8940_v13 = vpop.f32.mrf.mxu2  ;;  %v8987_v15 = vpop.f32.mrf.mxu3 }
 0xf95   :  { %9050 = vmatmul.bf16.gmra.mxu0 %v15738_v30  ;;  %v8988_v32 = vadd.f32 %v8987_v15, %v8939_v51  ;;  %v8941_v2 = vadd.f32 %v8940_v13, %v8892_v6  ;;  %v8846_v15 = vadd.f32 %v15838_v33, %v15865_v60  ;;  %v11223_v33 = vld [vmem:[#allocation13 + $0x200] sm:$0xf] }
 0xf96   :  { %v8896_v59 = vpop.f32.mrf.mxu1  ;;  %v11224_v36 = vor.u32 %v11770_v40, %v11223_v33 }
 0xf97   :  { %9419 = vst [vmem:[#allocation14] sm:$0xff] %v8988_v32  ;;  %v8895_v13 = vadd.f32 %v8894_v54, %v8846_v15 }
 0xf98   :  { %9323 = vmatpush.bf16.msrb.mxu2 %v11224_v36 }
 0xf99   :  { %9021 = vmatmul.bf16.gmra.mxu3 %v15877_v41  ;;  %9138 = vmatmul.bf16.gmra.mxu2 %v15743_v1 }
 0xf9a   :  { %v15881_v43 = vpop.f32.mrf.mxu0 }
 0xf9c   :  { %v8943_v28 = vpop.f32.mrf.mxu2  ;;  %v8989_v52 = vpop.f32.mrf.mxu3 }
 0xf9d   :  { %v8990_v11 = vadd.f32 %v8989_v52, %v8941_v2  ;;  %v8944_v18 = vadd.f32 %v8943_v28, %v8895_v13  ;;  %v8848_v2 = vadd.f32 %v15849_v35, %v15865_v60  ;;  %v11031_v52 = vld [vmem:[#allocation13 + $0x80] sm:$0xf]  ;;  %v11794_v35 = vld [vmem:[#allocation13 + $0x2c8] sm:$0xf0] }
 0xf9e   :  { %v8899_v51 = vpop.f32.mrf.mxu1  ;;  %v11320_v13 = vor.u32 %v11794_v35, %v11319_v53  ;;  %v11767_v35 = vld [vmem:[#allocation13 + $0x1f0] sm:$0xf0] }
 0xf9f   :  { %9422 = vst [vmem:[#allocation14 + $0x18] sm:$0xff] %v8990_v11  ;;  %v8897_v42 = vadd.f32 %v8896_v59, %v8848_v2  ;;  %v11032_v11 = vor.u32 %v11722_v63, %v11031_v52  ;;  %v11128_v59 = vor.u32 %v11746_v0, %v11127_v48  ;;  %v11007_v52 = vld [vmem:[#allocation13 + $0x50] sm:$0xf]  ;;  %v11716_v63 = vld [vmem:[#allocation13 + $0x58] sm:$0xf0] }
 0xfa0   :  { %9372 = vmatpush.bf16.msrb.mxu3 %v11320_v13  ;;  %v11008_v53 = vor.u32 %v11716_v63, %v11007_v52  ;;  %v10995_v0 = vld [vmem:[#allocation13 + $0x38] sm:$0xf]  ;;  %v10983_v52 = vld [vmem:[#allocation13 + $0x20] sm:$0xf]  ;;  %v11710_v63 = vld [vmem:[#allocation13 + $0x28] sm:$0xf0] }
 0xfa1   :  { %9094 = vmatmul.bf16.gmra.mxu1 %v15748_v8  ;;  %9225 = vmatpush.bf16.msrb.mxu0 %v11032_v11  ;;  %v8853_v11 = vadd.f32 %v15867_v38, %v15865_v60  ;;  %v11791_v38 = vld [vmem:[#allocation13 + $0x2b0] sm:$0xf0] }
 0xfa2   :  { %v15886_v32 = vpop.f32.mrf.mxu0  ;;  %9274 = vmatpush.bf16.msrb.mxu1 %v11128_v59 }
 0xfa4   :  { %v8945_v24 = vpop.f32.mrf.mxu2  ;;  %v8992_v16 = vpop.f32.mrf.mxu3 }
 0xfa5   :  { %9055 = vmatmul.bf16.gmra.mxu0 %v15756_v7  ;;  %v8993_v56 = vadd.f32 %v8992_v16, %v8944_v18  ;;  %v8946_v28 = vadd.f32 %v8945_v24, %v8897_v42  ;;  %v8851_v16 = vadd.f32 %v15852_v47, %v15865_v60  ;;  %v11019_v24 = vld [vmem:[#allocation13 + $0x68] sm:$0xf] }
 0xfa6   :  { %v8901_v6 = vpop.f32.mrf.mxu1 }
 0xfa7   :  { %9425 = vst [vmem:[#allocation14 + $0x30] sm:$0xff] %v8993_v56  ;;  %v11719_v56 = vld [vmem:[#allocation13 + $0x70] sm:$0xf0]  ;;  %v8900_v2 = vadd.f32 %v8899_v51, %v8851_v16  ;;  %v11211_v51 = vld [vmem:[#allocation13 + $0x1e8] sm:$0xf] }
 0xfa8   :  { %v11020_v33 = vor.u32 %v11719_v56, %v11019_v24  ;;  %v11212_v48 = vor.u32 %v11767_v35, %v11211_v51  ;;  %v11307_v24 = vld [vmem:[#allocation13 + $0x2a8] sm:$0xf]  ;;  %v8856_v51 = vadd.f32 %v15872_v39, %v15865_v60  ;;  %v11707_v35 = vld [vmem:[#allocation13 + $0x10] sm:$0xf0]  ;;  %v8858_v39 = vadd.f32 %v15881_v43, %v15865_v60 }
 0xfa9   :  { %9143 = vmatmul.bf16.gmra.mxu2 %v15761_v44  ;;  %9182 = vmatmul.bf16.vlgmr.msra.gmra.mxu3 %v15732_v57  ;;  %v11115_v56 = vld [vmem:[#allocation13 + $0x128] sm:$0xf] }
 0xfaa   :  { %v15893_v54 = vpop.f32.mrf.mxu0  ;;  %9226 = vmatpush.bf16.msrb.mxu0 %v11020_v33  ;;  %9324 = vmatpush.bf16.msrb.mxu2 %v11212_v48 }
 0xfac   :  { %v8948_v22 = vpop.f32.mrf.mxu2  ;;  %v8994_v9 = vpop.f32.mrf.mxu3 }
 0xfad   :  { %v8995_v15 = vadd.f32 %v8994_v9, %v8946_v28  ;;  %v8949_v36 = vadd.f32 %v8948_v22, %v8900_v2  ;;  %v11713_v22 = vld [vmem:[#allocation13 + $0x40] sm:$0xf0] }
 0xfae   :  { %v8904_v18 = vpop.f32.mrf.mxu1  ;;  %9227 = vmatpush.bf16.msrb.mxu0 %v11008_v53  ;;  %v10996_v13 = vor.u32 %v11713_v22, %v10995_v0  ;;  %v10984_v53 = vor.u32 %v11710_v63, %v10983_v52 }
 0xfaf   :  { %9428 = vst [vmem:[#allocation14 + $0x48] sm:$0xff] %v8995_v15  ;;  %v8902_v15 = vadd.f32 %v8901_v6, %v8853_v11  ;;  %v8905_v48 = vadd.f32 %v8904_v18, %v8856_v51  ;;  %v11740_v51 = vld [vmem:[#allocation13 + $0x118] sm:$0xf0] }
 0xfb1   :  { %9099 = vmatmul.bf16.gmra.mxu1 %v15766_v55 }
 0xfb2   :  { %v15898_v40 = vpop.f32.mrf.mxu0  ;;  %9228 = vmatpush.bf16.msrb.mxu0 %v10996_v13 }
 0xfb4   :  { %v8950_v42 = vpop.f32.mrf.mxu2  ;;  %v8997_v28 = vpop.f32.mrf.mxu3 }
 0xfb5   :  { %9060 = vmatmul.bf16.gmra.mxu0 %v15774_v4  ;;  %v8998_v47 = vadd.f32 %v8997_v28, %v8949_v36  ;;  %v8951_v16 = vadd.f32 %v8950_v42, %v8902_v15  ;;  %v11308_v36 = vor.u32 %v11791_v38, %v11307_v24  ;;  %v11743_v28 = vld [vmem:[#allocation13 + $0x130] sm:$0xf0]  ;;  %v10971_v42 = vld [vmem:[#allocation13 + $0x8] sm:$0xf] }
 0xfb6   :  { %v8906_v9 = vpop.f32.mrf.mxu1  ;;  %9229 = vmatpush.bf16.msrb.mxu0 %v10984_v53  ;;  %v10972_v0 = vor.u32 %v11707_v35, %v10971_v42  ;;  %v11103_v53 = vld [vmem:[#allocation13 + $0x110] sm:$0xf] }
 0xfb7   :  { %9431 = vst [vmem:[#allocation14 + $0x60] sm:$0xff] %v8998_v47  ;;  %v11116_v47 = vor.u32 %v11743_v28, %v11115_v56  ;;  %9373 = vmatpush.bf16.msrb.mxu3 %v11308_v36  ;;  %v8907_v56 = vadd.f32 %v8906_v9, %v8858_v39  ;;  %v11764_v36 = vld [vmem:[#allocation13 + $0x1d8] sm:$0xf0]  ;;  %v11295_v28 = vld [vmem:[#allocation13 + $0x290] sm:$0xf]  ;;  %v11104_v35 = vor.u32 %v11740_v51, %v11103_v53 }
 0xfb8   :  { %v11187_v39 = vld [vmem:[#allocation13 + $0x1b8] sm:$0xf] }
 0xfb9   :  { %9148 = vmatmul.bf16.gmra.mxu2 %v15779_v27  ;;  %9187 = vmatmul.bf16.gmra.mxu3 %v15750_v34 }
 0xfba   :  { %v15905_v59 = vpop.f32.mrf.mxu0  ;;  %9275 = vmatpush.bf16.msrb.mxu1 %v11116_v47  ;;  %9230 = vmatpush.bf16.msrb.mxu0 %v10972_v0  ;;  %v11788_v47 = vld [vmem:[#allocation13 + $0x298] sm:$0xf0] }
 0xfbb   :  { %v11296_v43 = vor.u32 %v11788_v47, %v11295_v28  ;;  %v8861_v28 = vadd.f32 %v15886_v32, %v15865_v60  ;;  %v11785_v47 = vld [vmem:[#allocation13 + $0x280] sm:$0xf0]  ;;  %v11175_v32 = vld [vmem:[#allocation13 + $0x1a0] sm:$0xf] }
 0xfbc   :  { %v8953_v2 = vpop.f32.mrf.mxu2  ;;  %v8999_v33 = vpop.f32.mrf.mxu3 }
 0xfbd   :  { %v9000_v6 = vadd.f32 %v8999_v33, %v8951_v16  ;;  %v8954_v15 = vadd.f32 %v8953_v2, %v8905_v48  ;;  %v11199_v33 = vld [vmem:[#allocation13 + $0x1d0] sm:$0xf]  ;;  %9374 = vmatpush.bf16.msrb.mxu3 %v11296_v43 }
 0xfbe   :  { %v15907_v11 = vpop.f32.mrf.mxu1  ;;  %9276 = vmatpush.bf16.msrb.mxu1 %v11104_v35 }
 0xfbf   :  { %9434 = vst [vmem:[#allocation14 + $0x78] sm:$0xff] %v9000_v6  ;;  %v11200_v6 = vor.u32 %v11764_v36, %v11199_v33  ;;  %v11079_v33 = vld [vmem:[#allocation13 + $0xe0] sm:$0xf]  ;;  %v11734_v36 = vld [vmem:[#allocation13 + $0xe8] sm:$0xf0]  ;;  %v8910_v43 = vadd.f32 %v15907_v11, %v8861_v28 }
 0xfc0   :  { %v11080_v53 = vor.u32 %v11734_v36, %v11079_v33  ;;  %v8863_v33 = vadd.f32 %v15893_v54, %v15865_v60  ;;  %v11782_v54 = vld [vmem:[#allocation13 + $0x268] sm:$0xf0] }
 0xfc1   :  { %9104 = vmatmul.bf16.gmra.mxu1 %v15784_v12  ;;  %9325 = vmatpush.bf16.msrb.mxu2 %v11200_v6  ;;  %v11283_v6 = vld [vmem:[#allocation13 + $0x278] sm:$0xf] }
 0xfc2   :  { %v15912_v22 = vpop.f32.mrf.mxu0 }
 0xfc4   :  { %v8955_v13 = vpop.f32.mrf.mxu2  ;;  %v9002_v16 = vpop.f32.mrf.mxu3 }
 0xfc5   :  { %9065 = vmatmul.bf16.gmra.mxu0 %v15792_v45  ;;  %v9003_v24 = vadd.f32 %v9002_v16, %v8954_v15  ;;  %v8956_v2 = vadd.f32 %v8955_v13, %v8907_v56  ;;  %v11091_v13 = vld [vmem:[#allocation13 + $0xf8] sm:$0xf]  ;;  %v11737_v16 = vld [vmem:[#allocation13 + $0x100] sm:$0xf0] }
 0xfc6   :  { %v15915_v38 = vpop.f32.mrf.mxu1  ;;  %v11761_v56 = vld [vmem:[#allocation13 + $0x1c0] sm:$0xf0] }
 0xfc7   :  { %9437 = vst [vmem:[#allocation14 + $0x90] sm:$0xff] %v9003_v24  ;;  %v11092_v24 = vor.u32 %v11737_v16, %v11091_v13  ;;  %v11067_v13 = vld [vmem:[#allocation13 + $0xc8] sm:$0xf]  ;;  %v11731_v16 = vld [vmem:[#allocation13 + $0xd0] sm:$0xf0]  ;;  %v8912_v28 = vadd.f32 %v15915_v38, %v8863_v33 }
 0xfc9   :  { %9153 = vmatmul.bf16.gmra.mxu2 %v15797_v26  ;;  %9192 = vmatmul.bf16.gmra.mxu3 %v15768_v49 }
 0xfca   :  { %v15921_v18 = vpop.f32.mrf.mxu0  ;;  %9277 = vmatpush.bf16.msrb.mxu1 %v11092_v24 }
 0xfcc   :  { %v8958_v52 = vpop.f32.mrf.mxu2  ;;  %v9004_v63 = vpop.f32.mrf.mxu3 }
 0xfcd   :  { %v9005_v42 = vadd.f32 %v9004_v63, %v8956_v2  ;;  %v11188_v2 = vor.u32 %v11761_v56, %v11187_v39  ;;  %v8959_v24 = vadd.f32 %v8958_v52, %v8910_v43  ;;  %v11068_v39 = vor.u32 %v11731_v16, %v11067_v13 }
 0xfce   :  { %v15923_v9 = vpop.f32.mrf.mxu1  ;;  %9278 = vmatpush.bf16.msrb.mxu1 %v11080_v53  ;;  %v11755_v53 = vld [vmem:[#allocation13 + $0x190] sm:$0xf0] }
 0xfcf   :  { %9440 = vst [vmem:[#allocation14 + $0xa8] sm:$0xff] %v9005_v42  ;;  %9326 = vmatpush.bf16.msrb.mxu2 %v11188_v2  ;;  %v11284_v42 = vor.u32 %v11785_v47, %v11283_v6  ;;  %v11163_v47 = vld [vmem:[#allocation13 + $0x188] sm:$0xf] }
 0xfd0   :  { %v11164_v43 = vor.u32 %v11755_v53, %v11163_v47  ;;  %v11779_v47 = vld [vmem:[#allocation13 + $0x250] sm:$0xf0] }
 0xfd1   :  { %9109 = vmatmul.bf16.gmra.mxu1 %v15802_v3  ;;  %9375 = vmatpush.bf16.msrb.mxu3 %v11284_v42 }
 0xfd2   :  { %v15926_v48 = vpop.f32.mrf.mxu0  ;;  %9279 = vmatpush.bf16.msrb.mxu1 %v11068_v39 }
 0xfd4   :  { %v8960_v0 = vpop.f32.mrf.mxu2 }
 0xfd5   :  { %9070 = vmatmul.bf16.gmra.mxu0 %v15807_v29  ;;  %v8961_v42 = vadd.f32 %v8960_v0, %v8912_v28  ;;  %v11259_v28 = vld [vmem:[#allocation13 + $0x248] sm:$0xf] }
 0xfd6   :  { %v15929_v15 = vpop.f32.mrf.mxu1 }
 0xfd9   :  { %9158 = vmatmul.bf16.gmra.mxu2 %v15812_v46  ;;  %9197 = vmatmul.bf16.gmra.mxu3 %v15786_v10  ;;  %v11758_v10 = vld [vmem:[#allocation13 + $0x1a8] sm:$0xf0] }
 0xfda   :  { %v15935_v63 = vpop.f32.mrf.mxu0  ;;  %v11176_v11 = vor.u32 %v11758_v10, %v11175_v32  ;;  %v11271_v10 = vld [vmem:[#allocation13 + $0x260] sm:$0xf] }
 0xfdc   :  { %v8963_v51 = vpop.f32.mrf.mxu2  ;;  %9327 = vmatpush.bf16.msrb.mxu2 %v11176_v11 }
 0xfde   :  { %v15938_v35 = vpop.f32.mrf.mxu1 }
 0xfe0   :  { %v9007_v56 = vpop.f32.mrf.mxu3  ;;  %9328 = vmatpush.bf16.msrb.mxu2 %v11164_v43  ;;  %v11260_v43 = vor.u32 %v11779_v47, %v11259_v28 }
 0xfe1   :  { %v9008_v2 = vadd.f32 %v9007_v56, %v8959_v24  ;;  %9114 = vmatmul.bf16.gmra.mxu1 %v15820_v31  ;;  %v11272_v24 = vor.u32 %v11782_v54, %v11271_v10 }
 0xfe2   :  { %v15944_v6 = vpop.f32.mrf.mxu0 }
 0xfe3   :  { %9443 = vst [vmem:[#allocation14 + $0xc0] sm:$0xff] %v9008_v2  ;;  %9376 = vmatpush.bf16.msrb.mxu3 %v11272_v24  ;;  %v8866_v2 = vadd.f32 %v15898_v40, %v15865_v60  ;;  %v8868_v40 = vadd.f32 %v15905_v59, %v15865_v60 }
 0xfe4   :  { %v8965_v36 = vpop.f32.mrf.mxu2 }
 0xfe5   :  { %9231 = vmatmul.bf16.vlgmr.msrb.gmra.mxu0 %v15696_v19  ;;  %v8915_v32 = vadd.f32 %v15923_v9, %v8866_v2  ;;  %v8917_v9 = vadd.f32 %v15929_v15, %v8868_v40 }
 0xfe6   :  { %v8921_v52 = vpop.f32.mrf.mxu1 }
 0xfe7   :  { %v8964_v11 = vadd.f32 %v8963_v51, %v8915_v32  ;;  %9377 = vmatpush.bf16.msrb.mxu3 %v11260_v43  ;;  %v8871_v32 = vadd.f32 %v15912_v22, %v15865_v60 }
 0xfe8   :  { %v9009_v13 = vpop.f32.mrf.mxu3 }
 0xfe9   :  { %v9010_v16 = vadd.f32 %v9009_v13, %v8961_v42  ;;  %9163 = vmatmul.bf16.gmra.mxu2 %v15828_v50  ;;  %9202 = vmatmul.bf16.gmra.mxu3 %v15815_v21  ;;  %v8920_v59 = vadd.f32 %v15938_v35, %v8871_v32 }
 0xfea   :  { %v15949_v19 = vpop.f32.mrf.mxu0 }
 0xfeb   :  { %9446 = vst [vmem:[#allocation14 + $0xd8] sm:$0xff] %v9010_v16  ;;  %v8966_v16 = vadd.f32 %v8965_v36, %v8917_v9 }
 0xfec   :  { %v8968_v38 = vpop.f32.mrf.mxu2 }
 0xfee   :  { %v8924_v39 = vpop.f32.mrf.mxu1 }
 0xff1   :  { %9119 = vmatmul.bf16.gmra.mxu1 %v15835_v61 }
 0xff2   :  { %v15956_v33 = vpop.f32.mrf.mxu0 }
 0xff4   :  { %v8970_v0 = vpop.f32.mrf.mxu2 }
 0xff5   :  { %9236 = vmatmul.bf16.gmra.mxu0 %v15706_v37 }
 0xff6   :  { %v8926_v56 = vpop.f32.mrf.mxu1 }
 0xff9   :  { %9168 = vmatmul.bf16.gmra.mxu2 %v15843_v25  ;;  %9207 = vmatmul.bf16.gmra.mxu3 %v15845_v58 }
 0xffa   :  { %v15964_v10 = vpop.f32.mrf.mxu0 }
 0xffc   :  { %v8973_v53 = vpop.f32.mrf.mxu2  ;;  %v9012_v42 = vpop.f32.mrf.mxu3 }
 0xffd   :  { %v9013_v13 = vadd.f32 %v9012_v42, %v8964_v11 }
 0xffe   :  { %v9085_v37 = vpop.f32.mrf.mxu1 }
 0xfff   :  { %9449 = vst [vmem:[#allocation14 + $0xf0] sm:$0xff] %v9013_v13  ;;  %v8876_v13 = vadd.f32 %v15926_v48, %v15865_v60  ;;  %v15990_v48 = vperm.slane %v15858_v23, 1 }
0x1001   :  { %9280 = vmatmul.bf16.vlgmr.msrb.gmra.mxu1 %v15714_v5  ;;  %v8969_v5 = vadd.f32 %v8968_v38, %v8920_v59  ;;  %v8925_v9 = vadd.f32 %v8924_v39, %v8876_v13  ;;  %v9044_v13 = vadd.f32 %v15964_v10, %v15990_v48 }
0x1002   :  { %v15972_v11 = vpop.f32.mrf.mxu0 }
0x1004   :  { %v8975_v51 = vpop.f32.mrf.mxu2  ;;  %v9014_v54 = vpop.f32.mrf.mxu3 }
0x1005   :  { %9241 = vmatmul.bf16.gmra.mxu0 %v15720_v62  ;;  %v9015_v24 = vadd.f32 %v9014_v54, %v8966_v16  ;;  %v8873_v62 = vadd.f32 %v15921_v18, %v15865_v60  ;;  %v8974_v18 = vadd.f32 %v8973_v53, %v8925_v9 }
0x1006   :  { %v9087_v2 = vpop.f32.mrf.mxu1 }
0x1007   :  { %9452 = vst [vmem:[#allocation14 + $0x108] sm:$0xff] %v9015_v24  ;;  %v8922_v42 = vadd.f32 %v8921_v52, %v8873_v62 }
0x1009   :  { %9212 = vmatmul.bf16.gmra.mxu3 %v15860_v17  ;;  %9329 = vmatmul.bf16.vlgmr.msrb.gmra.mxu2 %v15725_v14  ;;  %v8971_v22 = vadd.f32 %v8970_v0, %v8922_v42 }
0x100a   :  { %v15980_v40 = vpop.f32.mrf.mxu0 }
0x100c   :  { %v9017_v15 = vpop.f32.mrf.mxu3  ;;  %v9134_v36 = vpop.f32.mrf.mxu2 }
0x100d   :  { %v9018_v28 = vadd.f32 %v9017_v15, %v8969_v5  ;;  %v9037_v5 = vadd.f32 %v15944_v6, %v15990_v48 }
0x100e   :  { %v9090_v47 = vpop.f32.mrf.mxu1 }
0x100f   :  { %9455 = vst [vmem:[#allocation14 + $0x120] sm:$0xff] %v9018_v28 }
0x1011   :  { %9285 = vmatmul.bf16.gmra.mxu1 %v15730_v20 }
0x1012   :  { %v15986_v24 = vpop.f32.mrf.mxu0 }
0x1014   :  { %v9019_v35 = vpop.f32.mrf.mxu3  ;;  %v9136_v43 = vpop.f32.mrf.mxu2 }
0x1015   :  { %9246 = vmatmul.bf16.gmra.mxu0 %v15738_v30  ;;  %v9020_v14 = vadd.f32 %v9019_v35, %v8971_v22  ;;  %v8878_v30 = vadd.f32 %v15935_v63, %v15865_v60  ;;  %v9086_v60 = vadd.f32 %v9085_v37, %v9037_v5  ;;  %v9042_v22 = vadd.f32 %v15956_v33, %v15990_v48 }
0x1016   :  { %v9092_v38 = vpop.f32.mrf.mxu1 }
0x1017   :  { %9458 = vst [vmem:[#allocation14 + $0x138] sm:$0xff] %v9020_v14  ;;  %v8927_v54 = vadd.f32 %v8926_v56, %v8878_v30  ;;  %v9091_v35 = vadd.f32 %v9090_v47, %v9042_v22  ;;  %v9093_v9 = vadd.f32 %v9092_v38, %v9044_v13 }
0x1019   :  { %9217 = vmatmul.bf16.gmra.mxu3 %v15877_v41  ;;  %9334 = vmatmul.bf16.gmra.mxu2 %v15743_v1  ;;  %v8976_v39 = vadd.f32 %v8975_v51, %v8927_v54 }
0x101a   :  { %v15997_v63 = vpop.f32.mrf.mxu0 }
0x101c   :  { %v9022_v20 = vpop.f32.mrf.mxu3  ;;  %v9139_v52 = vpop.f32.mrf.mxu2 }
0x101d   :  { %v9023_v0 = vadd.f32 %v9022_v20, %v8974_v18  ;;  %v9047_v20 = vadd.f32 %v15972_v11, %v15990_v48 }
0x101e   :  { %v9095_v16 = vpop.f32.mrf.mxu1 }
0x101f   :  { %9461 = vst [vmem:[#allocation14 + $0x150] sm:$0xff] %v9023_v0 }
0x1021   :  { %9290 = vmatmul.bf16.gmra.mxu1 %v15748_v8  ;;  %v9135_v8 = vadd.f32 %v9134_v36, %v9086_v60 }
0x1024   :  { %v9024_v32 = vpop.f32.mrf.mxu3  ;;  %v9141_v1 = vpop.f32.mrf.mxu2 }
0x1025   :  { %9251 = vmatmul.bf16.gmra.mxu0 %v15756_v7  ;;  %v9025_v53 = vadd.f32 %v9024_v32, %v8976_v39  ;;  %v9039_v7 = vadd.f32 %v15949_v19, %v15990_v48  ;;  %v9140_v19 = vadd.f32 %v9139_v52, %v9091_v35  ;;  %v9142_v33 = vadd.f32 %v9141_v1, %v9093_v9 }
0x1026   :  { %v9097_v59 = vpop.f32.mrf.mxu1  ;;  %v9096_v52 = vadd.f32 %v9095_v16, %v9047_v20 }
0x1027   :  { %9464 = vst [vmem:[#allocation14 + $0x168] sm:$0xff] %v9025_v53  ;;  %v9088_v62 = vadd.f32 %v9087_v2, %v9039_v7  ;;  %v9052_v53 = vadd.f32 %v15986_v24, %v15990_v48 }
0x1029   :  { %9339 = vmatmul.bf16.gmra.mxu2 %v15761_v44  ;;  %9378 = vmatmul.bf16.vlgmr.msrb.gmra.mxu3 %v15732_v57  ;;  %v9137_v6 = vadd.f32 %v9136_v43, %v9088_v62  ;;  %v16002_v44 = vpop.f32.mrf.mxu0 }
0x102c   :  { %v9144_v56 = vpop.f32.mrf.mxu2  ;;  %v9183_v51 = vpop.f32.mrf.mxu3 }
0x102d   :  { %v9184_v15 = vadd.f32 %v9183_v51, %v9135_v8  ;;  %v9145_v10 = vadd.f32 %v9144_v56, %v9096_v52  ;;  %v9054_v51 = vadd.f32 %v15997_v63, %v15990_v48 }
0x102e   :  { %v9100_v28 = vpop.f32.mrf.mxu1 }
0x102f   :  { %9420 = vst [vmem:[#allocation14 + $0x8] sm:$0xff] %v9184_v15  ;;  %v9101_v5 = vadd.f32 %v9100_v28, %v9052_v53 }
0x1031   :  { %9295 = vmatmul.bf16.gmra.mxu1 %v15766_v55 }
0x1034   :  { %v9146_v37 = vpop.f32.mrf.mxu2  ;;  %v9185_v42 = vpop.f32.mrf.mxu3 }
0x1035   :  { %9256 = vmatmul.bf16.gmra.mxu0 %v15774_v4  ;;  %v9186_v57 = vadd.f32 %v9185_v42, %v9137_v6  ;;  %v9058_v4 = vpop.f32.mrf.mxu0 }
0x1036   :  { %v9102_v36 = vpop.f32.mrf.mxu1 }
0x1037   :  { %9423 = vst [vmem:[#allocation14 + $0x20] sm:$0xff] %v9186_v57  ;;  %v9103_v15 = vadd.f32 %v9102_v36, %v9054_v51 }
0x1039   :  { %9344 = vmatmul.bf16.gmra.mxu2 %v15779_v27  ;;  %9383 = vmatmul.bf16.gmra.mxu3 %v15750_v34 }
0x103c   :  { %v9149_v55 = vpop.f32.mrf.mxu2  ;;  %v9188_v2 = vpop.f32.mrf.mxu3 }
0x103d   :  { %v9189_v43 = vadd.f32 %v9188_v2, %v9140_v19  ;;  %v9061_v0 = vpop.f32.mrf.mxu0 }
0x103e   :  { %v9105_v14 = vpop.f32.mrf.mxu1 }
0x103f   :  { %9426 = vst [vmem:[#allocation14 + $0x38] sm:$0xff] %v9189_v43 }
0x1041   :  { %9300 = vmatmul.bf16.gmra.mxu1 %v15784_v12 }
0x1044   :  { %v9151_v18 = vpop.f32.mrf.mxu2  ;;  %v9190_v47 = vpop.f32.mrf.mxu3 }
0x1045   :  { %9261 = vmatmul.bf16.gmra.mxu0 %v15792_v45  ;;  %v9191_v27 = vadd.f32 %v9190_v47, %v9142_v33  ;;  %v9049_v45 = vadd.f32 %v15980_v40, %v15990_v48  ;;  %v9063_v32 = vpop.f32.mrf.mxu0  ;;  %v17224_v40 = vld [vmem:[#allocation100_spill] sm:$0xff]  ;;  %v9152_v24 = vadd.f32 %v9151_v18, %v9103_v15  ;;  %v16045_v15 = vperm.slane %v15858_v23, 2 }
0x1046   :  { %v9107_v34 = vpop.f32.mrf.mxu1 }
0x1047   :  { %9429 = vst [vmem:[#allocation14 + $0x50] sm:$0xff] %v9191_v27  ;;  %v9098_v39 = vadd.f32 %v9097_v59, %v9049_v45  ;;  %v9150_v59 = vadd.f32 %v9149_v55, %v9101_v5 }
0x1049   :  { %9349 = vmatmul.bf16.gmra.mxu2 %v15797_v26  ;;  %9388 = vmatmul.bf16.gmra.mxu3 %v15768_v49  ;;  %v9147_v11 = vadd.f32 %v9146_v37, %v9098_v39 }
0x104c   :  { %v9154_v38 = vpop.f32.mrf.mxu2  ;;  %v9193_v12 = vpop.f32.mrf.mxu3 }
0x104d   :  { %v9194_v30 = vadd.f32 %v9193_v12, %v9145_v10  ;;  %v9066_v8 = vpop.f32.mrf.mxu0 }
0x104e   :  { %v9110_v54 = vpop.f32.mrf.mxu1 }
0x104f   :  { %9432 = vst [vmem:[#allocation14 + $0x68] sm:$0xff] %v9194_v30 }
0x1051   :  { %9305 = vmatmul.bf16.gmra.mxu1 %v15802_v3 }
0x1054   :  { %v9156_v16 = vpop.f32.mrf.mxu2  ;;  %v9195_v1 = vpop.f32.mrf.mxu3 }
0x1055   :  { %9266 = vmatmul.bf16.gmra.mxu0 %v15807_v29  ;;  %v9196_v26 = vadd.f32 %v9195_v1, %v9147_v11  ;;  %v9068_v6 = vpop.f32.mrf.mxu0 }
0x1056   :  { %v9112_v49 = vpop.f32.mrf.mxu1  ;;  %v9069_v39 = vadd.f32 %v9068_v6, %v15990_v48 }
0x1057   :  { %9435 = vst [vmem:[#allocation14 + $0x80] sm:$0xff] %v9196_v26 }
0x1059   :  { %9354 = vmatmul.bf16.gmra.mxu2 %v15812_v46  ;;  %9393 = vmatmul.bf16.gmra.mxu3 %v17224_v40  ;;  %v9057_v46 = vadd.f32 %v16002_v44, %v15990_v48 }
0x105b   :  { %v9106_v37 = vadd.f32 %v9105_v14, %v9057_v46 }
0x105c   :  { %v9159_v60 = vpop.f32.mrf.mxu2  ;;  %v9198_v3 = vpop.f32.mrf.mxu3 }
0x105d   :  { %v9199_v56 = vadd.f32 %v9198_v3, %v9150_v59  ;;  %v9155_v63 = vadd.f32 %v9154_v38, %v9106_v37  ;;  %v9071_v19 = vpop.f32.mrf.mxu0  ;;  %v9067_v38 = vadd.f32 %v9066_v8, %v15990_v48 }
0x105e   :  { %v9115_v29 = vpop.f32.mrf.mxu1  ;;  %v9072_v5 = vadd.f32 %v9071_v19, %v15990_v48 }
0x105f   :  { %9438 = vst [vmem:[#allocation14 + $0x98] sm:$0xff] %v9199_v56 }
0x1061   :  { %9310 = vmatmul.bf16.gmra.mxu1 %v15820_v31  ;;  %v9059_v31 = vadd.f32 %v9058_v4, %v15990_v48 }
0x1063   :  { %v9108_v35 = vadd.f32 %v9107_v34, %v9059_v31 }
0x1064   :  { %v9161_v7 = vpop.f32.mrf.mxu2  ;;  %v9200_v28 = vpop.f32.mrf.mxu3 }
0x1065   :  { %v9201_v62 = vadd.f32 %v9200_v28, %v9152_v24  ;;  %v9157_v44 = vadd.f32 %v9156_v16, %v9108_v35  ;;  %v9073_v13 = vpop.f32.mrf.mxu0 }
0x1066   :  { %v9117_v42 = vpop.f32.mrf.mxu1  ;;  %v9074_v51 = vadd.f32 %v9073_v13, %v15990_v48 }
0x1067   :  { %9441 = vst [vmem:[#allocation14 + $0xb0] sm:$0xff] %v9201_v62 }
0x1069   :  { %9359 = vmatmul.bf16.gmra.mxu2 %v15828_v50  ;;  %9398 = vmatmul.bf16.gmra.mxu3 %v15815_v21  ;;  %v9062_v50 = vadd.f32 %v9061_v0, %v15990_v48 }
0x106b   :  { %v9111_v21 = vadd.f32 %v9110_v54, %v9062_v50 }
0x106c   :  { %v9164_v57 = vpop.f32.mrf.mxu2  ;;  %v9203_v36 = vpop.f32.mrf.mxu3 }
0x106d   :  { %v9204_v22 = vadd.f32 %v9203_v36, %v9155_v63  ;;  %v9160_v4 = vadd.f32 %v9159_v60, %v9111_v21  ;;  %v9232_v10 = vpop.f32.mrf.mxu0 }
0x106e   :  { %v9120_v55 = vpop.f32.mrf.mxu1 }
0x106f   :  { %9444 = vst [vmem:[#allocation14 + $0xc8] sm:$0xff] %v9204_v22  ;;  %v9121_v40 = vadd.f32 %v9120_v55, %v9072_v5 }
0x1071   :  { %9315 = vmatmul.bf16.gmra.mxu1 %v15835_v61  ;;  %v9064_v61 = vadd.f32 %v9063_v32, %v15990_v48  ;;  %v9118_v32 = vadd.f32 %v9117_v42, %v9069_v39 }
0x1073   :  { %v9113_v27 = vadd.f32 %v9112_v49, %v9064_v61 }
0x1074   :  { %v9166_v2 = vpop.f32.mrf.mxu2  ;;  %v9205_v43 = vpop.f32.mrf.mxu3 }
0x1075   :  { %v9206_v14 = vadd.f32 %v9205_v43, %v9157_v44  ;;  %v9162_v34 = vadd.f32 %v9161_v7, %v9113_v27  ;;  %v9234_v11 = vpop.f32.mrf.mxu0  ;;  %v9167_v1 = vadd.f32 %v9166_v2, %v9118_v32 }
0x1076   :  { %v9122_v47 = vpop.f32.mrf.mxu1  ;;  %v9235_v48 = vadd.f32 %v9234_v11, %v16045_v15 }
0x1077   :  { %9447 = vst [vmem:[#allocation14 + $0xe0] sm:$0xff] %v9206_v14 }
0x1079   :  { %9364 = vmatmul.bf16.gmra.mxu2 %v15843_v25  ;;  %9403 = vmatmul.bf16.gmra.mxu3 %v15845_v58  ;;  %v9116_v58 = vadd.f32 %v9115_v29, %v9067_v38  ;;  %v9123_v29 = vadd.f32 %v9122_v47, %v9074_v51 }
0x107b   :  { %v9165_v12 = vadd.f32 %v9164_v57, %v9116_v58 }
0x107c   :  { %v9169_v9 = vpop.f32.mrf.mxu2  ;;  %v9208_v33 = vpop.f32.mrf.mxu3 }
0x107d   :  { %v9209_v18 = vadd.f32 %v9208_v33, %v9160_v4  ;;  %v9170_v59 = vadd.f32 %v9169_v9, %v9121_v40 }
0x107e   :  { %v9281_v25 = vpop.f32.mrf.mxu1 }
0x107f   :  { %9450 = vst [vmem:[#allocation14 + $0xf8] sm:$0xff] %v9209_v18 }
0x1084   :  { %v9171_v20 = vpop.f32.mrf.mxu2  ;;  %v9210_v52 = vpop.f32.mrf.mxu3 }
0x1085   :  { %v9211_v0 = vadd.f32 %v9210_v52, %v9162_v34  ;;  %v9172_v24 = vadd.f32 %v9171_v20, %v9123_v29 }
0x1086   :  { %v9283_v16 = vpop.f32.mrf.mxu1 }
0x1087   :  { %9453 = vst [vmem:[#allocation14 + $0x110] sm:$0xff] %v9211_v0  ;;  %v9284_v23 = vadd.f32 %v9283_v16, %v9235_v48 }
0x1089   :  { %9408 = vmatmul.bf16.gmra.mxu3 %v15860_v17  ;;  %v9237_v17 = vpop.f32.mrf.mxu0 }
0x108a   :  { %v9238_v55 = vadd.f32 %v9237_v17, %v16045_v15 }
0x108c   :  { %v9213_v30 = vpop.f32.mrf.mxu3  ;;  %v9330_v54 = vpop.f32.mrf.mxu2 }
0x108d   :  { %v9214_v45 = vadd.f32 %v9213_v30, %v9165_v12 }
0x108e   :  { %v9286_v60 = vpop.f32.mrf.mxu1 }
0x108f   :  { %9456 = vst [vmem:[#allocation14 + $0x128] sm:$0xff] %v9214_v45  ;;  %v9287_v43 = vadd.f32 %v9286_v60, %v9238_v55 }
0x1091   :  { %v9239_v7 = vpop.f32.mrf.mxu0 }
0x1092   :  { %v9240_v9 = vadd.f32 %v9239_v7, %v16045_v15 }
0x1094   :  { %v9215_v26 = vpop.f32.mrf.mxu3  ;;  %v9332_v49 = vpop.f32.mrf.mxu2 }
0x1095   :  { %v9216_v53 = vadd.f32 %v9215_v26, %v9167_v1  ;;  %v9333_v35 = vadd.f32 %v9332_v49, %v9284_v23 }
0x1096   :  { %v9288_v46 = vpop.f32.mrf.mxu1 }
0x1097   :  { %9459 = vst [vmem:[#allocation14 + $0x140] sm:$0xff] %v9216_v53  ;;  %v9289_v33 = vadd.f32 %v9288_v46, %v9240_v9 }
0x1099   :  { %9413 = vmatmul.bf16.gmra.mxu3 %v15877_v41  ;;  %v9233_v41 = vadd.f32 %v9232_v10, %v16045_v15  ;;  %v9242_v36 = vpop.f32.mrf.mxu0 }
0x109a   :  { %v9243_v52 = vadd.f32 %v9242_v36, %v16045_v15 }
0x109b   :  { %v9282_v37 = vadd.f32 %v9281_v25, %v9233_v41 }
0x109c   :  { %v9218_v3 = vpop.f32.mrf.mxu3  ;;  %v9335_v56 = vpop.f32.mrf.mxu2 }
0x109d   :  { %v9219_v8 = vadd.f32 %v9218_v3, %v9170_v59  ;;  %v9331_v42 = vadd.f32 %v9330_v54, %v9282_v37  ;;  %v9336_v50 = vadd.f32 %v9335_v56, %v9287_v43 }
0x109e   :  { %v9291_v22 = vpop.f32.mrf.mxu1 }
0x109f   :  { %9462 = vst [vmem:[#allocation14 + $0x158] sm:$0xff] %v9219_v8  ;;  %v9292_v0 = vadd.f32 %v9291_v22, %v9243_v52 }
0x10a1   :  { %v9244_v2 = vpop.f32.mrf.mxu0 }
0x10a2   :  { %v9245_v30 = vadd.f32 %v9244_v2, %v16045_v15 }
0x10a4   :  { %v9220_v28 = vpop.f32.mrf.mxu3  ;;  %v9337_v6 = vpop.f32.mrf.mxu2 }
0x10a5   :  { %v9221_v62 = vadd.f32 %v9220_v28, %v9172_v24  ;;  %v9338_v47 = vadd.f32 %v9337_v6, %v9289_v33 }
0x10a6   :  { %v9293_v14 = vpop.f32.mrf.mxu1 }
0x10a7   :  { %9465 = vst [vmem:[#allocation14 + $0x170] sm:$0xff] %v9221_v62  ;;  %v9294_v45 = vadd.f32 %v9293_v14, %v9245_v30 }
0x10a9   :  { %v9247_v18 = vpop.f32.mrf.mxu0 }
0x10aa   :  { %v9248_v1 = vadd.f32 %v9247_v18, %v16045_v15 }
0x10ac   :  { %v9379_v63 = vpop.f32.mrf.mxu3  ;;  %v9340_v31 = vpop.f32.mrf.mxu2 }
0x10ad   :  { %v9380_v57 = vadd.f32 %v9379_v63, %v9331_v42  ;;  %v9341_v10 = vadd.f32 %v9340_v31, %v9292_v0 }
0x10ae   :  { %v9296_v61 = vpop.f32.mrf.mxu1 }
0x10af   :  { %9421 = vst [vmem:[#allocation14 + $0x10] sm:$0xff] %v9380_v57  ;;  %v9297_v49 = vadd.f32 %v9296_v61, %v9248_v1 }
0x10b1   :  { %v9249_v38 = vpop.f32.mrf.mxu0 }
0x10b2   :  { %v9250_v59 = vadd.f32 %v9249_v38, %v16045_v15 }
0x10b4   :  { %v9381_v19 = vpop.f32.mrf.mxu3  ;;  %v9342_v21 = vpop.f32.mrf.mxu2 }
0x10b5   :  { %v9382_v44 = vadd.f32 %v9381_v19, %v9333_v35  ;;  %v9343_v39 = vadd.f32 %v9342_v21, %v9294_v45 }
0x10b6   :  { %v9298_v12 = vpop.f32.mrf.mxu1 }
0x10b7   :  { %9424 = vst [vmem:[#allocation14 + $0x28] sm:$0xff] %v9382_v44  ;;  %v9299_v3 = vadd.f32 %v9298_v12, %v9250_v59 }
0x10b9   :  { %v9252_v16 = vpop.f32.mrf.mxu0 }
0x10ba   :  { %v9253_v7 = vadd.f32 %v9252_v16, %v16045_v15 }
0x10bc   :  { %v9384_v13 = vpop.f32.mrf.mxu3  ;;  %v9345_v20 = vpop.f32.mrf.mxu2 }
0x10bd   :  { %v9385_v4 = vadd.f32 %v9384_v13, %v9336_v50  ;;  %v9346_v5 = vadd.f32 %v9345_v20, %v9297_v49 }
0x10be   :  { %v9301_v26 = vpop.f32.mrf.mxu1 }
0x10bf   :  { %9427 = vst [vmem:[#allocation14 + $0x40] sm:$0xff] %v9385_v4  ;;  %v9302_v28 = vadd.f32 %v9301_v26, %v9253_v7 }
0x10c1   :  { %v9254_v60 = vpop.f32.mrf.mxu0 }
0x10c2   :  { %v9255_v63 = vadd.f32 %v9254_v60, %v16045_v15 }
0x10c4   :  { %v9386_v27 = vpop.f32.mrf.mxu3  ;;  %v9347_v54 = vpop.f32.mrf.mxu2 }
0x10c5   :  { %v9387_v34 = vadd.f32 %v9386_v27, %v9338_v47  ;;  %v9348_v56 = vadd.f32 %v9347_v54, %v9299_v3 }
0x10c6   :  { %v9303_v8 = vpop.f32.mrf.mxu1 }
0x10c7   :  { %9430 = vst [vmem:[#allocation14 + $0x58] sm:$0xff] %v9387_v34  ;;  %v9304_v57 = vadd.f32 %v9303_v8, %v9255_v63 }
0x10c9   :  { %v9257_v62 = vpop.f32.mrf.mxu0 }
0x10ca   :  { %v9258_v35 = vadd.f32 %v9257_v62, %v16045_v15 }
0x10cc   :  { %v9389_v25 = vpop.f32.mrf.mxu3  ;;  %v9350_v53 = vpop.f32.mrf.mxu2 }
0x10cd   :  { %v9390_v58 = vadd.f32 %v9389_v25, %v9341_v10  ;;  %v9351_v46 = vadd.f32 %v9350_v53, %v9302_v28 }
0x10ce   :  { %v9306_v41 = vpop.f32.mrf.mxu1 }
0x10cf   :  { %9433 = vst [vmem:[#allocation14 + $0x70] sm:$0xff] %v9390_v58  ;;  %v9307_v44 = vadd.f32 %v9306_v41, %v9258_v35 }
0x10d1   :  { %v9259_v48 = vpop.f32.mrf.mxu0 }
0x10d2   :  { %v9260_v50 = vadd.f32 %v9259_v48, %v16045_v15 }
0x10d4   :  { %v9391_v11 = vpop.f32.mrf.mxu3  ;;  %v9352_v51 = vpop.f32.mrf.mxu2 }
0x10d5   :  { %v9392_v32 = vadd.f32 %v9391_v11, %v9343_v39  ;;  %v9353_v36 = vadd.f32 %v9352_v51, %v9304_v57 }
0x10d6   :  { %v9308_v31 = vpop.f32.mrf.mxu1 }
0x10d7   :  { %9436 = vst [vmem:[#allocation14 + $0x88] sm:$0xff] %v9392_v32  ;;  %v9309_v13 = vadd.f32 %v9308_v31, %v9260_v50 }
0x10d9   :  { %v9262_v14 = vpop.f32.mrf.mxu0 }
0x10da   :  { %v9263_v47 = vadd.f32 %v9262_v14, %v16045_v15 }
0x10dc   :  { %v9394_v40 = vpop.f32.mrf.mxu3  ;;  %v9355_v42 = vpop.f32.mrf.mxu2 }
0x10dd   :  { %v9395_v17 = vadd.f32 %v9394_v40, %v9346_v5  ;;  %v9356_v55 = vadd.f32 %v9355_v42, %v9307_v44 }
0x10de   :  { %v9311_v21 = vpop.f32.mrf.mxu1 }
0x10df   :  { %9439 = vst [vmem:[#allocation14 + $0xa0] sm:$0xff] %v9395_v17  ;;  %v9312_v27 = vadd.f32 %v9311_v21, %v9263_v47 }
0x10e1   :  { %v9264_v61 = vpop.f32.mrf.mxu0 }
0x10e2   :  { %v9265_v38 = vadd.f32 %v9264_v61, %v16045_v15 }
0x10e4   :  { %v9396_v29 = vpop.f32.mrf.mxu3  ;;  %v9357_v19 = vpop.f32.mrf.mxu2 }
0x10e5   :  { %v9397_v24 = vadd.f32 %v9396_v29, %v9348_v56  ;;  %v9358_v9 = vadd.f32 %v9357_v19, %v9309_v13 }
0x10e6   :  { %v9313_v34 = vpop.f32.mrf.mxu1 }
0x10e7   :  { %9442 = vst [vmem:[#allocation14 + $0xb8] sm:$0xff] %v9397_v24  ;;  %v9314_v25 = vadd.f32 %v9313_v34, %v9265_v38 }
0x10e9   :  { %v9267_v58 = vpop.f32.mrf.mxu0 }
0x10ea   :  { %v9268_v11 = vadd.f32 %v9267_v58, %v16045_v15 }
0x10ec   :  { %v9399_v6 = vpop.f32.mrf.mxu3  ;;  %v9360_v4 = vpop.f32.mrf.mxu2 }
0x10ed   :  { %v9400_v37 = vadd.f32 %v9399_v6, %v9351_v46  ;;  %v9361_v20 = vadd.f32 %v9360_v4, %v9312_v27 }
0x10ee   :  { %v9316_v30 = vpop.f32.mrf.mxu1 }
0x10ef   :  { %9445 = vst [vmem:[#allocation14 + $0xd0] sm:$0xff] %v9400_v37  ;;  %v9317_v32 = vadd.f32 %v9316_v30, %v9268_v11 }
0x10f1   :  { %v9269_v1 = vpop.f32.mrf.mxu0 }
0x10f2   :  { %v9270_v5 = vadd.f32 %v9269_v1, %v16045_v15 }
0x10f4   :  { %v9401_v22 = vpop.f32.mrf.mxu3  ;;  %v9362_v52 = vpop.f32.mrf.mxu2 }
0x10f5   :  { %v9402_v23 = vadd.f32 %v9401_v22, %v9353_v36  ;;  %v9363_v12 = vadd.f32 %v9362_v52, %v9314_v25 }
0x10f6   :  { %v9318_v53 = vpop.f32.mrf.mxu1 }
0x10f7   :  { %9448 = vst [vmem:[#allocation14 + $0xe8] sm:$0xff] %v9402_v23  ;;  %v9319_v17 = vadd.f32 %v9318_v53, %v9270_v5 }
0x10fc   :  { %v9404_v2 = vpop.f32.mrf.mxu3  ;;  %v9365_v39 = vpop.f32.mrf.mxu2 }
0x10fd   :  { %v9405_v43 = vadd.f32 %v9404_v2, %v9356_v55  ;;  %v9366_v16 = vadd.f32 %v9365_v39, %v9317_v32 }
0x10ff   :  { %9451 = vst [vmem:[#allocation14 + $0x100] sm:$0xff] %v9405_v43 }
0x1104   :  { %v9406_v33 = vpop.f32.mrf.mxu3  ;;  %v9367_v40 = vpop.f32.mrf.mxu2 }
0x1105   :  { %v9407_v18 = vadd.f32 %v9406_v33, %v9358_v9  ;;  %v9368_v59 = vadd.f32 %v9367_v40, %v9319_v17 }
0x1107   :  { %9454 = vst [vmem:[#allocation14 + $0x118] sm:$0xff] %v9407_v18 }
0x110c   :  { %v9409_v0 = vpop.f32.mrf.mxu3 }
0x110d   :  { %v9410_v10 = vadd.f32 %v9409_v0, %v9361_v20 }
0x110f   :  { %9457 = vst [vmem:[#allocation14 + $0x130] sm:$0xff] %v9410_v10 }
0x1114   :  { %v9411_v54 = vpop.f32.mrf.mxu3 }
0x1115   :  { %v9412_v45 = vadd.f32 %v9411_v54, %v9363_v12 }
0x1117   :  { %9460 = vst [vmem:[#allocation14 + $0x148] sm:$0xff] %v9412_v45 }
0x111c   :  { %v9414_v26 = vpop.f32.mrf.mxu3 }
0x111d   :  { %v9415_v49 = vadd.f32 %v9414_v26, %v9366_v16 }
0x111f   :  { %9463 = vst [vmem:[#allocation14 + $0x160] sm:$0xff] %v9415_v49 }
0x1124   :  { %v9416_v60 = vpop.f32.mrf.mxu3 }
0x1125   :  { %v9417_v3 = vadd.f32 %v9416_v60, %v9368_v59 }
0x1127   :  { %9466 = vst [vmem:[#allocation14 + $0x178] sm:$0xff] %v9417_v3 }
0x1128   :  { %9479 = dma.vmem_to_hbm [thread:$0]  %s9472_s10, 6144, %s9474_s19, [#allocation4], %s12290_s20, %s12290_s20, %s12291_s21  }
0x1129   :  { %12276 = dma.done.wait [#allocation4], 6144  }
0x112a   :  { %12277 = vsyncadd [#allocation4], 4294961152 }
0x112b   :  { %9484 = vsyncpa [#allocation3], 1 }
0x112c   :  { %9485 = vsyncpa [#allocation6], 1 }
0x112d   :  { %9486 = vsyncpa [#allocation9], 1 }
0x112e   :  { %9487 = vsyncpa [#allocation12], 1 }
0x112f   :  { %9488 = vsyncpa [#allocation4], 1 }

</bundles_post_ra>
